<compile_context>
chip_gen: v7x
topology: tpu7x:2x2x1
jax: 0.10.0
libtpu: 0.0.40
codegen_flags: <defaults>
</compile_context>

<pallas_src>
import functools
import math

import jax
import jax.numpy as jnp
import numpy as np
from jax.experimental import pallas as pl
from jax.experimental.pallas import tpu as pltpu

_LANE = 128
_SUBLANE = 8
_SQRT1_2 = 0.7071067811865476


def _round_up(n, m=_LANE):
    return ((n + m - 1) // m) * m


# ----------------------------- shared math helpers (kernel + reference) -----------------------------

def _erf(x):
    # Abramowitz & Stegun 7.1.26 rational approximation (abs err ~1.5e-7).
    a1, a2, a3, a4, a5 = 0.254829592, -0.284496736, 1.421413741, -1.453152027, 1.061405429
    p = 0.3275911
    s = jnp.where(x >= 0.0, 1.0, -1.0)
    ax = jnp.abs(x)
    t = 1.0 / (1.0 + p * ax)
    poly = ((((a5 * t + a4) * t + a3) * t + a2) * t + a1) * t
    y = 1.0 - poly * jnp.exp(-ax * ax)
    return s * y


def _gelu(x):
    # exact (erf-based) GELU, matching torch.nn.GELU() default
    return 0.5 * x * (1.0 + _erf(x * _SQRT1_2))


def _sigmoid(x):
    # sigmoid(x) == 0.5*(1 + tanh(x/2)); tanh goes to the EUP slot, no divide on the hot path.
    return 0.5 * jnp.tanh(0.5 * x) + 0.5


def _layernorm(x, gamma, beta, eps=1e-5):
    mean = jnp.mean(x, axis=-1, keepdims=True)
    var = jnp.mean((x - mean) * (x - mean), axis=-1, keepdims=True)
    return (x - mean) * jax.lax.rsqrt(var + eps) * gamma + beta


def _masked_layernorm(x, gamma, beta, true_n, eps=1e-5):
    """LayerNorm over the first `true_n` lanes of a zero-padded (B, P) activation."""
    P = x.shape[-1]
    mask = (jax.lax.broadcasted_iota(jnp.int32, (1, P), 1) < true_n).astype(x.dtype)
    inv_n = 1.0 / float(true_n)
    mean = jnp.sum(x, axis=-1, keepdims=True) * inv_n          # padded lanes are exactly 0
    diff = (x - mean) * mask
    var = jnp.sum(diff * diff, axis=-1, keepdims=True) * inv_n
    return diff * jax.lax.rsqrt(var + eps) * gamma + beta


def _mm_bf16(a, w):
    # bf16 MXU inputs, f32 accumulation; elementwise math stays f32.
    return jnp.dot(a.astype(jnp.bfloat16), w.astype(jnp.bfloat16),
                   preferred_element_type=jnp.float32)


def _lstm_cell(gates, c, H):
    # gate order (i, f, g, o), combined b_ih + b_hh bias already folded into `gates`
    i = _sigmoid(gates[:, 0:H])
    f = _sigmoid(gates[:, H:2 * H])
    g = jnp.tanh(gates[:, 2 * H:3 * H])
    o = _sigmoid(gates[:, 3 * H:4 * H])
    c_new = f * c + i * g
    h_new = o * jnp.tanh(c_new)
    return h_new, c_new


# ----------------------------- fused forward kernel -----------------------------

def _fused_kernel(*refs, B, T, H, num_layers, d1, d2, vocab):
    """Whole IntentClassifier forward in one kernel (everything VMEM resident).

    refs layout:
      [0] ids      (T*B, 1) int32, time-major (B already padded to a sublane multiple)
      [1] emb      (vocab, E) f32
      [2 .. 2+4L)  per layer: wih_cat (Din, 8H) = [Wih_fwd | Wih_bwd],
                              whh_f (H, 4H), whh_b (H, 4H),
                              b_cat (1, 8H)  = [b_fwd | b_bwd]
      next 10      head (lane-padded to 128): w1,b1,g1,be1, w2,b2,g2,be2, wo,bo
      [-1]         out (B, 128) f32
    """
    f32, bf16 = jnp.float32, jnp.bfloat16
    TB = T * B
    G = 4 * H

    ids_ref, emb_ref = refs[0], refs[1]
    lstm_refs = refs[2:2 + 4 * num_layers]
    (w1_ref, b1_ref, g1_ref, be1_ref,
     w2_ref, b2_ref, g2_ref, be2_ref,
     wo_ref, bo_ref) = refs[2 + 4 * num_layers:2 + 4 * num_layers + 10]
    out_ref = refs[-1]

    # ---- embedding lookup as one-hot matmul (time-major (T*B, E)) ----
    ids = ids_ref[...]                                                    # (TB, 1) int32
    col = jax.lax.broadcasted_iota(jnp.int32, (TB, vocab), 1)
    onehot = (col == ids).astype(bf16)                                    # exact 0/1
    x = jnp.dot(onehot, emb_ref[...].astype(bf16),
                preferred_element_type=f32)                               # (TB, E)

    # ---- stacked bidirectional LSTM (h0 = c0 = 0) ----
    for layer in range(num_layers):
        wih_cat, whh_f, whh_b, b_cat = lstm_refs[4 * layer:4 * layer + 4]
        Uf = whh_f[...].astype(bf16)                                      # hoisted bf16 casts
        Ub = whh_b[...].astype(bf16)

        # hoisted input projection: ONE dense (TB, 8H) matmul covering both directions
        gx = jnp.dot(x.astype(bf16), wih_cat[...].astype(bf16),
                     preferred_element_type=f32) + b_cat[...]             # (TB, 8H)
        gx_f = gx[:, :G]                                                  # lane-aligned slices
        gx_b = gx[:, G:]

        hf = jnp.zeros((B, H), f32)
        cf = jnp.zeros((B, H), f32)
        hb = jnp.zeros((B, H), f32)
        cb = jnp.zeros((B, H), f32)
        hf_out = [None] * T
        hb_out = [None] * T

        # interleaved fwd/bwd recurrence: only h @ Whh remains on the serial path
        for s in range(T):
            tf, tb = s, T - 1 - s
            gf = gx_f[tf * B:(tf + 1) * B, :] + jnp.dot(hf.astype(bf16), Uf,
                                                        preferred_element_type=f32)
            gb = gx_b[tb * B:(tb + 1) * B, :] + jnp.dot(hb.astype(bf16), Ub,
                                                        preferred_element_type=f32)
            hf, cf = _lstm_cell(gf, cf, H)
            hb, cb = _lstm_cell(gb, cb, H)
            hf_out[tf] = hf
            hb_out[tb] = hb

        # dense assembly of the layer output (values only, no per-timestep stores)
        x = jnp.concatenate([jnp.concatenate(hf_out, axis=0),
                             jnp.concatenate(hb_out, axis=0)], axis=1)    # (TB, 2H)

    # ---- last timestep, GELU, MLP head (lane-padded to 128, masked LayerNorm) ----
    x_last = x[(T - 1) * B:, :]                                           # (B, 2H)
    h = _gelu(x_last)                                                     # act1 (dropout = identity)

    h1 = _mm_bf16(h, w1_ref[...]) + b1_ref[...]
    h1 = _gelu(_masked_layernorm(h1, g1_ref[...], be1_ref[...], d1))      # norm1 + act_lin1

    h2 = _mm_bf16(h1, w2_ref[...]) + b2_ref[...]
    h2 = _gelu(_masked_layernorm(h2, g2_ref[...], be2_ref[...], d2))      # norm2 + act_lin2

    out_ref[...] = _mm_bf16(h2, wo_ref[...]) + bo_ref[...]                # (B, 128) lane-dense


# ----------------------------- wrapper -----------------------------

def intent_classifier_forward(x_ids, embedding_matrix, lstm_params, padded_head, config):
    B, T = x_ids.shape
    H = config["hidden_size"]
    L = config["num_layers"]
    D1 = H - 100
    D2 = H // 2
    num_labels = config["num_labels"]
    vocab = embedding_matrix.shape[0]
    out_pad = _round_up(num_labels)

    # pad batch to a full sublane tile so every per-timestep slice is vreg-aligned
    B_pad = _round_up(B, _SUBLANE)
    if B_pad != B:
        x_ids_p = jnp.zeros((B_pad, T), jnp.int32).at[:B, :].set(x_ids)
    else:
        x_ids_p = x_ids
    ids_tm = jnp.transpose(x_ids_p).reshape(T * B_pad, 1).astype(jnp.int32)   # time-major ids

    inputs = [ids_tm, embedding_matrix]
    for p in lstm_params:
        # one-time weight plumbing: fuse fwd/bwd input projections into one matmul
        wih_cat = jnp.concatenate([p["wih_f"], p["wih_b"]], axis=1)           # (Din, 8H)
        b_cat = jnp.concatenate([p["b_f"], p["b_b"]], axis=1)                 # (1, 8H)
        inputs += [wih_cat, p["whh_f"], p["whh_b"], b_cat]
    hp = padded_head
    inputs += [hp["w1"], hp["b1"], hp["g1"], hp["be1"],
               hp["w2"], hp["b2"], hp["g2"], hp["be2"],
               hp["wo"], hp["bo"]]

    kernel = functools.partial(_fused_kernel, B=B_pad, T=T, H=H,
                               num_layers=L, d1=D1, d2=D2, vocab=vocab)
    vmem = pl.BlockSpec(memory_space=pltpu.MemorySpace.VMEM)
    out = pl.pallas_call(
        kernel,
        out_shape=jax.ShapeDtypeStruct((B_pad, out_pad), jnp.float32),
        in_specs=[vmem] * len(inputs),
        out_specs=vmem,
    )(*inputs)
    return out[:B, :num_labels]


# ----------------------------- pure-JAX reference (same bf16-at-the-dot policy) -----------------------------

def _ref_lstm_dir(x, wih, whh, b, reverse):
    B, T, _ = x.shape
    H = whh.shape[0]
    h = jnp.zeros((B, H), jnp.float32)
    c = jnp.zeros((B, H), jnp.float32)
    outs = [None] * T
    ts = range(T - 1, -1, -1) if reverse else range(T)
    for t in ts:
        gates = _mm_bf16(x[:, t, :], wih) + _mm_bf16(h, whh) + b
        h, c = _lstm_cell(gates, c, H)
        outs[t] = h
    return jnp.stack(outs, axis=1)


def _ref_forward(x_ids, embedding_matrix, lstm_params, head_params):
    x = embedding_matrix[x_ids]
    for p in lstm_params:
        fwd = _ref_lstm_dir(x, p["wih_f"], p["whh_f"], p["b_f"], reverse=False)
        bwd = _ref_lstm_dir(x, p["wih_b"], p["whh_b"], p["b_b"], reverse=True)
        x = jnp.concatenate([fwd, bwd], axis=-1)
    x = _gelu(x[:, -1, :])
    h1 = _gelu(_layernorm(_mm_bf16(x, head_params["w1"]) + head_params["b1"],
                          head_params["g1"], head_params["be1"]))
    h2 = _gelu(_layernorm(_mm_bf16(h1, head_params["w2"]) + head_params["b2"],
                          head_params["g2"], head_params["be2"]))
    return _mm_bf16(h2, head_params["wo"]) + head_params["bo"]


# ----------------------------- deterministic parameter init -----------------------------

def _xavier_uniform(key, out_dim, in_dim):
    limit = math.sqrt(6.0 / (in_dim + out_dim))
    return jax.random.uniform(key, (out_dim, in_dim), jnp.float32, -limit, limit)


def _xavier_normal(key, out_dim, in_dim):
    std = math.sqrt(2.0 / (in_dim + out_dim))
    return std * jax.random.normal(key, (out_dim, in_dim), jnp.float32)


def make_params(key, config, vocab_size):
    E = config["input_size"]
    H = config["hidden_size"]
    L = config["num_layers"]
    D1 = H - 100
    D2 = H // 2
    num_labels = config["num_labels"]

    keys = iter(jax.random.split(key, 8 + 8 * L))

    embedding_matrix = 0.1 * jax.random.normal(next(keys), (vocab_size, E), jnp.float32)

    lstm_params = []
    in_dim = E
    for _ in range(L):
        p = {}
        for direction in ("f", "b"):
            wih = _xavier_uniform(next(keys), 4 * H, in_dim)          # torch (4H, in)
            whh = _xavier_uniform(next(keys), 4 * H, H)               # torch (4H, H)
            bih = jax.random.uniform(next(keys), (4 * H,), jnp.float32,
                                     -1.0 / math.sqrt(H), 1.0 / math.sqrt(H))
            bhh = jax.random.uniform(next(keys), (4 * H,), jnp.float32,
                                     -1.0 / math.sqrt(H), 1.0 / math.sqrt(H))
            p["wih_" + direction] = wih.T                             # (in, 4H)
            p["whh_" + direction] = whh.T                             # (H, 4H)
            p["b_" + direction] = (bih + bhh).reshape(1, 4 * H)
        lstm_params.append(p)
        in_dim = 2 * H

    def linear(key_w, key_b, in_d, out_d):
        w = _xavier_normal(key_w, out_d, in_d).T                      # (in, out)
        b = jax.random.uniform(key_b, (1, out_d), jnp.float32,
                               -1.0 / math.sqrt(in_d), 1.0 / math.sqrt(in_d))
        return w, b

    kw1, kb1, kw2, kb2, kwo, kbo = jax.random.split(next(keys), 6)
    w1, b1 = linear(kw1, kb1, 2 * H, D1)
    w2, b2 = linear(kw2, kb2, D1, D2)
    wo, bo = linear(kwo, kbo, D2, num_labels)

    head_params = {
        "w1": w1, "b1": b1, "g1": jnp.ones((1, D1), jnp.float32), "be1": jnp.zeros((1, D1), jnp.float32),
        "w2": w2, "b2": b2, "g2": jnp.ones((1, D2), jnp.float32), "be2": jnp.zeros((1, D2), jnp.float32),
        "wo": wo, "bo": bo,
    }
    return embedding_matrix, lstm_params, head_params


def pad_head_params(hp, num_labels):
    """Zero-pad head weights/vectors to 128-wide lane tiles (one-time weight plumbing)."""
    d1 = hp["w1"].shape[1]
    d2 = hp["w2"].shape[1]
    P1, P2, PO = _round_up(d1), _round_up(d2), _round_up(num_labels)

    def padw(w, rows, cols):
        return jnp.zeros((rows, cols), jnp.float32).at[:w.shape[0], :w.shape[1]].set(w)

    def padv(v, cols):
        return jnp.zeros((1, cols), jnp.float32).at[:, :v.shape[1]].set(v)

    return {
        "w1": padw(hp["w1"], hp["w1"].shape[0], P1), "b1": padv(hp["b1"], P1),
        "g1": padv(hp["g1"], P1), "be1": padv(hp["be1"], P1),
        "w2": padw(hp["w2"], P1, P2), "b2": padv(hp["b2"], P2),
        "g2": padv(hp["g2"], P2), "be2": padv(hp["be2"], P2),
        "wo": padw(hp["wo"], P2, PO), "bo": padv(hp["bo"], PO),
    }


# ----------------------------- main -----------------------------

if __name__ == "__main__":
    config = {
        "input_size": 32,       # embedding dim
        "hidden_size": 128,     # LSTM hidden size (must be > 100 per the module)
        "num_layers": 2,
        "dropout_lstm": 0.1,    # inference mode -> identity
        "dropout_linear": 0.1,  # inference mode -> identity
        "num_labels": 5,
    }
    B, T, VOCAB = 2, 8, 50

    key = jax.random.PRNGKey(0)
    k_param, k_data = jax.random.split(key)
    embedding_matrix, lstm_params, head_params = make_params(k_param, config, VOCAB)
    padded_head = pad_head_params(head_params, config["num_labels"])

    x_ids = jax.random.randint(k_data, (B, T), 0, VOCAB, dtype=jnp.int32)

    logits = intent_classifier_forward(x_ids, embedding_matrix, lstm_params,
                                       padded_head, config)
    logits = jax.block_until_ready(logits)

    ref = jax.block_until_ready(_ref_forward(x_ids, embedding_matrix, lstm_params, head_params))
    np.testing.assert_allclose(np.asarray(logits), np.asarray(ref), rtol=2e-3, atol=2e-3)

    assert logits.shape == (B, config["num_labels"])
    print("KERNEL_OK")
</pallas_src>

<mosaic_0001>
module attributes {stable_mosaic.version = 11 : i64} {
  func.func @_fused_kernel(%arg0: memref<64x1xi32, #tpu.memory_space<vmem>>, %arg1: memref<50x32xf32, #tpu.memory_space<vmem>>, %arg2: memref<32x1024xf32, #tpu.memory_space<vmem>>, %arg3: memref<128x512xf32, #tpu.memory_space<vmem>>, %arg4: memref<128x512xf32, #tpu.memory_space<vmem>>, %arg5: memref<1x1024xf32, #tpu.memory_space<vmem>>, %arg6: memref<256x1024xf32, #tpu.memory_space<vmem>>, %arg7: memref<128x512xf32, #tpu.memory_space<vmem>>, %arg8: memref<128x512xf32, #tpu.memory_space<vmem>>, %arg9: memref<1x1024xf32, #tpu.memory_space<vmem>>, %arg10: memref<256x128xf32, #tpu.memory_space<vmem>>, %arg11: memref<1x128xf32, #tpu.memory_space<vmem>>, %arg12: memref<1x128xf32, #tpu.memory_space<vmem>>, %arg13: memref<1x128xf32, #tpu.memory_space<vmem>>, %arg14: memref<128x128xf32, #tpu.memory_space<vmem>>, %arg15: memref<1x128xf32, #tpu.memory_space<vmem>>, %arg16: memref<1x128xf32, #tpu.memory_space<vmem>>, %arg17: memref<1x128xf32, #tpu.memory_space<vmem>>, %arg18: memref<128x128xf32, #tpu.memory_space<vmem>>, %arg19: memref<1x128xf32, #tpu.memory_space<vmem>>, %arg20: memref<8x128xf32, #tpu.memory_space<vmem>>) attributes {dimension_semantics = [], scalar_prefetch = 0 : i64, scratch_operands = 0 : i64, tpu.core_type = #tpu.core_type<tc>} {
    %c0 = arith.constant 0 : index
    %c0_0 = arith.constant 0 : index
    %0 = vector.load %arg0[%c0, %c0_0] : memref<64x1xi32, #tpu.memory_space<vmem>>, vector<64x1xi32>
    %1 = tpu.iota {dimensions = array<i32: 1>} : vector<64x50xi32>
    %2 = vector.broadcast %0 : vector<64x1xi32> to vector<64x50xi32>
    %3 = arith.cmpi eq, %1, %2 : vector<64x50xi32>
    %4 = arith.extui %3 : vector<64x50xi1> to vector<64x50xi32>
    %5 = arith.sitofp %4 : vector<64x50xi32> to vector<64x50xf32>
    %6 = arith.truncf %5 : vector<64x50xf32> to vector<64x50xbf16>
    %c0_1 = arith.constant 0 : index
    %c0_2 = arith.constant 0 : index
    %7 = vector.load %arg1[%c0_1, %c0_2] : memref<50x32xf32, #tpu.memory_space<vmem>>, vector<50x32xf32>
    %8 = arith.truncf %7 : vector<50x32xf32> to vector<50x32xbf16>
    %cst = arith.constant dense<0.000000e+00> : vector<64x32xf32>
    %9 = tpu.matmul %6, %8, %cst {dimension_numbers = #tpu.dot_dimension_numbers<[1], [0], [0], [1], [0, 0, 1, 1], [], []>} : vector<64x50xbf16>, vector<50x32xbf16>, vector<64x32xf32> -> vector<64x32xf32>
    %c0_3 = arith.constant 0 : index
    %c0_4 = arith.constant 0 : index
    %10 = vector.load %arg3[%c0_3, %c0_4] : memref<128x512xf32, #tpu.memory_space<vmem>>, vector<128x512xf32>
    %11 = arith.truncf %10 : vector<128x512xf32> to vector<128x512xbf16>
    %c0_5 = arith.constant 0 : index
    %c0_6 = arith.constant 0 : index
    %12 = vector.load %arg4[%c0_5, %c0_6] : memref<128x512xf32, #tpu.memory_space<vmem>>, vector<128x512xf32>
    %13 = arith.truncf %12 : vector<128x512xf32> to vector<128x512xbf16>
    %14 = arith.truncf %9 : vector<64x32xf32> to vector<64x32xbf16>
    %c0_7 = arith.constant 0 : index
    %c0_8 = arith.constant 0 : index
    %15 = vector.load %arg2[%c0_7, %c0_8] : memref<32x1024xf32, #tpu.memory_space<vmem>>, vector<32x1024xf32>
    %16 = arith.truncf %15 : vector<32x1024xf32> to vector<32x1024xbf16>
    %cst_9 = arith.constant dense<0.000000e+00> : vector<64x1024xf32>
    %17 = tpu.matmul %14, %16, %cst_9 {dimension_numbers = #tpu.dot_dimension_numbers<[1], [0], [0], [1], [0, 0, 1, 1], [], []>} : vector<64x32xbf16>, vector<32x1024xbf16>, vector<64x1024xf32> -> vector<64x1024xf32>
    %c0_10 = arith.constant 0 : index
    %c0_11 = arith.constant 0 : index
    %18 = vector.load %arg5[%c0_10, %c0_11] : memref<1x1024xf32, #tpu.memory_space<vmem>>, vector<1x1024xf32>
    %19 = vector.broadcast %18 : vector<1x1024xf32> to vector<64x1024xf32>
    %20 = arith.addf %17, %19 : vector<64x1024xf32>
    %21 = vector.extract_strided_slice %20 {offsets = [0, 0], sizes = [64, 512], strides = [1, 1]} : vector<64x1024xf32> to vector<64x512xf32>
    %22 = vector.extract_strided_slice %20 {offsets = [0, 512], sizes = [64, 512], strides = [1, 1]} : vector<64x1024xf32> to vector<64x512xf32>
    %cst_12 = arith.constant 0.000000e+00 : f32
    %23 = vector.broadcast %cst_12 : f32 to vector<8x128xf32>
    %cst_13 = arith.constant 0.000000e+00 : f32
    %24 = vector.broadcast %cst_13 : f32 to vector<8x128xf32>
    %cst_14 = arith.constant 0.000000e+00 : f32
    %25 = vector.broadcast %cst_14 : f32 to vector<8x128xf32>
    %cst_15 = arith.constant 0.000000e+00 : f32
    %26 = vector.broadcast %cst_15 : f32 to vector<8x128xf32>
    %27 = vector.extract_strided_slice %21 {offsets = [0, 0], sizes = [8, 512], strides = [1, 1]} : vector<64x512xf32> to vector<8x512xf32>
    %28 = arith.truncf %23 : vector<8x128xf32> to vector<8x128xbf16>
    %cst_16 = arith.constant dense<0.000000e+00> : vector<8x512xf32>
    %29 = tpu.matmul %28, %11, %cst_16 {dimension_numbers = #tpu.dot_dimension_numbers<[1], [0], [0], [1], [0, 0, 1, 1], [], []>} : vector<8x128xbf16>, vector<128x512xbf16>, vector<8x512xf32> -> vector<8x512xf32>
    %30 = arith.addf %27, %29 : vector<8x512xf32>
    %31 = vector.extract_strided_slice %22 {offsets = [56, 0], sizes = [8, 512], strides = [1, 1]} : vector<64x512xf32> to vector<8x512xf32>
    %32 = arith.truncf %25 : vector<8x128xf32> to vector<8x128xbf16>
    %cst_17 = arith.constant dense<0.000000e+00> : vector<8x512xf32>
    %33 = tpu.matmul %32, %13, %cst_17 {dimension_numbers = #tpu.dot_dimension_numbers<[1], [0], [0], [1], [0, 0, 1, 1], [], []>} : vector<8x128xbf16>, vector<128x512xbf16>, vector<8x512xf32> -> vector<8x512xf32>
    %34 = arith.addf %31, %33 : vector<8x512xf32>
    %35 = vector.extract_strided_slice %30 {offsets = [0, 0], sizes = [8, 128], strides = [1, 1]} : vector<8x512xf32> to vector<8x128xf32>
    %cst_18 = arith.constant 5.000000e-01 : f32
    %36 = vector.broadcast %cst_18 : f32 to vector<8x128xf32>
    %37 = arith.mulf %36, %35 : vector<8x128xf32>
    %38 = math.tanh %37 : vector<8x128xf32>
    %cst_19 = arith.constant 5.000000e-01 : f32
    %39 = vector.broadcast %cst_19 : f32 to vector<8x128xf32>
    %40 = arith.mulf %39, %38 : vector<8x128xf32>
    %cst_20 = arith.constant 5.000000e-01 : f32
    %41 = vector.broadcast %cst_20 : f32 to vector<8x128xf32>
    %42 = arith.addf %40, %41 : vector<8x128xf32>
    %43 = vector.extract_strided_slice %30 {offsets = [0, 128], sizes = [8, 128], strides = [1, 1]} : vector<8x512xf32> to vector<8x128xf32>
    %cst_21 = arith.constant 5.000000e-01 : f32
    %44 = vector.broadcast %cst_21 : f32 to vector<8x128xf32>
    %45 = arith.mulf %44, %43 : vector<8x128xf32>
    %46 = math.tanh %45 : vector<8x128xf32>
    %cst_22 = arith.constant 5.000000e-01 : f32
    %47 = vector.broadcast %cst_22 : f32 to vector<8x128xf32>
    %48 = arith.mulf %47, %46 : vector<8x128xf32>
    %cst_23 = arith.constant 5.000000e-01 : f32
    %49 = vector.broadcast %cst_23 : f32 to vector<8x128xf32>
    %50 = arith.addf %48, %49 : vector<8x128xf32>
    %51 = vector.extract_strided_slice %30 {offsets = [0, 256], sizes = [8, 128], strides = [1, 1]} : vector<8x512xf32> to vector<8x128xf32>
    %52 = math.tanh %51 : vector<8x128xf32>
    %53 = vector.extract_strided_slice %30 {offsets = [0, 384], sizes = [8, 128], strides = [1, 1]} : vector<8x512xf32> to vector<8x128xf32>
    %cst_24 = arith.constant 5.000000e-01 : f32
    %54 = vector.broadcast %cst_24 : f32 to vector<8x128xf32>
    %55 = arith.mulf %54, %53 : vector<8x128xf32>
    %56 = math.tanh %55 : vector<8x128xf32>
    %cst_25 = arith.constant 5.000000e-01 : f32
    %57 = vector.broadcast %cst_25 : f32 to vector<8x128xf32>
    %58 = arith.mulf %57, %56 : vector<8x128xf32>
    %cst_26 = arith.constant 5.000000e-01 : f32
    %59 = vector.broadcast %cst_26 : f32 to vector<8x128xf32>
    %60 = arith.addf %58, %59 : vector<8x128xf32>
    %61 = arith.mulf %50, %24 : vector<8x128xf32>
    %62 = arith.mulf %42, %52 : vector<8x128xf32>
    %63 = arith.addf %61, %62 : vector<8x128xf32>
    %64 = math.tanh %63 : vector<8x128xf32>
    %65 = arith.mulf %60, %64 : vector<8x128xf32>
    %66 = vector.extract_strided_slice %34 {offsets = [0, 0], sizes = [8, 128], strides = [1, 1]} : vector<8x512xf32> to vector<8x128xf32>
    %cst_27 = arith.constant 5.000000e-01 : f32
    %67 = vector.broadcast %cst_27 : f32 to vector<8x128xf32>
    %68 = arith.mulf %67, %66 : vector<8x128xf32>
    %69 = math.tanh %68 : vector<8x128xf32>
    %cst_28 = arith.constant 5.000000e-01 : f32
    %70 = vector.broadcast %cst_28 : f32 to vector<8x128xf32>
    %71 = arith.mulf %70, %69 : vector<8x128xf32>
    %cst_29 = arith.constant 5.000000e-01 : f32
    %72 = vector.broadcast %cst_29 : f32 to vector<8x128xf32>
    %73 = arith.addf %71, %72 : vector<8x128xf32>
    %74 = vector.extract_strided_slice %34 {offsets = [0, 128], sizes = [8, 128], strides = [1, 1]} : vector<8x512xf32> to vector<8x128xf32>
    %cst_30 = arith.constant 5.000000e-01 : f32
    %75 = vector.broadcast %cst_30 : f32 to vector<8x128xf32>
    %76 = arith.mulf %75, %74 : vector<8x128xf32>
    %77 = math.tanh %76 : vector<8x128xf32>
    %cst_31 = arith.constant 5.000000e-01 : f32
    %78 = vector.broadcast %cst_31 : f32 to vector<8x128xf32>
    %79 = arith.mulf %78, %77 : vector<8x128xf32>
    %cst_32 = arith.constant 5.000000e-01 : f32
    %80 = vector.broadcast %cst_32 : f32 to vector<8x128xf32>
    %81 = arith.addf %79, %80 : vector<8x128xf32>
    %82 = vector.extract_strided_slice %34 {offsets = [0, 256], sizes = [8, 128], strides = [1, 1]} : vector<8x512xf32> to vector<8x128xf32>
    %83 = math.tanh %82 : vector<8x128xf32>
    %84 = vector.extract_strided_slice %34 {offsets = [0, 384], sizes = [8, 128], strides = [1, 1]} : vector<8x512xf32> to vector<8x128xf32>
    %cst_33 = arith.constant 5.000000e-01 : f32
    %85 = vector.broadcast %cst_33 : f32 to vector<8x128xf32>
    %86 = arith.mulf %85, %84 : vector<8x128xf32>
    %87 = math.tanh %86 : vector<8x128xf32>
    %cst_34 = arith.constant 5.000000e-01 : f32
    %88 = vector.broadcast %cst_34 : f32 to vector<8x128xf32>
    %89 = arith.mulf %88, %87 : vector<8x128xf32>
    %cst_35 = arith.constant 5.000000e-01 : f32
    %90 = vector.broadcast %cst_35 : f32 to vector<8x128xf32>
    %91 = arith.addf %89, %90 : vector<8x128xf32>
    %92 = arith.mulf %81, %26 : vector<8x128xf32>
    %93 = arith.mulf %73, %83 : vector<8x128xf32>
    %94 = arith.addf %92, %93 : vector<8x128xf32>
    %95 = math.tanh %94 : vector<8x128xf32>
    %96 = arith.mulf %91, %95 : vector<8x128xf32>
    %97 = vector.extract_strided_slice %21 {offsets = [8, 0], sizes = [8, 512], strides = [1, 1]} : vector<64x512xf32> to vector<8x512xf32>
    %98 = arith.truncf %65 : vector<8x128xf32> to vector<8x128xbf16>
    %cst_36 = arith.constant dense<0.000000e+00> : vector<8x512xf32>
    %99 = tpu.matmul %98, %11, %cst_36 {dimension_numbers = #tpu.dot_dimension_numbers<[1], [0], [0], [1], [0, 0, 1, 1], [], []>} : vector<8x128xbf16>, vector<128x512xbf16>, vector<8x512xf32> -> vector<8x512xf32>
    %100 = arith.addf %97, %99 : vector<8x512xf32>
    %101 = vector.extract_strided_slice %22 {offsets = [48, 0], sizes = [8, 512], strides = [1, 1]} : vector<64x512xf32> to vector<8x512xf32>
    %102 = arith.truncf %96 : vector<8x128xf32> to vector<8x128xbf16>
    %cst_37 = arith.constant dense<0.000000e+00> : vector<8x512xf32>
    %103 = tpu.matmul %102, %13, %cst_37 {dimension_numbers = #tpu.dot_dimension_numbers<[1], [0], [0], [1], [0, 0, 1, 1], [], []>} : vector<8x128xbf16>, vector<128x512xbf16>, vector<8x512xf32> -> vector<8x512xf32>
    %104 = arith.addf %101, %103 : vector<8x512xf32>
    %105 = vector.extract_strided_slice %100 {offsets = [0, 0], sizes = [8, 128], strides = [1, 1]} : vector<8x512xf32> to vector<8x128xf32>
    %cst_38 = arith.constant 5.000000e-01 : f32
    %106 = vector.broadcast %cst_38 : f32 to vector<8x128xf32>
    %107 = arith.mulf %106, %105 : vector<8x128xf32>
    %108 = math.tanh %107 : vector<8x128xf32>
    %cst_39 = arith.constant 5.000000e-01 : f32
    %109 = vector.broadcast %cst_39 : f32 to vector<8x128xf32>
    %110 = arith.mulf %109, %108 : vector<8x128xf32>
    %cst_40 = arith.constant 5.000000e-01 : f32
    %111 = vector.broadcast %cst_40 : f32 to vector<8x128xf32>
    %112 = arith.addf %110, %111 : vector<8x128xf32>
    %113 = vector.extract_strided_slice %100 {offsets = [0, 128], sizes = [8, 128], strides = [1, 1]} : vector<8x512xf32> to vector<8x128xf32>
    %cst_41 = arith.constant 5.000000e-01 : f32
    %114 = vector.broadcast %cst_41 : f32 to vector<8x128xf32>
    %115 = arith.mulf %114, %113 : vector<8x128xf32>
    %116 = math.tanh %115 : vector<8x128xf32>
    %cst_42 = arith.constant 5.000000e-01 : f32
    %117 = vector.broadcast %cst_42 : f32 to vector<8x128xf32>
    %118 = arith.mulf %117, %116 : vector<8x128xf32>
    %cst_43 = arith.constant 5.000000e-01 : f32
    %119 = vector.broadcast %cst_43 : f32 to vector<8x128xf32>
    %120 = arith.addf %118, %119 : vector<8x128xf32>
    %121 = vector.extract_strided_slice %100 {offsets = [0, 256], sizes = [8, 128], strides = [1, 1]} : vector<8x512xf32> to vector<8x128xf32>
    %122 = math.tanh %121 : vector<8x128xf32>
    %123 = vector.extract_strided_slice %100 {offsets = [0, 384], sizes = [8, 128], strides = [1, 1]} : vector<8x512xf32> to vector<8x128xf32>
    %cst_44 = arith.constant 5.000000e-01 : f32
    %124 = vector.broadcast %cst_44 : f32 to vector<8x128xf32>
    %125 = arith.mulf %124, %123 : vector<8x128xf32>
    %126 = math.tanh %125 : vector<8x128xf32>
    %cst_45 = arith.constant 5.000000e-01 : f32
    %127 = vector.broadcast %cst_45 : f32 to vector<8x128xf32>
    %128 = arith.mulf %127, %126 : vector<8x128xf32>
    %cst_46 = arith.constant 5.000000e-01 : f32
    %129 = vector.broadcast %cst_46 : f32 to vector<8x128xf32>
    %130 = arith.addf %128, %129 : vector<8x128xf32>
    %131 = arith.mulf %120, %63 : vector<8x128xf32>
    %132 = arith.mulf %112, %122 : vector<8x128xf32>
    %133 = arith.addf %131, %132 : vector<8x128xf32>
    %134 = math.tanh %133 : vector<8x128xf32>
    %135 = arith.mulf %130, %134 : vector<8x128xf32>
    %136 = vector.extract_strided_slice %104 {offsets = [0, 0], sizes = [8, 128], strides = [1, 1]} : vector<8x512xf32> to vector<8x128xf32>
    %cst_47 = arith.constant 5.000000e-01 : f32
    %137 = vector.broadcast %cst_47 : f32 to vector<8x128xf32>
    %138 = arith.mulf %137, %136 : vector<8x128xf32>
    %139 = math.tanh %138 : vector<8x128xf32>
    %cst_48 = arith.constant 5.000000e-01 : f32
    %140 = vector.broadcast %cst_48 : f32 to vector<8x128xf32>
    %141 = arith.mulf %140, %139 : vector<8x128xf32>
    %cst_49 = arith.constant 5.000000e-01 : f32
    %142 = vector.broadcast %cst_49 : f32 to vector<8x128xf32>
    %143 = arith.addf %141, %142 : vector<8x128xf32>
    %144 = vector.extract_strided_slice %104 {offsets = [0, 128], sizes = [8, 128], strides = [1, 1]} : vector<8x512xf32> to vector<8x128xf32>
    %cst_50 = arith.constant 5.000000e-01 : f32
    %145 = vector.broadcast %cst_50 : f32 to vector<8x128xf32>
    %146 = arith.mulf %145, %144 : vector<8x128xf32>
    %147 = math.tanh %146 : vector<8x128xf32>
    %cst_51 = arith.constant 5.000000e-01 : f32
    %148 = vector.broadcast %cst_51 : f32 to vector<8x128xf32>
    %149 = arith.mulf %148, %147 : vector<8x128xf32>
    %cst_52 = arith.constant 5.000000e-01 : f32
    %150 = vector.broadcast %cst_52 : f32 to vector<8x128xf32>
    %151 = arith.addf %149, %150 : vector<8x128xf32>
    %152 = vector.extract_strided_slice %104 {offsets = [0, 256], sizes = [8, 128], strides = [1, 1]} : vector<8x512xf32> to vector<8x128xf32>
    %153 = math.tanh %152 : vector<8x128xf32>
    %154 = vector.extract_strided_slice %104 {offsets = [0, 384], sizes = [8, 128], strides = [1, 1]} : vector<8x512xf32> to vector<8x128xf32>
    %cst_53 = arith.constant 5.000000e-01 : f32
    %155 = vector.broadcast %cst_53 : f32 to vector<8x128xf32>
    %156 = arith.mulf %155, %154 : vector<8x128xf32>
    %157 = math.tanh %156 : vector<8x128xf32>
    %cst_54 = arith.constant 5.000000e-01 : f32
    %158 = vector.broadcast %cst_54 : f32 to vector<8x128xf32>
    %159 = arith.mulf %158, %157 : vector<8x128xf32>
    %cst_55 = arith.constant 5.000000e-01 : f32
    %160 = vector.broadcast %cst_55 : f32 to vector<8x128xf32>
    %161 = arith.addf %159, %160 : vector<8x128xf32>
    %162 = arith.mulf %151, %94 : vector<8x128xf32>
    %163 = arith.mulf %143, %153 : vector<8x128xf32>
    %164 = arith.addf %162, %163 : vector<8x128xf32>
    %165 = math.tanh %164 : vector<8x128xf32>
    %166 = arith.mulf %161, %165 : vector<8x128xf32>
    %167 = vector.extract_strided_slice %21 {offsets = [16, 0], sizes = [8, 512], strides = [1, 1]} : vector<64x512xf32> to vector<8x512xf32>
    %168 = arith.truncf %135 : vector<8x128xf32> to vector<8x128xbf16>
    %cst_56 = arith.constant dense<0.000000e+00> : vector<8x512xf32>
    %169 = tpu.matmul %168, %11, %cst_56 {dimension_numbers = #tpu.dot_dimension_numbers<[1], [0], [0], [1], [0, 0, 1, 1], [], []>} : vector<8x128xbf16>, vector<128x512xbf16>, vector<8x512xf32> -> vector<8x512xf32>
    %170 = arith.addf %167, %169 : vector<8x512xf32>
    %171 = vector.extract_strided_slice %22 {offsets = [40, 0], sizes = [8, 512], strides = [1, 1]} : vector<64x512xf32> to vector<8x512xf32>
    %172 = arith.truncf %166 : vector<8x128xf32> to vector<8x128xbf16>
    %cst_57 = arith.constant dense<0.000000e+00> : vector<8x512xf32>
    %173 = tpu.matmul %172, %13, %cst_57 {dimension_numbers = #tpu.dot_dimension_numbers<[1], [0], [0], [1], [0, 0, 1, 1], [], []>} : vector<8x128xbf16>, vector<128x512xbf16>, vector<8x512xf32> -> vector<8x512xf32>
    %174 = arith.addf %171, %173 : vector<8x512xf32>
    %175 = vector.extract_strided_slice %170 {offsets = [0, 0], sizes = [8, 128], strides = [1, 1]} : vector<8x512xf32> to vector<8x128xf32>
    %cst_58 = arith.constant 5.000000e-01 : f32
    %176 = vector.broadcast %cst_58 : f32 to vector<8x128xf32>
    %177 = arith.mulf %176, %175 : vector<8x128xf32>
    %178 = math.tanh %177 : vector<8x128xf32>
    %cst_59 = arith.constant 5.000000e-01 : f32
    %179 = vector.broadcast %cst_59 : f32 to vector<8x128xf32>
    %180 = arith.mulf %179, %178 : vector<8x128xf32>
    %cst_60 = arith.constant 5.000000e-01 : f32
    %181 = vector.broadcast %cst_60 : f32 to vector<8x128xf32>
    %182 = arith.addf %180, %181 : vector<8x128xf32>
    %183 = vector.extract_strided_slice %170 {offsets = [0, 128], sizes = [8, 128], strides = [1, 1]} : vector<8x512xf32> to vector<8x128xf32>
    %cst_61 = arith.constant 5.000000e-01 : f32
    %184 = vector.broadcast %cst_61 : f32 to vector<8x128xf32>
    %185 = arith.mulf %184, %183 : vector<8x128xf32>
    %186 = math.tanh %185 : vector<8x128xf32>
    %cst_62 = arith.constant 5.000000e-01 : f32
    %187 = vector.broadcast %cst_62 : f32 to vector<8x128xf32>
    %188 = arith.mulf %187, %186 : vector<8x128xf32>
    %cst_63 = arith.constant 5.000000e-01 : f32
    %189 = vector.broadcast %cst_63 : f32 to vector<8x128xf32>
    %190 = arith.addf %188, %189 : vector<8x128xf32>
    %191 = vector.extract_strided_slice %170 {offsets = [0, 256], sizes = [8, 128], strides = [1, 1]} : vector<8x512xf32> to vector<8x128xf32>
    %192 = math.tanh %191 : vector<8x128xf32>
    %193 = vector.extract_strided_slice %170 {offsets = [0, 384], sizes = [8, 128], strides = [1, 1]} : vector<8x512xf32> to vector<8x128xf32>
    %cst_64 = arith.constant 5.000000e-01 : f32
    %194 = vector.broadcast %cst_64 : f32 to vector<8x128xf32>
    %195 = arith.mulf %194, %193 : vector<8x128xf32>
    %196 = math.tanh %195 : vector<8x128xf32>
    %cst_65 = arith.constant 5.000000e-01 : f32
    %197 = vector.broadcast %cst_65 : f32 to vector<8x128xf32>
    %198 = arith.mulf %197, %196 : vector<8x128xf32>
    %cst_66 = arith.constant 5.000000e-01 : f32
    %199 = vector.broadcast %cst_66 : f32 to vector<8x128xf32>
    %200 = arith.addf %198, %199 : vector<8x128xf32>
    %201 = arith.mulf %190, %133 : vector<8x128xf32>
    %202 = arith.mulf %182, %192 : vector<8x128xf32>
    %203 = arith.addf %201, %202 : vector<8x128xf32>
    %204 = math.tanh %203 : vector<8x128xf32>
    %205 = arith.mulf %200, %204 : vector<8x128xf32>
    %206 = vector.extract_strided_slice %174 {offsets = [0, 0], sizes = [8, 128], strides = [1, 1]} : vector<8x512xf32> to vector<8x128xf32>
    %cst_67 = arith.constant 5.000000e-01 : f32
    %207 = vector.broadcast %cst_67 : f32 to vector<8x128xf32>
    %208 = arith.mulf %207, %206 : vector<8x128xf32>
    %209 = math.tanh %208 : vector<8x128xf32>
    %cst_68 = arith.constant 5.000000e-01 : f32
    %210 = vector.broadcast %cst_68 : f32 to vector<8x128xf32>
    %211 = arith.mulf %210, %209 : vector<8x128xf32>
    %cst_69 = arith.constant 5.000000e-01 : f32
    %212 = vector.broadcast %cst_69 : f32 to vector<8x128xf32>
    %213 = arith.addf %211, %212 : vector<8x128xf32>
    %214 = vector.extract_strided_slice %174 {offsets = [0, 128], sizes = [8, 128], strides = [1, 1]} : vector<8x512xf32> to vector<8x128xf32>
    %cst_70 = arith.constant 5.000000e-01 : f32
    %215 = vector.broadcast %cst_70 : f32 to vector<8x128xf32>
    %216 = arith.mulf %215, %214 : vector<8x128xf32>
    %217 = math.tanh %216 : vector<8x128xf32>
    %cst_71 = arith.constant 5.000000e-01 : f32
    %218 = vector.broadcast %cst_71 : f32 to vector<8x128xf32>
    %219 = arith.mulf %218, %217 : vector<8x128xf32>
    %cst_72 = arith.constant 5.000000e-01 : f32
    %220 = vector.broadcast %cst_72 : f32 to vector<8x128xf32>
    %221 = arith.addf %219, %220 : vector<8x128xf32>
    %222 = vector.extract_strided_slice %174 {offsets = [0, 256], sizes = [8, 128], strides = [1, 1]} : vector<8x512xf32> to vector<8x128xf32>
    %223 = math.tanh %222 : vector<8x128xf32>
    %224 = vector.extract_strided_slice %174 {offsets = [0, 384], sizes = [8, 128], strides = [1, 1]} : vector<8x512xf32> to vector<8x128xf32>
    %cst_73 = arith.constant 5.000000e-01 : f32
    %225 = vector.broadcast %cst_73 : f32 to vector<8x128xf32>
    %226 = arith.mulf %225, %224 : vector<8x128xf32>
    %227 = math.tanh %226 : vector<8x128xf32>
    %cst_74 = arith.constant 5.000000e-01 : f32
    %228 = vector.broadcast %cst_74 : f32 to vector<8x128xf32>
    %229 = arith.mulf %228, %227 : vector<8x128xf32>
    %cst_75 = arith.constant 5.000000e-01 : f32
    %230 = vector.broadcast %cst_75 : f32 to vector<8x128xf32>
    %231 = arith.addf %229, %230 : vector<8x128xf32>
    %232 = arith.mulf %221, %164 : vector<8x128xf32>
    %233 = arith.mulf %213, %223 : vector<8x128xf32>
    %234 = arith.addf %232, %233 : vector<8x128xf32>
    %235 = math.tanh %234 : vector<8x128xf32>
    %236 = arith.mulf %231, %235 : vector<8x128xf32>
    %237 = vector.extract_strided_slice %21 {offsets = [24, 0], sizes = [8, 512], strides = [1, 1]} : vector<64x512xf32> to vector<8x512xf32>
    %238 = arith.truncf %205 : vector<8x128xf32> to vector<8x128xbf16>
    %cst_76 = arith.constant dense<0.000000e+00> : vector<8x512xf32>
    %239 = tpu.matmul %238, %11, %cst_76 {dimension_numbers = #tpu.dot_dimension_numbers<[1], [0], [0], [1], [0, 0, 1, 1], [], []>} : vector<8x128xbf16>, vector<128x512xbf16>, vector<8x512xf32> -> vector<8x512xf32>
    %240 = arith.addf %237, %239 : vector<8x512xf32>
    %241 = vector.extract_strided_slice %22 {offsets = [32, 0], sizes = [8, 512], strides = [1, 1]} : vector<64x512xf32> to vector<8x512xf32>
    %242 = arith.truncf %236 : vector<8x128xf32> to vector<8x128xbf16>
    %cst_77 = arith.constant dense<0.000000e+00> : vector<8x512xf32>
    %243 = tpu.matmul %242, %13, %cst_77 {dimension_numbers = #tpu.dot_dimension_numbers<[1], [0], [0], [1], [0, 0, 1, 1], [], []>} : vector<8x128xbf16>, vector<128x512xbf16>, vector<8x512xf32> -> vector<8x512xf32>
    %244 = arith.addf %241, %243 : vector<8x512xf32>
    %245 = vector.extract_strided_slice %240 {offsets = [0, 0], sizes = [8, 128], strides = [1, 1]} : vector<8x512xf32> to vector<8x128xf32>
    %cst_78 = arith.constant 5.000000e-01 : f32
    %246 = vector.broadcast %cst_78 : f32 to vector<8x128xf32>
    %247 = arith.mulf %246, %245 : vector<8x128xf32>
    %248 = math.tanh %247 : vector<8x128xf32>
    %cst_79 = arith.constant 5.000000e-01 : f32
    %249 = vector.broadcast %cst_79 : f32 to vector<8x128xf32>
    %250 = arith.mulf %249, %248 : vector<8x128xf32>
    %cst_80 = arith.constant 5.000000e-01 : f32
    %251 = vector.broadcast %cst_80 : f32 to vector<8x128xf32>
    %252 = arith.addf %250, %251 : vector<8x128xf32>
    %253 = vector.extract_strided_slice %240 {offsets = [0, 128], sizes = [8, 128], strides = [1, 1]} : vector<8x512xf32> to vector<8x128xf32>
    %cst_81 = arith.constant 5.000000e-01 : f32
    %254 = vector.broadcast %cst_81 : f32 to vector<8x128xf32>
    %255 = arith.mulf %254, %253 : vector<8x128xf32>
    %256 = math.tanh %255 : vector<8x128xf32>
    %cst_82 = arith.constant 5.000000e-01 : f32
    %257 = vector.broadcast %cst_82 : f32 to vector<8x128xf32>
    %258 = arith.mulf %257, %256 : vector<8x128xf32>
    %cst_83 = arith.constant 5.000000e-01 : f32
    %259 = vector.broadcast %cst_83 : f32 to vector<8x128xf32>
    %260 = arith.addf %258, %259 : vector<8x128xf32>
    %261 = vector.extract_strided_slice %240 {offsets = [0, 256], sizes = [8, 128], strides = [1, 1]} : vector<8x512xf32> to vector<8x128xf32>
    %262 = math.tanh %261 : vector<8x128xf32>
    %263 = vector.extract_strided_slice %240 {offsets = [0, 384], sizes = [8, 128], strides = [1, 1]} : vector<8x512xf32> to vector<8x128xf32>
    %cst_84 = arith.constant 5.000000e-01 : f32
    %264 = vector.broadcast %cst_84 : f32 to vector<8x128xf32>
    %265 = arith.mulf %264, %263 : vector<8x128xf32>
    %266 = math.tanh %265 : vector<8x128xf32>
    %cst_85 = arith.constant 5.000000e-01 : f32
    %267 = vector.broadcast %cst_85 : f32 to vector<8x128xf32>
    %268 = arith.mulf %267, %266 : vector<8x128xf32>
    %cst_86 = arith.constant 5.000000e-01 : f32
    %269 = vector.broadcast %cst_86 : f32 to vector<8x128xf32>
    %270 = arith.addf %268, %269 : vector<8x128xf32>
    %271 = arith.mulf %260, %203 : vector<8x128xf32>
    %272 = arith.mulf %252, %262 : vector<8x128xf32>
    %273 = arith.addf %271, %272 : vector<8x128xf32>
    %274 = math.tanh %273 : vector<8x128xf32>
    %275 = arith.mulf %270, %274 : vector<8x128xf32>
    %276 = vector.extract_strided_slice %244 {offsets = [0, 0], sizes = [8, 128], strides = [1, 1]} : vector<8x512xf32> to vector<8x128xf32>
    %cst_87 = arith.constant 5.000000e-01 : f32
    %277 = vector.broadcast %cst_87 : f32 to vector<8x128xf32>
    %278 = arith.mulf %277, %276 : vector<8x128xf32>
    %279 = math.tanh %278 : vector<8x128xf32>
    %cst_88 = arith.constant 5.000000e-01 : f32
    %280 = vector.broadcast %cst_88 : f32 to vector<8x128xf32>
    %281 = arith.mulf %280, %279 : vector<8x128xf32>
    %cst_89 = arith.constant 5.000000e-01 : f32
    %282 = vector.broadcast %cst_89 : f32 to vector<8x128xf32>
    %283 = arith.addf %281, %282 : vector<8x128xf32>
    %284 = vector.extract_strided_slice %244 {offsets = [0, 128], sizes = [8, 128], strides = [1, 1]} : vector<8x512xf32> to vector<8x128xf32>
    %cst_90 = arith.constant 5.000000e-01 : f32
    %285 = vector.broadcast %cst_90 : f32 to vector<8x128xf32>
    %286 = arith.mulf %285, %284 : vector<8x128xf32>
    %287 = math.tanh %286 : vector<8x128xf32>
    %cst_91 = arith.constant 5.000000e-01 : f32
    %288 = vector.broadcast %cst_91 : f32 to vector<8x128xf32>
    %289 = arith.mulf %288, %287 : vector<8x128xf32>
    %cst_92 = arith.constant 5.000000e-01 : f32
    %290 = vector.broadcast %cst_92 : f32 to vector<8x128xf32>
    %291 = arith.addf %289, %290 : vector<8x128xf32>
    %292 = vector.extract_strided_slice %244 {offsets = [0, 256], sizes = [8, 128], strides = [1, 1]} : vector<8x512xf32> to vector<8x128xf32>
    %293 = math.tanh %292 : vector<8x128xf32>
    %294 = vector.extract_strided_slice %244 {offsets = [0, 384], sizes = [8, 128], strides = [1, 1]} : vector<8x512xf32> to vector<8x128xf32>
    %cst_93 = arith.constant 5.000000e-01 : f32
    %295 = vector.broadcast %cst_93 : f32 to vector<8x128xf32>
    %296 = arith.mulf %295, %294 : vector<8x128xf32>
    %297 = math.tanh %296 : vector<8x128xf32>
    %cst_94 = arith.constant 5.000000e-01 : f32
    %298 = vector.broadcast %cst_94 : f32 to vector<8x128xf32>
    %299 = arith.mulf %298, %297 : vector<8x128xf32>
    %cst_95 = arith.constant 5.000000e-01 : f32
    %300 = vector.broadcast %cst_95 : f32 to vector<8x128xf32>
    %301 = arith.addf %299, %300 : vector<8x128xf32>
    %302 = arith.mulf %291, %234 : vector<8x128xf32>
    %303 = arith.mulf %283, %293 : vector<8x128xf32>
    %304 = arith.addf %302, %303 : vector<8x128xf32>
    %305 = math.tanh %304 : vector<8x128xf32>
    %306 = arith.mulf %301, %305 : vector<8x128xf32>
    %307 = vector.extract_strided_slice %21 {offsets = [32, 0], sizes = [8, 512], strides = [1, 1]} : vector<64x512xf32> to vector<8x512xf32>
    %308 = arith.truncf %275 : vector<8x128xf32> to vector<8x128xbf16>
    %cst_96 = arith.constant dense<0.000000e+00> : vector<8x512xf32>
    %309 = tpu.matmul %308, %11, %cst_96 {dimension_numbers = #tpu.dot_dimension_numbers<[1], [0], [0], [1], [0, 0, 1, 1], [], []>} : vector<8x128xbf16>, vector<128x512xbf16>, vector<8x512xf32> -> vector<8x512xf32>
    %310 = arith.addf %307, %309 : vector<8x512xf32>
    %311 = vector.extract_strided_slice %22 {offsets = [24, 0], sizes = [8, 512], strides = [1, 1]} : vector<64x512xf32> to vector<8x512xf32>
    %312 = arith.truncf %306 : vector<8x128xf32> to vector<8x128xbf16>
    %cst_97 = arith.constant dense<0.000000e+00> : vector<8x512xf32>
    %313 = tpu.matmul %312, %13, %cst_97 {dimension_numbers = #tpu.dot_dimension_numbers<[1], [0], [0], [1], [0, 0, 1, 1], [], []>} : vector<8x128xbf16>, vector<128x512xbf16>, vector<8x512xf32> -> vector<8x512xf32>
    %314 = arith.addf %311, %313 : vector<8x512xf32>
    %315 = vector.extract_strided_slice %310 {offsets = [0, 0], sizes = [8, 128], strides = [1, 1]} : vector<8x512xf32> to vector<8x128xf32>
    %cst_98 = arith.constant 5.000000e-01 : f32
    %316 = vector.broadcast %cst_98 : f32 to vector<8x128xf32>
    %317 = arith.mulf %316, %315 : vector<8x128xf32>
    %318 = math.tanh %317 : vector<8x128xf32>
    %cst_99 = arith.constant 5.000000e-01 : f32
    %319 = vector.broadcast %cst_99 : f32 to vector<8x128xf32>
    %320 = arith.mulf %319, %318 : vector<8x128xf32>
    %cst_100 = arith.constant 5.000000e-01 : f32
    %321 = vector.broadcast %cst_100 : f32 to vector<8x128xf32>
    %322 = arith.addf %320, %321 : vector<8x128xf32>
    %323 = vector.extract_strided_slice %310 {offsets = [0, 128], sizes = [8, 128], strides = [1, 1]} : vector<8x512xf32> to vector<8x128xf32>
    %cst_101 = arith.constant 5.000000e-01 : f32
    %324 = vector.broadcast %cst_101 : f32 to vector<8x128xf32>
    %325 = arith.mulf %324, %323 : vector<8x128xf32>
    %326 = math.tanh %325 : vector<8x128xf32>
    %cst_102 = arith.constant 5.000000e-01 : f32
    %327 = vector.broadcast %cst_102 : f32 to vector<8x128xf32>
    %328 = arith.mulf %327, %326 : vector<8x128xf32>
    %cst_103 = arith.constant 5.000000e-01 : f32
    %329 = vector.broadcast %cst_103 : f32 to vector<8x128xf32>
    %330 = arith.addf %328, %329 : vector<8x128xf32>
    %331 = vector.extract_strided_slice %310 {offsets = [0, 256], sizes = [8, 128], strides = [1, 1]} : vector<8x512xf32> to vector<8x128xf32>
    %332 = math.tanh %331 : vector<8x128xf32>
    %333 = vector.extract_strided_slice %310 {offsets = [0, 384], sizes = [8, 128], strides = [1, 1]} : vector<8x512xf32> to vector<8x128xf32>
    %cst_104 = arith.constant 5.000000e-01 : f32
    %334 = vector.broadcast %cst_104 : f32 to vector<8x128xf32>
    %335 = arith.mulf %334, %333 : vector<8x128xf32>
    %336 = math.tanh %335 : vector<8x128xf32>
    %cst_105 = arith.constant 5.000000e-01 : f32
    %337 = vector.broadcast %cst_105 : f32 to vector<8x128xf32>
    %338 = arith.mulf %337, %336 : vector<8x128xf32>
    %cst_106 = arith.constant 5.000000e-01 : f32
    %339 = vector.broadcast %cst_106 : f32 to vector<8x128xf32>
    %340 = arith.addf %338, %339 : vector<8x128xf32>
    %341 = arith.mulf %330, %273 : vector<8x128xf32>
    %342 = arith.mulf %322, %332 : vector<8x128xf32>
    %343 = arith.addf %341, %342 : vector<8x128xf32>
    %344 = math.tanh %343 : vector<8x128xf32>
    %345 = arith.mulf %340, %344 : vector<8x128xf32>
    %346 = vector.extract_strided_slice %314 {offsets = [0, 0], sizes = [8, 128], strides = [1, 1]} : vector<8x512xf32> to vector<8x128xf32>
    %cst_107 = arith.constant 5.000000e-01 : f32
    %347 = vector.broadcast %cst_107 : f32 to vector<8x128xf32>
    %348 = arith.mulf %347, %346 : vector<8x128xf32>
    %349 = math.tanh %348 : vector<8x128xf32>
    %cst_108 = arith.constant 5.000000e-01 : f32
    %350 = vector.broadcast %cst_108 : f32 to vector<8x128xf32>
    %351 = arith.mulf %350, %349 : vector<8x128xf32>
    %cst_109 = arith.constant 5.000000e-01 : f32
    %352 = vector.broadcast %cst_109 : f32 to vector<8x128xf32>
    %353 = arith.addf %351, %352 : vector<8x128xf32>
    %354 = vector.extract_strided_slice %314 {offsets = [0, 128], sizes = [8, 128], strides = [1, 1]} : vector<8x512xf32> to vector<8x128xf32>
    %cst_110 = arith.constant 5.000000e-01 : f32
    %355 = vector.broadcast %cst_110 : f32 to vector<8x128xf32>
    %356 = arith.mulf %355, %354 : vector<8x128xf32>
    %357 = math.tanh %356 : vector<8x128xf32>
    %cst_111 = arith.constant 5.000000e-01 : f32
    %358 = vector.broadcast %cst_111 : f32 to vector<8x128xf32>
    %359 = arith.mulf %358, %357 : vector<8x128xf32>
    %cst_112 = arith.constant 5.000000e-01 : f32
    %360 = vector.broadcast %cst_112 : f32 to vector<8x128xf32>
    %361 = arith.addf %359, %360 : vector<8x128xf32>
    %362 = vector.extract_strided_slice %314 {offsets = [0, 256], sizes = [8, 128], strides = [1, 1]} : vector<8x512xf32> to vector<8x128xf32>
    %363 = math.tanh %362 : vector<8x128xf32>
    %364 = vector.extract_strided_slice %314 {offsets = [0, 384], sizes = [8, 128], strides = [1, 1]} : vector<8x512xf32> to vector<8x128xf32>
    %cst_113 = arith.constant 5.000000e-01 : f32
    %365 = vector.broadcast %cst_113 : f32 to vector<8x128xf32>
    %366 = arith.mulf %365, %364 : vector<8x128xf32>
    %367 = math.tanh %366 : vector<8x128xf32>
    %cst_114 = arith.constant 5.000000e-01 : f32
    %368 = vector.broadcast %cst_114 : f32 to vector<8x128xf32>
    %369 = arith.mulf %368, %367 : vector<8x128xf32>
    %cst_115 = arith.constant 5.000000e-01 : f32
    %370 = vector.broadcast %cst_115 : f32 to vector<8x128xf32>
    %371 = arith.addf %369, %370 : vector<8x128xf32>
    %372 = arith.mulf %361, %304 : vector<8x128xf32>
    %373 = arith.mulf %353, %363 : vector<8x128xf32>
    %374 = arith.addf %372, %373 : vector<8x128xf32>
    %375 = math.tanh %374 : vector<8x128xf32>
    %376 = arith.mulf %371, %375 : vector<8x128xf32>
    %377 = vector.extract_strided_slice %21 {offsets = [40, 0], sizes = [8, 512], strides = [1, 1]} : vector<64x512xf32> to vector<8x512xf32>
    %378 = arith.truncf %345 : vector<8x128xf32> to vector<8x128xbf16>
    %cst_116 = arith.constant dense<0.000000e+00> : vector<8x512xf32>
    %379 = tpu.matmul %378, %11, %cst_116 {dimension_numbers = #tpu.dot_dimension_numbers<[1], [0], [0], [1], [0, 0, 1, 1], [], []>} : vector<8x128xbf16>, vector<128x512xbf16>, vector<8x512xf32> -> vector<8x512xf32>
    %380 = arith.addf %377, %379 : vector<8x512xf32>
    %381 = vector.extract_strided_slice %22 {offsets = [16, 0], sizes = [8, 512], strides = [1, 1]} : vector<64x512xf32> to vector<8x512xf32>
    %382 = arith.truncf %376 : vector<8x128xf32> to vector<8x128xbf16>
    %cst_117 = arith.constant dense<0.000000e+00> : vector<8x512xf32>
    %383 = tpu.matmul %382, %13, %cst_117 {dimension_numbers = #tpu.dot_dimension_numbers<[1], [0], [0], [1], [0, 0, 1, 1], [], []>} : vector<8x128xbf16>, vector<128x512xbf16>, vector<8x512xf32> -> vector<8x512xf32>
    %384 = arith.addf %381, %383 : vector<8x512xf32>
    %385 = vector.extract_strided_slice %380 {offsets = [0, 0], sizes = [8, 128], strides = [1, 1]} : vector<8x512xf32> to vector<8x128xf32>
    %cst_118 = arith.constant 5.000000e-01 : f32
    %386 = vector.broadcast %cst_118 : f32 to vector<8x128xf32>
    %387 = arith.mulf %386, %385 : vector<8x128xf32>
    %388 = math.tanh %387 : vector<8x128xf32>
    %cst_119 = arith.constant 5.000000e-01 : f32
    %389 = vector.broadcast %cst_119 : f32 to vector<8x128xf32>
    %390 = arith.mulf %389, %388 : vector<8x128xf32>
    %cst_120 = arith.constant 5.000000e-01 : f32
    %391 = vector.broadcast %cst_120 : f32 to vector<8x128xf32>
    %392 = arith.addf %390, %391 : vector<8x128xf32>
    %393 = vector.extract_strided_slice %380 {offsets = [0, 128], sizes = [8, 128], strides = [1, 1]} : vector<8x512xf32> to vector<8x128xf32>
    %cst_121 = arith.constant 5.000000e-01 : f32
    %394 = vector.broadcast %cst_121 : f32 to vector<8x128xf32>
    %395 = arith.mulf %394, %393 : vector<8x128xf32>
    %396 = math.tanh %395 : vector<8x128xf32>
    %cst_122 = arith.constant 5.000000e-01 : f32
    %397 = vector.broadcast %cst_122 : f32 to vector<8x128xf32>
    %398 = arith.mulf %397, %396 : vector<8x128xf32>
    %cst_123 = arith.constant 5.000000e-01 : f32
    %399 = vector.broadcast %cst_123 : f32 to vector<8x128xf32>
    %400 = arith.addf %398, %399 : vector<8x128xf32>
    %401 = vector.extract_strided_slice %380 {offsets = [0, 256], sizes = [8, 128], strides = [1, 1]} : vector<8x512xf32> to vector<8x128xf32>
    %402 = math.tanh %401 : vector<8x128xf32>
    %403 = vector.extract_strided_slice %380 {offsets = [0, 384], sizes = [8, 128], strides = [1, 1]} : vector<8x512xf32> to vector<8x128xf32>
    %cst_124 = arith.constant 5.000000e-01 : f32
    %404 = vector.broadcast %cst_124 : f32 to vector<8x128xf32>
    %405 = arith.mulf %404, %403 : vector<8x128xf32>
    %406 = math.tanh %405 : vector<8x128xf32>
    %cst_125 = arith.constant 5.000000e-01 : f32
    %407 = vector.broadcast %cst_125 : f32 to vector<8x128xf32>
    %408 = arith.mulf %407, %406 : vector<8x128xf32>
    %cst_126 = arith.constant 5.000000e-01 : f32
    %409 = vector.broadcast %cst_126 : f32 to vector<8x128xf32>
    %410 = arith.addf %408, %409 : vector<8x128xf32>
    %411 = arith.mulf %400, %343 : vector<8x128xf32>
    %412 = arith.mulf %392, %402 : vector<8x128xf32>
    %413 = arith.addf %411, %412 : vector<8x128xf32>
    %414 = math.tanh %413 : vector<8x128xf32>
    %415 = arith.mulf %410, %414 : vector<8x128xf32>
    %416 = vector.extract_strided_slice %384 {offsets = [0, 0], sizes = [8, 128], strides = [1, 1]} : vector<8x512xf32> to vector<8x128xf32>
    %cst_127 = arith.constant 5.000000e-01 : f32
    %417 = vector.broadcast %cst_127 : f32 to vector<8x128xf32>
    %418 = arith.mulf %417, %416 : vector<8x128xf32>
    %419 = math.tanh %418 : vector<8x128xf32>
    %cst_128 = arith.constant 5.000000e-01 : f32
    %420 = vector.broadcast %cst_128 : f32 to vector<8x128xf32>
    %421 = arith.mulf %420, %419 : vector<8x128xf32>
    %cst_129 = arith.constant 5.000000e-01 : f32
    %422 = vector.broadcast %cst_129 : f32 to vector<8x128xf32>
    %423 = arith.addf %421, %422 : vector<8x128xf32>
    %424 = vector.extract_strided_slice %384 {offsets = [0, 128], sizes = [8, 128], strides = [1, 1]} : vector<8x512xf32> to vector<8x128xf32>
    %cst_130 = arith.constant 5.000000e-01 : f32
    %425 = vector.broadcast %cst_130 : f32 to vector<8x128xf32>
    %426 = arith.mulf %425, %424 : vector<8x128xf32>
    %427 = math.tanh %426 : vector<8x128xf32>
    %cst_131 = arith.constant 5.000000e-01 : f32
    %428 = vector.broadcast %cst_131 : f32 to vector<8x128xf32>
    %429 = arith.mulf %428, %427 : vector<8x128xf32>
    %cst_132 = arith.constant 5.000000e-01 : f32
    %430 = vector.broadcast %cst_132 : f32 to vector<8x128xf32>
    %431 = arith.addf %429, %430 : vector<8x128xf32>
    %432 = vector.extract_strided_slice %384 {offsets = [0, 256], sizes = [8, 128], strides = [1, 1]} : vector<8x512xf32> to vector<8x128xf32>
    %433 = math.tanh %432 : vector<8x128xf32>
    %434 = vector.extract_strided_slice %384 {offsets = [0, 384], sizes = [8, 128], strides = [1, 1]} : vector<8x512xf32> to vector<8x128xf32>
    %cst_133 = arith.constant 5.000000e-01 : f32
    %435 = vector.broadcast %cst_133 : f32 to vector<8x128xf32>
    %436 = arith.mulf %435, %434 : vector<8x128xf32>
    %437 = math.tanh %436 : vector<8x128xf32>
    %cst_134 = arith.constant 5.000000e-01 : f32
    %438 = vector.broadcast %cst_134 : f32 to vector<8x128xf32>
    %439 = arith.mulf %438, %437 : vector<8x128xf32>
    %cst_135 = arith.constant 5.000000e-01 : f32
    %440 = vector.broadcast %cst_135 : f32 to vector<8x128xf32>
    %441 = arith.addf %439, %440 : vector<8x128xf32>
    %442 = arith.mulf %431, %374 : vector<8x128xf32>
    %443 = arith.mulf %423, %433 : vector<8x128xf32>
    %444 = arith.addf %442, %443 : vector<8x128xf32>
    %445 = math.tanh %444 : vector<8x128xf32>
    %446 = arith.mulf %441, %445 : vector<8x128xf32>
    %447 = vector.extract_strided_slice %21 {offsets = [48, 0], sizes = [8, 512], strides = [1, 1]} : vector<64x512xf32> to vector<8x512xf32>
    %448 = arith.truncf %415 : vector<8x128xf32> to vector<8x128xbf16>
    %cst_136 = arith.constant dense<0.000000e+00> : vector<8x512xf32>
    %449 = tpu.matmul %448, %11, %cst_136 {dimension_numbers = #tpu.dot_dimension_numbers<[1], [0], [0], [1], [0, 0, 1, 1], [], []>} : vector<8x128xbf16>, vector<128x512xbf16>, vector<8x512xf32> -> vector<8x512xf32>
    %450 = arith.addf %447, %449 : vector<8x512xf32>
    %451 = vector.extract_strided_slice %22 {offsets = [8, 0], sizes = [8, 512], strides = [1, 1]} : vector<64x512xf32> to vector<8x512xf32>
    %452 = arith.truncf %446 : vector<8x128xf32> to vector<8x128xbf16>
    %cst_137 = arith.constant dense<0.000000e+00> : vector<8x512xf32>
    %453 = tpu.matmul %452, %13, %cst_137 {dimension_numbers = #tpu.dot_dimension_numbers<[1], [0], [0], [1], [0, 0, 1, 1], [], []>} : vector<8x128xbf16>, vector<128x512xbf16>, vector<8x512xf32> -> vector<8x512xf32>
    %454 = arith.addf %451, %453 : vector<8x512xf32>
    %455 = vector.extract_strided_slice %450 {offsets = [0, 0], sizes = [8, 128], strides = [1, 1]} : vector<8x512xf32> to vector<8x128xf32>
    %cst_138 = arith.constant 5.000000e-01 : f32
    %456 = vector.broadcast %cst_138 : f32 to vector<8x128xf32>
    %457 = arith.mulf %456, %455 : vector<8x128xf32>
    %458 = math.tanh %457 : vector<8x128xf32>
    %cst_139 = arith.constant 5.000000e-01 : f32
    %459 = vector.broadcast %cst_139 : f32 to vector<8x128xf32>
    %460 = arith.mulf %459, %458 : vector<8x128xf32>
    %cst_140 = arith.constant 5.000000e-01 : f32
    %461 = vector.broadcast %cst_140 : f32 to vector<8x128xf32>
    %462 = arith.addf %460, %461 : vector<8x128xf32>
    %463 = vector.extract_strided_slice %450 {offsets = [0, 128], sizes = [8, 128], strides = [1, 1]} : vector<8x512xf32> to vector<8x128xf32>
    %cst_141 = arith.constant 5.000000e-01 : f32
    %464 = vector.broadcast %cst_141 : f32 to vector<8x128xf32>
    %465 = arith.mulf %464, %463 : vector<8x128xf32>
    %466 = math.tanh %465 : vector<8x128xf32>
    %cst_142 = arith.constant 5.000000e-01 : f32
    %467 = vector.broadcast %cst_142 : f32 to vector<8x128xf32>
    %468 = arith.mulf %467, %466 : vector<8x128xf32>
    %cst_143 = arith.constant 5.000000e-01 : f32
    %469 = vector.broadcast %cst_143 : f32 to vector<8x128xf32>
    %470 = arith.addf %468, %469 : vector<8x128xf32>
    %471 = vector.extract_strided_slice %450 {offsets = [0, 256], sizes = [8, 128], strides = [1, 1]} : vector<8x512xf32> to vector<8x128xf32>
    %472 = math.tanh %471 : vector<8x128xf32>
    %473 = vector.extract_strided_slice %450 {offsets = [0, 384], sizes = [8, 128], strides = [1, 1]} : vector<8x512xf32> to vector<8x128xf32>
    %cst_144 = arith.constant 5.000000e-01 : f32
    %474 = vector.broadcast %cst_144 : f32 to vector<8x128xf32>
    %475 = arith.mulf %474, %473 : vector<8x128xf32>
    %476 = math.tanh %475 : vector<8x128xf32>
    %cst_145 = arith.constant 5.000000e-01 : f32
    %477 = vector.broadcast %cst_145 : f32 to vector<8x128xf32>
    %478 = arith.mulf %477, %476 : vector<8x128xf32>
    %cst_146 = arith.constant 5.000000e-01 : f32
    %479 = vector.broadcast %cst_146 : f32 to vector<8x128xf32>
    %480 = arith.addf %478, %479 : vector<8x128xf32>
    %481 = arith.mulf %470, %413 : vector<8x128xf32>
    %482 = arith.mulf %462, %472 : vector<8x128xf32>
    %483 = arith.addf %481, %482 : vector<8x128xf32>
    %484 = math.tanh %483 : vector<8x128xf32>
    %485 = arith.mulf %480, %484 : vector<8x128xf32>
    %486 = vector.extract_strided_slice %454 {offsets = [0, 0], sizes = [8, 128], strides = [1, 1]} : vector<8x512xf32> to vector<8x128xf32>
    %cst_147 = arith.constant 5.000000e-01 : f32
    %487 = vector.broadcast %cst_147 : f32 to vector<8x128xf32>
    %488 = arith.mulf %487, %486 : vector<8x128xf32>
    %489 = math.tanh %488 : vector<8x128xf32>
    %cst_148 = arith.constant 5.000000e-01 : f32
    %490 = vector.broadcast %cst_148 : f32 to vector<8x128xf32>
    %491 = arith.mulf %490, %489 : vector<8x128xf32>
    %cst_149 = arith.constant 5.000000e-01 : f32
    %492 = vector.broadcast %cst_149 : f32 to vector<8x128xf32>
    %493 = arith.addf %491, %492 : vector<8x128xf32>
    %494 = vector.extract_strided_slice %454 {offsets = [0, 128], sizes = [8, 128], strides = [1, 1]} : vector<8x512xf32> to vector<8x128xf32>
    %cst_150 = arith.constant 5.000000e-01 : f32
    %495 = vector.broadcast %cst_150 : f32 to vector<8x128xf32>
    %496 = arith.mulf %495, %494 : vector<8x128xf32>
    %497 = math.tanh %496 : vector<8x128xf32>
    %cst_151 = arith.constant 5.000000e-01 : f32
    %498 = vector.broadcast %cst_151 : f32 to vector<8x128xf32>
    %499 = arith.mulf %498, %497 : vector<8x128xf32>
    %cst_152 = arith.constant 5.000000e-01 : f32
    %500 = vector.broadcast %cst_152 : f32 to vector<8x128xf32>
    %501 = arith.addf %499, %500 : vector<8x128xf32>
    %502 = vector.extract_strided_slice %454 {offsets = [0, 256], sizes = [8, 128], strides = [1, 1]} : vector<8x512xf32> to vector<8x128xf32>
    %503 = math.tanh %502 : vector<8x128xf32>
    %504 = vector.extract_strided_slice %454 {offsets = [0, 384], sizes = [8, 128], strides = [1, 1]} : vector<8x512xf32> to vector<8x128xf32>
    %cst_153 = arith.constant 5.000000e-01 : f32
    %505 = vector.broadcast %cst_153 : f32 to vector<8x128xf32>
    %506 = arith.mulf %505, %504 : vector<8x128xf32>
    %507 = math.tanh %506 : vector<8x128xf32>
    %cst_154 = arith.constant 5.000000e-01 : f32
    %508 = vector.broadcast %cst_154 : f32 to vector<8x128xf32>
    %509 = arith.mulf %508, %507 : vector<8x128xf32>
    %cst_155 = arith.constant 5.000000e-01 : f32
    %510 = vector.broadcast %cst_155 : f32 to vector<8x128xf32>
    %511 = arith.addf %509, %510 : vector<8x128xf32>
    %512 = arith.mulf %501, %444 : vector<8x128xf32>
    %513 = arith.mulf %493, %503 : vector<8x128xf32>
    %514 = arith.addf %512, %513 : vector<8x128xf32>
    %515 = math.tanh %514 : vector<8x128xf32>
    %516 = arith.mulf %511, %515 : vector<8x128xf32>
    %517 = vector.extract_strided_slice %21 {offsets = [56, 0], sizes = [8, 512], strides = [1, 1]} : vector<64x512xf32> to vector<8x512xf32>
    %518 = arith.truncf %485 : vector<8x128xf32> to vector<8x128xbf16>
    %cst_156 = arith.constant dense<0.000000e+00> : vector<8x512xf32>
    %519 = tpu.matmul %518, %11, %cst_156 {dimension_numbers = #tpu.dot_dimension_numbers<[1], [0], [0], [1], [0, 0, 1, 1], [], []>} : vector<8x128xbf16>, vector<128x512xbf16>, vector<8x512xf32> -> vector<8x512xf32>
    %520 = arith.addf %517, %519 : vector<8x512xf32>
    %521 = vector.extract_strided_slice %22 {offsets = [0, 0], sizes = [8, 512], strides = [1, 1]} : vector<64x512xf32> to vector<8x512xf32>
    %522 = arith.truncf %516 : vector<8x128xf32> to vector<8x128xbf16>
    %cst_157 = arith.constant dense<0.000000e+00> : vector<8x512xf32>
    %523 = tpu.matmul %522, %13, %cst_157 {dimension_numbers = #tpu.dot_dimension_numbers<[1], [0], [0], [1], [0, 0, 1, 1], [], []>} : vector<8x128xbf16>, vector<128x512xbf16>, vector<8x512xf32> -> vector<8x512xf32>
    %524 = arith.addf %521, %523 : vector<8x512xf32>
    %525 = vector.extract_strided_slice %520 {offsets = [0, 0], sizes = [8, 128], strides = [1, 1]} : vector<8x512xf32> to vector<8x128xf32>
    %cst_158 = arith.constant 5.000000e-01 : f32
    %526 = vector.broadcast %cst_158 : f32 to vector<8x128xf32>
    %527 = arith.mulf %526, %525 : vector<8x128xf32>
    %528 = math.tanh %527 : vector<8x128xf32>
    %cst_159 = arith.constant 5.000000e-01 : f32
    %529 = vector.broadcast %cst_159 : f32 to vector<8x128xf32>
    %530 = arith.mulf %529, %528 : vector<8x128xf32>
    %cst_160 = arith.constant 5.000000e-01 : f32
    %531 = vector.broadcast %cst_160 : f32 to vector<8x128xf32>
    %532 = arith.addf %530, %531 : vector<8x128xf32>
    %533 = vector.extract_strided_slice %520 {offsets = [0, 128], sizes = [8, 128], strides = [1, 1]} : vector<8x512xf32> to vector<8x128xf32>
    %cst_161 = arith.constant 5.000000e-01 : f32
    %534 = vector.broadcast %cst_161 : f32 to vector<8x128xf32>
    %535 = arith.mulf %534, %533 : vector<8x128xf32>
    %536 = math.tanh %535 : vector<8x128xf32>
    %cst_162 = arith.constant 5.000000e-01 : f32
    %537 = vector.broadcast %cst_162 : f32 to vector<8x128xf32>
    %538 = arith.mulf %537, %536 : vector<8x128xf32>
    %cst_163 = arith.constant 5.000000e-01 : f32
    %539 = vector.broadcast %cst_163 : f32 to vector<8x128xf32>
    %540 = arith.addf %538, %539 : vector<8x128xf32>
    %541 = vector.extract_strided_slice %520 {offsets = [0, 256], sizes = [8, 128], strides = [1, 1]} : vector<8x512xf32> to vector<8x128xf32>
    %542 = math.tanh %541 : vector<8x128xf32>
    %543 = vector.extract_strided_slice %520 {offsets = [0, 384], sizes = [8, 128], strides = [1, 1]} : vector<8x512xf32> to vector<8x128xf32>
    %cst_164 = arith.constant 5.000000e-01 : f32
    %544 = vector.broadcast %cst_164 : f32 to vector<8x128xf32>
    %545 = arith.mulf %544, %543 : vector<8x128xf32>
    %546 = math.tanh %545 : vector<8x128xf32>
    %cst_165 = arith.constant 5.000000e-01 : f32
    %547 = vector.broadcast %cst_165 : f32 to vector<8x128xf32>
    %548 = arith.mulf %547, %546 : vector<8x128xf32>
    %cst_166 = arith.constant 5.000000e-01 : f32
    %549 = vector.broadcast %cst_166 : f32 to vector<8x128xf32>
    %550 = arith.addf %548, %549 : vector<8x128xf32>
    %551 = arith.mulf %540, %483 : vector<8x128xf32>
    %552 = arith.mulf %532, %542 : vector<8x128xf32>
    %553 = arith.addf %551, %552 : vector<8x128xf32>
    %554 = math.tanh %553 : vector<8x128xf32>
    %555 = arith.mulf %550, %554 : vector<8x128xf32>
    %556 = vector.extract_strided_slice %524 {offsets = [0, 0], sizes = [8, 128], strides = [1, 1]} : vector<8x512xf32> to vector<8x128xf32>
    %cst_167 = arith.constant 5.000000e-01 : f32
    %557 = vector.broadcast %cst_167 : f32 to vector<8x128xf32>
    %558 = arith.mulf %557, %556 : vector<8x128xf32>
    %559 = math.tanh %558 : vector<8x128xf32>
    %cst_168 = arith.constant 5.000000e-01 : f32
    %560 = vector.broadcast %cst_168 : f32 to vector<8x128xf32>
    %561 = arith.mulf %560, %559 : vector<8x128xf32>
    %cst_169 = arith.constant 5.000000e-01 : f32
    %562 = vector.broadcast %cst_169 : f32 to vector<8x128xf32>
    %563 = arith.addf %561, %562 : vector<8x128xf32>
    %564 = vector.extract_strided_slice %524 {offsets = [0, 128], sizes = [8, 128], strides = [1, 1]} : vector<8x512xf32> to vector<8x128xf32>
    %cst_170 = arith.constant 5.000000e-01 : f32
    %565 = vector.broadcast %cst_170 : f32 to vector<8x128xf32>
    %566 = arith.mulf %565, %564 : vector<8x128xf32>
    %567 = math.tanh %566 : vector<8x128xf32>
    %cst_171 = arith.constant 5.000000e-01 : f32
    %568 = vector.broadcast %cst_171 : f32 to vector<8x128xf32>
    %569 = arith.mulf %568, %567 : vector<8x128xf32>
    %cst_172 = arith.constant 5.000000e-01 : f32
    %570 = vector.broadcast %cst_172 : f32 to vector<8x128xf32>
    %571 = arith.addf %569, %570 : vector<8x128xf32>
    %572 = vector.extract_strided_slice %524 {offsets = [0, 256], sizes = [8, 128], strides = [1, 1]} : vector<8x512xf32> to vector<8x128xf32>
    %573 = math.tanh %572 : vector<8x128xf32>
    %574 = vector.extract_strided_slice %524 {offsets = [0, 384], sizes = [8, 128], strides = [1, 1]} : vector<8x512xf32> to vector<8x128xf32>
    %cst_173 = arith.constant 5.000000e-01 : f32
    %575 = vector.broadcast %cst_173 : f32 to vector<8x128xf32>
    %576 = arith.mulf %575, %574 : vector<8x128xf32>
    %577 = math.tanh %576 : vector<8x128xf32>
    %cst_174 = arith.constant 5.000000e-01 : f32
    %578 = vector.broadcast %cst_174 : f32 to vector<8x128xf32>
    %579 = arith.mulf %578, %577 : vector<8x128xf32>
    %cst_175 = arith.constant 5.000000e-01 : f32
    %580 = vector.broadcast %cst_175 : f32 to vector<8x128xf32>
    %581 = arith.addf %579, %580 : vector<8x128xf32>
    %582 = arith.mulf %571, %514 : vector<8x128xf32>
    %583 = arith.mulf %563, %573 : vector<8x128xf32>
    %584 = arith.addf %582, %583 : vector<8x128xf32>
    %585 = math.tanh %584 : vector<8x128xf32>
    %586 = arith.mulf %581, %585 : vector<8x128xf32>
    %587 = tpu.concatenate %65, %135, %205, %275, %345, %415, %485, %555 in 0 : vector<8x128xf32>, vector<8x128xf32>, vector<8x128xf32>, vector<8x128xf32>, vector<8x128xf32>, vector<8x128xf32>, vector<8x128xf32>, vector<8x128xf32> -> vector<64x128xf32>
    %588 = tpu.concatenate %586, %516, %446, %376, %306, %236, %166, %96 in 0 : vector<8x128xf32>, vector<8x128xf32>, vector<8x128xf32>, vector<8x128xf32>, vector<8x128xf32>, vector<8x128xf32>, vector<8x128xf32>, vector<8x128xf32> -> vector<64x128xf32>
    %589 = tpu.concatenate %587, %588 in 1 : vector<64x128xf32>, vector<64x128xf32> -> vector<64x256xf32>
    %c0_176 = arith.constant 0 : index
    %c0_177 = arith.constant 0 : index
    %590 = vector.load %arg7[%c0_176, %c0_177] : memref<128x512xf32, #tpu.memory_space<vmem>>, vector<128x512xf32>
    %591 = arith.truncf %590 : vector<128x512xf32> to vector<128x512xbf16>
    %c0_178 = arith.constant 0 : index
    %c0_179 = arith.constant 0 : index
    %592 = vector.load %arg8[%c0_178, %c0_179] : memref<128x512xf32, #tpu.memory_space<vmem>>, vector<128x512xf32>
    %593 = arith.truncf %592 : vector<128x512xf32> to vector<128x512xbf16>
    %594 = arith.truncf %589 : vector<64x256xf32> to vector<64x256xbf16>
    %c0_180 = arith.constant 0 : index
    %c0_181 = arith.constant 0 : index
    %595 = vector.load %arg6[%c0_180, %c0_181] : memref<256x1024xf32, #tpu.memory_space<vmem>>, vector<256x1024xf32>
    %596 = arith.truncf %595 : vector<256x1024xf32> to vector<256x1024xbf16>
    %cst_182 = arith.constant dense<0.000000e+00> : vector<64x1024xf32>
    %597 = tpu.matmul %594, %596, %cst_182 {dimension_numbers = #tpu.dot_dimension_numbers<[1], [0], [0], [1], [0, 0, 1, 1], [], []>} : vector<64x256xbf16>, vector<256x1024xbf16>, vector<64x1024xf32> -> vector<64x1024xf32>
    %c0_183 = arith.constant 0 : index
    %c0_184 = arith.constant 0 : index
    %598 = vector.load %arg9[%c0_183, %c0_184] : memref<1x1024xf32, #tpu.memory_space<vmem>>, vector<1x1024xf32>
    %599 = vector.broadcast %598 : vector<1x1024xf32> to vector<64x1024xf32>
    %600 = arith.addf %597, %599 : vector<64x1024xf32>
    %601 = vector.extract_strided_slice %600 {offsets = [0, 0], sizes = [64, 512], strides = [1, 1]} : vector<64x1024xf32> to vector<64x512xf32>
    %602 = vector.extract_strided_slice %600 {offsets = [0, 512], sizes = [64, 512], strides = [1, 1]} : vector<64x1024xf32> to vector<64x512xf32>
    %cst_185 = arith.constant 0.000000e+00 : f32
    %603 = vector.broadcast %cst_185 : f32 to vector<8x128xf32>
    %cst_186 = arith.constant 0.000000e+00 : f32
    %604 = vector.broadcast %cst_186 : f32 to vector<8x128xf32>
    %cst_187 = arith.constant 0.000000e+00 : f32
    %605 = vector.broadcast %cst_187 : f32 to vector<8x128xf32>
    %cst_188 = arith.constant 0.000000e+00 : f32
    %606 = vector.broadcast %cst_188 : f32 to vector<8x128xf32>
    %607 = vector.extract_strided_slice %601 {offsets = [0, 0], sizes = [8, 512], strides = [1, 1]} : vector<64x512xf32> to vector<8x512xf32>
    %608 = arith.truncf %603 : vector<8x128xf32> to vector<8x128xbf16>
    %cst_189 = arith.constant dense<0.000000e+00> : vector<8x512xf32>
    %609 = tpu.matmul %608, %591, %cst_189 {dimension_numbers = #tpu.dot_dimension_numbers<[1], [0], [0], [1], [0, 0, 1, 1], [], []>} : vector<8x128xbf16>, vector<128x512xbf16>, vector<8x512xf32> -> vector<8x512xf32>
    %610 = arith.addf %607, %609 : vector<8x512xf32>
    %611 = vector.extract_strided_slice %602 {offsets = [56, 0], sizes = [8, 512], strides = [1, 1]} : vector<64x512xf32> to vector<8x512xf32>
    %612 = arith.truncf %605 : vector<8x128xf32> to vector<8x128xbf16>
    %cst_190 = arith.constant dense<0.000000e+00> : vector<8x512xf32>
    %613 = tpu.matmul %612, %593, %cst_190 {dimension_numbers = #tpu.dot_dimension_numbers<[1], [0], [0], [1], [0, 0, 1, 1], [], []>} : vector<8x128xbf16>, vector<128x512xbf16>, vector<8x512xf32> -> vector<8x512xf32>
    %614 = arith.addf %611, %613 : vector<8x512xf32>
    %615 = vector.extract_strided_slice %610 {offsets = [0, 0], sizes = [8, 128], strides = [1, 1]} : vector<8x512xf32> to vector<8x128xf32>
    %cst_191 = arith.constant 5.000000e-01 : f32
    %616 = vector.broadcast %cst_191 : f32 to vector<8x128xf32>
    %617 = arith.mulf %616, %615 : vector<8x128xf32>
    %618 = math.tanh %617 : vector<8x128xf32>
    %cst_192 = arith.constant 5.000000e-01 : f32
    %619 = vector.broadcast %cst_192 : f32 to vector<8x128xf32>
    %620 = arith.mulf %619, %618 : vector<8x128xf32>
    %cst_193 = arith.constant 5.000000e-01 : f32
    %621 = vector.broadcast %cst_193 : f32 to vector<8x128xf32>
    %622 = arith.addf %620, %621 : vector<8x128xf32>
    %623 = vector.extract_strided_slice %610 {offsets = [0, 128], sizes = [8, 128], strides = [1, 1]} : vector<8x512xf32> to vector<8x128xf32>
    %cst_194 = arith.constant 5.000000e-01 : f32
    %624 = vector.broadcast %cst_194 : f32 to vector<8x128xf32>
    %625 = arith.mulf %624, %623 : vector<8x128xf32>
    %626 = math.tanh %625 : vector<8x128xf32>
    %cst_195 = arith.constant 5.000000e-01 : f32
    %627 = vector.broadcast %cst_195 : f32 to vector<8x128xf32>
    %628 = arith.mulf %627, %626 : vector<8x128xf32>
    %cst_196 = arith.constant 5.000000e-01 : f32
    %629 = vector.broadcast %cst_196 : f32 to vector<8x128xf32>
    %630 = arith.addf %628, %629 : vector<8x128xf32>
    %631 = vector.extract_strided_slice %610 {offsets = [0, 256], sizes = [8, 128], strides = [1, 1]} : vector<8x512xf32> to vector<8x128xf32>
    %632 = math.tanh %631 : vector<8x128xf32>
    %633 = vector.extract_strided_slice %610 {offsets = [0, 384], sizes = [8, 128], strides = [1, 1]} : vector<8x512xf32> to vector<8x128xf32>
    %cst_197 = arith.constant 5.000000e-01 : f32
    %634 = vector.broadcast %cst_197 : f32 to vector<8x128xf32>
    %635 = arith.mulf %634, %633 : vector<8x128xf32>
    %636 = math.tanh %635 : vector<8x128xf32>
    %cst_198 = arith.constant 5.000000e-01 : f32
    %637 = vector.broadcast %cst_198 : f32 to vector<8x128xf32>
    %638 = arith.mulf %637, %636 : vector<8x128xf32>
    %cst_199 = arith.constant 5.000000e-01 : f32
    %639 = vector.broadcast %cst_199 : f32 to vector<8x128xf32>
    %640 = arith.addf %638, %639 : vector<8x128xf32>
    %641 = arith.mulf %630, %604 : vector<8x128xf32>
    %642 = arith.mulf %622, %632 : vector<8x128xf32>
    %643 = arith.addf %641, %642 : vector<8x128xf32>
    %644 = math.tanh %643 : vector<8x128xf32>
    %645 = arith.mulf %640, %644 : vector<8x128xf32>
    %646 = vector.extract_strided_slice %614 {offsets = [0, 0], sizes = [8, 128], strides = [1, 1]} : vector<8x512xf32> to vector<8x128xf32>
    %cst_200 = arith.constant 5.000000e-01 : f32
    %647 = vector.broadcast %cst_200 : f32 to vector<8x128xf32>
    %648 = arith.mulf %647, %646 : vector<8x128xf32>
    %649 = math.tanh %648 : vector<8x128xf32>
    %cst_201 = arith.constant 5.000000e-01 : f32
    %650 = vector.broadcast %cst_201 : f32 to vector<8x128xf32>
    %651 = arith.mulf %650, %649 : vector<8x128xf32>
    %cst_202 = arith.constant 5.000000e-01 : f32
    %652 = vector.broadcast %cst_202 : f32 to vector<8x128xf32>
    %653 = arith.addf %651, %652 : vector<8x128xf32>
    %654 = vector.extract_strided_slice %614 {offsets = [0, 128], sizes = [8, 128], strides = [1, 1]} : vector<8x512xf32> to vector<8x128xf32>
    %cst_203 = arith.constant 5.000000e-01 : f32
    %655 = vector.broadcast %cst_203 : f32 to vector<8x128xf32>
    %656 = arith.mulf %655, %654 : vector<8x128xf32>
    %657 = math.tanh %656 : vector<8x128xf32>
    %cst_204 = arith.constant 5.000000e-01 : f32
    %658 = vector.broadcast %cst_204 : f32 to vector<8x128xf32>
    %659 = arith.mulf %658, %657 : vector<8x128xf32>
    %cst_205 = arith.constant 5.000000e-01 : f32
    %660 = vector.broadcast %cst_205 : f32 to vector<8x128xf32>
    %661 = arith.addf %659, %660 : vector<8x128xf32>
    %662 = vector.extract_strided_slice %614 {offsets = [0, 256], sizes = [8, 128], strides = [1, 1]} : vector<8x512xf32> to vector<8x128xf32>
    %663 = math.tanh %662 : vector<8x128xf32>
    %664 = vector.extract_strided_slice %614 {offsets = [0, 384], sizes = [8, 128], strides = [1, 1]} : vector<8x512xf32> to vector<8x128xf32>
    %cst_206 = arith.constant 5.000000e-01 : f32
    %665 = vector.broadcast %cst_206 : f32 to vector<8x128xf32>
    %666 = arith.mulf %665, %664 : vector<8x128xf32>
    %667 = math.tanh %666 : vector<8x128xf32>
    %cst_207 = arith.constant 5.000000e-01 : f32
    %668 = vector.broadcast %cst_207 : f32 to vector<8x128xf32>
    %669 = arith.mulf %668, %667 : vector<8x128xf32>
    %cst_208 = arith.constant 5.000000e-01 : f32
    %670 = vector.broadcast %cst_208 : f32 to vector<8x128xf32>
    %671 = arith.addf %669, %670 : vector<8x128xf32>
    %672 = arith.mulf %661, %606 : vector<8x128xf32>
    %673 = arith.mulf %653, %663 : vector<8x128xf32>
    %674 = arith.addf %672, %673 : vector<8x128xf32>
    %675 = math.tanh %674 : vector<8x128xf32>
    %676 = arith.mulf %671, %675 : vector<8x128xf32>
    %677 = vector.extract_strided_slice %601 {offsets = [8, 0], sizes = [8, 512], strides = [1, 1]} : vector<64x512xf32> to vector<8x512xf32>
    %678 = arith.truncf %645 : vector<8x128xf32> to vector<8x128xbf16>
    %cst_209 = arith.constant dense<0.000000e+00> : vector<8x512xf32>
    %679 = tpu.matmul %678, %591, %cst_209 {dimension_numbers = #tpu.dot_dimension_numbers<[1], [0], [0], [1], [0, 0, 1, 1], [], []>} : vector<8x128xbf16>, vector<128x512xbf16>, vector<8x512xf32> -> vector<8x512xf32>
    %680 = arith.addf %677, %679 : vector<8x512xf32>
    %681 = vector.extract_strided_slice %602 {offsets = [48, 0], sizes = [8, 512], strides = [1, 1]} : vector<64x512xf32> to vector<8x512xf32>
    %682 = arith.truncf %676 : vector<8x128xf32> to vector<8x128xbf16>
    %cst_210 = arith.constant dense<0.000000e+00> : vector<8x512xf32>
    %683 = tpu.matmul %682, %593, %cst_210 {dimension_numbers = #tpu.dot_dimension_numbers<[1], [0], [0], [1], [0, 0, 1, 1], [], []>} : vector<8x128xbf16>, vector<128x512xbf16>, vector<8x512xf32> -> vector<8x512xf32>
    %684 = arith.addf %681, %683 : vector<8x512xf32>
    %685 = vector.extract_strided_slice %680 {offsets = [0, 0], sizes = [8, 128], strides = [1, 1]} : vector<8x512xf32> to vector<8x128xf32>
    %cst_211 = arith.constant 5.000000e-01 : f32
    %686 = vector.broadcast %cst_211 : f32 to vector<8x128xf32>
    %687 = arith.mulf %686, %685 : vector<8x128xf32>
    %688 = math.tanh %687 : vector<8x128xf32>
    %cst_212 = arith.constant 5.000000e-01 : f32
    %689 = vector.broadcast %cst_212 : f32 to vector<8x128xf32>
    %690 = arith.mulf %689, %688 : vector<8x128xf32>
    %cst_213 = arith.constant 5.000000e-01 : f32
    %691 = vector.broadcast %cst_213 : f32 to vector<8x128xf32>
    %692 = arith.addf %690, %691 : vector<8x128xf32>
    %693 = vector.extract_strided_slice %680 {offsets = [0, 128], sizes = [8, 128], strides = [1, 1]} : vector<8x512xf32> to vector<8x128xf32>
    %cst_214 = arith.constant 5.000000e-01 : f32
    %694 = vector.broadcast %cst_214 : f32 to vector<8x128xf32>
    %695 = arith.mulf %694, %693 : vector<8x128xf32>
    %696 = math.tanh %695 : vector<8x128xf32>
    %cst_215 = arith.constant 5.000000e-01 : f32
    %697 = vector.broadcast %cst_215 : f32 to vector<8x128xf32>
    %698 = arith.mulf %697, %696 : vector<8x128xf32>
    %cst_216 = arith.constant 5.000000e-01 : f32
    %699 = vector.broadcast %cst_216 : f32 to vector<8x128xf32>
    %700 = arith.addf %698, %699 : vector<8x128xf32>
    %701 = vector.extract_strided_slice %680 {offsets = [0, 256], sizes = [8, 128], strides = [1, 1]} : vector<8x512xf32> to vector<8x128xf32>
    %702 = math.tanh %701 : vector<8x128xf32>
    %703 = vector.extract_strided_slice %680 {offsets = [0, 384], sizes = [8, 128], strides = [1, 1]} : vector<8x512xf32> to vector<8x128xf32>
    %cst_217 = arith.constant 5.000000e-01 : f32
    %704 = vector.broadcast %cst_217 : f32 to vector<8x128xf32>
    %705 = arith.mulf %704, %703 : vector<8x128xf32>
    %706 = math.tanh %705 : vector<8x128xf32>
    %cst_218 = arith.constant 5.000000e-01 : f32
    %707 = vector.broadcast %cst_218 : f32 to vector<8x128xf32>
    %708 = arith.mulf %707, %706 : vector<8x128xf32>
    %cst_219 = arith.constant 5.000000e-01 : f32
    %709 = vector.broadcast %cst_219 : f32 to vector<8x128xf32>
    %710 = arith.addf %708, %709 : vector<8x128xf32>
    %711 = arith.mulf %700, %643 : vector<8x128xf32>
    %712 = arith.mulf %692, %702 : vector<8x128xf32>
    %713 = arith.addf %711, %712 : vector<8x128xf32>
    %714 = math.tanh %713 : vector<8x128xf32>
    %715 = arith.mulf %710, %714 : vector<8x128xf32>
    %716 = vector.extract_strided_slice %684 {offsets = [0, 0], sizes = [8, 128], strides = [1, 1]} : vector<8x512xf32> to vector<8x128xf32>
    %cst_220 = arith.constant 5.000000e-01 : f32
    %717 = vector.broadcast %cst_220 : f32 to vector<8x128xf32>
    %718 = arith.mulf %717, %716 : vector<8x128xf32>
    %719 = math.tanh %718 : vector<8x128xf32>
    %cst_221 = arith.constant 5.000000e-01 : f32
    %720 = vector.broadcast %cst_221 : f32 to vector<8x128xf32>
    %721 = arith.mulf %720, %719 : vector<8x128xf32>
    %cst_222 = arith.constant 5.000000e-01 : f32
    %722 = vector.broadcast %cst_222 : f32 to vector<8x128xf32>
    %723 = arith.addf %721, %722 : vector<8x128xf32>
    %724 = vector.extract_strided_slice %684 {offsets = [0, 128], sizes = [8, 128], strides = [1, 1]} : vector<8x512xf32> to vector<8x128xf32>
    %cst_223 = arith.constant 5.000000e-01 : f32
    %725 = vector.broadcast %cst_223 : f32 to vector<8x128xf32>
    %726 = arith.mulf %725, %724 : vector<8x128xf32>
    %727 = math.tanh %726 : vector<8x128xf32>
    %cst_224 = arith.constant 5.000000e-01 : f32
    %728 = vector.broadcast %cst_224 : f32 to vector<8x128xf32>
    %729 = arith.mulf %728, %727 : vector<8x128xf32>
    %cst_225 = arith.constant 5.000000e-01 : f32
    %730 = vector.broadcast %cst_225 : f32 to vector<8x128xf32>
    %731 = arith.addf %729, %730 : vector<8x128xf32>
    %732 = vector.extract_strided_slice %684 {offsets = [0, 256], sizes = [8, 128], strides = [1, 1]} : vector<8x512xf32> to vector<8x128xf32>
    %733 = math.tanh %732 : vector<8x128xf32>
    %734 = vector.extract_strided_slice %684 {offsets = [0, 384], sizes = [8, 128], strides = [1, 1]} : vector<8x512xf32> to vector<8x128xf32>
    %cst_226 = arith.constant 5.000000e-01 : f32
    %735 = vector.broadcast %cst_226 : f32 to vector<8x128xf32>
    %736 = arith.mulf %735, %734 : vector<8x128xf32>
    %737 = math.tanh %736 : vector<8x128xf32>
    %cst_227 = arith.constant 5.000000e-01 : f32
    %738 = vector.broadcast %cst_227 : f32 to vector<8x128xf32>
    %739 = arith.mulf %738, %737 : vector<8x128xf32>
    %cst_228 = arith.constant 5.000000e-01 : f32
    %740 = vector.broadcast %cst_228 : f32 to vector<8x128xf32>
    %741 = arith.addf %739, %740 : vector<8x128xf32>
    %742 = arith.mulf %731, %674 : vector<8x128xf32>
    %743 = arith.mulf %723, %733 : vector<8x128xf32>
    %744 = arith.addf %742, %743 : vector<8x128xf32>
    %745 = math.tanh %744 : vector<8x128xf32>
    %746 = arith.mulf %741, %745 : vector<8x128xf32>
    %747 = vector.extract_strided_slice %601 {offsets = [16, 0], sizes = [8, 512], strides = [1, 1]} : vector<64x512xf32> to vector<8x512xf32>
    %748 = arith.truncf %715 : vector<8x128xf32> to vector<8x128xbf16>
    %cst_229 = arith.constant dense<0.000000e+00> : vector<8x512xf32>
    %749 = tpu.matmul %748, %591, %cst_229 {dimension_numbers = #tpu.dot_dimension_numbers<[1], [0], [0], [1], [0, 0, 1, 1], [], []>} : vector<8x128xbf16>, vector<128x512xbf16>, vector<8x512xf32> -> vector<8x512xf32>
    %750 = arith.addf %747, %749 : vector<8x512xf32>
    %751 = vector.extract_strided_slice %602 {offsets = [40, 0], sizes = [8, 512], strides = [1, 1]} : vector<64x512xf32> to vector<8x512xf32>
    %752 = arith.truncf %746 : vector<8x128xf32> to vector<8x128xbf16>
    %cst_230 = arith.constant dense<0.000000e+00> : vector<8x512xf32>
    %753 = tpu.matmul %752, %593, %cst_230 {dimension_numbers = #tpu.dot_dimension_numbers<[1], [0], [0], [1], [0, 0, 1, 1], [], []>} : vector<8x128xbf16>, vector<128x512xbf16>, vector<8x512xf32> -> vector<8x512xf32>
    %754 = arith.addf %751, %753 : vector<8x512xf32>
    %755 = vector.extract_strided_slice %750 {offsets = [0, 0], sizes = [8, 128], strides = [1, 1]} : vector<8x512xf32> to vector<8x128xf32>
    %cst_231 = arith.constant 5.000000e-01 : f32
    %756 = vector.broadcast %cst_231 : f32 to vector<8x128xf32>
    %757 = arith.mulf %756, %755 : vector<8x128xf32>
    %758 = math.tanh %757 : vector<8x128xf32>
    %cst_232 = arith.constant 5.000000e-01 : f32
    %759 = vector.broadcast %cst_232 : f32 to vector<8x128xf32>
    %760 = arith.mulf %759, %758 : vector<8x128xf32>
    %cst_233 = arith.constant 5.000000e-01 : f32
    %761 = vector.broadcast %cst_233 : f32 to vector<8x128xf32>
    %762 = arith.addf %760, %761 : vector<8x128xf32>
    %763 = vector.extract_strided_slice %750 {offsets = [0, 128], sizes = [8, 128], strides = [1, 1]} : vector<8x512xf32> to vector<8x128xf32>
    %cst_234 = arith.constant 5.000000e-01 : f32
    %764 = vector.broadcast %cst_234 : f32 to vector<8x128xf32>
    %765 = arith.mulf %764, %763 : vector<8x128xf32>
    %766 = math.tanh %765 : vector<8x128xf32>
    %cst_235 = arith.constant 5.000000e-01 : f32
    %767 = vector.broadcast %cst_235 : f32 to vector<8x128xf32>
    %768 = arith.mulf %767, %766 : vector<8x128xf32>
    %cst_236 = arith.constant 5.000000e-01 : f32
    %769 = vector.broadcast %cst_236 : f32 to vector<8x128xf32>
    %770 = arith.addf %768, %769 : vector<8x128xf32>
    %771 = vector.extract_strided_slice %750 {offsets = [0, 256], sizes = [8, 128], strides = [1, 1]} : vector<8x512xf32> to vector<8x128xf32>
    %772 = math.tanh %771 : vector<8x128xf32>
    %773 = vector.extract_strided_slice %750 {offsets = [0, 384], sizes = [8, 128], strides = [1, 1]} : vector<8x512xf32> to vector<8x128xf32>
    %cst_237 = arith.constant 5.000000e-01 : f32
    %774 = vector.broadcast %cst_237 : f32 to vector<8x128xf32>
    %775 = arith.mulf %774, %773 : vector<8x128xf32>
    %776 = math.tanh %775 : vector<8x128xf32>
    %cst_238 = arith.constant 5.000000e-01 : f32
    %777 = vector.broadcast %cst_238 : f32 to vector<8x128xf32>
    %778 = arith.mulf %777, %776 : vector<8x128xf32>
    %cst_239 = arith.constant 5.000000e-01 : f32
    %779 = vector.broadcast %cst_239 : f32 to vector<8x128xf32>
    %780 = arith.addf %778, %779 : vector<8x128xf32>
    %781 = arith.mulf %770, %713 : vector<8x128xf32>
    %782 = arith.mulf %762, %772 : vector<8x128xf32>
    %783 = arith.addf %781, %782 : vector<8x128xf32>
    %784 = math.tanh %783 : vector<8x128xf32>
    %785 = arith.mulf %780, %784 : vector<8x128xf32>
    %786 = vector.extract_strided_slice %754 {offsets = [0, 0], sizes = [8, 128], strides = [1, 1]} : vector<8x512xf32> to vector<8x128xf32>
    %cst_240 = arith.constant 5.000000e-01 : f32
    %787 = vector.broadcast %cst_240 : f32 to vector<8x128xf32>
    %788 = arith.mulf %787, %786 : vector<8x128xf32>
    %789 = math.tanh %788 : vector<8x128xf32>
    %cst_241 = arith.constant 5.000000e-01 : f32
    %790 = vector.broadcast %cst_241 : f32 to vector<8x128xf32>
    %791 = arith.mulf %790, %789 : vector<8x128xf32>
    %cst_242 = arith.constant 5.000000e-01 : f32
    %792 = vector.broadcast %cst_242 : f32 to vector<8x128xf32>
    %793 = arith.addf %791, %792 : vector<8x128xf32>
    %794 = vector.extract_strided_slice %754 {offsets = [0, 128], sizes = [8, 128], strides = [1, 1]} : vector<8x512xf32> to vector<8x128xf32>
    %cst_243 = arith.constant 5.000000e-01 : f32
    %795 = vector.broadcast %cst_243 : f32 to vector<8x128xf32>
    %796 = arith.mulf %795, %794 : vector<8x128xf32>
    %797 = math.tanh %796 : vector<8x128xf32>
    %cst_244 = arith.constant 5.000000e-01 : f32
    %798 = vector.broadcast %cst_244 : f32 to vector<8x128xf32>
    %799 = arith.mulf %798, %797 : vector<8x128xf32>
    %cst_245 = arith.constant 5.000000e-01 : f32
    %800 = vector.broadcast %cst_245 : f32 to vector<8x128xf32>
    %801 = arith.addf %799, %800 : vector<8x128xf32>
    %802 = vector.extract_strided_slice %754 {offsets = [0, 256], sizes = [8, 128], strides = [1, 1]} : vector<8x512xf32> to vector<8x128xf32>
    %803 = math.tanh %802 : vector<8x128xf32>
    %804 = vector.extract_strided_slice %754 {offsets = [0, 384], sizes = [8, 128], strides = [1, 1]} : vector<8x512xf32> to vector<8x128xf32>
    %cst_246 = arith.constant 5.000000e-01 : f32
    %805 = vector.broadcast %cst_246 : f32 to vector<8x128xf32>
    %806 = arith.mulf %805, %804 : vector<8x128xf32>
    %807 = math.tanh %806 : vector<8x128xf32>
    %cst_247 = arith.constant 5.000000e-01 : f32
    %808 = vector.broadcast %cst_247 : f32 to vector<8x128xf32>
    %809 = arith.mulf %808, %807 : vector<8x128xf32>
    %cst_248 = arith.constant 5.000000e-01 : f32
    %810 = vector.broadcast %cst_248 : f32 to vector<8x128xf32>
    %811 = arith.addf %809, %810 : vector<8x128xf32>
    %812 = arith.mulf %801, %744 : vector<8x128xf32>
    %813 = arith.mulf %793, %803 : vector<8x128xf32>
    %814 = arith.addf %812, %813 : vector<8x128xf32>
    %815 = math.tanh %814 : vector<8x128xf32>
    %816 = arith.mulf %811, %815 : vector<8x128xf32>
    %817 = vector.extract_strided_slice %601 {offsets = [24, 0], sizes = [8, 512], strides = [1, 1]} : vector<64x512xf32> to vector<8x512xf32>
    %818 = arith.truncf %785 : vector<8x128xf32> to vector<8x128xbf16>
    %cst_249 = arith.constant dense<0.000000e+00> : vector<8x512xf32>
    %819 = tpu.matmul %818, %591, %cst_249 {dimension_numbers = #tpu.dot_dimension_numbers<[1], [0], [0], [1], [0, 0, 1, 1], [], []>} : vector<8x128xbf16>, vector<128x512xbf16>, vector<8x512xf32> -> vector<8x512xf32>
    %820 = arith.addf %817, %819 : vector<8x512xf32>
    %821 = vector.extract_strided_slice %602 {offsets = [32, 0], sizes = [8, 512], strides = [1, 1]} : vector<64x512xf32> to vector<8x512xf32>
    %822 = arith.truncf %816 : vector<8x128xf32> to vector<8x128xbf16>
    %cst_250 = arith.constant dense<0.000000e+00> : vector<8x512xf32>
    %823 = tpu.matmul %822, %593, %cst_250 {dimension_numbers = #tpu.dot_dimension_numbers<[1], [0], [0], [1], [0, 0, 1, 1], [], []>} : vector<8x128xbf16>, vector<128x512xbf16>, vector<8x512xf32> -> vector<8x512xf32>
    %824 = arith.addf %821, %823 : vector<8x512xf32>
    %825 = vector.extract_strided_slice %820 {offsets = [0, 0], sizes = [8, 128], strides = [1, 1]} : vector<8x512xf32> to vector<8x128xf32>
    %cst_251 = arith.constant 5.000000e-01 : f32
    %826 = vector.broadcast %cst_251 : f32 to vector<8x128xf32>
    %827 = arith.mulf %826, %825 : vector<8x128xf32>
    %828 = math.tanh %827 : vector<8x128xf32>
    %cst_252 = arith.constant 5.000000e-01 : f32
    %829 = vector.broadcast %cst_252 : f32 to vector<8x128xf32>
    %830 = arith.mulf %829, %828 : vector<8x128xf32>
    %cst_253 = arith.constant 5.000000e-01 : f32
    %831 = vector.broadcast %cst_253 : f32 to vector<8x128xf32>
    %832 = arith.addf %830, %831 : vector<8x128xf32>
    %833 = vector.extract_strided_slice %820 {offsets = [0, 128], sizes = [8, 128], strides = [1, 1]} : vector<8x512xf32> to vector<8x128xf32>
    %cst_254 = arith.constant 5.000000e-01 : f32
    %834 = vector.broadcast %cst_254 : f32 to vector<8x128xf32>
    %835 = arith.mulf %834, %833 : vector<8x128xf32>
    %836 = math.tanh %835 : vector<8x128xf32>
    %cst_255 = arith.constant 5.000000e-01 : f32
    %837 = vector.broadcast %cst_255 : f32 to vector<8x128xf32>
    %838 = arith.mulf %837, %836 : vector<8x128xf32>
    %cst_256 = arith.constant 5.000000e-01 : f32
    %839 = vector.broadcast %cst_256 : f32 to vector<8x128xf32>
    %840 = arith.addf %838, %839 : vector<8x128xf32>
    %841 = vector.extract_strided_slice %820 {offsets = [0, 256], sizes = [8, 128], strides = [1, 1]} : vector<8x512xf32> to vector<8x128xf32>
    %842 = math.tanh %841 : vector<8x128xf32>
    %843 = vector.extract_strided_slice %820 {offsets = [0, 384], sizes = [8, 128], strides = [1, 1]} : vector<8x512xf32> to vector<8x128xf32>
    %cst_257 = arith.constant 5.000000e-01 : f32
    %844 = vector.broadcast %cst_257 : f32 to vector<8x128xf32>
    %845 = arith.mulf %844, %843 : vector<8x128xf32>
    %846 = math.tanh %845 : vector<8x128xf32>
    %cst_258 = arith.constant 5.000000e-01 : f32
    %847 = vector.broadcast %cst_258 : f32 to vector<8x128xf32>
    %848 = arith.mulf %847, %846 : vector<8x128xf32>
    %cst_259 = arith.constant 5.000000e-01 : f32
    %849 = vector.broadcast %cst_259 : f32 to vector<8x128xf32>
    %850 = arith.addf %848, %849 : vector<8x128xf32>
    %851 = arith.mulf %840, %783 : vector<8x128xf32>
    %852 = arith.mulf %832, %842 : vector<8x128xf32>
    %853 = arith.addf %851, %852 : vector<8x128xf32>
    %854 = math.tanh %853 : vector<8x128xf32>
    %855 = arith.mulf %850, %854 : vector<8x128xf32>
    %856 = vector.extract_strided_slice %824 {offsets = [0, 0], sizes = [8, 128], strides = [1, 1]} : vector<8x512xf32> to vector<8x128xf32>
    %cst_260 = arith.constant 5.000000e-01 : f32
    %857 = vector.broadcast %cst_260 : f32 to vector<8x128xf32>
    %858 = arith.mulf %857, %856 : vector<8x128xf32>
    %859 = math.tanh %858 : vector<8x128xf32>
    %cst_261 = arith.constant 5.000000e-01 : f32
    %860 = vector.broadcast %cst_261 : f32 to vector<8x128xf32>
    %861 = arith.mulf %860, %859 : vector<8x128xf32>
    %cst_262 = arith.constant 5.000000e-01 : f32
    %862 = vector.broadcast %cst_262 : f32 to vector<8x128xf32>
    %863 = arith.addf %861, %862 : vector<8x128xf32>
    %864 = vector.extract_strided_slice %824 {offsets = [0, 128], sizes = [8, 128], strides = [1, 1]} : vector<8x512xf32> to vector<8x128xf32>
    %cst_263 = arith.constant 5.000000e-01 : f32
    %865 = vector.broadcast %cst_263 : f32 to vector<8x128xf32>
    %866 = arith.mulf %865, %864 : vector<8x128xf32>
    %867 = math.tanh %866 : vector<8x128xf32>
    %cst_264 = arith.constant 5.000000e-01 : f32
    %868 = vector.broadcast %cst_264 : f32 to vector<8x128xf32>
    %869 = arith.mulf %868, %867 : vector<8x128xf32>
    %cst_265 = arith.constant 5.000000e-01 : f32
    %870 = vector.broadcast %cst_265 : f32 to vector<8x128xf32>
    %871 = arith.addf %869, %870 : vector<8x128xf32>
    %872 = vector.extract_strided_slice %824 {offsets = [0, 256], sizes = [8, 128], strides = [1, 1]} : vector<8x512xf32> to vector<8x128xf32>
    %873 = math.tanh %872 : vector<8x128xf32>
    %874 = vector.extract_strided_slice %824 {offsets = [0, 384], sizes = [8, 128], strides = [1, 1]} : vector<8x512xf32> to vector<8x128xf32>
    %cst_266 = arith.constant 5.000000e-01 : f32
    %875 = vector.broadcast %cst_266 : f32 to vector<8x128xf32>
    %876 = arith.mulf %875, %874 : vector<8x128xf32>
    %877 = math.tanh %876 : vector<8x128xf32>
    %cst_267 = arith.constant 5.000000e-01 : f32
    %878 = vector.broadcast %cst_267 : f32 to vector<8x128xf32>
    %879 = arith.mulf %878, %877 : vector<8x128xf32>
    %cst_268 = arith.constant 5.000000e-01 : f32
    %880 = vector.broadcast %cst_268 : f32 to vector<8x128xf32>
    %881 = arith.addf %879, %880 : vector<8x128xf32>
    %882 = arith.mulf %871, %814 : vector<8x128xf32>
    %883 = arith.mulf %863, %873 : vector<8x128xf32>
    %884 = arith.addf %882, %883 : vector<8x128xf32>
    %885 = math.tanh %884 : vector<8x128xf32>
    %886 = arith.mulf %881, %885 : vector<8x128xf32>
    %887 = vector.extract_strided_slice %601 {offsets = [32, 0], sizes = [8, 512], strides = [1, 1]} : vector<64x512xf32> to vector<8x512xf32>
    %888 = arith.truncf %855 : vector<8x128xf32> to vector<8x128xbf16>
    %cst_269 = arith.constant dense<0.000000e+00> : vector<8x512xf32>
    %889 = tpu.matmul %888, %591, %cst_269 {dimension_numbers = #tpu.dot_dimension_numbers<[1], [0], [0], [1], [0, 0, 1, 1], [], []>} : vector<8x128xbf16>, vector<128x512xbf16>, vector<8x512xf32> -> vector<8x512xf32>
    %890 = arith.addf %887, %889 : vector<8x512xf32>
    %891 = vector.extract_strided_slice %602 {offsets = [24, 0], sizes = [8, 512], strides = [1, 1]} : vector<64x512xf32> to vector<8x512xf32>
    %892 = arith.truncf %886 : vector<8x128xf32> to vector<8x128xbf16>
    %cst_270 = arith.constant dense<0.000000e+00> : vector<8x512xf32>
    %893 = tpu.matmul %892, %593, %cst_270 {dimension_numbers = #tpu.dot_dimension_numbers<[1], [0], [0], [1], [0, 0, 1, 1], [], []>} : vector<8x128xbf16>, vector<128x512xbf16>, vector<8x512xf32> -> vector<8x512xf32>
    %894 = arith.addf %891, %893 : vector<8x512xf32>
    %895 = vector.extract_strided_slice %890 {offsets = [0, 0], sizes = [8, 128], strides = [1, 1]} : vector<8x512xf32> to vector<8x128xf32>
    %cst_271 = arith.constant 5.000000e-01 : f32
    %896 = vector.broadcast %cst_271 : f32 to vector<8x128xf32>
    %897 = arith.mulf %896, %895 : vector<8x128xf32>
    %898 = math.tanh %897 : vector<8x128xf32>
    %cst_272 = arith.constant 5.000000e-01 : f32
    %899 = vector.broadcast %cst_272 : f32 to vector<8x128xf32>
    %900 = arith.mulf %899, %898 : vector<8x128xf32>
    %cst_273 = arith.constant 5.000000e-01 : f32
    %901 = vector.broadcast %cst_273 : f32 to vector<8x128xf32>
    %902 = arith.addf %900, %901 : vector<8x128xf32>
    %903 = vector.extract_strided_slice %890 {offsets = [0, 128], sizes = [8, 128], strides = [1, 1]} : vector<8x512xf32> to vector<8x128xf32>
    %cst_274 = arith.constant 5.000000e-01 : f32
    %904 = vector.broadcast %cst_274 : f32 to vector<8x128xf32>
    %905 = arith.mulf %904, %903 : vector<8x128xf32>
    %906 = math.tanh %905 : vector<8x128xf32>
    %cst_275 = arith.constant 5.000000e-01 : f32
    %907 = vector.broadcast %cst_275 : f32 to vector<8x128xf32>
    %908 = arith.mulf %907, %906 : vector<8x128xf32>
    %cst_276 = arith.constant 5.000000e-01 : f32
    %909 = vector.broadcast %cst_276 : f32 to vector<8x128xf32>
    %910 = arith.addf %908, %909 : vector<8x128xf32>
    %911 = vector.extract_strided_slice %890 {offsets = [0, 256], sizes = [8, 128], strides = [1, 1]} : vector<8x512xf32> to vector<8x128xf32>
    %912 = math.tanh %911 : vector<8x128xf32>
    %913 = vector.extract_strided_slice %890 {offsets = [0, 384], sizes = [8, 128], strides = [1, 1]} : vector<8x512xf32> to vector<8x128xf32>
    %cst_277 = arith.constant 5.000000e-01 : f32
    %914 = vector.broadcast %cst_277 : f32 to vector<8x128xf32>
    %915 = arith.mulf %914, %913 : vector<8x128xf32>
    %916 = math.tanh %915 : vector<8x128xf32>
    %cst_278 = arith.constant 5.000000e-01 : f32
    %917 = vector.broadcast %cst_278 : f32 to vector<8x128xf32>
    %918 = arith.mulf %917, %916 : vector<8x128xf32>
    %cst_279 = arith.constant 5.000000e-01 : f32
    %919 = vector.broadcast %cst_279 : f32 to vector<8x128xf32>
    %920 = arith.addf %918, %919 : vector<8x128xf32>
    %921 = arith.mulf %910, %853 : vector<8x128xf32>
    %922 = arith.mulf %902, %912 : vector<8x128xf32>
    %923 = arith.addf %921, %922 : vector<8x128xf32>
    %924 = math.tanh %923 : vector<8x128xf32>
    %925 = arith.mulf %920, %924 : vector<8x128xf32>
    %926 = vector.extract_strided_slice %894 {offsets = [0, 0], sizes = [8, 128], strides = [1, 1]} : vector<8x512xf32> to vector<8x128xf32>
    %cst_280 = arith.constant 5.000000e-01 : f32
    %927 = vector.broadcast %cst_280 : f32 to vector<8x128xf32>
    %928 = arith.mulf %927, %926 : vector<8x128xf32>
    %929 = math.tanh %928 : vector<8x128xf32>
    %cst_281 = arith.constant 5.000000e-01 : f32
    %930 = vector.broadcast %cst_281 : f32 to vector<8x128xf32>
    %931 = arith.mulf %930, %929 : vector<8x128xf32>
    %cst_282 = arith.constant 5.000000e-01 : f32
    %932 = vector.broadcast %cst_282 : f32 to vector<8x128xf32>
    %933 = arith.addf %931, %932 : vector<8x128xf32>
    %934 = vector.extract_strided_slice %894 {offsets = [0, 128], sizes = [8, 128], strides = [1, 1]} : vector<8x512xf32> to vector<8x128xf32>
    %cst_283 = arith.constant 5.000000e-01 : f32
    %935 = vector.broadcast %cst_283 : f32 to vector<8x128xf32>
    %936 = arith.mulf %935, %934 : vector<8x128xf32>
    %937 = math.tanh %936 : vector<8x128xf32>
    %cst_284 = arith.constant 5.000000e-01 : f32
    %938 = vector.broadcast %cst_284 : f32 to vector<8x128xf32>
    %939 = arith.mulf %938, %937 : vector<8x128xf32>
    %cst_285 = arith.constant 5.000000e-01 : f32
    %940 = vector.broadcast %cst_285 : f32 to vector<8x128xf32>
    %941 = arith.addf %939, %940 : vector<8x128xf32>
    %942 = vector.extract_strided_slice %894 {offsets = [0, 256], sizes = [8, 128], strides = [1, 1]} : vector<8x512xf32> to vector<8x128xf32>
    %943 = math.tanh %942 : vector<8x128xf32>
    %944 = vector.extract_strided_slice %894 {offsets = [0, 384], sizes = [8, 128], strides = [1, 1]} : vector<8x512xf32> to vector<8x128xf32>
    %cst_286 = arith.constant 5.000000e-01 : f32
    %945 = vector.broadcast %cst_286 : f32 to vector<8x128xf32>
    %946 = arith.mulf %945, %944 : vector<8x128xf32>
    %947 = math.tanh %946 : vector<8x128xf32>
    %cst_287 = arith.constant 5.000000e-01 : f32
    %948 = vector.broadcast %cst_287 : f32 to vector<8x128xf32>
    %949 = arith.mulf %948, %947 : vector<8x128xf32>
    %cst_288 = arith.constant 5.000000e-01 : f32
    %950 = vector.broadcast %cst_288 : f32 to vector<8x128xf32>
    %951 = arith.addf %949, %950 : vector<8x128xf32>
    %952 = arith.mulf %941, %884 : vector<8x128xf32>
    %953 = arith.mulf %933, %943 : vector<8x128xf32>
    %954 = arith.addf %952, %953 : vector<8x128xf32>
    %955 = math.tanh %954 : vector<8x128xf32>
    %956 = arith.mulf %951, %955 : vector<8x128xf32>
    %957 = vector.extract_strided_slice %601 {offsets = [40, 0], sizes = [8, 512], strides = [1, 1]} : vector<64x512xf32> to vector<8x512xf32>
    %958 = arith.truncf %925 : vector<8x128xf32> to vector<8x128xbf16>
    %cst_289 = arith.constant dense<0.000000e+00> : vector<8x512xf32>
    %959 = tpu.matmul %958, %591, %cst_289 {dimension_numbers = #tpu.dot_dimension_numbers<[1], [0], [0], [1], [0, 0, 1, 1], [], []>} : vector<8x128xbf16>, vector<128x512xbf16>, vector<8x512xf32> -> vector<8x512xf32>
    %960 = arith.addf %957, %959 : vector<8x512xf32>
    %961 = vector.extract_strided_slice %602 {offsets = [16, 0], sizes = [8, 512], strides = [1, 1]} : vector<64x512xf32> to vector<8x512xf32>
    %962 = arith.truncf %956 : vector<8x128xf32> to vector<8x128xbf16>
    %cst_290 = arith.constant dense<0.000000e+00> : vector<8x512xf32>
    %963 = tpu.matmul %962, %593, %cst_290 {dimension_numbers = #tpu.dot_dimension_numbers<[1], [0], [0], [1], [0, 0, 1, 1], [], []>} : vector<8x128xbf16>, vector<128x512xbf16>, vector<8x512xf32> -> vector<8x512xf32>
    %964 = arith.addf %961, %963 : vector<8x512xf32>
    %965 = vector.extract_strided_slice %960 {offsets = [0, 0], sizes = [8, 128], strides = [1, 1]} : vector<8x512xf32> to vector<8x128xf32>
    %cst_291 = arith.constant 5.000000e-01 : f32
    %966 = vector.broadcast %cst_291 : f32 to vector<8x128xf32>
    %967 = arith.mulf %966, %965 : vector<8x128xf32>
    %968 = math.tanh %967 : vector<8x128xf32>
    %cst_292 = arith.constant 5.000000e-01 : f32
    %969 = vector.broadcast %cst_292 : f32 to vector<8x128xf32>
    %970 = arith.mulf %969, %968 : vector<8x128xf32>
    %cst_293 = arith.constant 5.000000e-01 : f32
    %971 = vector.broadcast %cst_293 : f32 to vector<8x128xf32>
    %972 = arith.addf %970, %971 : vector<8x128xf32>
    %973 = vector.extract_strided_slice %960 {offsets = [0, 128], sizes = [8, 128], strides = [1, 1]} : vector<8x512xf32> to vector<8x128xf32>
    %cst_294 = arith.constant 5.000000e-01 : f32
    %974 = vector.broadcast %cst_294 : f32 to vector<8x128xf32>
    %975 = arith.mulf %974, %973 : vector<8x128xf32>
    %976 = math.tanh %975 : vector<8x128xf32>
    %cst_295 = arith.constant 5.000000e-01 : f32
    %977 = vector.broadcast %cst_295 : f32 to vector<8x128xf32>
    %978 = arith.mulf %977, %976 : vector<8x128xf32>
    %cst_296 = arith.constant 5.000000e-01 : f32
    %979 = vector.broadcast %cst_296 : f32 to vector<8x128xf32>
    %980 = arith.addf %978, %979 : vector<8x128xf32>
    %981 = vector.extract_strided_slice %960 {offsets = [0, 256], sizes = [8, 128], strides = [1, 1]} : vector<8x512xf32> to vector<8x128xf32>
    %982 = math.tanh %981 : vector<8x128xf32>
    %983 = vector.extract_strided_slice %960 {offsets = [0, 384], sizes = [8, 128], strides = [1, 1]} : vector<8x512xf32> to vector<8x128xf32>
    %cst_297 = arith.constant 5.000000e-01 : f32
    %984 = vector.broadcast %cst_297 : f32 to vector<8x128xf32>
    %985 = arith.mulf %984, %983 : vector<8x128xf32>
    %986 = math.tanh %985 : vector<8x128xf32>
    %cst_298 = arith.constant 5.000000e-01 : f32
    %987 = vector.broadcast %cst_298 : f32 to vector<8x128xf32>
    %988 = arith.mulf %987, %986 : vector<8x128xf32>
    %cst_299 = arith.constant 5.000000e-01 : f32
    %989 = vector.broadcast %cst_299 : f32 to vector<8x128xf32>
    %990 = arith.addf %988, %989 : vector<8x128xf32>
    %991 = arith.mulf %980, %923 : vector<8x128xf32>
    %992 = arith.mulf %972, %982 : vector<8x128xf32>
    %993 = arith.addf %991, %992 : vector<8x128xf32>
    %994 = math.tanh %993 : vector<8x128xf32>
    %995 = arith.mulf %990, %994 : vector<8x128xf32>
    %996 = vector.extract_strided_slice %964 {offsets = [0, 0], sizes = [8, 128], strides = [1, 1]} : vector<8x512xf32> to vector<8x128xf32>
    %cst_300 = arith.constant 5.000000e-01 : f32
    %997 = vector.broadcast %cst_300 : f32 to vector<8x128xf32>
    %998 = arith.mulf %997, %996 : vector<8x128xf32>
    %999 = math.tanh %998 : vector<8x128xf32>
    %cst_301 = arith.constant 5.000000e-01 : f32
    %1000 = vector.broadcast %cst_301 : f32 to vector<8x128xf32>
    %1001 = arith.mulf %1000, %999 : vector<8x128xf32>
    %cst_302 = arith.constant 5.000000e-01 : f32
    %1002 = vector.broadcast %cst_302 : f32 to vector<8x128xf32>
    %1003 = arith.addf %1001, %1002 : vector<8x128xf32>
    %1004 = vector.extract_strided_slice %964 {offsets = [0, 128], sizes = [8, 128], strides = [1, 1]} : vector<8x512xf32> to vector<8x128xf32>
    %cst_303 = arith.constant 5.000000e-01 : f32
    %1005 = vector.broadcast %cst_303 : f32 to vector<8x128xf32>
    %1006 = arith.mulf %1005, %1004 : vector<8x128xf32>
    %1007 = math.tanh %1006 : vector<8x128xf32>
    %cst_304 = arith.constant 5.000000e-01 : f32
    %1008 = vector.broadcast %cst_304 : f32 to vector<8x128xf32>
    %1009 = arith.mulf %1008, %1007 : vector<8x128xf32>
    %cst_305 = arith.constant 5.000000e-01 : f32
    %1010 = vector.broadcast %cst_305 : f32 to vector<8x128xf32>
    %1011 = arith.addf %1009, %1010 : vector<8x128xf32>
    %1012 = vector.extract_strided_slice %964 {offsets = [0, 256], sizes = [8, 128], strides = [1, 1]} : vector<8x512xf32> to vector<8x128xf32>
    %1013 = math.tanh %1012 : vector<8x128xf32>
    %1014 = vector.extract_strided_slice %964 {offsets = [0, 384], sizes = [8, 128], strides = [1, 1]} : vector<8x512xf32> to vector<8x128xf32>
    %cst_306 = arith.constant 5.000000e-01 : f32
    %1015 = vector.broadcast %cst_306 : f32 to vector<8x128xf32>
    %1016 = arith.mulf %1015, %1014 : vector<8x128xf32>
    %1017 = math.tanh %1016 : vector<8x128xf32>
    %cst_307 = arith.constant 5.000000e-01 : f32
    %1018 = vector.broadcast %cst_307 : f32 to vector<8x128xf32>
    %1019 = arith.mulf %1018, %1017 : vector<8x128xf32>
    %cst_308 = arith.constant 5.000000e-01 : f32
    %1020 = vector.broadcast %cst_308 : f32 to vector<8x128xf32>
    %1021 = arith.addf %1019, %1020 : vector<8x128xf32>
    %1022 = arith.mulf %1011, %954 : vector<8x128xf32>
    %1023 = arith.mulf %1003, %1013 : vector<8x128xf32>
    %1024 = arith.addf %1022, %1023 : vector<8x128xf32>
    %1025 = math.tanh %1024 : vector<8x128xf32>
    %1026 = arith.mulf %1021, %1025 : vector<8x128xf32>
    %1027 = vector.extract_strided_slice %601 {offsets = [48, 0], sizes = [8, 512], strides = [1, 1]} : vector<64x512xf32> to vector<8x512xf32>
    %1028 = arith.truncf %995 : vector<8x128xf32> to vector<8x128xbf16>
    %cst_309 = arith.constant dense<0.000000e+00> : vector<8x512xf32>
    %1029 = tpu.matmul %1028, %591, %cst_309 {dimension_numbers = #tpu.dot_dimension_numbers<[1], [0], [0], [1], [0, 0, 1, 1], [], []>} : vector<8x128xbf16>, vector<128x512xbf16>, vector<8x512xf32> -> vector<8x512xf32>
    %1030 = arith.addf %1027, %1029 : vector<8x512xf32>
    %1031 = vector.extract_strided_slice %602 {offsets = [8, 0], sizes = [8, 512], strides = [1, 1]} : vector<64x512xf32> to vector<8x512xf32>
    %1032 = arith.truncf %1026 : vector<8x128xf32> to vector<8x128xbf16>
    %cst_310 = arith.constant dense<0.000000e+00> : vector<8x512xf32>
    %1033 = tpu.matmul %1032, %593, %cst_310 {dimension_numbers = #tpu.dot_dimension_numbers<[1], [0], [0], [1], [0, 0, 1, 1], [], []>} : vector<8x128xbf16>, vector<128x512xbf16>, vector<8x512xf32> -> vector<8x512xf32>
    %1034 = arith.addf %1031, %1033 : vector<8x512xf32>
    %1035 = vector.extract_strided_slice %1030 {offsets = [0, 0], sizes = [8, 128], strides = [1, 1]} : vector<8x512xf32> to vector<8x128xf32>
    %cst_311 = arith.constant 5.000000e-01 : f32
    %1036 = vector.broadcast %cst_311 : f32 to vector<8x128xf32>
    %1037 = arith.mulf %1036, %1035 : vector<8x128xf32>
    %1038 = math.tanh %1037 : vector<8x128xf32>
    %cst_312 = arith.constant 5.000000e-01 : f32
    %1039 = vector.broadcast %cst_312 : f32 to vector<8x128xf32>
    %1040 = arith.mulf %1039, %1038 : vector<8x128xf32>
    %cst_313 = arith.constant 5.000000e-01 : f32
    %1041 = vector.broadcast %cst_313 : f32 to vector<8x128xf32>
    %1042 = arith.addf %1040, %1041 : vector<8x128xf32>
    %1043 = vector.extract_strided_slice %1030 {offsets = [0, 128], sizes = [8, 128], strides = [1, 1]} : vector<8x512xf32> to vector<8x128xf32>
    %cst_314 = arith.constant 5.000000e-01 : f32
    %1044 = vector.broadcast %cst_314 : f32 to vector<8x128xf32>
    %1045 = arith.mulf %1044, %1043 : vector<8x128xf32>
    %1046 = math.tanh %1045 : vector<8x128xf32>
    %cst_315 = arith.constant 5.000000e-01 : f32
    %1047 = vector.broadcast %cst_315 : f32 to vector<8x128xf32>
    %1048 = arith.mulf %1047, %1046 : vector<8x128xf32>
    %cst_316 = arith.constant 5.000000e-01 : f32
    %1049 = vector.broadcast %cst_316 : f32 to vector<8x128xf32>
    %1050 = arith.addf %1048, %1049 : vector<8x128xf32>
    %1051 = vector.extract_strided_slice %1030 {offsets = [0, 256], sizes = [8, 128], strides = [1, 1]} : vector<8x512xf32> to vector<8x128xf32>
    %1052 = math.tanh %1051 : vector<8x128xf32>
    %1053 = vector.extract_strided_slice %1030 {offsets = [0, 384], sizes = [8, 128], strides = [1, 1]} : vector<8x512xf32> to vector<8x128xf32>
    %cst_317 = arith.constant 5.000000e-01 : f32
    %1054 = vector.broadcast %cst_317 : f32 to vector<8x128xf32>
    %1055 = arith.mulf %1054, %1053 : vector<8x128xf32>
    %1056 = math.tanh %1055 : vector<8x128xf32>
    %cst_318 = arith.constant 5.000000e-01 : f32
    %1057 = vector.broadcast %cst_318 : f32 to vector<8x128xf32>
    %1058 = arith.mulf %1057, %1056 : vector<8x128xf32>
    %cst_319 = arith.constant 5.000000e-01 : f32
    %1059 = vector.broadcast %cst_319 : f32 to vector<8x128xf32>
    %1060 = arith.addf %1058, %1059 : vector<8x128xf32>
    %1061 = arith.mulf %1050, %993 : vector<8x128xf32>
    %1062 = arith.mulf %1042, %1052 : vector<8x128xf32>
    %1063 = arith.addf %1061, %1062 : vector<8x128xf32>
    %1064 = math.tanh %1063 : vector<8x128xf32>
    %1065 = arith.mulf %1060, %1064 : vector<8x128xf32>
    %1066 = vector.extract_strided_slice %1034 {offsets = [0, 0], sizes = [8, 128], strides = [1, 1]} : vector<8x512xf32> to vector<8x128xf32>
    %cst_320 = arith.constant 5.000000e-01 : f32
    %1067 = vector.broadcast %cst_320 : f32 to vector<8x128xf32>
    %1068 = arith.mulf %1067, %1066 : vector<8x128xf32>
    %1069 = math.tanh %1068 : vector<8x128xf32>
    %cst_321 = arith.constant 5.000000e-01 : f32
    %1070 = vector.broadcast %cst_321 : f32 to vector<8x128xf32>
    %1071 = arith.mulf %1070, %1069 : vector<8x128xf32>
    %cst_322 = arith.constant 5.000000e-01 : f32
    %1072 = vector.broadcast %cst_322 : f32 to vector<8x128xf32>
    %1073 = arith.addf %1071, %1072 : vector<8x128xf32>
    %1074 = vector.extract_strided_slice %1034 {offsets = [0, 128], sizes = [8, 128], strides = [1, 1]} : vector<8x512xf32> to vector<8x128xf32>
    %cst_323 = arith.constant 5.000000e-01 : f32
    %1075 = vector.broadcast %cst_323 : f32 to vector<8x128xf32>
    %1076 = arith.mulf %1075, %1074 : vector<8x128xf32>
    %1077 = math.tanh %1076 : vector<8x128xf32>
    %cst_324 = arith.constant 5.000000e-01 : f32
    %1078 = vector.broadcast %cst_324 : f32 to vector<8x128xf32>
    %1079 = arith.mulf %1078, %1077 : vector<8x128xf32>
    %cst_325 = arith.constant 5.000000e-01 : f32
    %1080 = vector.broadcast %cst_325 : f32 to vector<8x128xf32>
    %1081 = arith.addf %1079, %1080 : vector<8x128xf32>
    %1082 = vector.extract_strided_slice %1034 {offsets = [0, 256], sizes = [8, 128], strides = [1, 1]} : vector<8x512xf32> to vector<8x128xf32>
    %1083 = math.tanh %1082 : vector<8x128xf32>
    %1084 = vector.extract_strided_slice %1034 {offsets = [0, 384], sizes = [8, 128], strides = [1, 1]} : vector<8x512xf32> to vector<8x128xf32>
    %cst_326 = arith.constant 5.000000e-01 : f32
    %1085 = vector.broadcast %cst_326 : f32 to vector<8x128xf32>
    %1086 = arith.mulf %1085, %1084 : vector<8x128xf32>
    %1087 = math.tanh %1086 : vector<8x128xf32>
    %cst_327 = arith.constant 5.000000e-01 : f32
    %1088 = vector.broadcast %cst_327 : f32 to vector<8x128xf32>
    %1089 = arith.mulf %1088, %1087 : vector<8x128xf32>
    %cst_328 = arith.constant 5.000000e-01 : f32
    %1090 = vector.broadcast %cst_328 : f32 to vector<8x128xf32>
    %1091 = arith.addf %1089, %1090 : vector<8x128xf32>
    %1092 = arith.mulf %1081, %1024 : vector<8x128xf32>
    %1093 = arith.mulf %1073, %1083 : vector<8x128xf32>
    %1094 = arith.addf %1092, %1093 : vector<8x128xf32>
    %1095 = math.tanh %1094 : vector<8x128xf32>
    %1096 = arith.mulf %1091, %1095 : vector<8x128xf32>
    %1097 = vector.extract_strided_slice %601 {offsets = [56, 0], sizes = [8, 512], strides = [1, 1]} : vector<64x512xf32> to vector<8x512xf32>
    %1098 = arith.truncf %1065 : vector<8x128xf32> to vector<8x128xbf16>
    %cst_329 = arith.constant dense<0.000000e+00> : vector<8x512xf32>
    %1099 = tpu.matmul %1098, %591, %cst_329 {dimension_numbers = #tpu.dot_dimension_numbers<[1], [0], [0], [1], [0, 0, 1, 1], [], []>} : vector<8x128xbf16>, vector<128x512xbf16>, vector<8x512xf32> -> vector<8x512xf32>
    %1100 = arith.addf %1097, %1099 : vector<8x512xf32>
    %1101 = vector.extract_strided_slice %602 {offsets = [0, 0], sizes = [8, 512], strides = [1, 1]} : vector<64x512xf32> to vector<8x512xf32>
    %1102 = arith.truncf %1096 : vector<8x128xf32> to vector<8x128xbf16>
    %cst_330 = arith.constant dense<0.000000e+00> : vector<8x512xf32>
    %1103 = tpu.matmul %1102, %593, %cst_330 {dimension_numbers = #tpu.dot_dimension_numbers<[1], [0], [0], [1], [0, 0, 1, 1], [], []>} : vector<8x128xbf16>, vector<128x512xbf16>, vector<8x512xf32> -> vector<8x512xf32>
    %1104 = arith.addf %1101, %1103 : vector<8x512xf32>
    %1105 = vector.extract_strided_slice %1100 {offsets = [0, 0], sizes = [8, 128], strides = [1, 1]} : vector<8x512xf32> to vector<8x128xf32>
    %cst_331 = arith.constant 5.000000e-01 : f32
    %1106 = vector.broadcast %cst_331 : f32 to vector<8x128xf32>
    %1107 = arith.mulf %1106, %1105 : vector<8x128xf32>
    %1108 = math.tanh %1107 : vector<8x128xf32>
    %cst_332 = arith.constant 5.000000e-01 : f32
    %1109 = vector.broadcast %cst_332 : f32 to vector<8x128xf32>
    %1110 = arith.mulf %1109, %1108 : vector<8x128xf32>
    %cst_333 = arith.constant 5.000000e-01 : f32
    %1111 = vector.broadcast %cst_333 : f32 to vector<8x128xf32>
    %1112 = arith.addf %1110, %1111 : vector<8x128xf32>
    %1113 = vector.extract_strided_slice %1100 {offsets = [0, 128], sizes = [8, 128], strides = [1, 1]} : vector<8x512xf32> to vector<8x128xf32>
    %cst_334 = arith.constant 5.000000e-01 : f32
    %1114 = vector.broadcast %cst_334 : f32 to vector<8x128xf32>
    %1115 = arith.mulf %1114, %1113 : vector<8x128xf32>
    %1116 = math.tanh %1115 : vector<8x128xf32>
    %cst_335 = arith.constant 5.000000e-01 : f32
    %1117 = vector.broadcast %cst_335 : f32 to vector<8x128xf32>
    %1118 = arith.mulf %1117, %1116 : vector<8x128xf32>
    %cst_336 = arith.constant 5.000000e-01 : f32
    %1119 = vector.broadcast %cst_336 : f32 to vector<8x128xf32>
    %1120 = arith.addf %1118, %1119 : vector<8x128xf32>
    %1121 = vector.extract_strided_slice %1100 {offsets = [0, 256], sizes = [8, 128], strides = [1, 1]} : vector<8x512xf32> to vector<8x128xf32>
    %1122 = math.tanh %1121 : vector<8x128xf32>
    %1123 = vector.extract_strided_slice %1100 {offsets = [0, 384], sizes = [8, 128], strides = [1, 1]} : vector<8x512xf32> to vector<8x128xf32>
    %cst_337 = arith.constant 5.000000e-01 : f32
    %1124 = vector.broadcast %cst_337 : f32 to vector<8x128xf32>
    %1125 = arith.mulf %1124, %1123 : vector<8x128xf32>
    %1126 = math.tanh %1125 : vector<8x128xf32>
    %cst_338 = arith.constant 5.000000e-01 : f32
    %1127 = vector.broadcast %cst_338 : f32 to vector<8x128xf32>
    %1128 = arith.mulf %1127, %1126 : vector<8x128xf32>
    %cst_339 = arith.constant 5.000000e-01 : f32
    %1129 = vector.broadcast %cst_339 : f32 to vector<8x128xf32>
    %1130 = arith.addf %1128, %1129 : vector<8x128xf32>
    %1131 = arith.mulf %1120, %1063 : vector<8x128xf32>
    %1132 = arith.mulf %1112, %1122 : vector<8x128xf32>
    %1133 = arith.addf %1131, %1132 : vector<8x128xf32>
    %1134 = math.tanh %1133 : vector<8x128xf32>
    %1135 = arith.mulf %1130, %1134 : vector<8x128xf32>
    %1136 = vector.extract_strided_slice %1104 {offsets = [0, 0], sizes = [8, 128], strides = [1, 1]} : vector<8x512xf32> to vector<8x128xf32>
    %cst_340 = arith.constant 5.000000e-01 : f32
    %1137 = vector.broadcast %cst_340 : f32 to vector<8x128xf32>
    %1138 = arith.mulf %1137, %1136 : vector<8x128xf32>
    %1139 = math.tanh %1138 : vector<8x128xf32>
    %cst_341 = arith.constant 5.000000e-01 : f32
    %1140 = vector.broadcast %cst_341 : f32 to vector<8x128xf32>
    %1141 = arith.mulf %1140, %1139 : vector<8x128xf32>
    %cst_342 = arith.constant 5.000000e-01 : f32
    %1142 = vector.broadcast %cst_342 : f32 to vector<8x128xf32>
    %1143 = arith.addf %1141, %1142 : vector<8x128xf32>
    %1144 = vector.extract_strided_slice %1104 {offsets = [0, 128], sizes = [8, 128], strides = [1, 1]} : vector<8x512xf32> to vector<8x128xf32>
    %cst_343 = arith.constant 5.000000e-01 : f32
    %1145 = vector.broadcast %cst_343 : f32 to vector<8x128xf32>
    %1146 = arith.mulf %1145, %1144 : vector<8x128xf32>
    %1147 = math.tanh %1146 : vector<8x128xf32>
    %cst_344 = arith.constant 5.000000e-01 : f32
    %1148 = vector.broadcast %cst_344 : f32 to vector<8x128xf32>
    %1149 = arith.mulf %1148, %1147 : vector<8x128xf32>
    %cst_345 = arith.constant 5.000000e-01 : f32
    %1150 = vector.broadcast %cst_345 : f32 to vector<8x128xf32>
    %1151 = arith.addf %1149, %1150 : vector<8x128xf32>
    %1152 = vector.extract_strided_slice %1104 {offsets = [0, 256], sizes = [8, 128], strides = [1, 1]} : vector<8x512xf32> to vector<8x128xf32>
    %1153 = math.tanh %1152 : vector<8x128xf32>
    %1154 = vector.extract_strided_slice %1104 {offsets = [0, 384], sizes = [8, 128], strides = [1, 1]} : vector<8x512xf32> to vector<8x128xf32>
    %cst_346 = arith.constant 5.000000e-01 : f32
    %1155 = vector.broadcast %cst_346 : f32 to vector<8x128xf32>
    %1156 = arith.mulf %1155, %1154 : vector<8x128xf32>
    %1157 = math.tanh %1156 : vector<8x128xf32>
    %cst_347 = arith.constant 5.000000e-01 : f32
    %1158 = vector.broadcast %cst_347 : f32 to vector<8x128xf32>
    %1159 = arith.mulf %1158, %1157 : vector<8x128xf32>
    %cst_348 = arith.constant 5.000000e-01 : f32
    %1160 = vector.broadcast %cst_348 : f32 to vector<8x128xf32>
    %1161 = arith.addf %1159, %1160 : vector<8x128xf32>
    %1162 = arith.mulf %1151, %1094 : vector<8x128xf32>
    %1163 = arith.mulf %1143, %1153 : vector<8x128xf32>
    %1164 = arith.addf %1162, %1163 : vector<8x128xf32>
    %1165 = math.tanh %1164 : vector<8x128xf32>
    %1166 = arith.mulf %1161, %1165 : vector<8x128xf32>
    %1167 = tpu.concatenate %645, %715, %785, %855, %925, %995, %1065, %1135 in 0 : vector<8x128xf32>, vector<8x128xf32>, vector<8x128xf32>, vector<8x128xf32>, vector<8x128xf32>, vector<8x128xf32>, vector<8x128xf32>, vector<8x128xf32> -> vector<64x128xf32>
    %1168 = tpu.concatenate %1166, %1096, %1026, %956, %886, %816, %746, %676 in 0 : vector<8x128xf32>, vector<8x128xf32>, vector<8x128xf32>, vector<8x128xf32>, vector<8x128xf32>, vector<8x128xf32>, vector<8x128xf32>, vector<8x128xf32> -> vector<64x128xf32>
    %1169 = tpu.concatenate %1167, %1168 in 1 : vector<64x128xf32>, vector<64x128xf32> -> vector<64x256xf32>
    %1170 = vector.extract_strided_slice %1169 {offsets = [56, 0], sizes = [8, 256], strides = [1, 1]} : vector<64x256xf32> to vector<8x256xf32>
    %cst_349 = arith.constant 5.000000e-01 : f32
    %1171 = vector.broadcast %cst_349 : f32 to vector<8x256xf32>
    %1172 = arith.mulf %1171, %1170 : vector<8x256xf32>
    %cst_350 = arith.constant 0.707106769 : f32
    %1173 = vector.broadcast %cst_350 : f32 to vector<8x256xf32>
    %1174 = arith.mulf %1170, %1173 : vector<8x256xf32>
    %cst_351 = arith.constant 0.000000e+00 : f32
    %1175 = vector.broadcast %cst_351 : f32 to vector<8x256xf32>
    %1176 = arith.cmpf oge, %1174, %1175 : vector<8x256xf32>
    %cst_352 = arith.constant 1.000000e+00 : f32
    %cst_353 = arith.constant -1.000000e+00 : f32
    %1177 = vector.broadcast %cst_352 : f32 to vector<8x256xf32>
    %1178 = vector.broadcast %cst_353 : f32 to vector<8x256xf32>
    %1179 = arith.select %1176, %1177, %1178 : vector<8x256xi1>, vector<8x256xf32>
    %1180 = math.absf %1174 : vector<8x256xf32>
    %cst_354 = arith.constant 0.327591091 : f32
    %1181 = vector.broadcast %cst_354 : f32 to vector<8x256xf32>
    %1182 = arith.mulf %1181, %1180 : vector<8x256xf32>
    %cst_355 = arith.constant 1.000000e+00 : f32
    %1183 = vector.broadcast %cst_355 : f32 to vector<8x256xf32>
    %1184 = arith.addf %1183, %1182 : vector<8x256xf32>
    %cst_356 = arith.constant 1.000000e+00 : f32
    %1185 = vector.broadcast %cst_356 : f32 to vector<8x256xf32>
    %1186 = arith.divf %1185, %1184 : vector<8x256xf32>
    %cst_357 = arith.constant 1.06140542 : f32
    %1187 = vector.broadcast %cst_357 : f32 to vector<8x256xf32>
    %1188 = arith.mulf %1187, %1186 : vector<8x256xf32>
    %cst_358 = arith.constant -1.45315206 : f32
    %1189 = vector.broadcast %cst_358 : f32 to vector<8x256xf32>
    %1190 = arith.addf %1188, %1189 : vector<8x256xf32>
    %1191 = arith.mulf %1190, %1186 : vector<8x256xf32>
    %cst_359 = arith.constant 1.42141378 : f32
    %1192 = vector.broadcast %cst_359 : f32 to vector<8x256xf32>
    %1193 = arith.addf %1191, %1192 : vector<8x256xf32>
    %1194 = arith.mulf %1193, %1186 : vector<8x256xf32>
    %cst_360 = arith.constant -0.284496725 : f32
    %1195 = vector.broadcast %cst_360 : f32 to vector<8x256xf32>
    %1196 = arith.addf %1194, %1195 : vector<8x256xf32>
    %1197 = arith.mulf %1196, %1186 : vector<8x256xf32>
    %cst_361 = arith.constant 0.254829586 : f32
    %1198 = vector.broadcast %cst_361 : f32 to vector<8x256xf32>
    %1199 = arith.addf %1197, %1198 : vector<8x256xf32>
    %1200 = arith.mulf %1199, %1186 : vector<8x256xf32>
    %cst_362 = arith.constant 0.000000e+00 : f32
    %1201 = vector.broadcast %cst_362 : f32 to vector<8x256xf32>
    %1202 = arith.subf %1201, %1180 : vector<8x256xf32>
    %1203 = arith.mulf %1202, %1180 : vector<8x256xf32>
    %1204 = math.exp %1203 : vector<8x256xf32>
    %1205 = arith.mulf %1200, %1204 : vector<8x256xf32>
    %cst_363 = arith.constant 1.000000e+00 : f32
    %1206 = vector.broadcast %cst_363 : f32 to vector<8x256xf32>
    %1207 = arith.subf %1206, %1205 : vector<8x256xf32>
    %1208 = arith.mulf %1179, %1207 : vector<8x256xf32>
    %cst_364 = arith.constant 1.000000e+00 : f32
    %1209 = vector.broadcast %cst_364 : f32 to vector<8x256xf32>
    %1210 = arith.addf %1209, %1208 : vector<8x256xf32>
    %1211 = arith.mulf %1172, %1210 : vector<8x256xf32>
    %c0_365 = arith.constant 0 : index
    %c0_366 = arith.constant 0 : index
    %1212 = vector.load %arg10[%c0_365, %c0_366] : memref<256x128xf32, #tpu.memory_space<vmem>>, vector<256x128xf32>
    %1213 = arith.truncf %1211 : vector<8x256xf32> to vector<8x256xbf16>
    %1214 = arith.truncf %1212 : vector<256x128xf32> to vector<256x128xbf16>
    %cst_367 = arith.constant dense<0.000000e+00> : vector<8x128xf32>
    %1215 = tpu.matmul %1213, %1214, %cst_367 {dimension_numbers = #tpu.dot_dimension_numbers<[1], [0], [0], [1], [0, 0, 1, 1], [], []>} : vector<8x256xbf16>, vector<256x128xbf16>, vector<8x128xf32> -> vector<8x128xf32>
    %c0_368 = arith.constant 0 : index
    %c0_369 = arith.constant 0 : index
    %1216 = vector.load %arg11[%c0_368, %c0_369] : memref<1x128xf32, #tpu.memory_space<vmem>>, vector<1x128xf32>
    %1217 = vector.broadcast %1216 : vector<1x128xf32> to vector<8x128xf32>
    %1218 = arith.addf %1215, %1217 : vector<8x128xf32>
    %c0_370 = arith.constant 0 : index
    %c0_371 = arith.constant 0 : index
    %1219 = vector.load %arg12[%c0_370, %c0_371] : memref<1x128xf32, #tpu.memory_space<vmem>>, vector<1x128xf32>
    %c0_372 = arith.constant 0 : index
    %c0_373 = arith.constant 0 : index
    %1220 = vector.load %arg13[%c0_372, %c0_373] : memref<1x128xf32, #tpu.memory_space<vmem>>, vector<1x128xf32>
    %1221 = tpu.iota {dimensions = array<i32: 1>} : vector<1x128xi32>
    %c28_i32 = arith.constant 28 : i32
    %1222 = vector.broadcast %c28_i32 : i32 to vector<1x128xi32>
    %1223 = arith.cmpi slt, %1221, %1222 : vector<1x128xi32>
    %1224 = arith.extui %1223 : vector<1x128xi1> to vector<1x128xi32>
    %1225 = arith.sitofp %1224 : vector<1x128xi32> to vector<1x128xf32>
    %cst_374 = arith.constant dense<0.000000e+00> : vector<8xf32>
    %1226 = vector.multi_reduction <add>, %1218, %cst_374 [1] : vector<8x128xf32> to vector<8xf32>
    %1227 = vector.shape_cast %1226 : vector<8xf32> to vector<8x1xf32>
    %cst_375 = arith.constant 0.0357142873 : f32
    %1228 = vector.broadcast %cst_375 : f32 to vector<8x1xf32>
    %1229 = arith.mulf %1227, %1228 : vector<8x1xf32>
    %1230 = vector.broadcast %1229 : vector<8x1xf32> to vector<8x128xf32>
    %1231 = arith.subf %1218, %1230 : vector<8x128xf32>
    %1232 = vector.broadcast %1225 : vector<1x128xf32> to vector<8x128xf32>
    %1233 = arith.mulf %1231, %1232 : vector<8x128xf32>
    %1234 = arith.mulf %1233, %1233 : vector<8x128xf32>
    %cst_376 = arith.constant dense<0.000000e+00> : vector<8xf32>
    %1235 = vector.multi_reduction <add>, %1234, %cst_376 [1] : vector<8x128xf32> to vector<8xf32>
    %1236 = vector.shape_cast %1235 : vector<8xf32> to vector<8x1xf32>
    %cst_377 = arith.constant 0.0357142873 : f32
    %1237 = vector.broadcast %cst_377 : f32 to vector<8x1xf32>
    %1238 = arith.mulf %1236, %1237 : vector<8x1xf32>
    %cst_378 = arith.constant 9.99999974E-6 : f32
    %1239 = vector.broadcast %cst_378 : f32 to vector<8x1xf32>
    %1240 = arith.addf %1238, %1239 : vector<8x1xf32>
    %1241 = math.rsqrt %1240 : vector<8x1xf32>
    %1242 = vector.broadcast %1241 : vector<8x1xf32> to vector<8x128xf32>
    %1243 = arith.mulf %1233, %1242 : vector<8x128xf32>
    %1244 = vector.broadcast %1219 : vector<1x128xf32> to vector<8x128xf32>
    %1245 = arith.mulf %1243, %1244 : vector<8x128xf32>
    %1246 = vector.broadcast %1220 : vector<1x128xf32> to vector<8x128xf32>
    %1247 = arith.addf %1245, %1246 : vector<8x128xf32>
    %cst_379 = arith.constant 5.000000e-01 : f32
    %1248 = vector.broadcast %cst_379 : f32 to vector<8x128xf32>
    %1249 = arith.mulf %1248, %1247 : vector<8x128xf32>
    %cst_380 = arith.constant 0.707106769 : f32
    %1250 = vector.broadcast %cst_380 : f32 to vector<8x128xf32>
    %1251 = arith.mulf %1247, %1250 : vector<8x128xf32>
    %cst_381 = arith.constant 0.000000e+00 : f32
    %1252 = vector.broadcast %cst_381 : f32 to vector<8x128xf32>
    %1253 = arith.cmpf oge, %1251, %1252 : vector<8x128xf32>
    %cst_382 = arith.constant 1.000000e+00 : f32
    %cst_383 = arith.constant -1.000000e+00 : f32
    %1254 = vector.broadcast %cst_382 : f32 to vector<8x128xf32>
    %1255 = vector.broadcast %cst_383 : f32 to vector<8x128xf32>
    %1256 = arith.select %1253, %1254, %1255 : vector<8x128xi1>, vector<8x128xf32>
    %1257 = math.absf %1251 : vector<8x128xf32>
    %cst_384 = arith.constant 0.327591091 : f32
    %1258 = vector.broadcast %cst_384 : f32 to vector<8x128xf32>
    %1259 = arith.mulf %1258, %1257 : vector<8x128xf32>
    %cst_385 = arith.constant 1.000000e+00 : f32
    %1260 = vector.broadcast %cst_385 : f32 to vector<8x128xf32>
    %1261 = arith.addf %1260, %1259 : vector<8x128xf32>
    %cst_386 = arith.constant 1.000000e+00 : f32
    %1262 = vector.broadcast %cst_386 : f32 to vector<8x128xf32>
    %1263 = arith.divf %1262, %1261 : vector<8x128xf32>
    %cst_387 = arith.constant 1.06140542 : f32
    %1264 = vector.broadcast %cst_387 : f32 to vector<8x128xf32>
    %1265 = arith.mulf %1264, %1263 : vector<8x128xf32>
    %cst_388 = arith.constant -1.45315206 : f32
    %1266 = vector.broadcast %cst_388 : f32 to vector<8x128xf32>
    %1267 = arith.addf %1265, %1266 : vector<8x128xf32>
    %1268 = arith.mulf %1267, %1263 : vector<8x128xf32>
    %cst_389 = arith.constant 1.42141378 : f32
    %1269 = vector.broadcast %cst_389 : f32 to vector<8x128xf32>
    %1270 = arith.addf %1268, %1269 : vector<8x128xf32>
    %1271 = arith.mulf %1270, %1263 : vector<8x128xf32>
    %cst_390 = arith.constant -0.284496725 : f32
    %1272 = vector.broadcast %cst_390 : f32 to vector<8x128xf32>
    %1273 = arith.addf %1271, %1272 : vector<8x128xf32>
    %1274 = arith.mulf %1273, %1263 : vector<8x128xf32>
    %cst_391 = arith.constant 0.254829586 : f32
    %1275 = vector.broadcast %cst_391 : f32 to vector<8x128xf32>
    %1276 = arith.addf %1274, %1275 : vector<8x128xf32>
    %1277 = arith.mulf %1276, %1263 : vector<8x128xf32>
    %cst_392 = arith.constant 0.000000e+00 : f32
    %1278 = vector.broadcast %cst_392 : f32 to vector<8x128xf32>
    %1279 = arith.subf %1278, %1257 : vector<8x128xf32>
    %1280 = arith.mulf %1279, %1257 : vector<8x128xf32>
    %1281 = math.exp %1280 : vector<8x128xf32>
    %1282 = arith.mulf %1277, %1281 : vector<8x128xf32>
    %cst_393 = arith.constant 1.000000e+00 : f32
    %1283 = vector.broadcast %cst_393 : f32 to vector<8x128xf32>
    %1284 = arith.subf %1283, %1282 : vector<8x128xf32>
    %1285 = arith.mulf %1256, %1284 : vector<8x128xf32>
    %cst_394 = arith.constant 1.000000e+00 : f32
    %1286 = vector.broadcast %cst_394 : f32 to vector<8x128xf32>
    %1287 = arith.addf %1286, %1285 : vector<8x128xf32>
    %1288 = arith.mulf %1249, %1287 : vector<8x128xf32>
    %c0_395 = arith.constant 0 : index
    %c0_396 = arith.constant 0 : index
    %1289 = vector.load %arg14[%c0_395, %c0_396] : memref<128x128xf32, #tpu.memory_space<vmem>>, vector<128x128xf32>
    %1290 = arith.truncf %1288 : vector<8x128xf32> to vector<8x128xbf16>
    %1291 = arith.truncf %1289 : vector<128x128xf32> to vector<128x128xbf16>
    %cst_397 = arith.constant dense<0.000000e+00> : vector<8x128xf32>
    %1292 = tpu.matmul %1290, %1291, %cst_397 {dimension_numbers = #tpu.dot_dimension_numbers<[1], [0], [0], [1], [0, 0, 1, 1], [], []>} : vector<8x128xbf16>, vector<128x128xbf16>, vector<8x128xf32> -> vector<8x128xf32>
    %c0_398 = arith.constant 0 : index
    %c0_399 = arith.constant 0 : index
    %1293 = vector.load %arg15[%c0_398, %c0_399] : memref<1x128xf32, #tpu.memory_space<vmem>>, vector<1x128xf32>
    %1294 = vector.broadcast %1293 : vector<1x128xf32> to vector<8x128xf32>
    %1295 = arith.addf %1292, %1294 : vector<8x128xf32>
    %c0_400 = arith.constant 0 : index
    %c0_401 = arith.constant 0 : index
    %1296 = vector.load %arg16[%c0_400, %c0_401] : memref<1x128xf32, #tpu.memory_space<vmem>>, vector<1x128xf32>
    %c0_402 = arith.constant 0 : index
    %c0_403 = arith.constant 0 : index
    %1297 = vector.load %arg17[%c0_402, %c0_403] : memref<1x128xf32, #tpu.memory_space<vmem>>, vector<1x128xf32>
    %1298 = tpu.iota {dimensions = array<i32: 1>} : vector<1x128xi32>
    %c64_i32 = arith.constant 64 : i32
    %1299 = vector.broadcast %c64_i32 : i32 to vector<1x128xi32>
    %1300 = arith.cmpi slt, %1298, %1299 : vector<1x128xi32>
    %1301 = arith.extui %1300 : vector<1x128xi1> to vector<1x128xi32>
    %1302 = arith.sitofp %1301 : vector<1x128xi32> to vector<1x128xf32>
    %cst_404 = arith.constant dense<0.000000e+00> : vector<8xf32>
    %1303 = vector.multi_reduction <add>, %1295, %cst_404 [1] : vector<8x128xf32> to vector<8xf32>
    %1304 = vector.shape_cast %1303 : vector<8xf32> to vector<8x1xf32>
    %cst_405 = arith.constant 1.562500e-02 : f32
    %1305 = vector.broadcast %cst_405 : f32 to vector<8x1xf32>
    %1306 = arith.mulf %1304, %1305 : vector<8x1xf32>
    %1307 = vector.broadcast %1306 : vector<8x1xf32> to vector<8x128xf32>
    %1308 = arith.subf %1295, %1307 : vector<8x128xf32>
    %1309 = vector.broadcast %1302 : vector<1x128xf32> to vector<8x128xf32>
    %1310 = arith.mulf %1308, %1309 : vector<8x128xf32>
    %1311 = arith.mulf %1310, %1310 : vector<8x128xf32>
    %cst_406 = arith.constant dense<0.000000e+00> : vector<8xf32>
    %1312 = vector.multi_reduction <add>, %1311, %cst_406 [1] : vector<8x128xf32> to vector<8xf32>
    %1313 = vector.shape_cast %1312 : vector<8xf32> to vector<8x1xf32>
    %cst_407 = arith.constant 1.562500e-02 : f32
    %1314 = vector.broadcast %cst_407 : f32 to vector<8x1xf32>
    %1315 = arith.mulf %1313, %1314 : vector<8x1xf32>
    %cst_408 = arith.constant 9.99999974E-6 : f32
    %1316 = vector.broadcast %cst_408 : f32 to vector<8x1xf32>
    %1317 = arith.addf %1315, %1316 : vector<8x1xf32>
    %1318 = math.rsqrt %1317 : vector<8x1xf32>
    %1319 = vector.broadcast %1318 : vector<8x1xf32> to vector<8x128xf32>
    %1320 = arith.mulf %1310, %1319 : vector<8x128xf32>
    %1321 = vector.broadcast %1296 : vector<1x128xf32> to vector<8x128xf32>
    %1322 = arith.mulf %1320, %1321 : vector<8x128xf32>
    %1323 = vector.broadcast %1297 : vector<1x128xf32> to vector<8x128xf32>
    %1324 = arith.addf %1322, %1323 : vector<8x128xf32>
    %cst_409 = arith.constant 5.000000e-01 : f32
    %1325 = vector.broadcast %cst_409 : f32 to vector<8x128xf32>
    %1326 = arith.mulf %1325, %1324 : vector<8x128xf32>
    %cst_410 = arith.constant 0.707106769 : f32
    %1327 = vector.broadcast %cst_410 : f32 to vector<8x128xf32>
    %1328 = arith.mulf %1324, %1327 : vector<8x128xf32>
    %cst_411 = arith.constant 0.000000e+00 : f32
    %1329 = vector.broadcast %cst_411 : f32 to vector<8x128xf32>
    %1330 = arith.cmpf oge, %1328, %1329 : vector<8x128xf32>
    %cst_412 = arith.constant 1.000000e+00 : f32
    %cst_413 = arith.constant -1.000000e+00 : f32
    %1331 = vector.broadcast %cst_412 : f32 to vector<8x128xf32>
    %1332 = vector.broadcast %cst_413 : f32 to vector<8x128xf32>
    %1333 = arith.select %1330, %1331, %1332 : vector<8x128xi1>, vector<8x128xf32>
    %1334 = math.absf %1328 : vector<8x128xf32>
    %cst_414 = arith.constant 0.327591091 : f32
    %1335 = vector.broadcast %cst_414 : f32 to vector<8x128xf32>
    %1336 = arith.mulf %1335, %1334 : vector<8x128xf32>
    %cst_415 = arith.constant 1.000000e+00 : f32
    %1337 = vector.broadcast %cst_415 : f32 to vector<8x128xf32>
    %1338 = arith.addf %1337, %1336 : vector<8x128xf32>
    %cst_416 = arith.constant 1.000000e+00 : f32
    %1339 = vector.broadcast %cst_416 : f32 to vector<8x128xf32>
    %1340 = arith.divf %1339, %1338 : vector<8x128xf32>
    %cst_417 = arith.constant 1.06140542 : f32
    %1341 = vector.broadcast %cst_417 : f32 to vector<8x128xf32>
    %1342 = arith.mulf %1341, %1340 : vector<8x128xf32>
    %cst_418 = arith.constant -1.45315206 : f32
    %1343 = vector.broadcast %cst_418 : f32 to vector<8x128xf32>
    %1344 = arith.addf %1342, %1343 : vector<8x128xf32>
    %1345 = arith.mulf %1344, %1340 : vector<8x128xf32>
    %cst_419 = arith.constant 1.42141378 : f32
    %1346 = vector.broadcast %cst_419 : f32 to vector<8x128xf32>
    %1347 = arith.addf %1345, %1346 : vector<8x128xf32>
    %1348 = arith.mulf %1347, %1340 : vector<8x128xf32>
    %cst_420 = arith.constant -0.284496725 : f32
    %1349 = vector.broadcast %cst_420 : f32 to vector<8x128xf32>
    %1350 = arith.addf %1348, %1349 : vector<8x128xf32>
    %1351 = arith.mulf %1350, %1340 : vector<8x128xf32>
    %cst_421 = arith.constant 0.254829586 : f32
    %1352 = vector.broadcast %cst_421 : f32 to vector<8x128xf32>
    %1353 = arith.addf %1351, %1352 : vector<8x128xf32>
    %1354 = arith.mulf %1353, %1340 : vector<8x128xf32>
    %cst_422 = arith.constant 0.000000e+00 : f32
    %1355 = vector.broadcast %cst_422 : f32 to vector<8x128xf32>
    %1356 = arith.subf %1355, %1334 : vector<8x128xf32>
    %1357 = arith.mulf %1356, %1334 : vector<8x128xf32>
    %1358 = math.exp %1357 : vector<8x128xf32>
    %1359 = arith.mulf %1354, %1358 : vector<8x128xf32>
    %cst_423 = arith.constant 1.000000e+00 : f32
    %1360 = vector.broadcast %cst_423 : f32 to vector<8x128xf32>
    %1361 = arith.subf %1360, %1359 : vector<8x128xf32>
    %1362 = arith.mulf %1333, %1361 : vector<8x128xf32>
    %cst_424 = arith.constant 1.000000e+00 : f32
    %1363 = vector.broadcast %cst_424 : f32 to vector<8x128xf32>
    %1364 = arith.addf %1363, %1362 : vector<8x128xf32>
    %1365 = arith.mulf %1326, %1364 : vector<8x128xf32>
    %c0_425 = arith.constant 0 : index
    %c0_426 = arith.constant 0 : index
    %1366 = vector.load %arg18[%c0_425, %c0_426] : memref<128x128xf32, #tpu.memory_space<vmem>>, vector<128x128xf32>
    %1367 = arith.truncf %1365 : vector<8x128xf32> to vector<8x128xbf16>
    %1368 = arith.truncf %1366 : vector<128x128xf32> to vector<128x128xbf16>
    %cst_427 = arith.constant dense<0.000000e+00> : vector<8x128xf32>
    %1369 = tpu.matmul %1367, %1368, %cst_427 {dimension_numbers = #tpu.dot_dimension_numbers<[1], [0], [0], [1], [0, 0, 1, 1], [], []>} : vector<8x128xbf16>, vector<128x128xbf16>, vector<8x128xf32> -> vector<8x128xf32>
    %c0_428 = arith.constant 0 : index
    %c0_429 = arith.constant 0 : index
    %1370 = vector.load %arg19[%c0_428, %c0_429] : memref<1x128xf32, #tpu.memory_space<vmem>>, vector<1x128xf32>
    %1371 = vector.broadcast %1370 : vector<1x128xf32> to vector<8x128xf32>
    %1372 = arith.addf %1369, %1371 : vector<8x128xf32>
    %c0_430 = arith.constant 0 : index
    %c0_431 = arith.constant 0 : index
    %1373 = vector.load %arg20[%c0_430, %c0_431] : memref<8x128xf32, #tpu.memory_space<vmem>>, vector<8x128xf32>
    tpu.vector_store %arg20[%c0_430, %c0_431], %1372 {strides = array<i32>} : memref<8x128xf32, #tpu.memory_space<vmem>>, vector<8x128xf32>,
    return
  }
}

</mosaic_0001>

<bundles_post_ra>
// kernel: tpu_custom_call.1
= control target key start
LH: loop header
LB: loop body
LE: loop exit
PB: predicated region body
PF: predicated region fallthrough
CT: control target
= control target key end

     0   :  { %s7670_s0 = inlined_call_operand.vmem [shape: s32[64,1], index: 0, kind: input, shape index: {}]   ;;  %s7671_s1 = inlined_call_operand.vmem [shape: f32[50,32], index: 1, kind: input, shape index: {}]   ;;  %s7672_s2 = inlined_call_operand.hbm [shape: f32[32,1024], index: 2, kind: input, shape index: {}]   ;;  %s7673_s3 = inlined_call_operand.hbm [shape: f32[128,512], index: 3, kind: input, shape index: {}]   ;;  %s7674_s4 = inlined_call_operand.hbm [shape: f32[128,512], index: 4, kind: input, shape index: {}]   ;;  %s7675_s5 = inlined_call_operand.vmem [shape: f32[1,1024], index: 5, kind: input, shape index: {}]   ;;  %s7676_s6 = inlined_call_operand.hbm [shape: f32[256,1024], index: 6, kind: input, shape index: {}]   ;;  %s7677_s7 = inlined_call_operand.hbm [shape: f32[128,512], index: 7, kind: input, shape index: {}]   ;;  %s7678_s8 = inlined_call_operand.hbm [shape: f32[128,512], index: 8, kind: input, shape index: {}]   ;;  %s7679_s9 = inlined_call_operand.vmem [shape: f32[1,1024], index: 9, kind: input, shape index: {}]   ;;  %s7680_s10 = inlined_call_operand.hbm [shape: f32[256,128], index: 10, kind: input, shape index: {}]   ;;  %s7681_s11 = inlined_call_operand.vmem [shape: f32[1,128], index: 11, kind: input, shape index: {}]   ;;  %s7682_s12 = inlined_call_operand.vmem [shape: f32[1,128], index: 12, kind: input, shape index: {}]   ;;  %s7683_s13 = inlined_call_operand.vmem [shape: f32[1,128], index: 13, kind: input, shape index: {}]   ;;  %s7684_s14 = inlined_call_operand.vmem [shape: f32[128,128], index: 14, kind: input, shape index: {}]   ;;  %s7685_s15 = inlined_call_operand.vmem [shape: f32[1,128], index: 15, kind: input, shape index: {}]   ;;  %s7686_s16 = inlined_call_operand.vmem [shape: f32[1,128], index: 16, kind: input, shape index: {}]   ;;  %s7687_s17 = inlined_call_operand.vmem [shape: f32[1,128], index: 17, kind: input, shape index: {}]   ;;  %s7688_s18 = inlined_call_operand.hbm [shape: f32[128,128], index: 18, kind: input, shape index: {}]   ;;  %s7689_s19 = inlined_call_operand.vmem [shape: f32[1,128], index: 19, kind: input, shape index: {}]   ;;  %s7690_s20 = inlined_call_operand.hbm [shape: f32[8,128], index: 20, kind: output, shape index: {}]  }
   0x1   :  { %7794 = sst [smem:[#allocation116_spill]] %s7670_s0 }
   0x2   :  { %7795 = sst [smem:[#allocation117_spill]] %s7671_s1 }
   0x3   :  { %7796 = sst [smem:[#allocation118_spill]] %s7672_s2 }
   0x4   :  { %7797 = sst [smem:[#allocation119_spill]] %s7673_s3 }
   0x5   :  { %7798 = sst [smem:[#allocation120_spill]] %s7674_s4 }
   0x6   :  { %7799 = sst [smem:[#allocation121_spill]] %s7689_s19 }
   0x7   :  { %7800 = sst [smem:[#allocation122_spill]] %s7690_s20 }
   0x8   :  { %25 = vsyncpa [#allocation3], 0 }
   0x9   :  { %26 = vsyncpa [#allocation6], 0 }
   0xa   :  { %27 = vsyncpa [#allocation9], 0 }
   0xb   :  { %28 = vsyncpa [#allocation12], 0 }
   0xc   :  { %29 = vsyncpa [#allocation15], 0 }
   0xd   :  { %30 = vsyncpa [#allocation4], 0  ;;  %s5507_s1 = smov [#allocation5]   ;;  %s7801_s2 = sld [smem:[#allocation119_spill]] }
   0xe   :  { %s52_s22 = sshll.u32 %s5507_s1, 4  ;;  %s53_s22 = int_to_ptr.vmem [resolvable:$true] %s52_s22 }
  0x13   :  { %s5297_s25 = scalar_lea.hbm %s7801_s2, 8192 }
  0x14   :  { %p5298_p0 = scmp.ne.s32.totalorder %s7801_s2, %s5297_s25  ;;  %p5301_p1 = scmp.lt.u32.totalorder %s5297_s25, %s7801_s2 }
  0x16   :  { %p5303_p2 = pnand %p5301_p1, %p5298_p0 }
  0x18   :  { %5306 = shalt.err (!%p5303_p2)
}
  0x19   :  { %s5307_s4 = scalar_lea.vmem %s53_s22, 8192  ;;  %p5312_p4 = scmp.lt.s32.totalorder %s53_s22, %s53_s22 }
  0x1a   :  { %p5308_p3 = scmp.ne.s32.totalorder %s53_s22, %s5307_s4  ;;  %p5313_p5 = scmp.lt.s32.totalorder %s5307_s4, %s5307_s4 }
  0x1c   :  { %p5314_p6 = por %p5313_p5, %p5312_p4 }
  0x1e   :  { %p5315_p7 = pnand %p5314_p6, %p5308_p3 }
  0x20   :  { %5318 = shalt.err (!%p5315_p7)
}
  0x21   :  { %s5508_s29 = smov 512   ;;  %s5509_s30 = smov 32  }
  0x22   :  { %58 = dma.hbm_to_vmem [thread:$0]  %s7801_s2, 8192, %s53_s22, [#allocation6], %s5508_s29, %s5508_s29, %s5509_s30  }
  0x23   :  { %s5510_s1 = smov [#allocation8]   ;;  %s5511_s24 = smov [#allocation11]  }
  0x24   :  { %s78_s23 = sshll.u32 %s5510_s1, 4  ;;  %s102_s25 = sshll.u32 %s5511_s24, 4  ;;  %s79_s23 = int_to_ptr.vmem [resolvable:$true] %s78_s23  ;;  %s103_s25 = int_to_ptr.vmem [resolvable:$true] %s102_s25 }
  0x25   :  { %s5319_s27 = scalar_lea.hbm %s7676_s6, 32768 }
  0x26   :  { %p5320_p8 = scmp.ne.s32.totalorder %s7676_s6, %s5319_s27  ;;  %p5323_p9 = scmp.lt.u32.totalorder %s5319_s27, %s7676_s6 }
  0x28   :  { %p5325_p10 = pnand %p5323_p9, %p5320_p8 }
  0x2a   :  { %5328 = shalt.err (!%p5325_p10)
}
  0x2b   :  { %s5329_s22 = scalar_lea.vmem %s79_s23, 32768  ;;  %p5334_p12 = scmp.lt.s32.totalorder %s79_s23, %s79_s23 }
  0x2c   :  { %p5330_p11 = scmp.ne.s32.totalorder %s79_s23, %s5329_s22  ;;  %p5335_p13 = scmp.lt.s32.totalorder %s5329_s22, %s5329_s22 }
  0x2e   :  { %p5336_p0 = por %p5335_p13, %p5334_p12 }
  0x30   :  { %p5337_p1 = pnand %p5336_p0, %p5330_p11 }
  0x32   :  { %5340 = shalt.err (!%p5337_p1)
}
  0x33   :  { %s7697_s2 = smov 1024   ;;  %s5513_s0 = smov 64  }
  0x34   :  { %84 = dma.hbm_to_vmem [thread:$0]  %s7676_s6, 32768, %s79_s23, [#allocation9], %s7697_s2, %s7697_s2, %s5513_s0  }
  0x35   :  { %s5341_s24 = scalar_lea.hbm %s7678_s8, 8192 }
  0x36   :  { %p5342_p2 = scmp.ne.s32.totalorder %s7678_s8, %s5341_s24  ;;  %p5345_p3 = scmp.lt.u32.totalorder %s5341_s24, %s7678_s8 }
  0x38   :  { %p5347_p4 = pnand %p5345_p3, %p5342_p2 }
  0x3a   :  { %5350 = shalt.err (!%p5347_p4)
}
  0x3b   :  { %s5351_s4 = scalar_lea.vmem %s103_s25, 8192  ;;  %p5356_p6 = scmp.lt.s32.totalorder %s103_s25, %s103_s25 }
  0x3c   :  { %p5352_p5 = scmp.ne.s32.totalorder %s103_s25, %s5351_s4  ;;  %p5357_p7 = scmp.lt.s32.totalorder %s5351_s4, %s5351_s4 }
  0x3e   :  { %p5358_p8 = por %p5357_p7, %p5356_p6 }
  0x40   :  { %p5359_p9 = pnand %p5358_p8, %p5352_p5 }
  0x42   :  { %5362 = shalt.err (!%p5359_p9)
}
  0x43   :  { %108 = dma.hbm_to_vmem [thread:$0]  %s7678_s8, 8192, %s103_s25, [#allocation12], %s5508_s29, %s5508_s29, %s5509_s30  }
  0x44   :  { %s5514_s22 = smov [#allocation2]   ;;  %s5515_s1 = smov [#allocation7]  }
  0x45   :  { %s40_s21 = sshll.u32 %s5514_s22, 4  ;;  %s64_s19 = sshll.u32 %s5515_s1, 4  ;;  %s41_s21 = int_to_ptr.vmem [resolvable:$true] %s40_s21  ;;  %s65_s19 = int_to_ptr.vmem [resolvable:$true] %s64_s19 }
  0x46   :  { %s7802_s3 = sld [smem:[#allocation118_spill]] }
  0x4c   :  { %s5363_s26 = scalar_lea.hbm %s7802_s3, 4096 }
  0x4d   :  { %p5364_p10 = scmp.ne.s32.totalorder %s7802_s3, %s5363_s26  ;;  %p5367_p11 = scmp.lt.u32.totalorder %s5363_s26, %s7802_s3 }
  0x4f   :  { %p5369_p12 = pnand %p5367_p11, %p5364_p10 }
  0x51   :  { %5372 = shalt.err (!%p5369_p12)
}
  0x52   :  { %s5373_s8 = scalar_lea.vmem %s41_s21, 4096  ;;  %p5378_p0 = scmp.lt.s32.totalorder %s41_s21, %s41_s21 }
  0x53   :  { %p5374_p13 = scmp.ne.s32.totalorder %s41_s21, %s5373_s8  ;;  %p5379_p1 = scmp.lt.s32.totalorder %s5373_s8, %s5373_s8 }
  0x55   :  { %p5380_p2 = por %p5379_p1, %p5378_p0 }
  0x57   :  { %p5381_p3 = pnand %p5380_p2, %p5374_p13 }
  0x59   :  { %5384 = shalt.err (!%p5381_p3)
}
  0x5a   :  { %s7803_s25 = smov 1024   ;;  %s7804_s1 = sld [smem:[#allocation120_spill]] }
  0x5b   :  { %46 = dma.hbm_to_vmem [thread:$0]  %s7802_s3, 4096, %s41_s21, [#allocation3], %s7803_s25, %s7803_s25, %s5513_s0  }
  0x60   :  { %s5385_s20 = scalar_lea.hbm %s7804_s1, 8192 }
  0x61   :  { %p5386_p4 = scmp.ne.s32.totalorder %s7804_s1, %s5385_s20  ;;  %p5389_p5 = scmp.lt.u32.totalorder %s5385_s20, %s7804_s1 }
  0x63   :  { %p5391_p6 = pnand %p5389_p5, %p5386_p4 }
  0x65   :  { %5394 = shalt.err (!%p5391_p6)
}
  0x66   :  { %s5395_s4 = scalar_lea.vmem %s65_s19, 8192  ;;  %p5400_p8 = scmp.lt.s32.totalorder %s65_s19, %s65_s19 }
  0x67   :  { %p5396_p7 = scmp.ne.s32.totalorder %s65_s19, %s5395_s4  ;;  %p5401_p9 = scmp.lt.s32.totalorder %s5395_s4, %s5395_s4 }
  0x69   :  { %p5402_p10 = por %p5401_p9, %p5400_p8 }
  0x6b   :  { %p5403_p11 = pnand %p5402_p10, %p5396_p7 }
  0x6d   :  { %5406 = shalt.err (!%p5403_p11)
}
  0x6e   :  { %70 = dma.hbm_to_vmem [thread:$0]  %s7804_s1, 8192, %s65_s19, [#allocation6], %s5508_s29, %s5508_s29, %s5509_s30  }
  0x6f   :  { %s5516_s3 = smov [#allocation10]   ;;  %s5517_s25 = smov [#allocation13]  }
  0x70   :  { %s90_s8 = sshll.u32 %s5516_s3, 4  ;;  %s116_s6 = sshll.u32 %s5517_s25, 4  ;;  %s91_s8 = int_to_ptr.vmem [resolvable:$true] %s90_s8  ;;  %s117_s6 = int_to_ptr.vmem [resolvable:$true] %s116_s6 }
  0x71   :  { %s5407_s2 = scalar_lea.hbm %s7677_s7, 8192 }
  0x72   :  { %p5408_p12 = scmp.ne.s32.totalorder %s7677_s7, %s5407_s2  ;;  %p5411_p13 = scmp.lt.u32.totalorder %s5407_s2, %s7677_s7 }
  0x74   :  { %p5413_p0 = pnand %p5411_p13, %p5408_p12 }
  0x76   :  { %5416 = shalt.err (!%p5413_p0)
}
  0x77   :  { %s5417_s19 = scalar_lea.vmem %s91_s8, 8192  ;;  %p5422_p2 = scmp.lt.s32.totalorder %s91_s8, %s91_s8 }
  0x78   :  { %p5418_p1 = scmp.ne.s32.totalorder %s91_s8, %s5417_s19  ;;  %p5423_p3 = scmp.lt.s32.totalorder %s5417_s19, %s5417_s19 }
  0x7a   :  { %p5424_p4 = por %p5423_p3, %p5422_p2 }
  0x7c   :  { %p5425_p5 = pnand %p5424_p4, %p5418_p1 }
  0x7e   :  { %5428 = shalt.err (!%p5425_p5)
}
  0x7f   :  { %96 = dma.hbm_to_vmem [thread:$0]  %s7677_s7, 8192, %s91_s8, [#allocation9], %s5508_s29, %s5508_s29, %s5509_s30  }
  0x80   :  { %s5429_s21 = scalar_lea.hbm %s7680_s10, 4096 }
  0x81   :  { %p5430_p6 = scmp.ne.s32.totalorder %s7680_s10, %s5429_s21  ;;  %p5433_p7 = scmp.lt.u32.totalorder %s5429_s21, %s7680_s10 }
  0x83   :  { %p5435_p8 = pnand %p5433_p7, %p5430_p6 }
  0x85   :  { %5438 = shalt.err (!%p5435_p8)
}
  0x86   :  { %s5439_s2 = scalar_lea.vmem %s117_s6, 4096  ;;  %p5444_p10 = scmp.lt.s32.totalorder %s117_s6, %s117_s6 }
  0x87   :  { %p5440_p9 = scmp.ne.s32.totalorder %s117_s6, %s5439_s2  ;;  %p5445_p11 = scmp.lt.s32.totalorder %s5439_s2, %s5439_s2 }
  0x89   :  { %p5446_p12 = por %p5445_p11, %p5444_p10 }
  0x8b   :  { %p5447_p13 = pnand %p5446_p12, %p5440_p9 }
  0x8d   :  { %5450 = shalt.err (!%p5447_p13)
}
  0x8e   :  { %s5518_s7 = smov 128   ;;  %s5519_s29 = smov 8  }
  0x8f   :  { %122 = dma.hbm_to_vmem [thread:$0]  %s7680_s10, 4096, %s117_s6, [#allocation12], %s5518_s7, %s5518_s7, %s5519_s29  }
  0x90   :  { %s5520_s20 = smov [#allocation14]   ;;  %s5451_s19 = scalar_lea.hbm %s7688_s18, 2048 }
  0x91   :  { %s142_s24 = sshll.u32 %s5520_s20, 4  ;;  %p5452_p0 = scmp.ne.s32.totalorder %s7688_s18, %s5451_s19  ;;  %s143_s24 = int_to_ptr.vmem [resolvable:$true] %s142_s24 }
  0x92   :  { %p5455_p1 = scmp.lt.u32.totalorder %s5451_s19, %s7688_s18 }
  0x94   :  { %p5457_p2 = pnand %p5455_p1, %p5452_p0 }
  0x96   :  { %5460 = shalt.err (!%p5457_p2)
}
  0x97   :  { %s5461_s21 = scalar_lea.vmem %s143_s24, 2048  ;;  %p5466_p4 = scmp.lt.s32.totalorder %s143_s24, %s143_s24 }
  0x98   :  { %p5462_p3 = scmp.ne.s32.totalorder %s143_s24, %s5461_s21  ;;  %p5467_p5 = scmp.lt.s32.totalorder %s5461_s21, %s5461_s21 }
  0x9a   :  { %p5468_p6 = por %p5467_p5, %p5466_p4 }
  0x9c   :  { %p5469_p7 = pnand %p5468_p6, %p5462_p3 }
  0x9e   :  { %5472 = shalt.err (!%p5469_p7)
}
  0x9f   :  { %148 = dma.hbm_to_vmem [thread:$0]  %s7688_s18, 2048, %s143_s24, [#allocation15], %s5518_s7, %s5518_s7, %s5519_s29  }
  0xa0   :  { %5495 = dma.done.wait [#allocation3], 4096  }
  0xa1   :  { %5496 = vsyncadd [#allocation3], 4294963200 }
  0xa2   :  { %5497 = dma.done.wait [#allocation6], 16384  }
  0xa3   :  { %5498 = vsyncadd [#allocation6], 4294950912 }
  0xa4   :  { %5499 = dma.done.wait [#allocation9], 40960  }
  0xa5   :  { %5500 = vsyncadd [#allocation9], 4294926336 }
  0xa6   :  { %5501 = dma.done.wait [#allocation12], 12288  }
  0xa7   :  { %5502 = vsyncadd [#allocation12], 4294955008 }
  0xa8   :  { %5503 = dma.done.wait [#allocation15], 2048  }
  0xa9   :  { %5504 = vsyncadd [#allocation15], 4294965248  ;;  %v7701_v0 = vmov 0   ;;  %s7805_s18 = sld [smem:[#allocation116_spill]]  ;;  %s7806_s24 = sld [smem:[#allocation117_spill]]  ;;  %vm262_vm0 = vcmask 1040384   ;;  %v7700_v30 = vlaneseq }
  0xaa   :  { %5026 = vset.pattern.permute.xlu1 %v7701_v0  ;;  %5025 = vset.pattern.permute.xlu0 %v7701_v0  ;;  %v530_v21 = vld [vmem:[#allocation2 + $0x18] sm:$0xff]  ;;  %v528_v23 = vld [vmem:[#allocation2 + $0x8] sm:$0xff]  ;;  %v527_v27 = vld [vmem:[#allocation2] sm:$0xff]  ;;  %vm249_vm5 = vcmask 408576   ;;  %v7698_v38 = vmov 0.0   ;;  %vm617_vm10 = vcmask 261120  }
  0xab   :  { %662 = vmatprep.mubr.bf16.mxu1 %v7701_v0  ;;  %v538_v22 = vld [vmem:[#allocation2 + $0x58] sm:$0xff]  ;;  %v536_v25 = vld [vmem:[#allocation2 + $0x48] sm:$0xff]  ;;  %v535_v28 = vld [vmem:[#allocation2 + $0x40] sm:$0xff]  ;;  %v5794_v31 = vand.u32 127, %v7700_v30  ;;  %vm5524_vm14 = vmmov 0   ;;  %s8211_s2 = sld [smem:[#allocation121_spill]] }
  0xac   :  { %v562_v24 = vpack.c.bf16 %v538_v22, %v530_v21  ;;  %v560_v26 = vpack.c.bf16 %v536_v25, %v528_v23  ;;  %v559_v29 = vpack.c.bf16 %v535_v28, %v527_v27  ;;  %v529_v36 = vld [vmem:[#allocation2 + $0x10] sm:$0xff]  ;;  %v544_v56 = vld [vmem:[#allocation2 + $0x88] sm:$0xff]  ;;  %v546_v58 = vld [vmem:[#allocation2 + $0x98] sm:$0xff]  ;;  %s5525_s7 = smov [#allocation16]  }
  0xad   :  { %7807 = vst [vmem:[#allocation23_spill] sm:$0xff] %v5794_v31  ;;  %v537_v37 = vld [vmem:[#allocation2 + $0x50] sm:$0xff]  ;;  %v552_v57 = vld [vmem:[#allocation2 + $0xc8] sm:$0xff]  ;;  %v554_v60 = vld [vmem:[#allocation2 + $0xd8] sm:$0xff]  ;;  %s4851_s29 = sshll.u32 %s5525_s7, 4  ;;  %s4852_s29 = int_to_ptr.vmem [resolvable:$true] %s4851_s29 }
  0xae   :  { %630 = vmatprep.subr.bf16.mxu1 %v560_v26  ;;  %v561_v45 = vpack.c.bf16 %v537_v37, %v529_v36  ;;  %v568_v59 = vpack.c.bf16 %v552_v57, %v544_v56  ;;  %v543_v61 = vld [vmem:[#allocation2 + $0x80] sm:$0xff]  ;;  %v570_v63 = vpack.c.bf16 %v554_v60, %v546_v58  ;;  %v558_v21 = vld [vmem:[#allocation2 + $0xf8] sm:$0xff]  ;;  %v336_v36 = vld [vmem:[#allocation5 + $0x28] sm:$0xff]  ;;  %s5473_s30 = scalar_lea.vmem %s4852_s29, 128  ;;  %p5478_p9 = scmp.lt.s32.totalorder %s4852_s29, %s4852_s29 }
  0xaf   :  { %v178_v1 = vld [vmem:[%s7805_s18 + $0x10] sm:$0xff]  ;;  %v176_v2 = vld [vmem:[%s7805_s18] sm:$0xff]  ;;  %v179_v3 = vld [vmem:[%s7805_s18 + $0x18] sm:$0xff]  ;;  %631 = vmatpush1.bf16.msra.mxu1 %v559_v29  ;;  %p5474_p8 = scmp.ne.s32.totalorder %s4852_s29, %s5473_s30  ;;  %p5479_p10 = scmp.lt.s32.totalorder %s5473_s30, %s5473_s30 }
  0xb0   :  { %193 = vperm.xlu1 %5026, %v178_v1   ;;  %187 = vperm.xlu0 %5025, %v176_v2   ;;  %v177_v4 = vld [vmem:[%s7805_s18 + $0x8] sm:$0xff]  ;;  %v238_v5 = vld [vmem:[%s7806_s24] sm:$0xff]  ;;  %v240_v7 = vld [vmem:[%s7806_s24 + $0x10] sm:$0xff] }
  0xb1   :  { %v239_v6 = vld [vmem:[%s7806_s24 + $0x8] sm:$0xff]  ;;  %v241_v8 = vld [vmem:[%s7806_s24 + $0x18] sm:$0xff]  ;;  %v242_v11 = vld [vmem:[%s7806_s24 + $0x20] sm:$0xff]  ;;  %632 = vmatprep.subr.bf16.mxu1 %v568_v59  ;;  %p5480_p11 = por %p5479_p10, %p5478_p9 }
  0xb2   :  { %v245_v9 = vpack.c.bf16 %v239_v6, %v238_v5  ;;  %v246_v10 = vpack.c.bf16 %v241_v8, %v240_v7  ;;  %v243_v12 = vld [vmem:[%s7806_s24 + $0x28] sm:$0xff]  ;;  %v180_v14 = vld [vmem:[%s7805_s18 + $0x20] sm:$0xff]  ;;  %v244_v16 = vld [vmem:[%s7806_s24 + $0x30] sm:$0x3] }
  0xb3   :  { %v181_v13 = vld [vmem:[%s7805_s18 + $0x28] sm:$0xff]  ;;  %v247_v15 = vpack.c.bf16 %v243_v12, %v242_v11  ;;  %v183_v17 = vld [vmem:[%s7805_s18 + $0x38] sm:$0xff]  ;;  %v182_v18 = vld [vmem:[%s7805_s18 + $0x30] sm:$0xff]  ;;  %v248_v19 = vpack.c.bf16 %v244_v16, %v244_v16  ;;  %p5481_p12 = pnand %p5480_p11, %p5474_p8 }
  0xb4   :  { %196 = vperm.xlu1 %5026, %v179_v3   ;;  %190 = vperm.xlu0 %5025, %v177_v4   ;;  %v551_v62 = vld [vmem:[#allocation2 + $0xc0] sm:$0xff]  ;;  %v545_v2 = vld [vmem:[#allocation2 + $0x90] sm:$0xff]  ;;  %v532_v5 = vld [vmem:[#allocation2 + $0x28] sm:$0xff] }
  0xb5   :  { %4949 = vmatprep.subr.bf16.mxu0 %v245_v9  ;;  %v264_v20 = vsel %vm262_vm0, %v248_v19, 0  ;;  %v567_v1 = vpack.c.bf16 %v551_v62, %v543_v61  ;;  %v553_v3 = vld [vmem:[#allocation2 + $0xd0] sm:$0xff]  ;;  %v540_v6 = vld [vmem:[#allocation2 + $0x68] sm:$0xff]  ;;  %v534_v8 = vld [vmem:[#allocation2 + $0x38] sm:$0xff] }
  0xb6   :  { %4950 = vmatpush3.bf16.msra.mxu0 %v245_v9  ;;  %v569_v4 = vpack.c.bf16 %v553_v3, %v545_v2  ;;  %v564_v7 = vpack.c.bf16 %v540_v6, %v532_v5  ;;  %v542_v9 = vld [vmem:[#allocation2 + $0x78] sm:$0xff]  ;;  %v531_v12 = vld [vmem:[#allocation2 + $0x20] sm:$0xff]  ;;  %v541_v16 = vld [vmem:[#allocation2 + $0x70] sm:$0xff] }
  0xb7   :  { %4951 = vmatprep.subr.bf16.mxu0 %v246_v10  ;;  %633 = vmatpush1.bf16.msra.mxu1 %v567_v1  ;;  %v547_v27 = vld [vmem:[#allocation2 + $0xa0] sm:$0xff]  ;;  %v549_v29 = vld [vmem:[#allocation2 + $0xb0] sm:$0xff]  ;;  %v334_v37 = vld [vmem:[#allocation5 + $0x18] sm:$0xff] }
  0xb8   :  { %202 = vperm.xlu1 %5026, %v181_v13   ;;  %199 = vperm.xlu0 %5025, %v180_v14   ;;  %v539_v13 = vld [vmem:[#allocation2 + $0x60] sm:$0xff]  ;;  %v342_v56 = vld [vmem:[#allocation5 + $0x58] sm:$0xff]  ;;  %v341_v1 = vld [vmem:[#allocation5 + $0x50] sm:$0xff] }
  0xb9   :  { %776 = vmatprep.subr.bf16.mxu1 %v564_v7  ;;  %v555_v28 = vld [vmem:[#allocation2 + $0xe0] sm:$0xff]  ;;  %v346_v57 = vld [vmem:[#allocation5 + $0x78] sm:$0xff]  ;;  %v345_v2 = vld [vmem:[#allocation5 + $0x70] sm:$0xff] }
  0xba   :  { %4952 = vmatpush3.bf16.msra.mxu0 %v246_v10  ;;  %v566_v10 = vpack.c.bf16 %v542_v9, %v534_v8  ;;  %v339_v60 = vld [vmem:[#allocation5 + $0x40] sm:$0xff]  ;;  %v348_v3 = vld [vmem:[#allocation5 + $0x88] sm:$0xff]  ;;  %v350_v5 = vld [vmem:[#allocation5 + $0x98] sm:$0xff]  ;;  %v5871_v8 = vpack.c.bf16 %v345_v2, %v341_v1 }
  0xbb   :  { %4953 = vmatprep.subr.bf16.mxu0 %v247_v15  ;;  %v343_v61 = vld [vmem:[#allocation5 + $0x60] sm:$0xff]  ;;  %v354_v6 = vld [vmem:[#allocation5 + $0xb8] sm:$0xff] }
  0xbc   :  { %208 = vperm.xlu1 %5026, %v183_v17   ;;  %205 = vperm.xlu0 %5025, %v182_v18   ;;  %v548_v17 = vld [vmem:[#allocation2 + $0xa8] sm:$0xff]  ;;  %v5869_v7 = vpack.c.bf16 %v343_v61, %v339_v60  ;;  %v347_v9 = vld [vmem:[#allocation5 + $0x80] sm:$0xff]  ;;  %v382_v1 = vld [vmem:[#allocation5 + $0x198] sm:$0xff] }
  0xbd   :  { %v380_v60 = vld [vmem:[#allocation5 + $0x188] sm:$0xff]  ;;  %v386_v2 = vld [vmem:[#allocation5 + $0x1b8] sm:$0xff] }
  0xbe   :  { %4954 = vmatpush3.bf16.msra.mxu0 %v247_v15  ;;  %v533_v15 = vld [vmem:[#allocation2 + $0x30] sm:$0xff]  ;;  %v384_v61 = vld [vmem:[#allocation5 + $0x1a8] sm:$0xff]  ;;  %v466_v30 = vld [vmem:[#allocation7 + $0x138] sm:$0xff] }
  0xbf   :  { %5005 = vmatprep.subr.msk.bf16.mxu0 %vm262_vm0, %v248_v19  ;;  %v556_v19 = vld [vmem:[#allocation2 + $0xe8] sm:$0xff]  ;;  %v565_v26 = vpack.c.bf16 %v541_v16, %v533_v15 }
  0xc0   :  { %v356_v15 = vld [vmem:[#allocation5 + $0xc8] sm:$0xff] }
  0xc1   :  { %v360_v16 = vld [vmem:[#allocation5 + $0xe8] sm:$0xff] }
  0xc2   :  { %4956 = vmatpush3.bf16.msra.mxu0 %v264_v20  ;;  %v550_v20 = vld [vmem:[#allocation2 + $0xb8] sm:$0xff] }
  0xc3   :  { %703 = vmatprep.subr.bf16.mxu0 %v562_v24  ;;  %v563_v24 = vpack.c.bf16 %v539_v13, %v531_v12  ;;  %v5877_v12 = vpack.c.bf16 %v354_v6, %v350_v5  ;;  %v349_v13 = vld [vmem:[#allocation5 + $0x90] sm:$0xff]  ;;  %v379_v5 = vld [vmem:[#allocation5 + $0x180] sm:$0xff] }
  0xc4   :  { %v383_v6 = vld [vmem:[#allocation5 + $0x1a0] sm:$0xff] }
 0x12f   :  { %v194_v32 = vpop.permute.xlu1 %193  ;;  %v188_v33 = vpop.permute.xlu0 %187 }
 0x130   :  { %vm212_vm1 = vcmp.eq.s32.totalorder %v5794_v31, %v194_v32  ;;  %vm210_vm2 = vcmp.eq.s32.totalorder %v5794_v31, %v188_v33  ;;  %v572_v32 = vpack.c.bf16 %v556_v19, %v548_v17  ;;  %v574_v33 = vpack.c.bf16 %v558_v21, %v550_v20  ;;  %v358_v17 = vld [vmem:[#allocation5 + $0xd8] sm:$0xff]  ;;  %v355_v21 = vld [vmem:[#allocation5 + $0xc0] sm:$0xff] }
 0x131   :  { %v4866_v39 = vsel %vm212_vm1, 1.0, %v7698_v38  ;;  %v4864_v40 = vsel %vm210_vm2, 1.0, %v7698_v38 }
 0x133   :  { %v197_v34 = vpop.permute.xlu1 %196  ;;  %v191_v35 = vpop.permute.xlu0 %190 }
 0x134   :  { %vm213_vm3 = vcmp.eq.s32.totalorder %v5794_v31, %v197_v34  ;;  %vm211_vm4 = vcmp.eq.s32.totalorder %v5794_v31, %v191_v35  ;;  %v557_v34 = vld [vmem:[#allocation2 + $0xf0] sm:$0xff]  ;;  %v332_v35 = vld [vmem:[#allocation5 + $0x8] sm:$0xff] }
 0x135   :  { %v4867_v41 = vsel %vm213_vm3, 1.0, %v7698_v38  ;;  %v4865_v42 = vsel %vm211_vm4, 1.0, %v7698_v38 }
 0x136   :  { %v235_v43 = vpack.c.bf16 %v4867_v41, %v4866_v39  ;;  %v234_v44 = vpack.c.bf16 %v4865_v42, %v4864_v40  ;;  %v338_v39 = vld [vmem:[#allocation5 + $0x38] sm:$0xff]  ;;  %v571_v40 = vpack.c.bf16 %v555_v28, %v547_v27  ;;  %v573_v42 = vpack.c.bf16 %v557_v34, %v549_v29  ;;  %v361_v27 = vld [vmem:[#allocation5 + $0xf0] sm:$0xff]  ;;  %v364_v28 = vld [vmem:[#allocation5 + $0x108] sm:$0xff] }
 0x137   :  { %v203_v46 = vpop.permute.xlu1 %202  ;;  %v200_v47 = vpop.permute.xlu0 %199  ;;  %v368_v29 = vld [vmem:[#allocation5 + $0x128] sm:$0xff] }
 0x138   :  { %vm215_vm6 = vcmp.eq.s32.totalorder %v5794_v31, %v203_v46  ;;  %vm214_vm7 = vcmp.eq.s32.totalorder %v5794_v31, %v200_v47  ;;  %4957 = vmatprep.mubr.msk.bf16.mxu0 %vm249_vm5, %v234_v44 }
 0x139   :  { %v4869_v48 = vsel %vm215_vm6, 1.0, %v7698_v38  ;;  %v4868_v49 = vsel %vm214_vm7, 1.0, %v7698_v38  ;;  %4958 = vmatmul.mubr.msk.bf16.vlgmr.msra.gmra.mrb[0].mxu0 %vm249_vm5, %v235_v43  ;;  %v5827_v43 = vpack.c.bf16 %v336_v36, %v332_v35  ;;  %v363_v36 = vld [vmem:[#allocation5 + $0x100] sm:$0xff] }
 0x13a   :  { %v236_v50 = vpack.c.bf16 %v4869_v48, %v4868_v49  ;;  %704 = vmatpush1.bf16.msra.mxu0 %v561_v45  ;;  %v5829_v45 = vpack.c.bf16 %v338_v39, %v334_v37  ;;  %v367_v37 = vld [vmem:[#allocation5 + $0x120] sm:$0xff]  ;;  %v5905_v39 = vpack.c.bf16 %v368_v29, %v364_v28  ;;  %v389_v29 = vld [vmem:[#allocation5 + $0x1d0] sm:$0xff] }
 0x13b   :  { %v209_v51 = vpop.permute.xlu1 %208  ;;  %v206_v52 = vpop.permute.xlu0 %205  ;;  %705 = vmatprep.subr.bf16.mxu0 %v570_v63  ;;  %v5861_v63 = vpack.c.bf16 %v346_v57, %v342_v56  ;;  %v373_v56 = vld [vmem:[#allocation5 + $0x150] sm:$0xff] }
 0x13c   :  { %vm217_vm8 = vcmp.eq.s32.totalorder %v5794_v31, %v209_v51  ;;  %vm216_vm9 = vcmp.eq.s32.totalorder %v5794_v31, %v206_v52  ;;  %4961 = vmatprep.mubr.msk.bf16.mxu0 %vm249_vm5, %v236_v50  ;;  %v331_v50 = vld [vmem:[#allocation5] sm:$0xff]  ;;  %v333_v52 = vld [vmem:[#allocation5 + $0x10] sm:$0xff]  ;;  %7814 = vst [vmem:[#allocation30_spill] sm:$0xff] %v5905_v39  ;;  %v472_v31 = vld [vmem:[#allocation7 + $0x168] sm:$0xff] }
 0x13d   :  { %v4871_v53 = vsel %vm217_vm8, 1.0, %v7698_v38  ;;  %v4870_v54 = vsel %vm216_vm9, 1.0, %v7698_v38  ;;  %v335_v51 = vld [vmem:[#allocation5 + $0x20] sm:$0xff]  ;;  %v377_v57 = vld [vmem:[#allocation5 + $0x170] sm:$0xff]  ;;  %v462_v38 = vld [vmem:[#allocation7 + $0x118] sm:$0xff] }
 0x13e   :  { %v237_v55 = vpack.c.bf16 %v4871_v53, %v4870_v54  ;;  %706 = vmatpush1.bf16.msra.mxu0 %v569_v4  ;;  %v337_v53 = vld [vmem:[#allocation5 + $0x30] sm:$0xff]  ;;  %v340_v54 = vld [vmem:[#allocation5 + $0x48] sm:$0xff]  ;;  %v5855_v58 = vpack.c.bf16 %v335_v51, %v331_v50  ;;  %v5913_v50 = vpack.c.bf16 %v367_v37, %v363_v36  ;;  %v430_v37 = vld [vmem:[#allocation7 + $0x18] sm:$0xff] }
 0x13f   :  { %849 = vmatprep.subr.bf16.mxu0 %v566_v10  ;;  %v5857_v59 = vpack.c.bf16 %v337_v53, %v333_v52  ;;  %v352_v4 = vld [vmem:[#allocation5 + $0xa8] sm:$0xff]  ;;  %v351_v10 = vld [vmem:[#allocation5 + $0xa0] sm:$0xff] }
 0x140   :  { %v5883_v19 = vpack.c.bf16 %v351_v10, %v347_v9  ;;  %7816 = vst [vmem:[#allocation32_spill] sm:$0xff] %v5913_v50  ;;  %v371_v52 = vld [vmem:[#allocation5 + $0x140] sm:$0xff]  ;;  %v5935_v9 = vpack.c.bf16 %v384_v61, %v380_v60  ;;  %v5937_v10 = vpack.c.bf16 %v386_v2, %v382_v1  ;;  %v432_v36 = vld [vmem:[#allocation7 + $0x28] sm:$0xff]  ;;  %v438_v60 = vld [vmem:[#allocation7 + $0x58] sm:$0xff] }
 0x141   :  { %4962 = vmatmul.mubr.msk.bf16.gmra.mrb[4].mxu0 %vm249_vm5, %v237_v55  ;;  %v344_v55 = vld [vmem:[#allocation5 + $0x68] sm:$0xff]  ;;  %v375_v53 = vld [vmem:[#allocation5 + $0x160] sm:$0xff]  ;;  %v442_v61 = vld [vmem:[#allocation7 + $0x78] sm:$0xff] }
 0x142   :  { %735 = vmatprep.mubr.bf16.mxu0 %v7701_v0  ;;  %v5859_v62 = vpack.c.bf16 %v344_v55, %v340_v54  ;;  %7808 = vst [vmem:[#allocation24_spill] sm:$0xff] %v5883_v19  ;;  %7822 = vst [vmem:[#allocation38_spill] sm:$0xff] %v5935_v9 }
 0x143   :  { %7823 = vst [vmem:[#allocation39_spill] sm:$0xff] %v5937_v10 }
 0x20c   :  { %v4959_v11 = vpop.f32.mrb[0].mxu0 }
 0x20d   :  { %v300_v14 = vpop.f32.mrb[1].mxu0 }
 0x20e   :  { %v4960_v18 = vpop.f32.mrb[2].mxu0 }
 0x20f   :  { %v5817_v22 = vpack.c.bf16 %v4960_v18, %v4959_v11  ;;  %v303_v23 = vpop.f32.mrb[3].mxu0  ;;  %v5875_v11 = vpack.c.bf16 %v352_v4, %v348_v3  ;;  %v362_v18 = vld [vmem:[#allocation5 + $0xf8] sm:$0xff]  ;;  %v5929_v3 = vpack.c.bf16 %v375_v53, %v371_v52  ;;  %v5931_v4 = vpack.c.bf16 %v377_v57, %v373_v56  ;;  %v429_v53 = vld [vmem:[#allocation7 + $0x10] sm:$0xff]  ;;  %v436_v56 = vld [vmem:[#allocation7 + $0x48] sm:$0xff] }
 0x210   :  { %v5819_v25 = vpack.c.bf16 %v303_v23, %v300_v14  ;;  %v353_v14 = vld [vmem:[#allocation5 + $0xb0] sm:$0xff]  ;;  %v359_v23 = vld [vmem:[#allocation5 + $0xe0] sm:$0xff]  ;;  %v440_v57 = vld [vmem:[#allocation7 + $0x68] sm:$0xff] }
 0x211   :  { %v5885_v20 = vpack.c.bf16 %v353_v14, %v349_v13  ;;  %v5899_v34 = vpack.c.bf16 %v359_v23, %v355_v21  ;;  %7820 = vst [vmem:[#allocation36_spill] sm:$0xff] %v5929_v3  ;;  %7821 = vst [vmem:[#allocation37_spill] sm:$0xff] %v5931_v4  ;;  %v381_v13 = vld [vmem:[#allocation5 + $0x190] sm:$0xff]  ;;  %v388_v14 = vld [vmem:[#allocation5 + $0x1c8] sm:$0xff] }
 0x212   :  { %4876 = vmatmul.mubr.msk.bf16.vlgmr.msra.gmra.mrb[0].mxu1 %vm617_vm10, %v5819_v25  ;;  %4880 = vmatmul.mubr.msk.bf16.vlgmr.msra.gmra.mrb[8].mxu0 %vm617_vm10, %v5819_v25  ;;  %v387_v23 = vld [vmem:[#allocation5 + $0x1c0] sm:$0xff] }
 0x213   :  { %777 = vmatpush1.bf16.msra.mxu1 %v563_v24  ;;  %672 = vmatprep.mubr.bf16.mxu1 %v7701_v0  ;;  %7809 = vst [vmem:[#allocation25_spill] sm:$0xff] %v5885_v20  ;;  %v5889_v24 = vpack.c.bf16 %v360_v16, %v356_v15  ;;  %7812 = vst [vmem:[#allocation28_spill] sm:$0xff] %v5899_v34  ;;  %v392_v15 = vld [vmem:[#allocation5 + $0x1e8] sm:$0xff]  ;;  %v390_v16 = vld [vmem:[#allocation5 + $0x1d8] sm:$0xff] }
 0x214   :  { %v4963_v41 = vpop.f32.mrb[4].mxu0  ;;  %745 = vmatprep.mubr.bf16.mxu0 %v7701_v0  ;;  %850 = vmatpush1.bf16.msra.mxu0 %v565_v26  ;;  %v357_v26 = vld [vmem:[#allocation5 + $0xd0] sm:$0xff] }
 0x215   :  { %v316_v44 = vpop.f32.mrb[5].mxu0  ;;  %778 = vmatprep.subr.bf16.mxu1 %v572_v32  ;;  %851 = vmatprep.subr.bf16.mxu0 %v574_v33  ;;  %7810 = vst [vmem:[#allocation26_spill] sm:$0xff] %v5889_v24  ;;  %v366_v32 = vld [vmem:[#allocation5 + $0x118] sm:$0xff]  ;;  %v5901_v35 = vpack.c.bf16 %v361_v27, %v357_v26  ;;  %v391_v26 = vld [vmem:[#allocation5 + $0x1e0] sm:$0xff]  ;;  %v5949_v27 = vpack.c.bf16 %v392_v15, %v388_v14  ;;  %v437_v14 = vld [vmem:[#allocation7 + $0x50] sm:$0xff] }
 0x216   :  { %v4964_v46 = vpop.f32.mrb[6].mxu0  ;;  %v370_v33 = vld [vmem:[#allocation5 + $0x138] sm:$0xff]  ;;  %v441_v15 = vld [vmem:[#allocation7 + $0x70] sm:$0xff] }
 0x217   :  { %v5831_v47 = vpack.c.bf16 %v4964_v46, %v4963_v41  ;;  %v319_v48 = vpop.f32.mrb[7].mxu0  ;;  %779 = vmatpush1.bf16.msra.mxu1 %v571_v40  ;;  %7813 = vst [vmem:[#allocation29_spill] sm:$0xff] %v5901_v35  ;;  %v5907_v40 = vpack.c.bf16 %v370_v33, %v366_v32  ;;  %v365_v41 = vld [vmem:[#allocation5 + $0x110] sm:$0xff]  ;;  %v374_v46 = vld [vmem:[#allocation5 + $0x158] sm:$0xff]  ;;  %7826 = vst [vmem:[#allocation42_spill] sm:$0xff] %v5949_v27 }
 0x218   :  { %v5833_v49 = vpack.c.bf16 %v319_v48, %v316_v44  ;;  %852 = vmatpush1.bf16.msra.mxu0 %v573_v42  ;;  %922 = vmatprep.subr.bf16.mxu1 %v5827_v43  ;;  %v372_v42 = vld [vmem:[#allocation5 + $0x148] sm:$0xff]  ;;  %v378_v48 = vld [vmem:[#allocation5 + $0x178] sm:$0xff]  ;;  %v393_v32 = vld [vmem:[#allocation5 + $0x1f0] sm:$0xff] }
 0x219   :  { %963 = vmatprep.subr.bf16.mxu0 %v5829_v45  ;;  %7815 = vst [vmem:[#allocation31_spill] sm:$0xff] %v5907_v40  ;;  %v376_v44 = vld [vmem:[#allocation5 + $0x168] sm:$0xff]  ;;  %v5921_v55 = vpack.c.bf16 %v378_v48, %v374_v46  ;;  %v431_v46 = vld [vmem:[#allocation7 + $0x20] sm:$0xff] }
 0x21a   :  { %4877 = vmatmul.mubr.msk.bf16.gmra.mrb[4].mxu1 %vm617_vm10, %v5817_v22  ;;  %4881 = vmatmul.mubr.msk.bf16.gmra.mrb[12].mxu0 %vm617_vm10, %v5817_v22  ;;  %v5919_v54 = vpack.c.bf16 %v376_v44, %v372_v42  ;;  %v428_v33 = vld [vmem:[#allocation7 + $0x8] sm:$0xff]  ;;  %v5961_v42 = vpack.c.bf16 %v393_v32, %v389_v29  ;;  %v427_v44 = vld [vmem:[#allocation7] sm:$0xff]  ;;  %v5989_v32 = vpack.c.bf16 %v441_v15, %v437_v14 }
 0x21b   :  { %682 = vmatprep.mubr.bf16.mxu1 %v7701_v0  ;;  %755 = vmatprep.mubr.bf16.mxu0 %v7701_v0  ;;  %7819 = vst [vmem:[#allocation35_spill] sm:$0xff] %v5921_v55  ;;  %v5965_v48 = vpack.c.bf16 %v432_v36, %v428_v33  ;;  %v5973_v1 = vpack.c.bf16 %v431_v46, %v427_v44  ;;  %v443_v33 = vld [vmem:[#allocation7 + $0x80] sm:$0xff]  ;;  %v445_v44 = vld [vmem:[#allocation7 + $0x90] sm:$0xff] }
 0x21c   :  { %7818 = vst [vmem:[#allocation34_spill] sm:$0xff] %v5919_v54  ;;  %7829 = vst [vmem:[#allocation45_spill] sm:$0xff] %v5961_v42  ;;  %v447_v36 = vld [vmem:[#allocation7 + $0xa0] sm:$0xff]  ;;  %v449_v46 = vld [vmem:[#allocation7 + $0xb0] sm:$0xff] }
 0x21d   :  { %7830 = vst [vmem:[#allocation46_spill] sm:$0xff] %v5965_v48 }
 0x222   :  { %4878 = vmatmul.mubr.msk.bf16.gmra.mrb[8].mxu1 %vm617_vm10, %v5833_v49  ;;  %4882 = vmatmul.mubr.msk.bf16.gmra.mrb[16].mxu0 %vm617_vm10, %v5833_v49 }
 0x223   :  { %692 = vmatprep.mubr.bf16.mxu1 %v7701_v0  ;;  %765 = vmatprep.mubr.bf16.mxu0 %v7701_v0 }
 0x22a   :  { %4879 = vmatmul.mubr.msk.bf16.gmra.mrb[12].mxu1 %vm617_vm10, %v5831_v47  ;;  %4883 = vmatmul.mubr.msk.bf16.gmra.mrb[20].mxu0 %vm617_vm10, %v5831_v47 }
 0x22b   :  { %808 = vmatprep.mubr.bf16.mxu1 %v7701_v0  ;;  %881 = vmatprep.mubr.bf16.mxu0 %v7701_v0 }
 0x232   :  { %4884 = vmatmul.mubr.msk.bf16.vlgmr.msra.gmra.mrb[16].mxu1 %vm617_vm10, %v5819_v25  ;;  %4888 = vmatmul.mubr.msk.bf16.vlgmr.msra.gmra.mrb[24].mxu0 %vm617_vm10, %v5819_v25  ;;  %v5891_v25 = vpack.c.bf16 %v362_v18, %v358_v17  ;;  %v394_v17 = vld [vmem:[#allocation5 + $0x1f8] sm:$0xff]  ;;  %v5943_v18 = vpack.c.bf16 %v383_v6, %v379_v5  ;;  %v435_v5 = vld [vmem:[#allocation7 + $0x40] sm:$0xff] }
 0x233   :  { %923 = vmatpush1.bf16.msra.mxu1 %v5855_v58  ;;  %964 = vmatpush1.bf16.msra.mxu0 %v5857_v59  ;;  %v5951_v28 = vpack.c.bf16 %v394_v17, %v390_v16  ;;  %v439_v6 = vld [vmem:[#allocation7 + $0x60] sm:$0xff]  ;;  %v444_v16 = vld [vmem:[#allocation7 + $0x88] sm:$0xff] }
 0x234   :  { %924 = vmatprep.subr.bf16.mxu1 %v5859_v62  ;;  %965 = vmatprep.subr.bf16.mxu0 %v5861_v63  ;;  %7811 = vst [vmem:[#allocation27_spill] sm:$0xff] %v5891_v25  ;;  %7824 = vst [vmem:[#allocation40_spill] sm:$0xff] %v5943_v18  ;;  %v448_v17 = vld [vmem:[#allocation7 + $0xa8] sm:$0xff]  ;;  %v5987_v29 = vpack.c.bf16 %v439_v6, %v435_v5  ;;  %v451_v5 = vld [vmem:[#allocation7 + $0xc0] sm:$0xff] }
 0x235   :  { %818 = vmatprep.mubr.bf16.mxu1 %v7701_v0  ;;  %891 = vmatprep.mubr.bf16.mxu0 %v7701_v0  ;;  %7827 = vst [vmem:[#allocation43_spill] sm:$0xff] %v5951_v28  ;;  %v455_v6 = vld [vmem:[#allocation7 + $0xe0] sm:$0xff] }
 0x237   :  { %925 = vmatpush1.bf16.msra.mxu1 %v5869_v7  ;;  %966 = vmatpush1.bf16.msra.mxu0 %v5871_v8 }
 0x238   :  { %926 = vmatprep.subr.bf16.mxu1 %v5875_v11  ;;  %967 = vmatprep.subr.bf16.mxu0 %v5877_v12 }
 0x23a   :  { %4885 = vmatmul.mubr.msk.bf16.gmra.mrb[20].mxu1 %vm617_vm10, %v5817_v22  ;;  %4889 = vmatmul.mubr.msk.bf16.gmra.mrb[28].mxu0 %vm617_vm10, %v5817_v22  ;;  %v369_v22 = vld [vmem:[#allocation5 + $0x130] sm:$0xff] }
 0x23b   :  { %927 = vmatpush1.bf16.msra.mxu1 %v5883_v19  ;;  %968 = vmatpush1.bf16.msra.mxu0 %v5885_v20  ;;  %v5915_v51 = vpack.c.bf16 %v369_v22, %v365_v41  ;;  %v434_v41 = vld [vmem:[#allocation7 + $0x38] sm:$0xff]  ;;  %v5959_v22 = vpack.c.bf16 %v391_v26, %v387_v23 }
 0x23c   :  { %928 = vmatprep.subr.bf16.mxu1 %v5889_v24  ;;  %969 = vmatprep.subr.bf16.mxu0 %v5891_v25  ;;  %v5967_v52 = vpack.c.bf16 %v434_v41, %v430_v37  ;;  %v446_v23 = vld [vmem:[#allocation7 + $0x98] sm:$0xff]  ;;  %v5993_v37 = vpack.c.bf16 %v448_v17, %v444_v16  ;;  %v453_v16 = vld [vmem:[#allocation7 + $0xd0] sm:$0xff] }
 0x23d   :  { %828 = vmatprep.mubr.bf16.mxu1 %v7701_v0  ;;  %901 = vmatprep.mubr.bf16.mxu0 %v7701_v0  ;;  %7817 = vst [vmem:[#allocation33_spill] sm:$0xff] %v5915_v51  ;;  %7828 = vst [vmem:[#allocation44_spill] sm:$0xff] %v5959_v22  ;;  %v450_v26 = vld [vmem:[#allocation7 + $0xb8] sm:$0xff]  ;;  %v457_v17 = vld [vmem:[#allocation7 + $0xf0] sm:$0xff] }
 0x23e   :  { %7831 = vst [vmem:[#allocation47_spill] sm:$0xff] %v5967_v52  ;;  %v5995_v41 = vpack.c.bf16 %v450_v26, %v446_v23  ;;  %v460_v23 = vld [vmem:[#allocation7 + $0x108] sm:$0xff] }
 0x23f   :  { %929 = vmatpush1.bf16.msra.mxu1 %v5899_v34  ;;  %970 = vmatpush1.bf16.msra.mxu0 %v5901_v35  ;;  %v464_v26 = vld [vmem:[#allocation7 + $0x128] sm:$0xff] }
 0x240   :  { %930 = vmatprep.subr.bf16.mxu1 %v5905_v39  ;;  %971 = vmatprep.subr.bf16.mxu0 %v5907_v40 }
 0x242   :  { %4886 = vmatmul.mubr.msk.bf16.gmra.mrb[24].mxu1 %vm617_vm10, %v5833_v49  ;;  %4890 = vmatmul.mubr.msk.bf16.gmra.mrb[32].mxu0 %vm617_vm10, %v5833_v49  ;;  %v385_v49 = vld [vmem:[#allocation5 + $0x1b0] sm:$0xff] }
 0x243   :  { %931 = vmatpush1.bf16.msra.mxu1 %v5913_v50  ;;  %972 = vmatpush1.bf16.msra.mxu0 %v5915_v51  ;;  %v5945_v21 = vpack.c.bf16 %v385_v49, %v381_v13  ;;  %v5979_v13 = vpack.c.bf16 %v440_v57, %v436_v56  ;;  %v5981_v49 = vpack.c.bf16 %v442_v61, %v438_v60  ;;  %v454_v56 = vld [vmem:[#allocation7 + $0xd8] sm:$0xff] }
 0x244   :  { %932 = vmatprep.subr.bf16.mxu1 %v5919_v54  ;;  %973 = vmatprep.subr.bf16.mxu0 %v5921_v55  ;;  %v458_v57 = vld [vmem:[#allocation7 + $0xf8] sm:$0xff]  ;;  %v6001_v60 = vpack.c.bf16 %v447_v36, %v443_v33  ;;  %v6003_v61 = vpack.c.bf16 %v449_v46, %v445_v44  ;;  %v6013_v33 = vpack.c.bf16 %v455_v6, %v451_v5  ;;  %v459_v44 = vld [vmem:[#allocation7 + $0x100] sm:$0xff] }
 0x245   :  { %838 = vmatprep.mubr.bf16.mxu1 %v7701_v0  ;;  %911 = vmatprep.mubr.bf16.mxu0 %v7701_v0  ;;  %7825 = vst [vmem:[#allocation41_spill] sm:$0xff] %v5945_v21  ;;  %v6009_v15 = vpack.c.bf16 %v458_v57, %v454_v56  ;;  %v6015_v36 = vpack.c.bf16 %v457_v17, %v453_v16  ;;  %v463_v46 = vld [vmem:[#allocation7 + $0x120] sm:$0xff]  ;;  %v461_v56 = vld [vmem:[#allocation7 + $0x110] sm:$0xff] }
 0x246   :  { %7832 = vst [vmem:[#allocation48_spill] sm:$0xff] %v6001_v60  ;;  %7833 = vst [vmem:[#allocation49_spill] sm:$0xff] %v6003_v61  ;;  %v465_v57 = vld [vmem:[#allocation7 + $0x130] sm:$0xff]  ;;  %v6025_v5 = vpack.c.bf16 %v463_v46, %v459_v44  ;;  %v467_v16 = vld [vmem:[#allocation7 + $0x140] sm:$0xff] }
 0x247   :  { %933 = vmatpush1.bf16.msra.mxu1 %v5929_v3  ;;  %974 = vmatpush1.bf16.msra.mxu0 %v5931_v4  ;;  %7835 = vst [vmem:[#allocation51_spill] sm:$0xff] %v6009_v15  ;;  %7836 = vst [vmem:[#allocation52_spill] sm:$0xff] %v6013_v33  ;;  %v6027_v6 = vpack.c.bf16 %v465_v57, %v461_v56  ;;  %v471_v17 = vld [vmem:[#allocation7 + $0x160] sm:$0xff] }
 0x248   :  { %934 = vmatprep.subr.bf16.mxu1 %v5935_v9  ;;  %975 = vmatprep.subr.bf16.mxu0 %v5937_v10  ;;  %7837 = vst [vmem:[#allocation53_spill] sm:$0xff] %v6015_v36  ;;  %7840 = vst [vmem:[#allocation56_spill] sm:$0xff] %v6025_v5  ;;  %v6037_v44 = vpack.c.bf16 %v471_v17, %v467_v16  ;;  %v475_v56 = vld [vmem:[#allocation7 + $0x180] sm:$0xff] }
 0x249   :  { %7841 = vst [vmem:[#allocation57_spill] sm:$0xff] %v6027_v6  ;;  %v479_v57 = vld [vmem:[#allocation7 + $0x1a0] sm:$0xff] }
 0x24a   :  { %4887 = vmatmul.mubr.msk.bf16.gmra.mrb[28].mxu1 %vm617_vm10, %v5831_v47  ;;  %4891 = vmatmul.mubr.msk.bf16.gmra.mrb[36].mxu0 %vm617_vm10, %v5831_v47  ;;  %v433_v47 = vld [vmem:[#allocation7 + $0x30] sm:$0xff]  ;;  %v6049_v16 = vpack.c.bf16 %v479_v57, %v475_v56 }
 0x24b   :  { %935 = vmatpush1.bf16.msra.mxu1 %v5943_v18  ;;  %976 = vmatpush1.bf16.msra.mxu0 %v5945_v21  ;;  %v5975_v2 = vpack.c.bf16 %v433_v47, %v429_v53  ;;  %v452_v53 = vld [vmem:[#allocation7 + $0xc8] sm:$0xff] }
 0x24c   :  { %936 = vmatprep.subr.bf16.mxu1 %v5949_v27  ;;  %977 = vmatprep.subr.bf16.mxu0 %v5951_v28  ;;  %v456_v47 = vld [vmem:[#allocation7 + $0xe8] sm:$0xff] }
 0x24d   :  { %954 = vmatprep.mubr.bf16.mxu1 %v7701_v0  ;;  %995 = vmatprep.mubr.bf16.mxu0 %v7701_v0  ;;  %v6007_v14 = vpack.c.bf16 %v456_v47, %v452_v53  ;;  %v6019_v53 = vpack.c.bf16 %v464_v26, %v460_v23  ;;  %v6021_v47 = vpack.c.bf16 %v466_v30, %v462_v38  ;;  %v469_v23 = vld [vmem:[#allocation7 + $0x150] sm:$0xff] }
 0x24e   :  { %v473_v26 = vld [vmem:[#allocation7 + $0x170] sm:$0xff] }
 0x24f   :  { %937 = vmatpush1.bf16.msra.mxu1 %v5959_v22  ;;  %978 = vmatpush1.bf16.msra.mxu0 %v5961_v42  ;;  %7834 = vst [vmem:[#allocation50_spill] sm:$0xff] %v6007_v14  ;;  %7838 = vst [vmem:[#allocation54_spill] sm:$0xff] %v6019_v53  ;;  %v6039_v46 = vpack.c.bf16 %v473_v26, %v469_v23  ;;  %v483_v23 = vld [vmem:[#allocation7 + $0x1c0] sm:$0xff]  ;;  %v489_v26 = vld [vmem:[#allocation7 + $0x1f0] sm:$0xff] }
 0x250   :  { %1008 = vmatprep.subr.bf16.mxu1 %v5965_v48  ;;  %1049 = vmatprep.subr.bf16.mxu0 %v5967_v52  ;;  %7839 = vst [vmem:[#allocation55_spill] sm:$0xff] %v6021_v47 }
 0x252   :  { %955 = vmatmul.mubr.bf16.vlgmr.msra.gmra.mrb[32].mxu1 %v7701_v0  ;;  %996 = vmatmul.mubr.bf16.vlgmr.msra.gmra.mrb[40].mxu0 %v7701_v0 }
 0x253   :  { %1009 = vmatpush1.bf16.msra.mxu1 %v5973_v1  ;;  %1050 = vmatpush1.bf16.msra.mxu0 %v5975_v2 }
 0x254   :  { %1010 = vmatprep.subr.bf16.mxu1 %v5979_v13  ;;  %1051 = vmatprep.subr.bf16.mxu0 %v5981_v49 }
 0x255   :  { %1040 = vmatprep.mubr.bf16.mxu1 %v7701_v0  ;;  %1081 = vmatprep.mubr.bf16.mxu0 %v7701_v0  ;;  %v468_v0 = vld [vmem:[#allocation7 + $0x148] sm:$0xff] }
 0x256   :  { %v6031_v30 = vpack.c.bf16 %v472_v31, %v468_v0 }
 0x257   :  { %1011 = vmatpush1.bf16.msra.mxu1 %v5987_v29  ;;  %1052 = vmatpush1.bf16.msra.mxu0 %v5989_v32 }
 0x258   :  { %1012 = vmatprep.subr.bf16.mxu1 %v5993_v37  ;;  %1053 = vmatprep.subr.bf16.mxu0 %v5995_v41 }
 0x25b   :  { %1013 = vmatpush1.bf16.msra.mxu1 %v6001_v60  ;;  %1054 = vmatpush1.bf16.msra.mxu0 %v6003_v61  ;;  %v470_v60 = vld [vmem:[#allocation7 + $0x158] sm:$0xff] }
 0x25c   :  { %1014 = vmatprep.subr.bf16.mxu1 %v6007_v14  ;;  %1055 = vmatprep.subr.bf16.mxu0 %v6009_v15  ;;  %v474_v61 = vld [vmem:[#allocation7 + $0x178] sm:$0xff]  ;;  %v476_v15 = vld [vmem:[#allocation7 + $0x188] sm:$0xff] }
 0x25d   :  { %v6033_v38 = vpack.c.bf16 %v474_v61, %v470_v60  ;;  %v478_v14 = vld [vmem:[#allocation7 + $0x198] sm:$0xff]  ;;  %v477_v60 = vld [vmem:[#allocation7 + $0x190] sm:$0xff] }
 0x25e   :  { %v481_v61 = vld [vmem:[#allocation7 + $0x1b0] sm:$0xff] }
 0x25f   :  { %1015 = vmatpush1.bf16.msra.mxu1 %v6013_v33  ;;  %1056 = vmatpush1.bf16.msra.mxu0 %v6015_v36  ;;  %v480_v33 = vld [vmem:[#allocation7 + $0x1a8] sm:$0xff]  ;;  %v482_v36 = vld [vmem:[#allocation7 + $0x1b8] sm:$0xff]  ;;  %v6051_v17 = vpack.c.bf16 %v481_v61, %v477_v60  ;;  %v6115_v61 = vld [vmem:[%s7675_s5] sm:$0xff] }
 0x260   :  { %1016 = vmatprep.subr.bf16.mxu1 %v6019_v53  ;;  %1057 = vmatprep.subr.bf16.mxu0 %v6021_v47  ;;  %v6043_v0 = vpack.c.bf16 %v480_v33, %v476_v15  ;;  %v6045_v31 = vpack.c.bf16 %v482_v36, %v478_v14  ;;  %v484_v47 = vld [vmem:[#allocation7 + $0x1c8] sm:$0xff]  ;;  %v486_v53 = vld [vmem:[#allocation7 + $0x1d8] sm:$0xff]  ;;  %v487_v33 = vld [vmem:[#allocation7 + $0x1e0] sm:$0xff] }
 0x261   :  { %v485_v36 = vld [vmem:[#allocation7 + $0x1d0] sm:$0xff]  ;;  %v6061_v56 = vpack.c.bf16 %v487_v33, %v483_v23 }
 0x262   :  { %v6063_v57 = vpack.c.bf16 %v489_v26, %v485_v36 }
 0x263   :  { %1017 = vmatpush1.bf16.msra.mxu1 %v6025_v5  ;;  %1058 = vmatpush1.bf16.msra.mxu0 %v6027_v6  ;;  %v488_v5 = vld [vmem:[#allocation7 + $0x1e8] sm:$0xff]  ;;  %v490_v6 = vld [vmem:[#allocation7 + $0x1f8] sm:$0xff] }
 0x264   :  { %1018 = vmatprep.subr.bf16.mxu1 %v6031_v30  ;;  %1059 = vmatprep.subr.bf16.mxu0 %v6033_v38  ;;  %v6055_v14 = vpack.c.bf16 %v488_v5, %v484_v47  ;;  %v6057_v15 = vpack.c.bf16 %v490_v6, %v486_v53  ;;  %v7842_v53 = vmov 0   ;;  %v7843_v47 = vlaneseq }
 0x266   :  { %v6108_v5 = vshrl.u32 %v7843_v47, 7 }
 0x267   :  { %1019 = vmatpush1.bf16.msra.mxu1 %v6037_v44  ;;  %1060 = vmatpush1.bf16.msra.mxu0 %v6039_v46 }
 0x268   :  { %1020 = vmatprep.subr.bf16.mxu1 %v6043_v0  ;;  %1061 = vmatprep.subr.bf16.mxu0 %v6045_v31  ;;  %7844 = vst [vmem:[#allocation58_spill] sm:$0xff] %v6108_v5  ;;  %v7735_v6 = vsub.s32 0, %v6108_v5  ;;  %v7740_v60 = vsub.s32 2, %v6108_v5  ;;  %v7747_v23 = vsub.s32 1, %v6108_v5 }
 0x26a   :  { %v6126_v47 = vrot.slane %v6115_v61, %v7735_v6  ;;  %v6140_v33 = vrot.slane %v6115_v61, %v7747_v23 }
 0x26b   :  { %1021 = vmatpush1.bf16.msra.mxu1 %v6049_v16  ;;  %1062 = vmatpush1.bf16.msra.mxu0 %v6051_v17 }
 0x26c   :  { %1022 = vmatprep.subr.bf16.mxu1 %v6055_v14  ;;  %1063 = vmatprep.subr.bf16.mxu0 %v6057_v15 }
 0x26f   :  { %1023 = vmatpush1.bf16.msra.mxu1 %v6061_v56  ;;  %1064 = vmatpush1.bf16.msra.mxu0 %v6063_v57 }
 0x270   :  { %1131 = vmatprep.subr.bf16.mxu1 %v5827_v43  ;;  %1172 = vmatprep.subr.bf16.mxu0 %v5829_v45 }
 0x272   :  { %1041 = vmatmul.mubr.bf16.vlgmr.msra.gmra.mrb[36].mxu1 %v7842_v53  ;;  %1082 = vmatmul.mubr.bf16.vlgmr.msra.gmra.mrb[44].mxu0 %v7842_v53 }
 0x273   :  { %1132 = vmatpush1.bf16.msra.mxu1 %v5855_v58  ;;  %1173 = vmatpush1.bf16.msra.mxu0 %v5857_v59 }
 0x274   :  { %1133 = vmatprep.subr.bf16.mxu1 %v5859_v62  ;;  %1174 = vmatprep.subr.bf16.mxu0 %v5861_v63 }
 0x275   :  { %1163 = vmatprep.mubr.bf16.mxu1 %v7842_v53  ;;  %1204 = vmatprep.mubr.bf16.mxu0 %v7842_v53 }
 0x277   :  { %1134 = vmatpush1.bf16.msra.mxu1 %v5869_v7  ;;  %1175 = vmatpush1.bf16.msra.mxu0 %v5871_v8 }
 0x278   :  { %1135 = vmatprep.subr.bf16.mxu1 %v5875_v11  ;;  %1176 = vmatprep.subr.bf16.mxu0 %v5877_v12 }
 0x27b   :  { %1136 = vmatpush1.bf16.msra.mxu1 %v5883_v19  ;;  %1177 = vmatpush1.bf16.msra.mxu0 %v5885_v20 }
 0x27c   :  { %1137 = vmatprep.subr.bf16.mxu1 %v5889_v24  ;;  %1178 = vmatprep.subr.bf16.mxu0 %v5891_v25 }
 0x27f   :  { %1138 = vmatpush1.bf16.msra.mxu1 %v5899_v34  ;;  %1179 = vmatpush1.bf16.msra.mxu0 %v5901_v35 }
 0x280   :  { %1139 = vmatprep.subr.bf16.mxu1 %v5905_v39  ;;  %1180 = vmatprep.subr.bf16.mxu0 %v5907_v40 }
 0x283   :  { %1140 = vmatpush1.bf16.msra.mxu1 %v5913_v50  ;;  %1181 = vmatpush1.bf16.msra.mxu0 %v5915_v51 }
 0x284   :  { %1141 = vmatprep.subr.bf16.mxu1 %v5919_v54  ;;  %1182 = vmatprep.subr.bf16.mxu0 %v5921_v55 }
 0x287   :  { %1142 = vmatpush1.bf16.msra.mxu1 %v5929_v3  ;;  %1183 = vmatpush1.bf16.msra.mxu0 %v5931_v4 }
 0x288   :  { %1143 = vmatprep.subr.bf16.mxu1 %v5935_v9  ;;  %1184 = vmatprep.subr.bf16.mxu0 %v5937_v10 }
 0x28b   :  { %1144 = vmatpush1.bf16.msra.mxu1 %v5943_v18  ;;  %1185 = vmatpush1.bf16.msra.mxu0 %v5945_v21 }
 0x28c   :  { %1145 = vmatprep.subr.bf16.mxu1 %v5949_v27  ;;  %1186 = vmatprep.subr.bf16.mxu0 %v5951_v28 }
 0x28f   :  { %1146 = vmatpush1.bf16.msra.mxu1 %v5959_v22  ;;  %1187 = vmatpush1.bf16.msra.mxu0 %v5961_v42  ;;  %v7845_v22 = vsub.s32 3, %v6108_v5 }
 0x290   :  { %1218 = vmatprep.subr.bf16.mxu1 %v5965_v48  ;;  %1259 = vmatprep.subr.bf16.mxu0 %v5967_v52  ;;  %v6131_v52 = vrot.slane %v6115_v61, %v7740_v60 }
 0x291   :  { %v6145_v28 = vrot.slane %v6115_v61, %v7845_v22 }
 0x2e5   :  { %v6119_v36 = vpop.f32.mrb[0].mxu1  ;;  %v6121_v26 = vpop.f32.mrb[8].mxu0 }
 0x2e6   :  { %v6133_v48 = vpop.f32.mrb[1].mxu1  ;;  %v6135_v42 = vpop.f32.mrb[9].mxu0  ;;  %v665_v50 = vadd.f32 %v6119_v36, %v6126_v47 }
 0x2e7   :  { %v668_v6 = vpop.f32.mrb[2].mxu1  ;;  %v741_v27 = vpop.f32.mrb[10].mxu0 }
 0x2e8   :  { %v6148_v21 = vadd.f32 %v668_v6, %v6126_v47  ;;  %v6151_v60 = vadd.f32 %v741_v27, %v6131_v52  ;;  %v670_v18 = vpop.f32.mrb[3].mxu1  ;;  %v743_v10 = vpop.f32.mrb[11].mxu0 }
 0x2e9   :  { %v6154_v9 = vadd.f32 %v670_v18, %v6140_v33  ;;  %v6157_v23 = vadd.f32 %v743_v10, %v6145_v28 }
 0x2ea   :  { %7846 = vst [vmem:[#allocation59_spill] sm:$0xff] %v6148_v21  ;;  %7847 = vst [vmem:[#allocation60_spill] sm:$0xff] %v6151_v60 }
 0x2eb   :  { %7848 = vst [vmem:[#allocation61_spill] sm:$0xff] %v6154_v9  ;;  %7849 = vst [vmem:[#allocation62_spill] sm:$0xff] %v6157_v23 }
 0x2ed   :  { %v674_v4 = vpop.f32.mrb[4].mxu1  ;;  %v747_v3 = vpop.f32.mrb[12].mxu0 }
 0x2ee   :  { %v6160_v22 = vadd.f32 %v674_v4, %v6126_v47  ;;  %v6163_v55 = vadd.f32 %v747_v3, %v6131_v52  ;;  %v676_v6 = vpop.f32.mrb[5].mxu1  ;;  %v749_v21 = vpop.f32.mrb[13].mxu0 }
 0x2ef   :  { %v6166_v27 = vadd.f32 %v676_v6, %v6140_v33  ;;  %v6169_v60 = vadd.f32 %v749_v21, %v6145_v28  ;;  %v678_v18 = vpop.f32.mrb[6].mxu1  ;;  %v751_v9 = vpop.f32.mrb[14].mxu0 }
 0x2f0   :  { %7850 = vst [vmem:[#allocation63_spill] sm:$0xff] %v6160_v22  ;;  %7851 = vst [vmem:[#allocation64_spill] sm:$0xff] %v6163_v55  ;;  %v6172_v10 = vadd.f32 %v678_v18, %v6126_v47  ;;  %v6175_v23 = vadd.f32 %v751_v9, %v6131_v52  ;;  %v680_v4 = vpop.f32.mrb[7].mxu1  ;;  %v753_v22 = vpop.f32.mrb[15].mxu0 }
 0x2f1   :  { %7852 = vst [vmem:[#allocation65_spill] sm:$0xff] %v6166_v27  ;;  %7853 = vst [vmem:[#allocation66_spill] sm:$0xff] %v6169_v60  ;;  %v6178_v3 = vadd.f32 %v680_v4, %v6140_v33  ;;  %v6181_v55 = vadd.f32 %v753_v22, %v6145_v28 }
 0x2f2   :  { %7854 = vst [vmem:[#allocation67_spill] sm:$0xff] %v6172_v10  ;;  %7855 = vst [vmem:[#allocation68_spill] sm:$0xff] %v6175_v23 }
 0x2f3   :  { %7856 = vst [vmem:[#allocation69_spill] sm:$0xff] %v6178_v3  ;;  %7857 = vst [vmem:[#allocation70_spill] sm:$0xff] %v6181_v55 }
 0x2f5   :  { %v684_v6 = vpop.f32.mrb[8].mxu1  ;;  %v757_v27 = vpop.f32.mrb[16].mxu0 }
 0x2f6   :  { %v6184_v21 = vadd.f32 %v684_v6, %v6126_v47  ;;  %v6187_v60 = vadd.f32 %v757_v27, %v6131_v52  ;;  %v686_v18 = vpop.f32.mrb[9].mxu1  ;;  %v759_v10 = vpop.f32.mrb[17].mxu0 }
 0x2f7   :  { %v6190_v9 = vadd.f32 %v686_v18, %v6140_v33  ;;  %v6193_v23 = vadd.f32 %v759_v10, %v6145_v28  ;;  %v688_v4 = vpop.f32.mrb[10].mxu1  ;;  %v761_v3 = vpop.f32.mrb[18].mxu0 }
 0x2f8   :  { %7858 = vst [vmem:[#allocation71_spill] sm:$0xff] %v6184_v21  ;;  %7859 = vst [vmem:[#allocation72_spill] sm:$0xff] %v6187_v60  ;;  %v6196_v22 = vadd.f32 %v688_v4, %v6126_v47  ;;  %v6199_v55 = vadd.f32 %v761_v3, %v6131_v52  ;;  %v690_v6 = vpop.f32.mrb[11].mxu1  ;;  %v763_v21 = vpop.f32.mrb[19].mxu0 }
 0x2f9   :  { %7860 = vst [vmem:[#allocation73_spill] sm:$0xff] %v6190_v9  ;;  %7861 = vst [vmem:[#allocation74_spill] sm:$0xff] %v6193_v23  ;;  %v6202_v27 = vadd.f32 %v690_v6, %v6140_v33  ;;  %v6205_v60 = vadd.f32 %v763_v21, %v6145_v28 }
 0x2fa   :  { %7862 = vst [vmem:[#allocation75_spill] sm:$0xff] %v6196_v22  ;;  %7863 = vst [vmem:[#allocation76_spill] sm:$0xff] %v6199_v55 }
 0x2fb   :  { %7864 = vst [vmem:[#allocation77_spill] sm:$0xff] %v6202_v27  ;;  %7865 = vst [vmem:[#allocation78_spill] sm:$0xff] %v6205_v60 }
 0x2fd   :  { %v694_v18 = vpop.f32.mrb[12].mxu1  ;;  %v767_v9 = vpop.f32.mrb[20].mxu0 }
 0x2fe   :  { %v6208_v10 = vadd.f32 %v694_v18, %v6126_v47  ;;  %v6211_v23 = vadd.f32 %v767_v9, %v6131_v52  ;;  %v696_v4 = vpop.f32.mrb[13].mxu1  ;;  %v769_v22 = vpop.f32.mrb[21].mxu0 }
 0x2ff   :  { %v6216_v6 = vadd.f32 %v696_v4, %v6140_v33  ;;  %v6219_v21 = vadd.f32 %v769_v22, %v6145_v28  ;;  %v698_v60 = vpop.f32.mrb[14].mxu1  ;;  %v771_v27 = vpop.f32.mrb[22].mxu0 }
 0x300   :  { %7866 = vst [vmem:[#allocation79_spill] sm:$0xff] %v6208_v10  ;;  %7867 = vst [vmem:[#allocation80_spill] sm:$0xff] %v6211_v23  ;;  %v6224_v9 = vadd.f32 %v698_v60, %v6126_v47  ;;  %v6227_v23 = vadd.f32 %v771_v27, %v6131_v52  ;;  %v700_v3 = vpop.f32.mrb[15].mxu1  ;;  %v773_v55 = vpop.f32.mrb[23].mxu0  ;;  %v7875_v10 = vsub.s32 6, %v6108_v5  ;;  %v7876_v27 = vsub.s32 5, %v6108_v5 }
 0x301   :  { %7868 = vst [vmem:[#allocation81_spill] sm:$0xff] %v6216_v6  ;;  %7869 = vst [vmem:[#allocation82_spill] sm:$0xff] %v6219_v21  ;;  %v6230_v4 = vadd.f32 %v700_v3, %v6140_v33  ;;  %v6233_v22 = vadd.f32 %v773_v55, %v6145_v28  ;;  %v7874_v21 = vsub.s32 4, %v6108_v5  ;;  %v7877_v3 = vsub.s32 7, %v6108_v5 }
 0x302   :  { %7870 = vst [vmem:[#allocation83_spill] sm:$0xff] %v6224_v9  ;;  %7871 = vst [vmem:[#allocation84_spill] sm:$0xff] %v6227_v23  ;;  %v6243_v60 = vrot.slane %v6115_v61, %v7875_v10  ;;  %v6248_v23 = vrot.slane %v6115_v61, %v7876_v27 }
 0x303   :  { %7872 = vst [vmem:[#allocation85_spill] sm:$0xff] %v6230_v4  ;;  %7873 = vst [vmem:[#allocation86_spill] sm:$0xff] %v6233_v22  ;;  %v6238_v18 = vrot.slane %v6115_v61, %v7874_v21  ;;  %v6253_v55 = vrot.slane %v6115_v61, %v7877_v3 }
 0x305   :  { %v810_v22 = vpop.f32.mrb[16].mxu1  ;;  %v883_v4 = vpop.f32.mrb[24].mxu0 }
 0x306   :  { %v6256_v21 = vadd.f32 %v810_v22, %v6238_v18  ;;  %v6259_v9 = vadd.f32 %v883_v4, %v6243_v60  ;;  %v812_v10 = vpop.f32.mrb[17].mxu1  ;;  %v885_v6 = vpop.f32.mrb[25].mxu0 }
 0x307   :  { %v6262_v54 = vadd.f32 %v812_v10, %v6248_v23  ;;  %v6265_v27 = vadd.f32 %v885_v6, %v6253_v55  ;;  %v814_v5 = vpop.f32.mrb[18].mxu1  ;;  %v887_v51 = vpop.f32.mrb[26].mxu0 }
 0x308   :  { %7878 = vst [vmem:[#allocation87_spill] sm:$0xff] %v6256_v21  ;;  %7879 = vst [vmem:[#allocation88_spill] sm:$0xff] %v6259_v9  ;;  %v6268_v61 = vadd.f32 %v814_v5, %v6238_v18  ;;  %v6271_v3 = vadd.f32 %v887_v51, %v6243_v60  ;;  %v816_v22 = vpop.f32.mrb[19].mxu1  ;;  %v889_v21 = vpop.f32.mrb[27].mxu0 }
 0x309   :  { %7880 = vst [vmem:[#allocation89_spill] sm:$0xff] %v6262_v54  ;;  %7881 = vst [vmem:[#allocation90_spill] sm:$0xff] %v6265_v27  ;;  %v6274_v4 = vadd.f32 %v816_v22, %v6248_v23  ;;  %v6277_v9 = vadd.f32 %v889_v21, %v6253_v55 }
 0x30a   :  { %7882 = vst [vmem:[#allocation91_spill] sm:$0xff] %v6268_v61  ;;  %7883 = vst [vmem:[#allocation92_spill] sm:$0xff] %v6271_v3 }
 0x30b   :  { %7884 = vst [vmem:[#allocation93_spill] sm:$0xff] %v6274_v4  ;;  %7885 = vst [vmem:[#allocation94_spill] sm:$0xff] %v6277_v9 }
 0x30d   :  { %v820_v10 = vpop.f32.mrb[20].mxu1  ;;  %v893_v54 = vpop.f32.mrb[28].mxu0 }
 0x30e   :  { %v6280_v6 = vadd.f32 %v820_v10, %v6238_v18  ;;  %v6283_v27 = vadd.f32 %v893_v54, %v6243_v60  ;;  %v822_v5 = vpop.f32.mrb[21].mxu1  ;;  %v895_v61 = vpop.f32.mrb[29].mxu0 }
 0x30f   :  { %v6286_v51 = vadd.f32 %v822_v5, %v6248_v23  ;;  %v6289_v3 = vadd.f32 %v895_v61, %v6253_v55  ;;  %v824_v22 = vpop.f32.mrb[22].mxu1  ;;  %v897_v4 = vpop.f32.mrb[30].mxu0 }
 0x310   :  { %7886 = vst [vmem:[#allocation95_spill] sm:$0xff] %v6280_v6  ;;  %7887 = vst [vmem:[#allocation96_spill] sm:$0xff] %v6283_v27  ;;  %v6292_v21 = vadd.f32 %v824_v22, %v6238_v18  ;;  %v6295_v9 = vadd.f32 %v897_v4, %v6243_v60  ;;  %v826_v10 = vpop.f32.mrb[23].mxu1  ;;  %v899_v6 = vpop.f32.mrb[31].mxu0 }
 0x311   :  { %7888 = vst [vmem:[#allocation97_spill] sm:$0xff] %v6286_v51  ;;  %7889 = vst [vmem:[#allocation98_spill] sm:$0xff] %v6289_v3  ;;  %v6298_v54 = vadd.f32 %v826_v10, %v6248_v23  ;;  %v6301_v27 = vadd.f32 %v899_v6, %v6253_v55 }
 0x312   :  { %7890 = vst [vmem:[#allocation99_spill] sm:$0xff] %v6292_v21  ;;  %7891 = vst [vmem:[#allocation100_spill] sm:$0xff] %v6295_v9 }
 0x313   :  { %7892 = vst [vmem:[#allocation101_spill] sm:$0xff] %v6298_v54  ;;  %7893 = vst [vmem:[#allocation102_spill] sm:$0xff] %v6301_v27 }
 0x315   :  { %v830_v5 = vpop.f32.mrb[24].mxu1  ;;  %v903_v51 = vpop.f32.mrb[32].mxu0 }
 0x316   :  { %v6304_v61 = vadd.f32 %v830_v5, %v6238_v18  ;;  %v6307_v3 = vadd.f32 %v903_v51, %v6243_v60  ;;  %v832_v22 = vpop.f32.mrb[25].mxu1  ;;  %v905_v21 = vpop.f32.mrb[33].mxu0 }
 0x317   :  { %v6310_v4 = vadd.f32 %v832_v22, %v6248_v23  ;;  %v6313_v9 = vadd.f32 %v905_v21, %v6253_v55  ;;  %v834_v10 = vpop.f32.mrb[26].mxu1  ;;  %v907_v54 = vpop.f32.mrb[34].mxu0 }
 0x318   :  { %7894 = vst [vmem:[#allocation103_spill] sm:$0xff] %v6304_v61  ;;  %7895 = vst [vmem:[#allocation104_spill] sm:$0xff] %v6307_v3  ;;  %v6316_v6 = vadd.f32 %v834_v10, %v6238_v18  ;;  %v6319_v27 = vadd.f32 %v907_v54, %v6243_v60  ;;  %v836_v5 = vpop.f32.mrb[27].mxu1  ;;  %v909_v61 = vpop.f32.mrb[35].mxu0 }
 0x319   :  { %7896 = vst [vmem:[#allocation105_spill] sm:$0xff] %v6310_v4  ;;  %7897 = vst [vmem:[#allocation106_spill] sm:$0xff] %v6313_v9  ;;  %v6322_v51 = vadd.f32 %v836_v5, %v6248_v23  ;;  %v6325_v3 = vadd.f32 %v909_v61, %v6253_v55 }
 0x31a   :  { %7898 = vst [vmem:[#allocation107_spill] sm:$0xff] %v6316_v6  ;;  %7899 = vst [vmem:[#allocation108_spill] sm:$0xff] %v6319_v27 }
 0x31b   :  { %7900 = vst [vmem:[#allocation109_spill] sm:$0xff] %v6322_v51  ;;  %7901 = vst [vmem:[#allocation110_spill] sm:$0xff] %v6325_v3 }
 0x31d   :  { %v840_v22 = vpop.f32.mrb[28].mxu1  ;;  %v913_v4 = vpop.f32.mrb[36].mxu0 }
 0x31e   :  { %v6328_v21 = vadd.f32 %v840_v22, %v6238_v18  ;;  %v6331_v9 = vadd.f32 %v913_v4, %v6243_v60  ;;  %v842_v10 = vpop.f32.mrb[29].mxu1  ;;  %v915_v6 = vpop.f32.mrb[37].mxu0  ;;  %v738_v22 = vadd.f32 %v6121_v26, %v6131_v52  ;;  %v667_v4 = vadd.f32 %v6133_v48, %v6140_v33 }
 0x31f   :  { %v6334_v54 = vadd.f32 %v842_v10, %v6248_v23  ;;  %v6337_v27 = vadd.f32 %v915_v6, %v6253_v55  ;;  %v844_v5 = vpop.f32.mrb[30].mxu1  ;;  %v917_v51 = vpop.f32.mrb[38].mxu0  ;;  %v740_v10 = vadd.f32 %v6135_v42, %v6145_v28 }
 0x320   :  { %7902 = vst [vmem:[#allocation111_spill] sm:$0xff] %v6328_v21  ;;  %7903 = vst [vmem:[#allocation112_spill] sm:$0xff] %v6331_v9  ;;  %v846_v61 = vpop.f32.mrb[31].mxu1  ;;  %v919_v3 = vpop.f32.mrb[39].mxu0 }
 0x321   :  { %7904 = vst [vmem:[#allocation113_spill] sm:$0xff] %v6334_v54  ;;  %7905 = vst [vmem:[#allocation114_spill] sm:$0xff] %v6337_v27 }
 0x325   :  { %v956_v54 = vpop.f32.mrb[32].mxu1  ;;  %v997_v9 = vpop.f32.mrb[40].mxu0 }
 0x326   :  { %v1004_v6 = vadd.f32 %v956_v54, %v665_v50  ;;  %v1006_v27 = vadd.f32 %v997_v9, %v738_v22  ;;  %v958_v21 = vpop.f32.mrb[33].mxu1  ;;  %v999_v40 = vpop.f32.mrb[41].mxu0  ;;  %v920_v22 = vadd.f32 %v919_v3, %v6253_v55 }
 0x327   :  { %v1005_v39 = vadd.f32 %v958_v21, %v667_v4  ;;  %v1007_v35 = vadd.f32 %v999_v40, %v740_v10  ;;  %v960_v34 = vpop.f32.mrb[34].mxu1  ;;  %v1001_v25 = vpop.f32.mrb[42].mxu0 }
 0x328   :  { %v1094_v36 = vmul.f32 0.5, %v1004_v6  ;;  %v961_v47 = vpop.f32.mrb[35].mxu1  ;;  %v1002_v24 = vpop.f32.mrb[43].mxu0 }
 0x329   :  { %v1098_v52 = vmul.f32 0.5, %v1005_v39  ;;  %v1103_v48 = vmul.f32 0.5, %v1007_v35  ;;  %v845_v39 = vadd.f32 %v844_v5, %v6238_v18  ;;  %v918_v35 = vadd.f32 %v917_v51, %v6243_v60 }
 0x32a   :  { %5027 = vtanh.f32 %v1094_v36 }
 0x32b   :  { %5029 = vtanh.f32 %v1098_v52 }
 0x32c   :  { %5031 = vtanh.f32 %v1006_v27  ;;  %v847_v27 = vadd.f32 %v846_v61, %v6248_v23 }
 0x32d   :  { %5033 = vtanh.f32 %v1103_v48 }
 0x334   :  { %v5028_v33 = vpop.eup %5027 }
 0x335   :  { %v5030_v28 = vpop.eup %5029  ;;  %v1096_v42 = vmul.f32 0.5, %v5028_v33 }
 0x336   :  { %v1100_v26 = vmul.f32 0.5, %v5030_v28  ;;  %v5032_v9 = vpop.eup %5031 }
 0x337   :  { %v1097_v50 = vadd.f32 0.5, %v1096_v42  ;;  %v5034_v24 = vpop.eup %5033 }
 0x338   :  { %v1101_v54 = vadd.f32 0.5, %v1100_v26  ;;  %v1105_v25 = vmul.f32 0.5, %v5034_v24  ;;  %v7908_v24 = vld [vmem:[#allocation49_spill] sm:$0xff] }
 0x339   :  { %v1108_v21 = vmul.f32 %v5032_v9, %v1097_v50 }
 0x33a   :  { %v1107_v40 = vmul.f32 0.0, %v1101_v54  ;;  %v1106_v48 = vadd.f32 0.5, %v1105_v25 }
 0x33c   :  { %v6347_v34 = vadd.f32 %v1108_v21, %v1107_v40  ;;  %v7907_v40 = vld [vmem:[#allocation48_spill] sm:$0xff] }
 0x33e   :  { %5035 = vtanh.f32 %v6347_v34 }
 0x345   :  { %v1042_v4 = vpop.f32.mrb[36].mxu1  ;;  %v1083_v10 = vpop.f32.mrb[44].mxu0 }
 0x346   :  { %v1090_v6 = vadd.f32 %v1042_v4, %v845_v39  ;;  %v1092_v36 = vadd.f32 %v1083_v10, %v918_v35  ;;  %v1044_v47 = vpop.f32.mrb[37].mxu1  ;;  %v1085_v52 = vpop.f32.mrb[45].mxu0  ;;  %v7909_v39 = vld [vmem:[#allocation50_spill] sm:$0xff]  ;;  %v7910_v35 = vld [vmem:[#allocation51_spill] sm:$0xff] }
 0x347   :  { %v1091_v33 = vadd.f32 %v1044_v47, %v847_v27  ;;  %v1093_v28 = vadd.f32 %v1085_v52, %v920_v22  ;;  %v1046_v42 = vpop.f32.mrb[38].mxu1  ;;  %v1087_v26 = vpop.f32.mrb[46].mxu0  ;;  %v7913_v47 = vld [vmem:[#allocation54_spill] sm:$0xff]  ;;  %v7914_v52 = vld [vmem:[#allocation55_spill] sm:$0xff] }
 0x348   :  { %v5036_v50 = vpop.eup %5035  ;;  %v1112_v9 = vmul.f32 0.5, %v1090_v6  ;;  %v1047_v18 = vpop.f32.mrb[39].mxu1  ;;  %v7911_v6 = vld [vmem:[#allocation52_spill] sm:$0xff] }
 0x349   :  { %v1088_v5 = vpop.f32.mrb[47].mxu0  ;;  %v6354_v60 = vmul.f32 %v5036_v50, %v1106_v48  ;;  %v1116_v23 = vmul.f32 0.5, %v1091_v33  ;;  %v1121_v3 = vmul.f32 0.5, %v1093_v28  ;;  %v7915_v33 = vld [vmem:[#allocation56_spill] sm:$0xff]  ;;  %v7916_v28 = vld [vmem:[#allocation57_spill] sm:$0xff] }
 0x34a   :  { %5037 = vtanh.f32 %v1112_v9 }
 0x34b   :  { %7906 = vst [vmem:[#allocation115_spill] sm:$0xff] %v6354_v60  ;;  %5039 = vtanh.f32 %v1116_v23  ;;  %v1130_v55 = vpack.c.bf16 %v6354_v60, %v6354_v60  ;;  %v7918_v23 = vld [vmem:[#allocation26_spill] sm:$0xff]  ;;  %v7936_v60 = vld [vmem:[#allocation44_spill] sm:$0xff] }
 0x34c   :  { %5041 = vtanh.f32 %v1092_v36  ;;  %v7912_v36 = vld [vmem:[#allocation53_spill] sm:$0xff] }
 0x34d   :  { %1164 = vmatmul.mubr.bf16.vlgmr.msra.gmra.mrb[40].mxu1 %v1130_v55  ;;  %1205 = vmatmul.mubr.bf16.vlgmr.msra.gmra.mrb[48].mxu0 %v1130_v55  ;;  %5043 = vtanh.f32 %v1121_v3  ;;  %v7919_v55 = vld [vmem:[#allocation27_spill] sm:$0xff]  ;;  %v7920_v3 = vld [vmem:[#allocation28_spill] sm:$0xff] }
 0x34e   :  { %1219 = vmatpush1.bf16.msra.mxu1 %v5973_v1  ;;  %1260 = vmatpush1.bf16.msra.mxu0 %v5975_v2 }
 0x34f   :  { %1220 = vmatprep.subr.bf16.mxu1 %v5979_v13  ;;  %1261 = vmatprep.subr.bf16.mxu0 %v5981_v49 }
 0x350   :  { %1250 = vmatprep.mubr.bf16.mxu1 %v7842_v53  ;;  %1291 = vmatprep.mubr.bf16.mxu0 %v7842_v53 }
 0x352   :  { %1221 = vmatpush1.bf16.msra.mxu1 %v5987_v29  ;;  %1262 = vmatpush1.bf16.msra.mxu0 %v5989_v32 }
 0x353   :  { %1222 = vmatprep.subr.bf16.mxu1 %v5993_v37  ;;  %1263 = vmatprep.subr.bf16.mxu0 %v5995_v41 }
 0x354   :  { %v5038_v51 = vpop.eup %5037 }
 0x355   :  { %v5040_v61 = vpop.eup %5039  ;;  %v1114_v54 = vmul.f32 0.5, %v5038_v51  ;;  %v7921_v51 = vld [vmem:[#allocation29_spill] sm:$0xff] }
 0x356   :  { %v1118_v21 = vmul.f32 0.5, %v5040_v61  ;;  %1223 = vmatpush1.bf16.msra.mxu1 %v7907_v40  ;;  %1264 = vmatpush1.bf16.msra.mxu0 %v7908_v24  ;;  %v5042_v27 = vpop.eup %5041  ;;  %v7922_v61 = vld [vmem:[#allocation30_spill] sm:$0xff] }
 0x357   :  { %v1115_v25 = vadd.f32 0.5, %v1114_v54  ;;  %1224 = vmatprep.subr.bf16.mxu1 %v7909_v39  ;;  %1265 = vmatprep.subr.bf16.mxu0 %v7910_v35  ;;  %v5044_v42 = vpop.eup %5043  ;;  %v7923_v54 = vld [vmem:[#allocation31_spill] sm:$0xff] }
 0x358   :  { %v1119_v22 = vadd.f32 0.5, %v1118_v21  ;;  %v1123_v26 = vmul.f32 0.5, %v5044_v42  ;;  %v7924_v21 = vld [vmem:[#allocation32_spill] sm:$0xff]  ;;  %v7930_v42 = vld [vmem:[#allocation38_spill] sm:$0xff] }
 0x359   :  { %v1126_v4 = vmul.f32 %v5042_v27, %v1115_v25  ;;  %v7925_v25 = vld [vmem:[#allocation33_spill] sm:$0xff]  ;;  %v7926_v27 = vld [vmem:[#allocation34_spill] sm:$0xff] }
 0x35a   :  { %v1125_v10 = vmul.f32 0.0, %v1119_v22  ;;  %1225 = vmatpush1.bf16.msra.mxu1 %v7911_v6  ;;  %1266 = vmatpush1.bf16.msra.mxu0 %v7912_v36  ;;  %v1124_v50 = vadd.f32 0.5, %v1123_v26  ;;  %v7927_v22 = vld [vmem:[#allocation35_spill] sm:$0xff] }
 0x35b   :  { %1226 = vmatprep.subr.bf16.mxu1 %v7913_v47  ;;  %1267 = vmatprep.subr.bf16.mxu0 %v7914_v52  ;;  %v7931_v26 = vld [vmem:[#allocation39_spill] sm:$0xff] }
 0x35c   :  { %v6376_v48 = vadd.f32 %v1126_v4, %v1125_v10  ;;  %v7928_v4 = vld [vmem:[#allocation36_spill] sm:$0xff]  ;;  %v7929_v10 = vld [vmem:[#allocation37_spill] sm:$0xff] }
 0x35e   :  { %5045 = vtanh.f32 %v6376_v48  ;;  %1227 = vmatpush1.bf16.msra.mxu1 %v7915_v33  ;;  %1268 = vmatpush1.bf16.msra.mxu0 %v7916_v28 }
 0x35f   :  { %1228 = vmatprep.subr.bf16.mxu1 %v6031_v30  ;;  %1269 = vmatprep.subr.bf16.mxu0 %v6033_v38 }
 0x362   :  { %1229 = vmatpush1.bf16.msra.mxu1 %v6037_v44  ;;  %1270 = vmatpush1.bf16.msra.mxu0 %v6039_v46 }
 0x363   :  { %1230 = vmatprep.subr.bf16.mxu1 %v6043_v0  ;;  %1271 = vmatprep.subr.bf16.mxu0 %v6045_v31 }
 0x366   :  { %1231 = vmatpush1.bf16.msra.mxu1 %v6049_v16  ;;  %1272 = vmatpush1.bf16.msra.mxu0 %v6051_v17 }
 0x367   :  { %1232 = vmatprep.subr.bf16.mxu1 %v6055_v14  ;;  %1273 = vmatprep.subr.bf16.mxu0 %v6057_v15 }
 0x368   :  { %v5046_v9 = vpop.eup %5045 }
 0x369   :  { %v6391_v18 = vmul.f32 %v5046_v9, %v1124_v50  ;;  %v7932_v50 = vld [vmem:[#allocation40_spill] sm:$0xff]  ;;  %v7933_v9 = vld [vmem:[#allocation41_spill] sm:$0xff] }
 0x36a   :  { %1233 = vmatpush1.bf16.msra.mxu1 %v6061_v56  ;;  %1274 = vmatpush1.bf16.msra.mxu0 %v6063_v57 }
 0x36b   :  { %7917 = vst [vmem:[#allocation48_spill] sm:$0xff] %v6391_v18  ;;  %v1217_v5 = vpack.c.bf16 %v6391_v18, %v6391_v18  ;;  %1341 = vmatprep.subr.bf16.mxu1 %v5827_v43  ;;  %1382 = vmatprep.subr.bf16.mxu0 %v5829_v45  ;;  %v7935_v18 = vld [vmem:[#allocation43_spill] sm:$0xff] }
 0x36d   :  { %1251 = vmatmul.mubr.bf16.vlgmr.msra.gmra.mrb[44].mxu1 %v1217_v5  ;;  %1292 = vmatmul.mubr.bf16.vlgmr.msra.gmra.mrb[52].mxu0 %v1217_v5  ;;  %v7934_v5 = vld [vmem:[#allocation42_spill] sm:$0xff] }
 0x36e   :  { %1342 = vmatpush1.bf16.msra.mxu1 %v5855_v58  ;;  %1383 = vmatpush1.bf16.msra.mxu0 %v5857_v59 }
 0x36f   :  { %1343 = vmatprep.subr.bf16.mxu1 %v5859_v62  ;;  %1384 = vmatprep.subr.bf16.mxu0 %v5861_v63 }
 0x370   :  { %1373 = vmatprep.mubr.bf16.mxu1 %v7842_v53  ;;  %1414 = vmatprep.mubr.bf16.mxu0 %v7842_v53 }
 0x372   :  { %1344 = vmatpush1.bf16.msra.mxu1 %v5869_v7  ;;  %1385 = vmatpush1.bf16.msra.mxu0 %v5871_v8 }
 0x373   :  { %1345 = vmatprep.subr.bf16.mxu1 %v5875_v11  ;;  %1386 = vmatprep.subr.bf16.mxu0 %v5877_v12 }
 0x376   :  { %1346 = vmatpush1.bf16.msra.mxu1 %v5883_v19  ;;  %1387 = vmatpush1.bf16.msra.mxu0 %v5885_v20 }
 0x377   :  { %1347 = vmatprep.subr.bf16.mxu1 %v7918_v23  ;;  %1388 = vmatprep.subr.bf16.mxu0 %v7919_v55 }
 0x37a   :  { %1348 = vmatpush1.bf16.msra.mxu1 %v7920_v3  ;;  %1389 = vmatpush1.bf16.msra.mxu0 %v7921_v51  ;;  %v7943_v51 = vld [vmem:[#allocation62_spill] sm:$0xff] }
 0x37b   :  { %1349 = vmatprep.subr.bf16.mxu1 %v7922_v61  ;;  %1390 = vmatprep.subr.bf16.mxu0 %v7923_v54  ;;  %v7942_v61 = vld [vmem:[#allocation61_spill] sm:$0xff] }
 0x37e   :  { %1350 = vmatpush1.bf16.msra.mxu1 %v7924_v21  ;;  %1391 = vmatpush1.bf16.msra.mxu0 %v7925_v25  ;;  %v7940_v25 = vld [vmem:[#allocation59_spill] sm:$0xff]  ;;  %v7941_v21 = vld [vmem:[#allocation60_spill] sm:$0xff] }
 0x37f   :  { %1351 = vmatprep.subr.bf16.mxu1 %v7926_v27  ;;  %1392 = vmatprep.subr.bf16.mxu0 %v7927_v22  ;;  %v7937_v27 = vld [vmem:[#allocation45_spill] sm:$0xff]  ;;  %v7938_v22 = vld [vmem:[#allocation46_spill] sm:$0xff] }
 0x382   :  { %1352 = vmatpush1.bf16.msra.mxu1 %v7928_v4  ;;  %1393 = vmatpush1.bf16.msra.mxu0 %v7929_v10  ;;  %v7939_v4 = vld [vmem:[#allocation47_spill] sm:$0xff] }
 0x383   :  { %1353 = vmatprep.subr.bf16.mxu1 %v7930_v42  ;;  %1394 = vmatprep.subr.bf16.mxu0 %v7931_v26 }
 0x386   :  { %1354 = vmatpush1.bf16.msra.mxu1 %v7932_v50  ;;  %1395 = vmatpush1.bf16.msra.mxu0 %v7933_v9 }
 0x387   :  { %1355 = vmatprep.subr.bf16.mxu1 %v7934_v5  ;;  %1396 = vmatprep.subr.bf16.mxu0 %v7935_v18 }
 0x38a   :  { %1356 = vmatpush1.bf16.msra.mxu1 %v7936_v60  ;;  %1397 = vmatpush1.bf16.msra.mxu0 %v7937_v27 }
 0x38b   :  { %1428 = vmatprep.subr.bf16.mxu1 %v7938_v22  ;;  %1469 = vmatprep.subr.bf16.mxu0 %v7939_v4 }
 0x420   :  { %v1165_v10 = vpop.f32.mrb[40].mxu1  ;;  %v1206_v42 = vpop.f32.mrb[48].mxu0 }
 0x421   :  { %v1213_v26 = vadd.f32 %v1165_v10, %v7940_v25  ;;  %v1215_v50 = vadd.f32 %v1206_v42, %v7941_v21  ;;  %v1167_v54 = vpop.f32.mrb[41].mxu1  ;;  %v1208_v9 = vpop.f32.mrb[49].mxu0 }
 0x422   :  { %v1214_v5 = vadd.f32 %v1167_v54, %v7942_v61  ;;  %v1216_v18 = vadd.f32 %v1208_v9, %v7943_v51  ;;  %v1169_v3 = vpop.f32.mrb[42].mxu1  ;;  %v1210_v60 = vpop.f32.mrb[50].mxu0 }
 0x423   :  { %v1304_v55 = vmul.f32 0.5, %v1213_v26  ;;  %v1170_v27 = vpop.f32.mrb[43].mxu1  ;;  %v1211_v23 = vpop.f32.mrb[51].mxu0  ;;  %v7946_v26 = vld [vmem:[#allocation112_spill] sm:$0xff] }
 0x424   :  { %v1308_v22 = vmul.f32 0.5, %v1214_v5  ;;  %v1313_v4 = vmul.f32 0.5, %v1216_v18  ;;  %v7945_v18 = vld [vmem:[#allocation111_spill] sm:$0xff]  ;;  %v7947_v5 = vld [vmem:[#allocation113_spill] sm:$0xff] }
 0x425   :  { %5047 = vtanh.f32 %v1304_v55 }
 0x426   :  { %5049 = vtanh.f32 %v1308_v22 }
 0x427   :  { %5051 = vtanh.f32 %v1215_v50 }
 0x428   :  { %5053 = vtanh.f32 %v1313_v4 }
 0x42f   :  { %v5048_v20 = vpop.eup %5047 }
 0x430   :  { %v5050_v25 = vpop.eup %5049  ;;  %v1306_v10 = vmul.f32 0.5, %v5048_v20 }
 0x431   :  { %v1310_v21 = vmul.f32 0.5, %v5050_v25  ;;  %v5052_v19 = vpop.eup %5051 }
 0x432   :  { %v1307_v42 = vadd.f32 0.5, %v1306_v10  ;;  %v5054_v23 = vpop.eup %5053 }
 0x433   :  { %v1311_v61 = vadd.f32 0.5, %v1310_v21  ;;  %v1315_v55 = vmul.f32 0.5, %v5054_v23 }
 0x434   :  { %v1318_v54 = vmul.f32 %v5052_v19, %v1307_v42  ;;  %v7948_v19 = vld [vmem:[#allocation114_spill] sm:$0xff] }
 0x435   :  { %v1317_v3 = vmul.f32 %v1311_v61, %v6347_v34  ;;  %v1316_v9 = vadd.f32 0.5, %v1315_v55 }
 0x437   :  { %v6438_v60 = vadd.f32 %v1318_v54, %v1317_v3 }
 0x439   :  { %7944 = vst [vmem:[#allocation49_spill] sm:$0xff] %v6438_v60  ;;  %5055 = vtanh.f32 %v6438_v60 }
 0x440   :  { %v1252_v51 = vpop.f32.mrb[44].mxu1  ;;  %v1293_v27 = vpop.f32.mrb[52].mxu0 }
 0x441   :  { %v1300_v22 = vadd.f32 %v1252_v51, %v7945_v18  ;;  %v1302_v20 = vadd.f32 %v1293_v27, %v7946_v26  ;;  %v1254_v50 = vpop.f32.mrb[45].mxu1  ;;  %v1295_v4 = vpop.f32.mrb[53].mxu0 }
 0x442   :  { %v1301_v25 = vadd.f32 %v1254_v50, %v7947_v5  ;;  %v1303_v10 = vadd.f32 %v1295_v4, %v7948_v19  ;;  %v1256_v34 = vpop.f32.mrb[46].mxu1  ;;  %v1297_v21 = vpop.f32.mrb[54].mxu0 }
 0x443   :  { %v5056_v42 = vpop.eup %5055  ;;  %v1322_v61 = vmul.f32 0.5, %v1300_v22  ;;  %v1257_v54 = vpop.f32.mrb[47].mxu1 }
 0x444   :  { %v1298_v3 = vpop.f32.mrb[55].mxu0  ;;  %v6445_v23 = vmul.f32 %v5056_v42, %v1316_v9  ;;  %v1326_v60 = vmul.f32 0.5, %v1301_v25  ;;  %v1331_v55 = vmul.f32 0.5, %v1303_v10  ;;  %v7951_v42 = vld [vmem:[#allocation24_spill] sm:$0xff]  ;;  %v7953_v54 = vld [vmem:[#allocation26_spill] sm:$0xff] }
 0x445   :  { %5057 = vtanh.f32 %v1322_v61  ;;  %v7952_v61 = vld [vmem:[#allocation25_spill] sm:$0xff]  ;;  %v7954_v3 = vld [vmem:[#allocation27_spill] sm:$0xff] }
 0x446   :  { %7949 = vst [vmem:[#allocation50_spill] sm:$0xff] %v6445_v23  ;;  %5059 = vtanh.f32 %v1326_v60  ;;  %v1340_v51 = vpack.c.bf16 %v6445_v23, %v6445_v23  ;;  %v7972_v23 = vld [vmem:[#allocation45_spill] sm:$0xff] }
 0x447   :  { %5061 = vtanh.f32 %v1302_v20 }
 0x448   :  { %1374 = vmatmul.mubr.bf16.vlgmr.msra.gmra.mrb[48].mxu1 %v1340_v51  ;;  %1415 = vmatmul.mubr.bf16.vlgmr.msra.gmra.mrb[56].mxu0 %v1340_v51  ;;  %5063 = vtanh.f32 %v1331_v55  ;;  %v7955_v51 = vld [vmem:[#allocation28_spill] sm:$0xff]  ;;  %v7956_v55 = vld [vmem:[#allocation29_spill] sm:$0xff] }
 0x449   :  { %1429 = vmatpush1.bf16.msra.mxu1 %v5973_v1  ;;  %1470 = vmatpush1.bf16.msra.mxu0 %v5975_v2 }
 0x44a   :  { %1430 = vmatprep.subr.bf16.mxu1 %v5979_v13  ;;  %1471 = vmatprep.subr.bf16.mxu0 %v5981_v49 }
 0x44b   :  { %1460 = vmatprep.mubr.bf16.mxu1 %v7842_v53  ;;  %1501 = vmatprep.mubr.bf16.mxu0 %v7842_v53 }
 0x44d   :  { %1431 = vmatpush1.bf16.msra.mxu1 %v5987_v29  ;;  %1472 = vmatpush1.bf16.msra.mxu0 %v5989_v32 }
 0x44e   :  { %1432 = vmatprep.subr.bf16.mxu1 %v5993_v37  ;;  %1473 = vmatprep.subr.bf16.mxu0 %v5995_v41 }
 0x44f   :  { %v5058_v60 = vpop.eup %5057 }
 0x450   :  { %v5060_v27 = vpop.eup %5059  ;;  %v1324_v18 = vmul.f32 0.5, %v5058_v60  ;;  %v7957_v60 = vld [vmem:[#allocation30_spill] sm:$0xff] }
 0x451   :  { %v1328_v22 = vmul.f32 0.5, %v5060_v27  ;;  %1433 = vmatpush1.bf16.msra.mxu1 %v7907_v40  ;;  %1474 = vmatpush1.bf16.msra.mxu0 %v7908_v24  ;;  %v5062_v20 = vpop.eup %5061  ;;  %v7958_v27 = vld [vmem:[#allocation31_spill] sm:$0xff] }
 0x452   :  { %v1325_v26 = vadd.f32 0.5, %v1324_v18  ;;  %1434 = vmatprep.subr.bf16.mxu1 %v7909_v39  ;;  %1475 = vmatprep.subr.bf16.mxu0 %v7910_v35  ;;  %v7959_v18 = vld [vmem:[#allocation32_spill] sm:$0xff] }
 0x453   :  { %v1329_v50 = vadd.f32 0.5, %v1328_v22  ;;  %v7960_v22 = vld [vmem:[#allocation33_spill] sm:$0xff] }
 0x454   :  { %v1336_v4 = vmul.f32 %v5062_v20, %v1325_v26  ;;  %v7961_v26 = vld [vmem:[#allocation34_spill] sm:$0xff]  ;;  %v7962_v20 = vld [vmem:[#allocation35_spill] sm:$0xff] }
 0x455   :  { %v1335_v9 = vmul.f32 %v1329_v50, %v6376_v48  ;;  %1435 = vmatpush1.bf16.msra.mxu1 %v7911_v6  ;;  %1476 = vmatpush1.bf16.msra.mxu0 %v7912_v36  ;;  %v5064_v48 = vpop.eup %5063  ;;  %v7963_v50 = vld [vmem:[#allocation36_spill] sm:$0xff] }
 0x456   :  { %1436 = vmatprep.subr.bf16.mxu1 %v7913_v47  ;;  %1477 = vmatprep.subr.bf16.mxu0 %v7914_v52  ;;  %v1333_v25 = vmul.f32 0.5, %v5064_v48  ;;  %v7966_v48 = vld [vmem:[#allocation39_spill] sm:$0xff] }
 0x457   :  { %v6468_v5 = vadd.f32 %v1336_v4, %v1335_v9  ;;  %v7964_v4 = vld [vmem:[#allocation37_spill] sm:$0xff]  ;;  %v7965_v9 = vld [vmem:[#allocation38_spill] sm:$0xff] }
 0x458   :  { %v1334_v19 = vadd.f32 0.5, %v1333_v25  ;;  %v7967_v25 = vld [vmem:[#allocation40_spill] sm:$0xff] }
 0x459   :  { %5065 = vtanh.f32 %v6468_v5  ;;  %1437 = vmatpush1.bf16.msra.mxu1 %v7915_v33  ;;  %1478 = vmatpush1.bf16.msra.mxu0 %v7916_v28 }
 0x45a   :  { %1438 = vmatprep.subr.bf16.mxu1 %v6031_v30  ;;  %1479 = vmatprep.subr.bf16.mxu0 %v6033_v38 }
 0x45d   :  { %1439 = vmatpush1.bf16.msra.mxu1 %v6037_v44  ;;  %1480 = vmatpush1.bf16.msra.mxu0 %v6039_v46 }
 0x45e   :  { %1440 = vmatprep.subr.bf16.mxu1 %v6043_v0  ;;  %1481 = vmatprep.subr.bf16.mxu0 %v6045_v31 }
 0x461   :  { %1441 = vmatpush1.bf16.msra.mxu1 %v6049_v16  ;;  %1482 = vmatpush1.bf16.msra.mxu0 %v6051_v17 }
 0x462   :  { %1442 = vmatprep.subr.bf16.mxu1 %v6055_v14  ;;  %1483 = vmatprep.subr.bf16.mxu0 %v6057_v15 }
 0x463   :  { %v5066_v10 = vpop.eup %5065 }
 0x464   :  { %v6483_v34 = vmul.f32 %v5066_v10, %v1334_v19  ;;  %v7968_v19 = vld [vmem:[#allocation41_spill] sm:$0xff]  ;;  %v7969_v10 = vld [vmem:[#allocation42_spill] sm:$0xff] }
 0x465   :  { %1443 = vmatpush1.bf16.msra.mxu1 %v6061_v56  ;;  %1484 = vmatpush1.bf16.msra.mxu0 %v6063_v57 }
 0x466   :  { %7950 = vst [vmem:[#allocation51_spill] sm:$0xff] %v6483_v34  ;;  %v1427_v21 = vpack.c.bf16 %v6483_v34, %v6483_v34  ;;  %1551 = vmatprep.subr.bf16.mxu1 %v5827_v43  ;;  %1592 = vmatprep.subr.bf16.mxu0 %v5829_v45  ;;  %v7971_v34 = vld [vmem:[#allocation44_spill] sm:$0xff] }
 0x468   :  { %1461 = vmatmul.mubr.bf16.vlgmr.msra.gmra.mrb[52].mxu1 %v1427_v21  ;;  %1502 = vmatmul.mubr.bf16.vlgmr.msra.gmra.mrb[60].mxu0 %v1427_v21  ;;  %v7970_v21 = vld [vmem:[#allocation43_spill] sm:$0xff] }
 0x469   :  { %1552 = vmatpush1.bf16.msra.mxu1 %v5855_v58  ;;  %1593 = vmatpush1.bf16.msra.mxu0 %v5857_v59 }
 0x46a   :  { %1553 = vmatprep.subr.bf16.mxu1 %v5859_v62  ;;  %1594 = vmatprep.subr.bf16.mxu0 %v5861_v63 }
 0x46b   :  { %1583 = vmatprep.mubr.bf16.mxu1 %v7842_v53  ;;  %1624 = vmatprep.mubr.bf16.mxu0 %v7842_v53 }
 0x46d   :  { %1554 = vmatpush1.bf16.msra.mxu1 %v5869_v7  ;;  %1595 = vmatpush1.bf16.msra.mxu0 %v5871_v8 }
 0x46e   :  { %1555 = vmatprep.subr.bf16.mxu1 %v5875_v11  ;;  %1596 = vmatprep.subr.bf16.mxu0 %v5877_v12 }
 0x471   :  { %1556 = vmatpush1.bf16.msra.mxu1 %v7951_v42  ;;  %1597 = vmatpush1.bf16.msra.mxu0 %v7952_v61 }
 0x472   :  { %1557 = vmatprep.subr.bf16.mxu1 %v7953_v54  ;;  %1598 = vmatprep.subr.bf16.mxu0 %v7954_v3 }
 0x475   :  { %1558 = vmatpush1.bf16.msra.mxu1 %v7955_v51  ;;  %1599 = vmatpush1.bf16.msra.mxu0 %v7956_v55 }
 0x476   :  { %1559 = vmatprep.subr.bf16.mxu1 %v7957_v60  ;;  %1600 = vmatprep.subr.bf16.mxu0 %v7958_v27  ;;  %v7977_v27 = vld [vmem:[#allocation65_spill] sm:$0xff]  ;;  %v7978_v60 = vld [vmem:[#allocation66_spill] sm:$0xff] }
 0x479   :  { %1560 = vmatpush1.bf16.msra.mxu1 %v7959_v18  ;;  %1601 = vmatpush1.bf16.msra.mxu0 %v7960_v22  ;;  %v7976_v22 = vld [vmem:[#allocation64_spill] sm:$0xff] }
 0x47a   :  { %1561 = vmatprep.subr.bf16.mxu1 %v7961_v26  ;;  %1602 = vmatprep.subr.bf16.mxu0 %v7962_v20  ;;  %v7973_v20 = vld [vmem:[#allocation46_spill] sm:$0xff]  ;;  %v7975_v26 = vld [vmem:[#allocation63_spill] sm:$0xff] }
 0x47d   :  { %1562 = vmatpush1.bf16.msra.mxu1 %v7963_v50  ;;  %1603 = vmatpush1.bf16.msra.mxu0 %v7964_v4  ;;  %v7974_v50 = vld [vmem:[#allocation47_spill] sm:$0xff] }
 0x47e   :  { %1563 = vmatprep.subr.bf16.mxu1 %v7965_v9  ;;  %1604 = vmatprep.subr.bf16.mxu0 %v7966_v48 }
 0x481   :  { %1564 = vmatpush1.bf16.msra.mxu1 %v7967_v25  ;;  %1605 = vmatpush1.bf16.msra.mxu0 %v7968_v19 }
 0x482   :  { %1565 = vmatprep.subr.bf16.mxu1 %v7969_v10  ;;  %1606 = vmatprep.subr.bf16.mxu0 %v7970_v21 }
 0x485   :  { %1566 = vmatpush1.bf16.msra.mxu1 %v7971_v34  ;;  %1607 = vmatpush1.bf16.msra.mxu0 %v7972_v23 }
 0x486   :  { %1638 = vmatprep.subr.bf16.mxu1 %v7973_v20  ;;  %1679 = vmatprep.subr.bf16.mxu0 %v7974_v50 }
 0x51b   :  { %v1375_v4 = vpop.f32.mrb[48].mxu1  ;;  %v1416_v9 = vpop.f32.mrb[56].mxu0 }
 0x51c   :  { %v1423_v48 = vadd.f32 %v1375_v4, %v7975_v26  ;;  %v1425_v25 = vadd.f32 %v1416_v9, %v7976_v22  ;;  %v1377_v18 = vpop.f32.mrb[49].mxu1  ;;  %v1418_v19 = vpop.f32.mrb[57].mxu0 }
 0x51d   :  { %v1424_v10 = vadd.f32 %v1377_v18, %v7977_v27  ;;  %v1426_v21 = vadd.f32 %v1418_v19, %v7978_v60  ;;  %v1379_v55 = vpop.f32.mrb[50].mxu1  ;;  %v1420_v34 = vpop.f32.mrb[58].mxu0  ;;  %v7979_v60 = vld [vmem:[#allocation49_spill] sm:$0xff]  ;;  %v7982_v19 = vld [vmem:[#allocation108_spill] sm:$0xff] }
 0x51e   :  { %v1514_v51 = vmul.f32 0.5, %v1423_v48  ;;  %v1380_v23 = vpop.f32.mrb[51].mxu1  ;;  %v1421_v3 = vpop.f32.mrb[59].mxu0  ;;  %v7981_v48 = vld [vmem:[#allocation107_spill] sm:$0xff] }
 0x51f   :  { %v1518_v20 = vmul.f32 0.5, %v1424_v10  ;;  %v1523_v50 = vmul.f32 0.5, %v1426_v21 }
 0x520   :  { %5067 = vtanh.f32 %v1514_v51 }
 0x521   :  { %5069 = vtanh.f32 %v1518_v20 }
 0x522   :  { %5071 = vtanh.f32 %v1425_v25 }
 0x523   :  { %5073 = vtanh.f32 %v1523_v50 }
 0x52a   :  { %v5068_v54 = vpop.eup %5067 }
 0x52b   :  { %v5070_v26 = vpop.eup %5069  ;;  %v1516_v4 = vmul.f32 0.5, %v5068_v54 }
 0x52c   :  { %v1520_v22 = vmul.f32 0.5, %v5070_v26  ;;  %v5072_v61 = vpop.eup %5071  ;;  %v7983_v26 = vld [vmem:[#allocation109_spill] sm:$0xff] }
 0x52d   :  { %v1517_v9 = vadd.f32 0.5, %v1516_v4  ;;  %v5074_v23 = vpop.eup %5073 }
 0x52e   :  { %v1521_v27 = vadd.f32 0.5, %v1520_v22  ;;  %v1525_v3 = vmul.f32 0.5, %v5074_v23 }
 0x52f   :  { %v1528_v18 = vmul.f32 %v5072_v61, %v1517_v9  ;;  %v7984_v61 = vld [vmem:[#allocation110_spill] sm:$0xff] }
 0x530   :  { %v1527_v55 = vmul.f32 %v1521_v27, %v7979_v60  ;;  %v1526_v21 = vadd.f32 0.5, %v1525_v3 }
 0x532   :  { %v6530_v34 = vadd.f32 %v1528_v18, %v1527_v55 }
 0x534   :  { %7980 = vst [vmem:[#allocation52_spill] sm:$0xff] %v6530_v34  ;;  %5075 = vtanh.f32 %v6530_v34 }
 0x53b   :  { %v1462_v51 = vpop.f32.mrb[52].mxu1  ;;  %v1503_v20 = vpop.f32.mrb[60].mxu0 }
 0x53c   :  { %v1510_v25 = vadd.f32 %v1462_v51, %v7981_v48  ;;  %v1512_v54 = vadd.f32 %v1503_v20, %v7982_v19  ;;  %v1464_v10 = vpop.f32.mrb[53].mxu1  ;;  %v1505_v50 = vpop.f32.mrb[61].mxu0 }
 0x53d   :  { %v1511_v4 = vadd.f32 %v1464_v10, %v7983_v26  ;;  %v1513_v22 = vadd.f32 %v1505_v50, %v7984_v61  ;;  %v1466_v9 = vpop.f32.mrb[54].mxu1  ;;  %v1507_v27 = vpop.f32.mrb[62].mxu0 }
 0x53e   :  { %v5076_v18 = vpop.eup %5075  ;;  %v1532_v60 = vmul.f32 0.5, %v1510_v25  ;;  %v1467_v55 = vpop.f32.mrb[55].mxu1  ;;  %v7987_v27 = vld [vmem:[#allocation24_spill] sm:$0xff] }
 0x53f   :  { %v1508_v34 = vpop.f32.mrb[63].mxu0  ;;  %v6537_v23 = vmul.f32 %v5076_v18, %v1526_v21  ;;  %v1536_v42 = vmul.f32 0.5, %v1511_v4  ;;  %v7988_v18 = vld [vmem:[#allocation25_spill] sm:$0xff]  ;;  %v7990_v55 = vld [vmem:[#allocation27_spill] sm:$0xff] }
 0x540   :  { %5077 = vtanh.f32 %v1532_v60  ;;  %v1541_v34 = vmul.f32 0.5, %v1513_v22  ;;  %v7989_v60 = vld [vmem:[#allocation26_spill] sm:$0xff] }
 0x541   :  { %7985 = vst [vmem:[#allocation53_spill] sm:$0xff] %v6537_v23  ;;  %5079 = vtanh.f32 %v1536_v42  ;;  %v1550_v51 = vpack.c.bf16 %v6537_v23, %v6537_v23  ;;  %v8008_v23 = vld [vmem:[#allocation45_spill] sm:$0xff] }
 0x542   :  { %5081 = vtanh.f32 %v1512_v54 }
 0x543   :  { %1584 = vmatmul.mubr.bf16.vlgmr.msra.gmra.mrb[56].mxu1 %v1550_v51  ;;  %1625 = vmatmul.mubr.bf16.vlgmr.msra.gmra.mrb[64].mxu0 %v1550_v51  ;;  %5083 = vtanh.f32 %v1541_v34  ;;  %v7991_v51 = vld [vmem:[#allocation28_spill] sm:$0xff]  ;;  %v7992_v34 = vld [vmem:[#allocation29_spill] sm:$0xff] }
 0x544   :  { %1639 = vmatpush1.bf16.msra.mxu1 %v5973_v1  ;;  %1680 = vmatpush1.bf16.msra.mxu0 %v5975_v2 }
 0x545   :  { %1640 = vmatprep.subr.bf16.mxu1 %v5979_v13  ;;  %1681 = vmatprep.subr.bf16.mxu0 %v5981_v49 }
 0x546   :  { %1670 = vmatprep.mubr.bf16.mxu1 %v7842_v53  ;;  %1711 = vmatprep.mubr.bf16.mxu0 %v7842_v53 }
 0x548   :  { %1641 = vmatpush1.bf16.msra.mxu1 %v5987_v29  ;;  %1682 = vmatpush1.bf16.msra.mxu0 %v5989_v32 }
 0x549   :  { %1642 = vmatprep.subr.bf16.mxu1 %v5993_v37  ;;  %1683 = vmatprep.subr.bf16.mxu0 %v5995_v41 }
 0x54a   :  { %v5078_v42 = vpop.eup %5077 }
 0x54b   :  { %v5080_v3 = vpop.eup %5079  ;;  %v1534_v20 = vmul.f32 0.5, %v5078_v42  ;;  %v7993_v42 = vld [vmem:[#allocation30_spill] sm:$0xff] }
 0x54c   :  { %v1538_v48 = vmul.f32 0.5, %v5080_v3  ;;  %1643 = vmatpush1.bf16.msra.mxu1 %v7907_v40  ;;  %1684 = vmatpush1.bf16.msra.mxu0 %v7908_v24  ;;  %v5082_v19 = vpop.eup %5081  ;;  %v7994_v3 = vld [vmem:[#allocation31_spill] sm:$0xff] }
 0x54d   :  { %v1535_v25 = vadd.f32 0.5, %v1534_v20  ;;  %1644 = vmatprep.subr.bf16.mxu1 %v7909_v39  ;;  %1685 = vmatprep.subr.bf16.mxu0 %v7910_v35  ;;  %v7995_v20 = vld [vmem:[#allocation32_spill] sm:$0xff] }
 0x54e   :  { %v1539_v54 = vadd.f32 0.5, %v1538_v48  ;;  %v7996_v48 = vld [vmem:[#allocation33_spill] sm:$0xff] }
 0x54f   :  { %v1546_v10 = vmul.f32 %v5082_v19, %v1535_v25  ;;  %v7997_v25 = vld [vmem:[#allocation34_spill] sm:$0xff]  ;;  %v7998_v19 = vld [vmem:[#allocation35_spill] sm:$0xff] }
 0x550   :  { %v1545_v50 = vmul.f32 %v1539_v54, %v6468_v5  ;;  %1645 = vmatpush1.bf16.msra.mxu1 %v7911_v6  ;;  %1686 = vmatpush1.bf16.msra.mxu0 %v7912_v36  ;;  %v5084_v5 = vpop.eup %5083  ;;  %v7999_v54 = vld [vmem:[#allocation36_spill] sm:$0xff] }
 0x551   :  { %1646 = vmatprep.subr.bf16.mxu1 %v7913_v47  ;;  %1687 = vmatprep.subr.bf16.mxu0 %v7914_v52  ;;  %v1543_v26 = vmul.f32 0.5, %v5084_v5  ;;  %v8002_v5 = vld [vmem:[#allocation39_spill] sm:$0xff] }
 0x552   :  { %v6560_v21 = vadd.f32 %v1546_v10, %v1545_v50  ;;  %v8000_v10 = vld [vmem:[#allocation37_spill] sm:$0xff]  ;;  %v8001_v50 = vld [vmem:[#allocation38_spill] sm:$0xff] }
 0x553   :  { %v1544_v4 = vadd.f32 0.5, %v1543_v26  ;;  %v8003_v26 = vld [vmem:[#allocation40_spill] sm:$0xff] }
 0x554   :  { %5085 = vtanh.f32 %v6560_v21  ;;  %1647 = vmatpush1.bf16.msra.mxu1 %v7915_v33  ;;  %1688 = vmatpush1.bf16.msra.mxu0 %v7916_v28 }
 0x555   :  { %1648 = vmatprep.subr.bf16.mxu1 %v6031_v30  ;;  %1689 = vmatprep.subr.bf16.mxu0 %v6033_v38 }
 0x558   :  { %1649 = vmatpush1.bf16.msra.mxu1 %v6037_v44  ;;  %1690 = vmatpush1.bf16.msra.mxu0 %v6039_v46 }
 0x559   :  { %1650 = vmatprep.subr.bf16.mxu1 %v6043_v0  ;;  %1691 = vmatprep.subr.bf16.mxu0 %v6045_v31 }
 0x55c   :  { %1651 = vmatpush1.bf16.msra.mxu1 %v6049_v16  ;;  %1692 = vmatpush1.bf16.msra.mxu0 %v6051_v17 }
 0x55d   :  { %1652 = vmatprep.subr.bf16.mxu1 %v6055_v14  ;;  %1693 = vmatprep.subr.bf16.mxu0 %v6057_v15 }
 0x55e   :  { %v5086_v61 = vpop.eup %5085 }
 0x55f   :  { %v6575_v22 = vmul.f32 %v5086_v61, %v1544_v4  ;;  %v8004_v4 = vld [vmem:[#allocation41_spill] sm:$0xff]  ;;  %v8005_v61 = vld [vmem:[#allocation42_spill] sm:$0xff] }
 0x560   :  { %1653 = vmatpush1.bf16.msra.mxu1 %v6061_v56  ;;  %1694 = vmatpush1.bf16.msra.mxu0 %v6063_v57 }
 0x561   :  { %7986 = vst [vmem:[#allocation54_spill] sm:$0xff] %v6575_v22  ;;  %v1637_v9 = vpack.c.bf16 %v6575_v22, %v6575_v22  ;;  %1761 = vmatprep.subr.bf16.mxu1 %v5827_v43  ;;  %1802 = vmatprep.subr.bf16.mxu0 %v5829_v45  ;;  %v8007_v22 = vld [vmem:[#allocation44_spill] sm:$0xff] }
 0x563   :  { %1671 = vmatmul.mubr.bf16.vlgmr.msra.gmra.mrb[60].mxu1 %v1637_v9  ;;  %1712 = vmatmul.mubr.bf16.vlgmr.msra.gmra.mrb[68].mxu0 %v1637_v9  ;;  %v8006_v9 = vld [vmem:[#allocation43_spill] sm:$0xff] }
 0x564   :  { %1762 = vmatpush1.bf16.msra.mxu1 %v5855_v58  ;;  %1803 = vmatpush1.bf16.msra.mxu0 %v5857_v59 }
 0x565   :  { %1763 = vmatprep.subr.bf16.mxu1 %v5859_v62  ;;  %1804 = vmatprep.subr.bf16.mxu0 %v5861_v63 }
 0x566   :  { %1793 = vmatprep.mubr.bf16.mxu1 %v7842_v53  ;;  %1834 = vmatprep.mubr.bf16.mxu0 %v7842_v53 }
 0x568   :  { %1764 = vmatpush1.bf16.msra.mxu1 %v5869_v7  ;;  %1805 = vmatpush1.bf16.msra.mxu0 %v5871_v8 }
 0x569   :  { %1765 = vmatprep.subr.bf16.mxu1 %v5875_v11  ;;  %1806 = vmatprep.subr.bf16.mxu0 %v5877_v12 }
 0x56c   :  { %1766 = vmatpush1.bf16.msra.mxu1 %v7987_v27  ;;  %1807 = vmatpush1.bf16.msra.mxu0 %v7988_v18 }
 0x56d   :  { %1767 = vmatprep.subr.bf16.mxu1 %v7989_v60  ;;  %1808 = vmatprep.subr.bf16.mxu0 %v7990_v55 }
 0x570   :  { %1768 = vmatpush1.bf16.msra.mxu1 %v7991_v51  ;;  %1809 = vmatpush1.bf16.msra.mxu0 %v7992_v34 }
 0x571   :  { %1769 = vmatprep.subr.bf16.mxu1 %v7993_v42  ;;  %1810 = vmatprep.subr.bf16.mxu0 %v7994_v3  ;;  %v8013_v3 = vld [vmem:[#allocation69_spill] sm:$0xff]  ;;  %v8014_v42 = vld [vmem:[#allocation70_spill] sm:$0xff] }
 0x574   :  { %1770 = vmatpush1.bf16.msra.mxu1 %v7995_v20  ;;  %1811 = vmatpush1.bf16.msra.mxu0 %v7996_v48  ;;  %v8012_v48 = vld [vmem:[#allocation68_spill] sm:$0xff] }
 0x575   :  { %1771 = vmatprep.subr.bf16.mxu1 %v7997_v25  ;;  %1812 = vmatprep.subr.bf16.mxu0 %v7998_v19  ;;  %v8009_v19 = vld [vmem:[#allocation46_spill] sm:$0xff]  ;;  %v8011_v25 = vld [vmem:[#allocation67_spill] sm:$0xff] }
 0x578   :  { %1772 = vmatpush1.bf16.msra.mxu1 %v7999_v54  ;;  %1813 = vmatpush1.bf16.msra.mxu0 %v8000_v10  ;;  %v8010_v54 = vld [vmem:[#allocation47_spill] sm:$0xff] }
 0x579   :  { %1773 = vmatprep.subr.bf16.mxu1 %v8001_v50  ;;  %1814 = vmatprep.subr.bf16.mxu0 %v8002_v5 }
 0x57c   :  { %1774 = vmatpush1.bf16.msra.mxu1 %v8003_v26  ;;  %1815 = vmatpush1.bf16.msra.mxu0 %v8004_v4 }
 0x57d   :  { %1775 = vmatprep.subr.bf16.mxu1 %v8005_v61  ;;  %1816 = vmatprep.subr.bf16.mxu0 %v8006_v9 }
 0x580   :  { %1776 = vmatpush1.bf16.msra.mxu1 %v8007_v22  ;;  %1817 = vmatpush1.bf16.msra.mxu0 %v8008_v23 }
 0x581   :  { %1848 = vmatprep.subr.bf16.mxu1 %v8009_v19  ;;  %1889 = vmatprep.subr.bf16.mxu0 %v8010_v54 }
 0x616   :  { %v1585_v10 = vpop.f32.mrb[56].mxu1  ;;  %v1626_v50 = vpop.f32.mrb[64].mxu0 }
 0x617   :  { %v1633_v5 = vadd.f32 %v1585_v10, %v8011_v25  ;;  %v1635_v26 = vadd.f32 %v1626_v50, %v8012_v48  ;;  %v1587_v20 = vpop.f32.mrb[57].mxu1  ;;  %v1628_v4 = vpop.f32.mrb[65].mxu0 }
 0x618   :  { %v1634_v61 = vadd.f32 %v1587_v20, %v8013_v3  ;;  %v1636_v9 = vadd.f32 %v1628_v4, %v8014_v42  ;;  %v1589_v34 = vpop.f32.mrb[58].mxu1  ;;  %v1630_v22 = vpop.f32.mrb[66].mxu0  ;;  %v8015_v42 = vld [vmem:[#allocation52_spill] sm:$0xff] }
 0x619   :  { %v1724_v51 = vmul.f32 0.5, %v1633_v5  ;;  %v1590_v23 = vpop.f32.mrb[59].mxu1  ;;  %v1631_v55 = vpop.f32.mrb[67].mxu0  ;;  %v8017_v5 = vld [vmem:[#allocation103_spill] sm:$0xff]  ;;  %v8018_v4 = vld [vmem:[#allocation104_spill] sm:$0xff] }
 0x61a   :  { %v1728_v19 = vmul.f32 0.5, %v1634_v61  ;;  %v1733_v54 = vmul.f32 0.5, %v1636_v9 }
 0x61b   :  { %5087 = vtanh.f32 %v1724_v51 }
 0x61c   :  { %5089 = vtanh.f32 %v1728_v19 }
 0x61d   :  { %5091 = vtanh.f32 %v1635_v26 }
 0x61e   :  { %5093 = vtanh.f32 %v1733_v54 }
 0x625   :  { %v5088_v60 = vpop.eup %5087 }
 0x626   :  { %v5090_v25 = vpop.eup %5089  ;;  %v1726_v10 = vmul.f32 0.5, %v5088_v60 }
 0x627   :  { %v1730_v48 = vmul.f32 0.5, %v5090_v25  ;;  %v5092_v18 = vpop.eup %5091  ;;  %v8019_v25 = vld [vmem:[#allocation105_spill] sm:$0xff] }
 0x628   :  { %v1727_v50 = vadd.f32 0.5, %v1726_v10  ;;  %v5094_v23 = vpop.eup %5093 }
 0x629   :  { %v1731_v3 = vadd.f32 0.5, %v1730_v48  ;;  %v1735_v55 = vmul.f32 0.5, %v5094_v23 }
 0x62a   :  { %v1738_v20 = vmul.f32 %v5092_v18, %v1727_v50  ;;  %v8020_v18 = vld [vmem:[#allocation106_spill] sm:$0xff] }
 0x62b   :  { %v1737_v34 = vmul.f32 %v1731_v3, %v8015_v42  ;;  %v1736_v9 = vadd.f32 0.5, %v1735_v55 }
 0x62d   :  { %v6622_v22 = vadd.f32 %v1738_v20, %v1737_v34 }
 0x62f   :  { %8016 = vst [vmem:[#allocation55_spill] sm:$0xff] %v6622_v22  ;;  %5095 = vtanh.f32 %v6622_v22 }
 0x636   :  { %v1672_v51 = vpop.f32.mrb[60].mxu1  ;;  %v1713_v19 = vpop.f32.mrb[68].mxu0 }
 0x637   :  { %v1720_v26 = vadd.f32 %v1672_v51, %v8017_v5  ;;  %v1722_v60 = vadd.f32 %v1713_v19, %v8018_v4  ;;  %v1674_v61 = vpop.f32.mrb[61].mxu1  ;;  %v1715_v54 = vpop.f32.mrb[69].mxu0 }
 0x638   :  { %v1721_v10 = vadd.f32 %v1674_v61, %v8019_v25  ;;  %v1723_v48 = vadd.f32 %v1715_v54, %v8020_v18  ;;  %v1676_v50 = vpop.f32.mrb[62].mxu1  ;;  %v1717_v3 = vpop.f32.mrb[70].mxu0 }
 0x639   :  { %v5096_v20 = vpop.eup %5095  ;;  %v1742_v42 = vmul.f32 0.5, %v1720_v26  ;;  %v1677_v34 = vpop.f32.mrb[63].mxu1  ;;  %v8023_v3 = vld [vmem:[#allocation24_spill] sm:$0xff] }
 0x63a   :  { %v1718_v22 = vpop.f32.mrb[71].mxu0  ;;  %v6629_v23 = vmul.f32 %v5096_v20, %v1736_v9  ;;  %v1746_v27 = vmul.f32 0.5, %v1721_v10  ;;  %v8024_v20 = vld [vmem:[#allocation25_spill] sm:$0xff]  ;;  %v8026_v34 = vld [vmem:[#allocation27_spill] sm:$0xff] }
 0x63b   :  { %5097 = vtanh.f32 %v1742_v42  ;;  %v1751_v22 = vmul.f32 0.5, %v1723_v48  ;;  %v8025_v42 = vld [vmem:[#allocation26_spill] sm:$0xff] }
 0x63c   :  { %8021 = vst [vmem:[#allocation56_spill] sm:$0xff] %v6629_v23  ;;  %5099 = vtanh.f32 %v1746_v27  ;;  %v1760_v51 = vpack.c.bf16 %v6629_v23, %v6629_v23  ;;  %v8044_v23 = vld [vmem:[#allocation45_spill] sm:$0xff] }
 0x63d   :  { %5101 = vtanh.f32 %v1722_v60 }
 0x63e   :  { %1794 = vmatmul.mubr.bf16.vlgmr.msra.gmra.mrb[64].mxu1 %v1760_v51  ;;  %1835 = vmatmul.mubr.bf16.vlgmr.msra.gmra.mrb[72].mxu0 %v1760_v51  ;;  %5103 = vtanh.f32 %v1751_v22  ;;  %v8027_v51 = vld [vmem:[#allocation28_spill] sm:$0xff]  ;;  %v8028_v22 = vld [vmem:[#allocation29_spill] sm:$0xff] }
 0x63f   :  { %1849 = vmatpush1.bf16.msra.mxu1 %v5973_v1  ;;  %1890 = vmatpush1.bf16.msra.mxu0 %v5975_v2 }
 0x640   :  { %1850 = vmatprep.subr.bf16.mxu1 %v5979_v13  ;;  %1891 = vmatprep.subr.bf16.mxu0 %v5981_v49 }
 0x641   :  { %1880 = vmatprep.mubr.bf16.mxu1 %v7842_v53  ;;  %1921 = vmatprep.mubr.bf16.mxu0 %v7842_v53 }
 0x643   :  { %1851 = vmatpush1.bf16.msra.mxu1 %v5987_v29  ;;  %1892 = vmatpush1.bf16.msra.mxu0 %v5989_v32 }
 0x644   :  { %1852 = vmatprep.subr.bf16.mxu1 %v5993_v37  ;;  %1893 = vmatprep.subr.bf16.mxu0 %v5995_v41 }
 0x645   :  { %v5098_v27 = vpop.eup %5097 }
 0x646   :  { %v5100_v55 = vpop.eup %5099  ;;  %v1744_v19 = vmul.f32 0.5, %v5098_v27  ;;  %v8029_v27 = vld [vmem:[#allocation30_spill] sm:$0xff] }
 0x647   :  { %v1748_v5 = vmul.f32 0.5, %v5100_v55  ;;  %1853 = vmatpush1.bf16.msra.mxu1 %v7907_v40  ;;  %1894 = vmatpush1.bf16.msra.mxu0 %v7908_v24  ;;  %v5102_v4 = vpop.eup %5101  ;;  %v8030_v55 = vld [vmem:[#allocation31_spill] sm:$0xff] }
 0x648   :  { %v1745_v26 = vadd.f32 0.5, %v1744_v19  ;;  %1854 = vmatprep.subr.bf16.mxu1 %v7909_v39  ;;  %1895 = vmatprep.subr.bf16.mxu0 %v7910_v35  ;;  %v8031_v19 = vld [vmem:[#allocation32_spill] sm:$0xff] }
 0x649   :  { %v1749_v60 = vadd.f32 0.5, %v1748_v5  ;;  %v8032_v5 = vld [vmem:[#allocation33_spill] sm:$0xff] }
 0x64a   :  { %v1756_v61 = vmul.f32 %v5102_v4, %v1745_v26  ;;  %v8033_v26 = vld [vmem:[#allocation34_spill] sm:$0xff]  ;;  %v8034_v4 = vld [vmem:[#allocation35_spill] sm:$0xff] }
 0x64b   :  { %v1755_v54 = vmul.f32 %v1749_v60, %v6560_v21  ;;  %1855 = vmatpush1.bf16.msra.mxu1 %v7911_v6  ;;  %1896 = vmatpush1.bf16.msra.mxu0 %v7912_v36  ;;  %v5104_v21 = vpop.eup %5103  ;;  %v8035_v60 = vld [vmem:[#allocation36_spill] sm:$0xff] }
 0x64c   :  { %1856 = vmatprep.subr.bf16.mxu1 %v7913_v47  ;;  %1897 = vmatprep.subr.bf16.mxu0 %v7914_v52  ;;  %v1753_v25 = vmul.f32 0.5, %v5104_v21  ;;  %v8038_v21 = vld [vmem:[#allocation39_spill] sm:$0xff] }
 0x64d   :  { %v6652_v9 = vadd.f32 %v1756_v61, %v1755_v54  ;;  %v8036_v61 = vld [vmem:[#allocation37_spill] sm:$0xff]  ;;  %v8037_v54 = vld [vmem:[#allocation38_spill] sm:$0xff] }
 0x64e   :  { %v1754_v10 = vadd.f32 0.5, %v1753_v25  ;;  %v8039_v25 = vld [vmem:[#allocation40_spill] sm:$0xff] }
 0x64f   :  { %5105 = vtanh.f32 %v6652_v9  ;;  %1857 = vmatpush1.bf16.msra.mxu1 %v7915_v33  ;;  %1898 = vmatpush1.bf16.msra.mxu0 %v7916_v28 }
 0x650   :  { %1858 = vmatprep.subr.bf16.mxu1 %v6031_v30  ;;  %1899 = vmatprep.subr.bf16.mxu0 %v6033_v38 }
 0x653   :  { %1859 = vmatpush1.bf16.msra.mxu1 %v6037_v44  ;;  %1900 = vmatpush1.bf16.msra.mxu0 %v6039_v46 }
 0x654   :  { %1860 = vmatprep.subr.bf16.mxu1 %v6043_v0  ;;  %1901 = vmatprep.subr.bf16.mxu0 %v6045_v31 }
 0x657   :  { %1861 = vmatpush1.bf16.msra.mxu1 %v6049_v16  ;;  %1902 = vmatpush1.bf16.msra.mxu0 %v6051_v17 }
 0x658   :  { %1862 = vmatprep.subr.bf16.mxu1 %v6055_v14  ;;  %1903 = vmatprep.subr.bf16.mxu0 %v6057_v15 }
 0x659   :  { %v5106_v18 = vpop.eup %5105 }
 0x65a   :  { %v6667_v48 = vmul.f32 %v5106_v18, %v1754_v10  ;;  %v8040_v10 = vld [vmem:[#allocation41_spill] sm:$0xff]  ;;  %v8041_v18 = vld [vmem:[#allocation42_spill] sm:$0xff] }
 0x65b   :  { %1863 = vmatpush1.bf16.msra.mxu1 %v6061_v56  ;;  %1904 = vmatpush1.bf16.msra.mxu0 %v6063_v57 }
 0x65c   :  { %8022 = vst [vmem:[#allocation57_spill] sm:$0xff] %v6667_v48  ;;  %v1847_v50 = vpack.c.bf16 %v6667_v48, %v6667_v48  ;;  %1971 = vmatprep.subr.bf16.mxu1 %v5827_v43  ;;  %2012 = vmatprep.subr.bf16.mxu0 %v5829_v45  ;;  %v8043_v48 = vld [vmem:[#allocation44_spill] sm:$0xff] }
 0x65e   :  { %1881 = vmatmul.mubr.bf16.vlgmr.msra.gmra.mrb[68].mxu1 %v1847_v50  ;;  %1922 = vmatmul.mubr.bf16.vlgmr.msra.gmra.mrb[76].mxu0 %v1847_v50  ;;  %v8042_v50 = vld [vmem:[#allocation43_spill] sm:$0xff] }
 0x65f   :  { %1972 = vmatpush1.bf16.msra.mxu1 %v5855_v58  ;;  %2013 = vmatpush1.bf16.msra.mxu0 %v5857_v59 }
 0x660   :  { %1973 = vmatprep.subr.bf16.mxu1 %v5859_v62  ;;  %2014 = vmatprep.subr.bf16.mxu0 %v5861_v63 }
 0x661   :  { %2003 = vmatprep.mubr.bf16.mxu1 %v7842_v53  ;;  %2044 = vmatprep.mubr.bf16.mxu0 %v7842_v53 }
 0x663   :  { %1974 = vmatpush1.bf16.msra.mxu1 %v5869_v7  ;;  %2015 = vmatpush1.bf16.msra.mxu0 %v5871_v8 }
 0x664   :  { %1975 = vmatprep.subr.bf16.mxu1 %v5875_v11  ;;  %2016 = vmatprep.subr.bf16.mxu0 %v5877_v12 }
 0x667   :  { %1976 = vmatpush1.bf16.msra.mxu1 %v8023_v3  ;;  %2017 = vmatpush1.bf16.msra.mxu0 %v8024_v20 }
 0x668   :  { %1977 = vmatprep.subr.bf16.mxu1 %v8025_v42  ;;  %2018 = vmatprep.subr.bf16.mxu0 %v8026_v34 }
 0x66b   :  { %1978 = vmatpush1.bf16.msra.mxu1 %v8027_v51  ;;  %2019 = vmatpush1.bf16.msra.mxu0 %v8028_v22 }
 0x66c   :  { %1979 = vmatprep.subr.bf16.mxu1 %v8029_v27  ;;  %2020 = vmatprep.subr.bf16.mxu0 %v8030_v55  ;;  %v8049_v55 = vld [vmem:[#allocation73_spill] sm:$0xff]  ;;  %v8050_v27 = vld [vmem:[#allocation74_spill] sm:$0xff] }
 0x66f   :  { %1980 = vmatpush1.bf16.msra.mxu1 %v8031_v19  ;;  %2021 = vmatpush1.bf16.msra.mxu0 %v8032_v5  ;;  %v8048_v5 = vld [vmem:[#allocation72_spill] sm:$0xff] }
 0x670   :  { %1981 = vmatprep.subr.bf16.mxu1 %v8033_v26  ;;  %2022 = vmatprep.subr.bf16.mxu0 %v8034_v4  ;;  %v8045_v4 = vld [vmem:[#allocation46_spill] sm:$0xff]  ;;  %v8047_v26 = vld [vmem:[#allocation71_spill] sm:$0xff] }
 0x673   :  { %1982 = vmatpush1.bf16.msra.mxu1 %v8035_v60  ;;  %2023 = vmatpush1.bf16.msra.mxu0 %v8036_v61  ;;  %v8046_v60 = vld [vmem:[#allocation47_spill] sm:$0xff] }
 0x674   :  { %1983 = vmatprep.subr.bf16.mxu1 %v8037_v54  ;;  %2024 = vmatprep.subr.bf16.mxu0 %v8038_v21 }
 0x677   :  { %1984 = vmatpush1.bf16.msra.mxu1 %v8039_v25  ;;  %2025 = vmatpush1.bf16.msra.mxu0 %v8040_v10 }
 0x678   :  { %1985 = vmatprep.subr.bf16.mxu1 %v8041_v18  ;;  %2026 = vmatprep.subr.bf16.mxu0 %v8042_v50 }
 0x67b   :  { %1986 = vmatpush1.bf16.msra.mxu1 %v8043_v48  ;;  %2027 = vmatpush1.bf16.msra.mxu0 %v8044_v23 }
 0x67c   :  { %2058 = vmatprep.subr.bf16.mxu1 %v8045_v4  ;;  %2099 = vmatprep.subr.bf16.mxu0 %v8046_v60 }
 0x711   :  { %v1795_v61 = vpop.f32.mrb[64].mxu1  ;;  %v1836_v54 = vpop.f32.mrb[72].mxu0 }
 0x712   :  { %v1843_v21 = vadd.f32 %v1795_v61, %v8047_v26  ;;  %v1845_v25 = vadd.f32 %v1836_v54, %v8048_v5  ;;  %v1797_v19 = vpop.f32.mrb[65].mxu1  ;;  %v1838_v10 = vpop.f32.mrb[73].mxu0 }
 0x713   :  { %v1844_v18 = vadd.f32 %v1797_v19, %v8049_v55  ;;  %v1846_v50 = vadd.f32 %v1838_v10, %v8050_v27  ;;  %v1799_v22 = vpop.f32.mrb[66].mxu1  ;;  %v1840_v48 = vpop.f32.mrb[74].mxu0  ;;  %v8051_v27 = vld [vmem:[#allocation55_spill] sm:$0xff]  ;;  %v8054_v10 = vld [vmem:[#allocation100_spill] sm:$0xff] }
 0x714   :  { %v1934_v51 = vmul.f32 0.5, %v1843_v21  ;;  %v1800_v23 = vpop.f32.mrb[67].mxu1  ;;  %v1841_v34 = vpop.f32.mrb[75].mxu0  ;;  %v8053_v21 = vld [vmem:[#allocation99_spill] sm:$0xff] }
 0x715   :  { %v1938_v4 = vmul.f32 0.5, %v1844_v18  ;;  %v1943_v60 = vmul.f32 0.5, %v1846_v50 }
 0x716   :  { %5107 = vtanh.f32 %v1934_v51 }
 0x717   :  { %5109 = vtanh.f32 %v1938_v4 }
 0x718   :  { %5111 = vtanh.f32 %v1845_v25 }
 0x719   :  { %5113 = vtanh.f32 %v1943_v60 }
 0x720   :  { %v5108_v42 = vpop.eup %5107 }
 0x721   :  { %v5110_v26 = vpop.eup %5109  ;;  %v1936_v61 = vmul.f32 0.5, %v5108_v42 }
 0x722   :  { %v1940_v5 = vmul.f32 0.5, %v5110_v26  ;;  %v5112_v20 = vpop.eup %5111  ;;  %v8055_v26 = vld [vmem:[#allocation101_spill] sm:$0xff] }
 0x723   :  { %v1937_v54 = vadd.f32 0.5, %v1936_v61  ;;  %v5114_v23 = vpop.eup %5113 }
 0x724   :  { %v1941_v55 = vadd.f32 0.5, %v1940_v5  ;;  %v1945_v34 = vmul.f32 0.5, %v5114_v23 }
 0x725   :  { %v1948_v19 = vmul.f32 %v5112_v20, %v1937_v54  ;;  %v8056_v20 = vld [vmem:[#allocation102_spill] sm:$0xff] }
 0x726   :  { %v1947_v22 = vmul.f32 %v1941_v55, %v8051_v27  ;;  %v1946_v50 = vadd.f32 0.5, %v1945_v34 }
 0x728   :  { %v6714_v48 = vadd.f32 %v1948_v19, %v1947_v22 }
 0x72a   :  { %8052 = vst [vmem:[#allocation59_spill] sm:$0xff] %v6714_v48  ;;  %5115 = vtanh.f32 %v6714_v48 }
 0x731   :  { %v1882_v51 = vpop.f32.mrb[68].mxu1  ;;  %v1923_v4 = vpop.f32.mrb[76].mxu0 }
 0x732   :  { %v1930_v25 = vadd.f32 %v1882_v51, %v8053_v21  ;;  %v1932_v42 = vadd.f32 %v1923_v4, %v8054_v10  ;;  %v1884_v18 = vpop.f32.mrb[69].mxu1  ;;  %v1925_v60 = vpop.f32.mrb[77].mxu0 }
 0x733   :  { %v1931_v61 = vadd.f32 %v1884_v18, %v8055_v26  ;;  %v1933_v5 = vadd.f32 %v1925_v60, %v8056_v20  ;;  %v1886_v54 = vpop.f32.mrb[70].mxu1  ;;  %v1927_v55 = vpop.f32.mrb[78].mxu0 }
 0x734   :  { %v5116_v19 = vpop.eup %5115  ;;  %v1952_v27 = vmul.f32 0.5, %v1930_v25  ;;  %v1887_v22 = vpop.f32.mrb[71].mxu1  ;;  %v8059_v55 = vld [vmem:[#allocation24_spill] sm:$0xff] }
 0x735   :  { %v1928_v48 = vpop.f32.mrb[79].mxu0  ;;  %v6721_v23 = vmul.f32 %v5116_v19, %v1946_v50  ;;  %v1956_v3 = vmul.f32 0.5, %v1931_v61  ;;  %v8060_v19 = vld [vmem:[#allocation25_spill] sm:$0xff]  ;;  %v8062_v22 = vld [vmem:[#allocation27_spill] sm:$0xff] }
 0x736   :  { %5117 = vtanh.f32 %v1952_v27  ;;  %v1961_v48 = vmul.f32 0.5, %v1933_v5  ;;  %v8061_v27 = vld [vmem:[#allocation26_spill] sm:$0xff] }
 0x737   :  { %8057 = vst [vmem:[#allocation60_spill] sm:$0xff] %v6721_v23  ;;  %5119 = vtanh.f32 %v1956_v3  ;;  %v1970_v51 = vpack.c.bf16 %v6721_v23, %v6721_v23  ;;  %v8079_v23 = vld [vmem:[#allocation44_spill] sm:$0xff] }
 0x738   :  { %5121 = vtanh.f32 %v1932_v42 }
 0x739   :  { %2004 = vmatmul.mubr.bf16.vlgmr.msra.gmra.mrb[72].mxu1 %v1970_v51  ;;  %2045 = vmatmul.mubr.bf16.vlgmr.msra.gmra.mrb[80].mxu0 %v1970_v51  ;;  %5123 = vtanh.f32 %v1961_v48  ;;  %v8063_v51 = vld [vmem:[#allocation28_spill] sm:$0xff]  ;;  %v8064_v48 = vld [vmem:[#allocation29_spill] sm:$0xff] }
 0x73a   :  { %2059 = vmatpush1.bf16.msra.mxu1 %v5973_v1  ;;  %2100 = vmatpush1.bf16.msra.mxu0 %v5975_v2 }
 0x73b   :  { %2060 = vmatprep.subr.bf16.mxu1 %v5979_v13  ;;  %2101 = vmatprep.subr.bf16.mxu0 %v5981_v49 }
 0x73c   :  { %2090 = vmatprep.mubr.bf16.mxu1 %v7842_v53  ;;  %2131 = vmatprep.mubr.bf16.mxu0 %v7842_v53 }
 0x73e   :  { %2061 = vmatpush1.bf16.msra.mxu1 %v5987_v29  ;;  %2102 = vmatpush1.bf16.msra.mxu0 %v5989_v32 }
 0x73f   :  { %2062 = vmatprep.subr.bf16.mxu1 %v5993_v37  ;;  %2103 = vmatprep.subr.bf16.mxu0 %v5995_v41 }
 0x740   :  { %v5118_v3 = vpop.eup %5117 }
 0x741   :  { %v5120_v34 = vpop.eup %5119  ;;  %v1954_v4 = vmul.f32 0.5, %v5118_v3  ;;  %v8065_v3 = vld [vmem:[#allocation30_spill] sm:$0xff] }
 0x742   :  { %v1958_v21 = vmul.f32 0.5, %v5120_v34  ;;  %2063 = vmatpush1.bf16.msra.mxu1 %v7907_v40  ;;  %2104 = vmatpush1.bf16.msra.mxu0 %v7908_v24  ;;  %v5122_v10 = vpop.eup %5121  ;;  %v8066_v34 = vld [vmem:[#allocation31_spill] sm:$0xff] }
 0x743   :  { %v1955_v25 = vadd.f32 0.5, %v1954_v4  ;;  %2064 = vmatprep.subr.bf16.mxu1 %v7909_v39  ;;  %2105 = vmatprep.subr.bf16.mxu0 %v7910_v35  ;;  %v8067_v4 = vld [vmem:[#allocation32_spill] sm:$0xff] }
 0x744   :  { %v1959_v42 = vadd.f32 0.5, %v1958_v21  ;;  %v8068_v21 = vld [vmem:[#allocation33_spill] sm:$0xff] }
 0x745   :  { %v1966_v18 = vmul.f32 %v5122_v10, %v1955_v25  ;;  %v8069_v25 = vld [vmem:[#allocation34_spill] sm:$0xff]  ;;  %v8070_v10 = vld [vmem:[#allocation35_spill] sm:$0xff] }
 0x746   :  { %v1965_v60 = vmul.f32 %v1959_v42, %v6652_v9  ;;  %2065 = vmatpush1.bf16.msra.mxu1 %v7911_v6  ;;  %2106 = vmatpush1.bf16.msra.mxu0 %v7912_v36  ;;  %v5124_v9 = vpop.eup %5123  ;;  %v8071_v42 = vld [vmem:[#allocation36_spill] sm:$0xff] }
 0x747   :  { %2066 = vmatprep.subr.bf16.mxu1 %v7913_v47  ;;  %2107 = vmatprep.subr.bf16.mxu0 %v7914_v52  ;;  %v1963_v26 = vmul.f32 0.5, %v5124_v9  ;;  %v8074_v9 = vld [vmem:[#allocation39_spill] sm:$0xff] }
 0x748   :  { %v6744_v50 = vadd.f32 %v1966_v18, %v1965_v60  ;;  %v8072_v18 = vld [vmem:[#allocation37_spill] sm:$0xff]  ;;  %v8073_v60 = vld [vmem:[#allocation38_spill] sm:$0xff] }
 0x749   :  { %v1964_v61 = vadd.f32 0.5, %v1963_v26  ;;  %v8075_v26 = vld [vmem:[#allocation40_spill] sm:$0xff] }
 0x74a   :  { %5125 = vtanh.f32 %v6744_v50  ;;  %2067 = vmatpush1.bf16.msra.mxu1 %v7915_v33  ;;  %2108 = vmatpush1.bf16.msra.mxu0 %v7916_v28 }
 0x74b   :  { %2068 = vmatprep.subr.bf16.mxu1 %v6031_v30  ;;  %2109 = vmatprep.subr.bf16.mxu0 %v6033_v38 }
 0x74e   :  { %2069 = vmatpush1.bf16.msra.mxu1 %v6037_v44  ;;  %2110 = vmatpush1.bf16.msra.mxu0 %v6039_v46 }
 0x74f   :  { %2070 = vmatprep.subr.bf16.mxu1 %v6043_v0  ;;  %2111 = vmatprep.subr.bf16.mxu0 %v6045_v31 }
 0x752   :  { %2071 = vmatpush1.bf16.msra.mxu1 %v6049_v16  ;;  %2112 = vmatpush1.bf16.msra.mxu0 %v6051_v17 }
 0x753   :  { %2072 = vmatprep.subr.bf16.mxu1 %v6055_v14  ;;  %2113 = vmatprep.subr.bf16.mxu0 %v6057_v15 }
 0x754   :  { %v5126_v20 = vpop.eup %5125 }
 0x755   :  { %v6759_v5 = vmul.f32 %v5126_v20, %v1964_v61  ;;  %v8076_v61 = vld [vmem:[#allocation41_spill] sm:$0xff]  ;;  %v8077_v20 = vld [vmem:[#allocation42_spill] sm:$0xff] }
 0x756   :  { %2073 = vmatpush1.bf16.msra.mxu1 %v6061_v56  ;;  %2114 = vmatpush1.bf16.msra.mxu0 %v6063_v57 }
 0x757   :  { %8058 = vst [vmem:[#allocation61_spill] sm:$0xff] %v6759_v5  ;;  %v2057_v54 = vpack.c.bf16 %v6759_v5, %v6759_v5  ;;  %2181 = vmatprep.subr.bf16.mxu1 %v5827_v43  ;;  %2222 = vmatprep.subr.bf16.mxu0 %v5829_v45  ;;  %v8080_v5 = vld [vmem:[#allocation45_spill] sm:$0xff] }
 0x759   :  { %2091 = vmatmul.mubr.bf16.vlgmr.msra.gmra.mrb[76].mxu1 %v2057_v54  ;;  %2132 = vmatmul.mubr.bf16.vlgmr.msra.gmra.mrb[84].mxu0 %v2057_v54  ;;  %v8078_v54 = vld [vmem:[#allocation43_spill] sm:$0xff] }
 0x75a   :  { %2182 = vmatpush1.bf16.msra.mxu1 %v5855_v58  ;;  %2223 = vmatpush1.bf16.msra.mxu0 %v5857_v59 }
 0x75b   :  { %2183 = vmatprep.subr.bf16.mxu1 %v5859_v62  ;;  %2224 = vmatprep.subr.bf16.mxu0 %v5861_v63 }
 0x75c   :  { %2213 = vmatprep.mubr.bf16.mxu1 %v7842_v53  ;;  %2254 = vmatprep.mubr.bf16.mxu0 %v7842_v53 }
 0x75e   :  { %2184 = vmatpush1.bf16.msra.mxu1 %v5869_v7  ;;  %2225 = vmatpush1.bf16.msra.mxu0 %v5871_v8 }
 0x75f   :  { %2185 = vmatprep.subr.bf16.mxu1 %v5875_v11  ;;  %2226 = vmatprep.subr.bf16.mxu0 %v5877_v12 }
 0x762   :  { %2186 = vmatpush1.bf16.msra.mxu1 %v8059_v55  ;;  %2227 = vmatpush1.bf16.msra.mxu0 %v8060_v19 }
 0x763   :  { %2187 = vmatprep.subr.bf16.mxu1 %v8061_v27  ;;  %2228 = vmatprep.subr.bf16.mxu0 %v8062_v22 }
 0x766   :  { %2188 = vmatpush1.bf16.msra.mxu1 %v8063_v51  ;;  %2229 = vmatpush1.bf16.msra.mxu0 %v8064_v48 }
 0x767   :  { %2189 = vmatprep.subr.bf16.mxu1 %v8065_v3  ;;  %2230 = vmatprep.subr.bf16.mxu0 %v8066_v34  ;;  %v8085_v34 = vld [vmem:[#allocation77_spill] sm:$0xff]  ;;  %v8086_v3 = vld [vmem:[#allocation78_spill] sm:$0xff] }
 0x76a   :  { %2190 = vmatpush1.bf16.msra.mxu1 %v8067_v4  ;;  %2231 = vmatpush1.bf16.msra.mxu0 %v8068_v21  ;;  %v8084_v21 = vld [vmem:[#allocation76_spill] sm:$0xff] }
 0x76b   :  { %2191 = vmatprep.subr.bf16.mxu1 %v8069_v25  ;;  %2232 = vmatprep.subr.bf16.mxu0 %v8070_v10  ;;  %v8081_v10 = vld [vmem:[#allocation46_spill] sm:$0xff]  ;;  %v8083_v25 = vld [vmem:[#allocation75_spill] sm:$0xff] }
 0x76e   :  { %2192 = vmatpush1.bf16.msra.mxu1 %v8071_v42  ;;  %2233 = vmatpush1.bf16.msra.mxu0 %v8072_v18  ;;  %v8082_v42 = vld [vmem:[#allocation47_spill] sm:$0xff] }
 0x76f   :  { %2193 = vmatprep.subr.bf16.mxu1 %v8073_v60  ;;  %2234 = vmatprep.subr.bf16.mxu0 %v8074_v9 }
 0x772   :  { %2194 = vmatpush1.bf16.msra.mxu1 %v8075_v26  ;;  %2235 = vmatpush1.bf16.msra.mxu0 %v8076_v61 }
 0x773   :  { %2195 = vmatprep.subr.bf16.mxu1 %v8077_v20  ;;  %2236 = vmatprep.subr.bf16.mxu0 %v8078_v54 }
 0x776   :  { %2196 = vmatpush1.bf16.msra.mxu1 %v8079_v23  ;;  %2237 = vmatpush1.bf16.msra.mxu0 %v8080_v5 }
 0x777   :  { %2268 = vmatprep.subr.bf16.mxu1 %v8081_v10  ;;  %2309 = vmatprep.subr.bf16.mxu0 %v8082_v42 }
 0x80c   :  { %v2005_v18 = vpop.f32.mrb[72].mxu1  ;;  %v2046_v60 = vpop.f32.mrb[80].mxu0 }
 0x80d   :  { %v2053_v9 = vadd.f32 %v2005_v18, %v8083_v25  ;;  %v2055_v26 = vadd.f32 %v2046_v60, %v8084_v21  ;;  %v2007_v4 = vpop.f32.mrb[73].mxu1  ;;  %v2048_v61 = vpop.f32.mrb[81].mxu0 }
 0x80e   :  { %v2054_v20 = vadd.f32 %v2007_v4, %v8085_v34  ;;  %v2056_v54 = vadd.f32 %v2048_v61, %v8086_v3  ;;  %v2009_v48 = vpop.f32.mrb[74].mxu1  ;;  %v2050_v23 = vpop.f32.mrb[82].mxu0  ;;  %v8087_v3 = vld [vmem:[#allocation59_spill] sm:$0xff]  ;;  %v8090_v61 = vld [vmem:[#allocation96_spill] sm:$0xff] }
 0x80f   :  { %v2144_v51 = vmul.f32 0.5, %v2053_v9  ;;  %v2010_v5 = vpop.f32.mrb[75].mxu1  ;;  %v2051_v22 = vpop.f32.mrb[83].mxu0  ;;  %v8089_v9 = vld [vmem:[#allocation95_spill] sm:$0xff] }
 0x810   :  { %v2148_v10 = vmul.f32 0.5, %v2054_v20  ;;  %v2153_v42 = vmul.f32 0.5, %v2056_v54 }
 0x811   :  { %5127 = vtanh.f32 %v2144_v51 }
 0x812   :  { %5129 = vtanh.f32 %v2148_v10 }
 0x813   :  { %5131 = vtanh.f32 %v2055_v26 }
 0x814   :  { %5133 = vtanh.f32 %v2153_v42 }
 0x81b   :  { %v5128_v27 = vpop.eup %5127 }
 0x81c   :  { %v5130_v25 = vpop.eup %5129  ;;  %v2146_v18 = vmul.f32 0.5, %v5128_v27 }
 0x81d   :  { %v2150_v21 = vmul.f32 0.5, %v5130_v25  ;;  %v5132_v19 = vpop.eup %5131  ;;  %v8091_v25 = vld [vmem:[#allocation97_spill] sm:$0xff] }
 0x81e   :  { %v2147_v60 = vadd.f32 0.5, %v2146_v18  ;;  %v5134_v5 = vpop.eup %5133 }
 0x81f   :  { %v2151_v34 = vadd.f32 0.5, %v2150_v21  ;;  %v2155_v22 = vmul.f32 0.5, %v5134_v5 }
 0x820   :  { %v2158_v4 = vmul.f32 %v5132_v19, %v2147_v60  ;;  %v8092_v19 = vld [vmem:[#allocation98_spill] sm:$0xff] }
 0x821   :  { %v2157_v48 = vmul.f32 %v2151_v34, %v8087_v3  ;;  %v2156_v54 = vadd.f32 0.5, %v2155_v22 }
 0x823   :  { %v6806_v23 = vadd.f32 %v2158_v4, %v2157_v48 }
 0x825   :  { %8088 = vst [vmem:[#allocation62_spill] sm:$0xff] %v6806_v23  ;;  %5135 = vtanh.f32 %v6806_v23 }
 0x82c   :  { %v2092_v51 = vpop.f32.mrb[76].mxu1  ;;  %v2133_v10 = vpop.f32.mrb[84].mxu0 }
 0x82d   :  { %v2140_v26 = vadd.f32 %v2092_v51, %v8089_v9  ;;  %v2142_v27 = vadd.f32 %v2133_v10, %v8090_v61  ;;  %v2094_v20 = vpop.f32.mrb[77].mxu1  ;;  %v2135_v42 = vpop.f32.mrb[85].mxu0 }
 0x82e   :  { %v2141_v18 = vadd.f32 %v2094_v20, %v8091_v25  ;;  %v2143_v21 = vadd.f32 %v2135_v42, %v8092_v19  ;;  %v2096_v60 = vpop.f32.mrb[78].mxu1  ;;  %v2137_v34 = vpop.f32.mrb[86].mxu0 }
 0x82f   :  { %v5136_v4 = vpop.eup %5135  ;;  %v2162_v3 = vmul.f32 0.5, %v2140_v26  ;;  %v2097_v48 = vpop.f32.mrb[79].mxu1  ;;  %v8099_v34 = vld [vmem:[#allocation30_spill] sm:$0xff] }
 0x830   :  { %v2138_v23 = vpop.f32.mrb[87].mxu0  ;;  %v6813_v5 = vmul.f32 %v5136_v4, %v2156_v54  ;;  %v2166_v55 = vmul.f32 0.5, %v2141_v18  ;;  %v8104_v4 = vld [vmem:[#allocation35_spill] sm:$0xff]  ;;  %v8106_v48 = vld [vmem:[#allocation37_spill] sm:$0xff] }
 0x831   :  { %5137 = vtanh.f32 %v2162_v3  ;;  %v2171_v23 = vmul.f32 0.5, %v2143_v21  ;;  %v8105_v3 = vld [vmem:[#allocation36_spill] sm:$0xff] }
 0x832   :  { %5139 = vtanh.f32 %v2166_v55  ;;  %v2180_v51 = vpack.c.bf16 %v6813_v5, %v6813_v5 }
 0x833   :  { %5141 = vtanh.f32 %v2142_v27 }
 0x834   :  { %2214 = vmatmul.mubr.bf16.vlgmr.msra.gmra.mrb[80].mxu1 %v2180_v51  ;;  %2255 = vmatmul.mubr.bf16.vlgmr.msra.gmra.mrb[88].mxu0 %v2180_v51  ;;  %5143 = vtanh.f32 %v2171_v23  ;;  %v8107_v51 = vld [vmem:[#allocation38_spill] sm:$0xff]  ;;  %v8108_v23 = vld [vmem:[#allocation39_spill] sm:$0xff] }
 0x835   :  { %2269 = vmatpush1.bf16.msra.mxu1 %v5973_v1  ;;  %2310 = vmatpush1.bf16.msra.mxu0 %v5975_v2 }
 0x836   :  { %2270 = vmatprep.subr.bf16.mxu1 %v5979_v13  ;;  %2311 = vmatprep.subr.bf16.mxu0 %v5981_v49 }
 0x837   :  { %2300 = vmatprep.mubr.bf16.mxu1 %v7842_v53  ;;  %2341 = vmatprep.mubr.bf16.mxu0 %v7842_v53 }
 0x839   :  { %2271 = vmatpush1.bf16.msra.mxu1 %v5987_v29  ;;  %2312 = vmatpush1.bf16.msra.mxu0 %v5989_v32 }
 0x83a   :  { %2272 = vmatprep.subr.bf16.mxu1 %v5993_v37  ;;  %2313 = vmatprep.subr.bf16.mxu0 %v5995_v41 }
 0x83b   :  { %v5138_v55 = vpop.eup %5137 }
 0x83c   :  { %v5140_v22 = vpop.eup %5139  ;;  %v2164_v10 = vmul.f32 0.5, %v5138_v55  ;;  %v8109_v55 = vld [vmem:[#allocation40_spill] sm:$0xff] }
 0x83d   :  { %v2168_v9 = vmul.f32 0.5, %v5140_v22  ;;  %2273 = vmatpush1.bf16.msra.mxu1 %v7907_v40  ;;  %2314 = vmatpush1.bf16.msra.mxu0 %v7908_v24  ;;  %v5142_v61 = vpop.eup %5141  ;;  %v8110_v22 = vld [vmem:[#allocation41_spill] sm:$0xff] }
 0x83e   :  { %v2165_v26 = vadd.f32 0.5, %v2164_v10  ;;  %2274 = vmatprep.subr.bf16.mxu1 %v7909_v39  ;;  %2315 = vmatprep.subr.bf16.mxu0 %v7910_v35  ;;  %v8111_v10 = vld [vmem:[#allocation42_spill] sm:$0xff] }
 0x83f   :  { %v2169_v27 = vadd.f32 0.5, %v2168_v9  ;;  %v8112_v9 = vld [vmem:[#allocation43_spill] sm:$0xff] }
 0x840   :  { %v2176_v20 = vmul.f32 %v5142_v61, %v2165_v26  ;;  %v8113_v26 = vld [vmem:[#allocation44_spill] sm:$0xff]  ;;  %v8114_v61 = vld [vmem:[#allocation45_spill] sm:$0xff] }
 0x841   :  { %v2175_v42 = vmul.f32 %v2169_v27, %v6744_v50  ;;  %2275 = vmatpush1.bf16.msra.mxu1 %v7911_v6  ;;  %2316 = vmatpush1.bf16.msra.mxu0 %v7912_v36  ;;  %v5144_v50 = vpop.eup %5143  ;;  %v8115_v27 = vld [vmem:[#allocation46_spill] sm:$0xff] }
 0x842   :  { %2276 = vmatprep.subr.bf16.mxu1 %v7913_v47  ;;  %2317 = vmatprep.subr.bf16.mxu0 %v7914_v52  ;;  %v2173_v25 = vmul.f32 0.5, %v5144_v50 }
 0x843   :  { %v6836_v54 = vadd.f32 %v2176_v20, %v2175_v42  ;;  %v8116_v20 = vld [vmem:[#allocation47_spill] sm:$0xff] }
 0x844   :  { %v2174_v18 = vadd.f32 0.5, %v2173_v25  ;;  %v8117_v25 = vld [vmem:[#allocation79_spill] sm:$0xff] }
 0x845   :  { %5145 = vtanh.f32 %v6836_v54  ;;  %2277 = vmatpush1.bf16.msra.mxu1 %v7915_v33  ;;  %2318 = vmatpush1.bf16.msra.mxu0 %v7916_v28 }
 0x846   :  { %2278 = vmatprep.subr.bf16.mxu1 %v6031_v30  ;;  %2319 = vmatprep.subr.bf16.mxu0 %v6033_v38 }
 0x849   :  { %2279 = vmatpush1.bf16.msra.mxu1 %v6037_v44  ;;  %2320 = vmatpush1.bf16.msra.mxu0 %v6039_v46 }
 0x84a   :  { %2280 = vmatprep.subr.bf16.mxu1 %v6043_v0  ;;  %2321 = vmatprep.subr.bf16.mxu0 %v6045_v31 }
 0x84d   :  { %2281 = vmatpush1.bf16.msra.mxu1 %v6049_v16  ;;  %2322 = vmatpush1.bf16.msra.mxu0 %v6051_v17 }
 0x84e   :  { %2282 = vmatprep.subr.bf16.mxu1 %v6055_v14  ;;  %2323 = vmatprep.subr.bf16.mxu0 %v6057_v15 }
 0x84f   :  { %v5146_v19 = vpop.eup %5145 }
 0x850   :  { %v6851_v21 = vmul.f32 %v5146_v19, %v2174_v18  ;;  %v8118_v19 = vld [vmem:[#allocation80_spill] sm:$0xff] }
 0x851   :  { %2283 = vmatpush1.bf16.msra.mxu1 %v6061_v56  ;;  %2324 = vmatpush1.bf16.msra.mxu0 %v6063_v57 }
 0x852   :  { %v2267_v60 = vpack.c.bf16 %v6851_v21, %v6851_v21  ;;  %2391 = vmatprep.subr.bf16.mxu1 %v5827_v43  ;;  %2432 = vmatprep.subr.bf16.mxu0 %v5829_v45  ;;  %v8093_v43 = vld [vmem:[#allocation24_spill] sm:$0xff]  ;;  %v8094_v45 = vld [vmem:[#allocation25_spill] sm:$0xff] }
 0x854   :  { %2301 = vmatmul.mubr.bf16.vlgmr.msra.gmra.mrb[84].mxu1 %v2267_v60  ;;  %2342 = vmatmul.mubr.bf16.vlgmr.msra.gmra.mrb[92].mxu0 %v2267_v60 }
 0x855   :  { %2392 = vmatpush1.bf16.msra.mxu1 %v5855_v58  ;;  %2433 = vmatpush1.bf16.msra.mxu0 %v5857_v59  ;;  %v8095_v58 = vld [vmem:[#allocation26_spill] sm:$0xff]  ;;  %v8096_v59 = vld [vmem:[#allocation27_spill] sm:$0xff] }
 0x856   :  { %2393 = vmatprep.subr.bf16.mxu1 %v5859_v62  ;;  %2434 = vmatprep.subr.bf16.mxu0 %v5861_v63  ;;  %v8097_v62 = vld [vmem:[#allocation28_spill] sm:$0xff]  ;;  %v8098_v63 = vld [vmem:[#allocation29_spill] sm:$0xff] }
 0x857   :  { %2423 = vmatprep.mubr.bf16.mxu1 %v7842_v53  ;;  %2464 = vmatprep.mubr.bf16.mxu0 %v7842_v53 }
 0x859   :  { %2394 = vmatpush1.bf16.msra.mxu1 %v5869_v7  ;;  %2435 = vmatpush1.bf16.msra.mxu0 %v5871_v8  ;;  %v8100_v7 = vld [vmem:[#allocation31_spill] sm:$0xff]  ;;  %v8101_v8 = vld [vmem:[#allocation32_spill] sm:$0xff] }
 0x85a   :  { %2395 = vmatprep.subr.bf16.mxu1 %v5875_v11  ;;  %2436 = vmatprep.subr.bf16.mxu0 %v5877_v12  ;;  %v8102_v11 = vld [vmem:[#allocation33_spill] sm:$0xff]  ;;  %v8103_v12 = vld [vmem:[#allocation34_spill] sm:$0xff] }
 0x85d   :  { %2396 = vmatpush1.bf16.msra.mxu1 %v8093_v43  ;;  %2437 = vmatpush1.bf16.msra.mxu0 %v8094_v45 }
 0x85e   :  { %2397 = vmatprep.subr.bf16.mxu1 %v8095_v58  ;;  %2438 = vmatprep.subr.bf16.mxu0 %v8096_v59  ;;  %v8119_v58 = vld [vmem:[#allocation81_spill] sm:$0xff] }
 0x861   :  { %2398 = vmatpush1.bf16.msra.mxu1 %v8097_v62  ;;  %2439 = vmatpush1.bf16.msra.mxu0 %v8098_v63  ;;  %v8120_v62 = vld [vmem:[#allocation82_spill] sm:$0xff] }
 0x862   :  { %2399 = vmatprep.subr.bf16.mxu1 %v8099_v34  ;;  %2440 = vmatprep.subr.bf16.mxu0 %v8100_v7 }
 0x865   :  { %2400 = vmatpush1.bf16.msra.mxu1 %v8101_v8  ;;  %2441 = vmatpush1.bf16.msra.mxu0 %v8102_v11 }
 0x866   :  { %2401 = vmatprep.subr.bf16.mxu1 %v8103_v12  ;;  %2442 = vmatprep.subr.bf16.mxu0 %v8104_v4 }
 0x869   :  { %2402 = vmatpush1.bf16.msra.mxu1 %v8105_v3  ;;  %2443 = vmatpush1.bf16.msra.mxu0 %v8106_v48 }
 0x86a   :  { %2403 = vmatprep.subr.bf16.mxu1 %v8107_v51  ;;  %2444 = vmatprep.subr.bf16.mxu0 %v8108_v23 }
 0x86d   :  { %2404 = vmatpush1.bf16.msra.mxu1 %v8109_v55  ;;  %2445 = vmatpush1.bf16.msra.mxu0 %v8110_v22 }
 0x86e   :  { %2405 = vmatprep.subr.bf16.mxu1 %v8111_v10  ;;  %2446 = vmatprep.subr.bf16.mxu0 %v8112_v9 }
 0x871   :  { %2406 = vmatpush1.bf16.msra.mxu1 %v8113_v26  ;;  %2447 = vmatpush1.bf16.msra.mxu0 %v8114_v61  ;;  %v8121_v61 = vld [vmem:[#allocation62_spill] sm:$0xff] }
 0x872   :  { %2478 = vmatprep.subr.bf16.mxu1 %v8115_v27  ;;  %2519 = vmatprep.subr.bf16.mxu0 %v8116_v20 }
 0x907   :  { %v2215_v42 = vpop.f32.mrb[80].mxu1  ;;  %v2256_v50 = vpop.f32.mrb[88].mxu0 }
 0x908   :  { %v2263_v18 = vadd.f32 %v2215_v42, %v8117_v25  ;;  %v2265_v60 = vadd.f32 %v2256_v50, %v8118_v19  ;;  %v2217_v43 = vpop.f32.mrb[81].mxu1  ;;  %v2258_v45 = vpop.f32.mrb[89].mxu0  ;;  %v8122_v19 = vld [vmem:[#allocation91_spill] sm:$0xff] }
 0x909   :  { %v2264_v59 = vadd.f32 %v2217_v43, %v8119_v58  ;;  %v2266_v63 = vadd.f32 %v2258_v45, %v8120_v62  ;;  %v2219_v34 = vpop.f32.mrb[82].mxu1  ;;  %v2260_v7 = vpop.f32.mrb[90].mxu0  ;;  %v8123_v43 = vld [vmem:[#allocation92_spill] sm:$0xff] }
 0x90a   :  { %v2354_v8 = vmul.f32 0.5, %v2263_v18  ;;  %v2220_v11 = vpop.f32.mrb[83].mxu1  ;;  %v2261_v12 = vpop.f32.mrb[91].mxu0  ;;  %v8125_v7 = vld [vmem:[#allocation94_spill] sm:$0xff] }
 0x90b   :  { %v2358_v4 = vmul.f32 0.5, %v2264_v59  ;;  %v2363_v3 = vmul.f32 0.5, %v2266_v63  ;;  %v8124_v63 = vld [vmem:[#allocation93_spill] sm:$0xff] }
 0x90c   :  { %5147 = vtanh.f32 %v2354_v8 }
 0x90d   :  { %5149 = vtanh.f32 %v2358_v4 }
 0x90e   :  { %5151 = vtanh.f32 %v2265_v60 }
 0x90f   :  { %5153 = vtanh.f32 %v2363_v3 }
 0x916   :  { %v5148_v48 = vpop.eup %5147 }
 0x917   :  { %v5150_v51 = vpop.eup %5149  ;;  %v2356_v23 = vmul.f32 0.5, %v5148_v48 }
 0x918   :  { %v2360_v55 = vmul.f32 0.5, %v5150_v51  ;;  %v5152_v10 = vpop.eup %5151 }
 0x919   :  { %v2357_v22 = vadd.f32 0.5, %v2356_v23  ;;  %v5154_v42 = vpop.eup %5153 }
 0x91a   :  { %v2361_v9 = vadd.f32 0.5, %v2360_v55  ;;  %v2365_v50 = vmul.f32 0.5, %v5154_v42 }
 0x91b   :  { %v2368_v26 = vmul.f32 %v5152_v10, %v2357_v22 }
 0x91c   :  { %v2367_v27 = vmul.f32 %v2361_v9, %v8121_v61  ;;  %v2366_v62 = vadd.f32 0.5, %v2365_v50  ;;  %v2816_v61 = vld [vmem:[#allocation8 + $0x80] sm:$0xff] }
 0x91e   :  { %v6898_v20 = vadd.f32 %v2368_v26, %v2367_v27  ;;  %v2824_v27 = vld [vmem:[#allocation8 + $0xc0] sm:$0xff] }
 0x91f   :  { %v3064_v50 = vpack.c.bf16 %v2824_v27, %v2816_v61  ;;  %v2899_v61 = vld [vmem:[#allocation8 + $0x318] sm:$0xff] }
 0x920   :  { %5155 = vtanh.f32 %v6898_v20 }
 0x927   :  { %v2302_v25 = vpop.f32.mrb[84].mxu1  ;;  %v2343_v18 = vpop.f32.mrb[92].mxu0 }
 0x928   :  { %v2350_v60 = vadd.f32 %v2302_v25, %v8122_v19  ;;  %v2352_v45 = vadd.f32 %v2343_v18, %v8123_v43  ;;  %v2304_v58 = vpop.f32.mrb[85].mxu1  ;;  %v2345_v59 = vpop.f32.mrb[93].mxu0  ;;  %v2818_v25 = vld [vmem:[#allocation8 + $0x90] sm:$0xff]  ;;  %v2841_v43 = vld [vmem:[#allocation8 + $0x148] sm:$0xff] }
 0x929   :  { %v2351_v34 = vadd.f32 %v2304_v58, %v8124_v63  ;;  %v2353_v8 = vadd.f32 %v2345_v59, %v8125_v7  ;;  %v2306_v11 = vpop.f32.mrb[86].mxu1  ;;  %v2347_v12 = vpop.f32.mrb[94].mxu0  ;;  %v2826_v18 = vld [vmem:[#allocation8 + $0xd0] sm:$0xff]  ;;  %v2843_v59 = vld [vmem:[#allocation8 + $0x158] sm:$0xff]  ;;  %v2840_v63 = vld [vmem:[#allocation8 + $0x140] sm:$0xff] }
 0x92a   :  { %v5156_v4 = vpop.eup %5155  ;;  %v2372_v3 = vmul.f32 0.5, %v2350_v60  ;;  %v2307_v48 = vpop.f32.mrb[87].mxu1  ;;  %v3066_v19 = vpack.c.bf16 %v2826_v18, %v2818_v25  ;;  %v2833_v60 = vld [vmem:[#allocation8 + $0x108] sm:$0xff]  ;;  %v2842_v11 = vld [vmem:[#allocation8 + $0x150] sm:$0xff]  ;;  %v2904_v25 = vld [vmem:[#allocation8 + $0x340] sm:$0xff] }
 0x92b   :  { %v2348_v51 = vpop.f32.mrb[95].mxu0  ;;  %v6905_v23 = vmul.f32 %v5156_v4, %v2366_v62  ;;  %v2376_v55 = vmul.f32 0.5, %v2351_v34  ;;  %v2381_v10 = vmul.f32 0.5, %v2353_v8  ;;  %v3073_v58 = vpack.c.bf16 %v2841_v43, %v2833_v60  ;;  %v2832_v62 = vld [vmem:[#allocation8 + $0x100] sm:$0xff]  ;;  %v2834_v8 = vld [vmem:[#allocation8 + $0x110] sm:$0xff]  ;;  %v2849_v4 = vld [vmem:[#allocation8 + $0x188] sm:$0xff] }
 0x92c   :  { %5157 = vtanh.f32 %v2372_v3  ;;  %v3072_v7 = vpack.c.bf16 %v2840_v63, %v2832_v62  ;;  %v3074_v12 = vpack.c.bf16 %v2842_v11, %v2834_v8  ;;  %v2857_v3 = vld [vmem:[#allocation8 + $0x1c8] sm:$0xff]  ;;  %v2851_v48 = vld [vmem:[#allocation8 + $0x198] sm:$0xff]  ;;  %v2898_v60 = vld [vmem:[#allocation8 + $0x310] sm:$0xff] }
 0x92d   :  { %5159 = vtanh.f32 %v2376_v55  ;;  %v2390_v22 = vpack.c.bf16 %v6905_v23, %v6905_v23  ;;  %v3081_v51 = vpack.c.bf16 %v2857_v3, %v2849_v4  ;;  %v2859_v55 = vld [vmem:[#allocation8 + $0x1d8] sm:$0xff]  ;;  %v2906_v43 = vld [vmem:[#allocation8 + $0x350] sm:$0xff]  ;;  %v2920_v8 = vld [vmem:[#allocation8 + $0x3c0] sm:$0xff] }
 0x92e   :  { %5161 = vtanh.f32 %v2352_v45  ;;  %v2835_v45 = vld [vmem:[#allocation8 + $0x118] sm:$0xff]  ;;  %v2914_v4 = vld [vmem:[#allocation8 + $0x390] sm:$0xff] }
 0x92f   :  { %2424 = vmatmul.mubr.bf16.vlgmr.msra.gmra.mrb[88].mxu1 %v2390_v22  ;;  %2465 = vmatmul.mubr.bf16.vlgmr.msra.gmra.mrb[96].mxu0 %v2390_v22  ;;  %5163 = vtanh.f32 %v2381_v10  ;;  %v3075_v34 = vpack.c.bf16 %v2843_v59, %v2835_v45  ;;  %v2848_v22 = vld [vmem:[#allocation8 + $0x180] sm:$0xff]  ;;  %v3106_v45 = vpack.c.bf16 %v2906_v43, %v2898_v60  ;;  %v2921_v59 = vld [vmem:[#allocation8 + $0x3c8] sm:$0xff]  ;;  %v2915_v62 = vld [vmem:[#allocation8 + $0x398] sm:$0xff] }
 0x930   :  { %2479 = vmatpush1.bf16.msra.mxu1 %v5973_v1  ;;  %2520 = vmatpush1.bf16.msra.mxu0 %v5975_v2  ;;  %v2856_v10 = vld [vmem:[#allocation8 + $0x1c0] sm:$0xff]  ;;  %v2922_v3 = vld [vmem:[#allocation8 + $0x3d0] sm:$0xff] }
 0x931   :  { %2480 = vmatprep.subr.bf16.mxu1 %v5979_v13  ;;  %2521 = vmatprep.subr.bf16.mxu0 %v5981_v49  ;;  %v2984_v60 = vld [vmem:[#allocation8 + $0x5c0] sm:$0xff] }
 0x932   :  { %2510 = vmatprep.mubr.bf16.mxu1 %v7842_v53  ;;  %2551 = vmatprep.mubr.bf16.mxu0 %v7842_v53 }
 0x934   :  { %2481 = vmatpush1.bf16.msra.mxu1 %v5987_v29  ;;  %2522 = vmatpush1.bf16.msra.mxu0 %v5989_v32 }
 0x935   :  { %2482 = vmatprep.subr.bf16.mxu1 %v5993_v37  ;;  %2523 = vmatprep.subr.bf16.mxu0 %v5995_v41 }
 0x936   :  { %v5158_v1 = vpop.eup %5157 }
 0x937   :  { %v5160_v9 = vpop.eup %5159  ;;  %v2374_v2 = vmul.f32 0.5, %v5158_v1  ;;  %v3083_v1 = vpack.c.bf16 %v2859_v55, %v2851_v48  ;;  %v3114_v48 = vpack.c.bf16 %v2922_v3, %v2914_v4  ;;  %v2937_v55 = vld [vmem:[#allocation8 + $0x448] sm:$0xff]  ;;  %v3000_v4 = vld [vmem:[#allocation8 + $0x640] sm:$0xff] }
 0x938   :  { %v2378_v26 = vmul.f32 0.5, %v5160_v9  ;;  %2483 = vmatpush1.bf16.msra.mxu1 %v7907_v40  ;;  %2524 = vmatpush1.bf16.msra.mxu0 %v7908_v24  ;;  %v5162_v49 = vpop.eup %5161  ;;  %v3080_v9 = vpack.c.bf16 %v2856_v10, %v2848_v22  ;;  %v2931_v22 = vld [vmem:[#allocation8 + $0x418] sm:$0xff] }
 0x939   :  { %v2375_v13 = vadd.f32 0.5, %v2374_v2  ;;  %2484 = vmatprep.subr.bf16.mxu1 %v7909_v39  ;;  %2525 = vmatprep.subr.bf16.mxu0 %v7910_v35  ;;  %v5164_v40 = vpop.eup %5163  ;;  %v2808_v35 = vld [vmem:[#allocation8 + $0x40] sm:$0xff]  ;;  %v2850_v2 = vld [vmem:[#allocation8 + $0x190] sm:$0xff] }
 0x93a   :  { %v2379_v29 = vadd.f32 0.5, %v2378_v26  ;;  %v2383_v24 = vmul.f32 0.5, %v5164_v40  ;;  %v2858_v26 = vld [vmem:[#allocation8 + $0x1d0] sm:$0xff]  ;;  %v2875_v40 = vld [vmem:[#allocation8 + $0x258] sm:$0xff] }
 0x93b   :  { %v2386_v32 = vmul.f32 %v5162_v49, %v2375_v13  ;;  %v3082_v13 = vpack.c.bf16 %v2858_v26, %v2850_v2  ;;  %v2865_v49 = vld [vmem:[#allocation8 + $0x208] sm:$0xff]  ;;  %v2936_v2 = vld [vmem:[#allocation8 + $0x440] sm:$0xff] }
 0x93c   :  { %v2385_v37 = vmul.f32 %v2379_v29, %v6836_v54  ;;  %2485 = vmatpush1.bf16.msra.mxu1 %v7911_v6  ;;  %2526 = vmatpush1.bf16.msra.mxu0 %v7912_v36  ;;  %v2384_v39 = vadd.f32 0.5, %v2383_v24  ;;  %v2802_v36 = vld [vmem:[#allocation8 + $0x10] sm:$0xff]  ;;  %v2827_v54 = vld [vmem:[#allocation8 + $0xd8] sm:$0xff]  ;;  %v2873_v29 = vld [vmem:[#allocation8 + $0x248] sm:$0xff] }
 0x93d   :  { %2486 = vmatprep.subr.bf16.mxu1 %v7913_v47  ;;  %2527 = vmatprep.subr.bf16.mxu0 %v7914_v52  ;;  %v2810_v47 = vld [vmem:[#allocation8 + $0x50] sm:$0xff]  ;;  %v2825_v52 = vld [vmem:[#allocation8 + $0xc8] sm:$0xff]  ;;  %v2864_v24 = vld [vmem:[#allocation8 + $0x200] sm:$0xff] }
 0x93e   :  { %v6928_v41 = vadd.f32 %v2386_v32, %v2385_v37  ;;  %v2867_v32 = vld [vmem:[#allocation8 + $0x218] sm:$0xff]  ;;  %v3089_v37 = vpack.c.bf16 %v2873_v29, %v2865_v49  ;;  %v2930_v49 = vld [vmem:[#allocation8 + $0x410] sm:$0xff] }
 0x93f   :  { %v2938_v29 = vld [vmem:[#allocation8 + $0x450] sm:$0xff] }
 0x940   :  { %5165 = vtanh.f32 %v6928_v41  ;;  %2487 = vmatpush1.bf16.msra.mxu1 %v7915_v33  ;;  %2528 = vmatpush1.bf16.msra.mxu0 %v7916_v28  ;;  %v2819_v33 = vld [vmem:[#allocation8 + $0x98] sm:$0xff] }
 0x941   :  { %2488 = vmatprep.subr.bf16.mxu1 %v6031_v30  ;;  %2529 = vmatprep.subr.bf16.mxu0 %v6033_v38  ;;  %v3067_v42 = vpack.c.bf16 %v2827_v54, %v2819_v33  ;;  %v2905_v54 = vld [vmem:[#allocation8 + $0x348] sm:$0xff] }
 0x944   :  { %2489 = vmatpush1.bf16.msra.mxu1 %v6037_v44  ;;  %2530 = vmatpush1.bf16.msra.mxu0 %v6039_v46  ;;  %v2801_v46 = vld [vmem:[#allocation8 + $0x8] sm:$0xff] }
 0x945   :  { %2490 = vmatprep.subr.bf16.mxu1 %v6043_v0  ;;  %2531 = vmatprep.subr.bf16.mxu0 %v6045_v31  ;;  %v2809_v0 = vld [vmem:[#allocation8 + $0x48] sm:$0xff]  ;;  %v2803_v31 = vld [vmem:[#allocation8 + $0x18] sm:$0xff] }
 0x948   :  { %2491 = vmatpush1.bf16.msra.mxu1 %v6049_v16  ;;  %2532 = vmatpush1.bf16.msra.mxu0 %v6051_v17  ;;  %v3057_v16 = vpack.c.bf16 %v2809_v0, %v2801_v46  ;;  %v2811_v17 = vld [vmem:[#allocation8 + $0x58] sm:$0xff]  ;;  %v2866_v46 = vld [vmem:[#allocation8 + $0x210] sm:$0xff] }
 0x949   :  { %2492 = vmatprep.subr.bf16.mxu1 %v6055_v14  ;;  %2533 = vmatprep.subr.bf16.mxu0 %v6057_v15  ;;  %v2800_v14 = vld [vmem:[#allocation8] sm:$0xff]  ;;  %v3059_v15 = vpack.c.bf16 %v2811_v17, %v2803_v31  ;;  %v2874_v0 = vld [vmem:[#allocation8 + $0x250] sm:$0xff]  ;;  %v2889_v17 = vld [vmem:[#allocation8 + $0x2c8] sm:$0xff] }
 0x94a   :  { %v5166_v30 = vpop.eup %5165  ;;  %v3056_v6 = vpack.c.bf16 %v2808_v35, %v2800_v14  ;;  %v3090_v31 = vpack.c.bf16 %v2874_v0, %v2866_v46  ;;  %v2883_v14 = vld [vmem:[#allocation8 + $0x298] sm:$0xff]  ;;  %v2952_v46 = vld [vmem:[#allocation8 + $0x4c0] sm:$0xff] }
 0x94b   :  { %v6943_v38 = vmul.f32 %v5166_v30, %v2384_v39  ;;  %v2872_v39 = vld [vmem:[#allocation8 + $0x240] sm:$0xff]  ;;  %v3091_v30 = vpack.c.bf16 %v2875_v40, %v2867_v32  ;;  %v3122_v32 = vpack.c.bf16 %v2938_v29, %v2930_v49  ;;  %v2953_v40 = vld [vmem:[#allocation8 + $0x4c8] sm:$0xff] }
 0x94c   :  { %2493 = vmatpush1.bf16.msra.mxu1 %v6061_v56  ;;  %2534 = vmatpush1.bf16.msra.mxu0 %v6063_v57  ;;  %v3058_v56 = vpack.c.bf16 %v2810_v47, %v2802_v36  ;;  %v2817_v57 = vld [vmem:[#allocation8 + $0x88] sm:$0xff]  ;;  %v2888_v36 = vld [vmem:[#allocation8 + $0x2c0] sm:$0xff] }
 0x94d   :  { %v2477_v44 = vpack.c.bf16 %v6943_v38, %v6943_v38  ;;  %3226 = vmatprep.subr.bf16.mxu1 %v3057_v16  ;;  %3299 = vmatprep.subr.bf16.mxu0 %v3059_v15  ;;  %v3065_v28 = vpack.c.bf16 %v2825_v52, %v2817_v57  ;;  %v2881_v16 = vld [vmem:[#allocation8 + $0x288] sm:$0xff]  ;;  %v2891_v15 = vld [vmem:[#allocation8 + $0x2d8] sm:$0xff]  ;;  %v2882_v57 = vld [vmem:[#allocation8 + $0x290] sm:$0xff] }
 0x94e   :  { %v3097_v35 = vpack.c.bf16 %v2889_v17, %v2881_v16  ;;  %v3099_v47 = vpack.c.bf16 %v2891_v15, %v2883_v14  ;;  %v2890_v52 = vld [vmem:[#allocation8 + $0x2d0] sm:$0xff]  ;;  %v2969_v15 = vld [vmem:[#allocation8 + $0x548] sm:$0xff]  ;;  %v3016_v49 = vld [vmem:[#allocation8 + $0x6c0] sm:$0xff] }
 0x94f   :  { %2511 = vmatmul.mubr.bf16.vlgmr.msra.gmra.mrb[92].mxu1 %v2477_v44  ;;  %2552 = vmatmul.mubr.bf16.vlgmr.msra.gmra.mrb[100].mxu0 %v2477_v44  ;;  %v3088_v44 = vpack.c.bf16 %v2872_v39, %v2864_v24  ;;  %v3098_v33 = vpack.c.bf16 %v2890_v52, %v2882_v57  ;;  %v2947_v24 = vld [vmem:[#allocation8 + $0x498] sm:$0xff]  ;;  %v2946_v16 = vld [vmem:[#allocation8 + $0x490] sm:$0xff]  ;;  %v2968_v57 = vld [vmem:[#allocation8 + $0x540] sm:$0xff] }
 0x950   :  { %3227 = vmatpush1.bf16.msra.mxu1 %v3056_v6  ;;  %3300 = vmatpush1.bf16.msra.mxu0 %v3058_v56  ;;  %v2880_v6 = vld [vmem:[#allocation8 + $0x280] sm:$0xff]  ;;  %v2954_v17 = vld [vmem:[#allocation8 + $0x4d0] sm:$0xff] }
 0x951   :  { %3228 = vmatprep.subr.bf16.mxu1 %v3065_v28  ;;  %3301 = vmatprep.subr.bf16.mxu0 %v3067_v42  ;;  %v3096_v56 = vpack.c.bf16 %v2888_v36, %v2880_v6  ;;  %v2897_v28 = vld [vmem:[#allocation8 + $0x308] sm:$0xff]  ;;  %v2907_v42 = vld [vmem:[#allocation8 + $0x358] sm:$0xff]  ;;  %v3130_v14 = vpack.c.bf16 %v2954_v17, %v2946_v16  ;;  %v3032_v16 = vld [vmem:[#allocation8 + $0x740] sm:$0xff] }
 0x952   :  { %v3105_v27 = vpack.c.bf16 %v2905_v54, %v2897_v28  ;;  %v3107_v18 = vpack.c.bf16 %v2907_v42, %v2899_v61  ;;  %v2963_v6 = vld [vmem:[#allocation8 + $0x518] sm:$0xff]  ;;  %v2962_v28 = vld [vmem:[#allocation8 + $0x510] sm:$0xff]  ;;  %v2985_v42 = vld [vmem:[#allocation8 + $0x5c8] sm:$0xff] }
 0x953   :  { %v2970_v54 = vld [vmem:[#allocation8 + $0x550] sm:$0xff] }
 0x954   :  { %3229 = vmatpush1.bf16.msra.mxu1 %v3064_v50  ;;  %3302 = vmatpush1.bf16.msra.mxu0 %v3066_v19  ;;  %v2896_v50 = vld [vmem:[#allocation8 + $0x300] sm:$0xff]  ;;  %v3138_v61 = vpack.c.bf16 %v2970_v54, %v2962_v28 }
 0x955   :  { %3230 = vmatprep.subr.bf16.mxu1 %v3073_v58  ;;  %3303 = vmatprep.subr.bf16.mxu0 %v3075_v34  ;;  %v3104_v19 = vpack.c.bf16 %v2904_v25, %v2896_v50  ;;  %v2913_v58 = vld [vmem:[#allocation8 + $0x388] sm:$0xff]  ;;  %v2923_v34 = vld [vmem:[#allocation8 + $0x3d8] sm:$0xff]  ;;  %v3048_v28 = vld [vmem:[#allocation8 + $0x7c0] sm:$0xff] }
 0x956   :  { %v3113_v63 = vpack.c.bf16 %v2921_v59, %v2913_v58  ;;  %v3115_v11 = vpack.c.bf16 %v2923_v34, %v2915_v62  ;;  %v2979_v50 = vld [vmem:[#allocation8 + $0x598] sm:$0xff]  ;;  %v2978_v58 = vld [vmem:[#allocation8 + $0x590] sm:$0xff]  ;;  %v3001_v34 = vld [vmem:[#allocation8 + $0x648] sm:$0xff] }
 0x957   :  { %v2986_v59 = vld [vmem:[#allocation8 + $0x5d0] sm:$0xff] }
 0x958   :  { %3231 = vmatpush1.bf16.msra.mxu1 %v3072_v7  ;;  %3304 = vmatpush1.bf16.msra.mxu0 %v3074_v12  ;;  %v2912_v7 = vld [vmem:[#allocation8 + $0x380] sm:$0xff]  ;;  %v3146_v62 = vpack.c.bf16 %v2986_v59, %v2978_v58 }
 0x959   :  { %3232 = vmatprep.subr.bf16.mxu1 %v3081_v51  ;;  %3305 = vmatprep.subr.bf16.mxu0 %v3083_v1  ;;  %v3112_v12 = vpack.c.bf16 %v2920_v8, %v2912_v7  ;;  %v2929_v51 = vld [vmem:[#allocation8 + $0x408] sm:$0xff]  ;;  %v2939_v1 = vld [vmem:[#allocation8 + $0x458] sm:$0xff] }
 0x95a   :  { %v3121_v10 = vpack.c.bf16 %v2937_v55, %v2929_v51  ;;  %v3123_v26 = vpack.c.bf16 %v2939_v1, %v2931_v22  ;;  %v2995_v7 = vld [vmem:[#allocation8 + $0x618] sm:$0xff]  ;;  %v2994_v51 = vld [vmem:[#allocation8 + $0x610] sm:$0xff]  ;;  %v3017_v1 = vld [vmem:[#allocation8 + $0x6c8] sm:$0xff] }
 0x95b   :  { %v3002_v55 = vld [vmem:[#allocation8 + $0x650] sm:$0xff] }
 0x95c   :  { %3233 = vmatpush1.bf16.msra.mxu1 %v3080_v9  ;;  %3306 = vmatpush1.bf16.msra.mxu0 %v3082_v13  ;;  %v2928_v9 = vld [vmem:[#allocation8 + $0x400] sm:$0xff]  ;;  %v3154_v22 = vpack.c.bf16 %v3002_v55, %v2994_v51 }
 0x95d   :  { %3234 = vmatprep.subr.bf16.mxu1 %v3089_v37  ;;  %3307 = vmatprep.subr.bf16.mxu0 %v3091_v30  ;;  %v3120_v13 = vpack.c.bf16 %v2936_v2, %v2928_v9  ;;  %v2945_v37 = vld [vmem:[#allocation8 + $0x488] sm:$0xff]  ;;  %v2955_v30 = vld [vmem:[#allocation8 + $0x4d8] sm:$0xff] }
 0x95e   :  { %v3129_v39 = vpack.c.bf16 %v2953_v40, %v2945_v37  ;;  %v3131_v0 = vpack.c.bf16 %v2955_v30, %v2947_v24  ;;  %v3011_v9 = vld [vmem:[#allocation8 + $0x698] sm:$0xff]  ;;  %v3010_v37 = vld [vmem:[#allocation8 + $0x690] sm:$0xff]  ;;  %v3033_v30 = vld [vmem:[#allocation8 + $0x748] sm:$0xff] }
 0x95f   :  { %v3018_v40 = vld [vmem:[#allocation8 + $0x6d0] sm:$0xff] }
 0x960   :  { %3235 = vmatpush1.bf16.msra.mxu1 %v3088_v44  ;;  %3308 = vmatpush1.bf16.msra.mxu0 %v3090_v31  ;;  %v2944_v44 = vld [vmem:[#allocation8 + $0x480] sm:$0xff]  ;;  %v3162_v24 = vpack.c.bf16 %v3018_v40, %v3010_v37 }
 0x961   :  { %3236 = vmatprep.subr.bf16.mxu1 %v3097_v35  ;;  %3309 = vmatprep.subr.bf16.mxu0 %v3099_v47  ;;  %v3128_v31 = vpack.c.bf16 %v2952_v46, %v2944_v44  ;;  %v2961_v35 = vld [vmem:[#allocation8 + $0x508] sm:$0xff]  ;;  %v2971_v47 = vld [vmem:[#allocation8 + $0x558] sm:$0xff] }
 0x962   :  { %v3137_v36 = vpack.c.bf16 %v2969_v15, %v2961_v35  ;;  %v3139_v52 = vpack.c.bf16 %v2971_v47, %v2963_v6  ;;  %v3027_v44 = vld [vmem:[#allocation8 + $0x718] sm:$0xff]  ;;  %v3026_v35 = vld [vmem:[#allocation8 + $0x710] sm:$0xff]  ;;  %v3049_v47 = vld [vmem:[#allocation8 + $0x7c8] sm:$0xff] }
 0x963   :  { %v3034_v15 = vld [vmem:[#allocation8 + $0x750] sm:$0xff] }
 0x964   :  { %3237 = vmatpush1.bf16.msra.mxu1 %v3096_v56  ;;  %3310 = vmatpush1.bf16.msra.mxu0 %v3098_v33  ;;  %v2960_v56 = vld [vmem:[#allocation8 + $0x500] sm:$0xff]  ;;  %v3170_v6 = vpack.c.bf16 %v3034_v15, %v3026_v35 }
 0x965   :  { %3238 = vmatprep.subr.bf16.mxu1 %v3105_v27  ;;  %3311 = vmatprep.subr.bf16.mxu0 %v3107_v18  ;;  %v3136_v33 = vpack.c.bf16 %v2968_v57, %v2960_v56  ;;  %v2977_v27 = vld [vmem:[#allocation8 + $0x588] sm:$0xff]  ;;  %v2987_v18 = vld [vmem:[#allocation8 + $0x5d8] sm:$0xff] }
 0x966   :  { %v3145_v25 = vpack.c.bf16 %v2985_v42, %v2977_v27  ;;  %v3147_v43 = vpack.c.bf16 %v2987_v18, %v2979_v50  ;;  %v3043_v56 = vld [vmem:[#allocation8 + $0x798] sm:$0xff]  ;;  %v3042_v27 = vld [vmem:[#allocation8 + $0x790] sm:$0xff]  ;;  %v2813_v18 = vld [vmem:[#allocation8 + $0x68] sm:$0xff] }
 0x967   :  { %v3050_v42 = vld [vmem:[#allocation8 + $0x7d0] sm:$0xff] }
 0x968   :  { %3239 = vmatpush1.bf16.msra.mxu1 %v3104_v19  ;;  %3312 = vmatpush1.bf16.msra.mxu0 %v3106_v45  ;;  %v2976_v19 = vld [vmem:[#allocation8 + $0x580] sm:$0xff]  ;;  %v3178_v50 = vpack.c.bf16 %v3050_v42, %v3042_v27 }
 0x969   :  { %3240 = vmatprep.subr.bf16.mxu1 %v3113_v63  ;;  %3313 = vmatprep.subr.bf16.mxu0 %v3115_v11  ;;  %v3144_v45 = vpack.c.bf16 %v2984_v60, %v2976_v19  ;;  %v2993_v63 = vld [vmem:[#allocation8 + $0x608] sm:$0xff]  ;;  %v3003_v11 = vld [vmem:[#allocation8 + $0x658] sm:$0xff] }
 0x96a   :  { %v3153_v8 = vpack.c.bf16 %v3001_v34, %v2993_v63  ;;  %v3155_v3 = vpack.c.bf16 %v3003_v11, %v2995_v7  ;;  %v2807_v19 = vld [vmem:[#allocation8 + $0x38] sm:$0xff]  ;;  %v8127_v34 = vld [vmem:[#allocation84_spill] sm:$0xff] }
 0x96c   :  { %3241 = vmatpush1.bf16.msra.mxu1 %v3112_v12  ;;  %3314 = vmatpush1.bf16.msra.mxu0 %v3114_v48  ;;  %v2992_v12 = vld [vmem:[#allocation8 + $0x600] sm:$0xff] }
 0x96d   :  { %3242 = vmatprep.subr.bf16.mxu1 %v3121_v10  ;;  %3315 = vmatprep.subr.bf16.mxu0 %v3123_v26  ;;  %v3152_v48 = vpack.c.bf16 %v3000_v4, %v2992_v12  ;;  %v3009_v10 = vld [vmem:[#allocation8 + $0x688] sm:$0xff]  ;;  %v3019_v26 = vld [vmem:[#allocation8 + $0x6d8] sm:$0xff] }
 0x96e   :  { %v3161_v2 = vpack.c.bf16 %v3017_v1, %v3009_v10  ;;  %v3163_v29 = vpack.c.bf16 %v3019_v26, %v3011_v9  ;;  %v8128_v12 = vld [vmem:[#allocation85_spill] sm:$0xff] }
 0x970   :  { %3243 = vmatpush1.bf16.msra.mxu1 %v3120_v13  ;;  %3316 = vmatpush1.bf16.msra.mxu0 %v3122_v32  ;;  %v3008_v13 = vld [vmem:[#allocation8 + $0x680] sm:$0xff] }
 0x971   :  { %3244 = vmatprep.subr.bf16.mxu1 %v3129_v39  ;;  %3317 = vmatprep.subr.bf16.mxu0 %v3131_v0  ;;  %v3160_v32 = vpack.c.bf16 %v3016_v49, %v3008_v13  ;;  %v3025_v39 = vld [vmem:[#allocation8 + $0x708] sm:$0xff]  ;;  %v3035_v0 = vld [vmem:[#allocation8 + $0x758] sm:$0xff] }
 0x972   :  { %v3169_v46 = vpack.c.bf16 %v3033_v30, %v3025_v39  ;;  %v3171_v17 = vpack.c.bf16 %v3035_v0, %v3027_v44 }
 0x974   :  { %3245 = vmatpush1.bf16.msra.mxu1 %v3128_v31  ;;  %3318 = vmatpush1.bf16.msra.mxu0 %v3130_v14  ;;  %v3024_v31 = vld [vmem:[#allocation8 + $0x700] sm:$0xff] }
 0x975   :  { %3246 = vmatprep.subr.bf16.mxu1 %v3137_v36  ;;  %3319 = vmatprep.subr.bf16.mxu0 %v3139_v52  ;;  %v3168_v14 = vpack.c.bf16 %v3032_v16, %v3024_v31  ;;  %v3041_v36 = vld [vmem:[#allocation8 + $0x788] sm:$0xff]  ;;  %v3051_v52 = vld [vmem:[#allocation8 + $0x7d8] sm:$0xff] }
 0x976   :  { %v3177_v57 = vpack.c.bf16 %v3049_v47, %v3041_v36  ;;  %v3179_v54 = vpack.c.bf16 %v3051_v52, %v3043_v56  ;;  %v8130_v16 = vld [vmem:[#allocation87_spill] sm:$0xff]  ;;  %v8132_v47 = vld [vmem:[#allocation89_spill] sm:$0xff] }
 0x978   :  { %3247 = vmatpush1.bf16.msra.mxu1 %v3136_v33  ;;  %3320 = vmatpush1.bf16.msra.mxu0 %v3138_v61  ;;  %v3040_v33 = vld [vmem:[#allocation8 + $0x780] sm:$0xff] }
 0x979   :  { %3248 = vmatprep.subr.bf16.mxu1 %v3145_v25  ;;  %3321 = vmatprep.subr.bf16.mxu0 %v3147_v43  ;;  %v3176_v61 = vpack.c.bf16 %v3048_v28, %v3040_v33  ;;  %v2805_v25 = vld [vmem:[#allocation8 + $0x28] sm:$0xff]  ;;  %v2815_v43 = vld [vmem:[#allocation8 + $0x78] sm:$0xff] }
 0x97a   :  { %v3061_v60 = vpack.c.bf16 %v2813_v18, %v2805_v25 }
 0x97c   :  { %3249 = vmatpush1.bf16.msra.mxu1 %v3144_v45  ;;  %3322 = vmatpush1.bf16.msra.mxu0 %v3146_v62  ;;  %v3063_v45 = vpack.c.bf16 %v2815_v43, %v2807_v19  ;;  %v8126_v62 = vld [vmem:[#allocation83_spill] sm:$0xff] }
 0x97d   :  { %3250 = vmatprep.subr.bf16.mxu1 %v3153_v8  ;;  %3323 = vmatprep.subr.bf16.mxu0 %v3155_v3  ;;  %v8129_v3 = vld [vmem:[#allocation86_spill] sm:$0xff] }
 0x980   :  { %3251 = vmatpush1.bf16.msra.mxu1 %v3152_v48  ;;  %3324 = vmatpush1.bf16.msra.mxu0 %v3154_v22 }
 0x981   :  { %3252 = vmatprep.subr.bf16.mxu1 %v3161_v2  ;;  %3325 = vmatprep.subr.bf16.mxu0 %v3163_v29 }
 0x984   :  { %3253 = vmatpush1.bf16.msra.mxu1 %v3160_v32  ;;  %3326 = vmatpush1.bf16.msra.mxu0 %v3162_v24 }
 0x985   :  { %3254 = vmatprep.subr.bf16.mxu1 %v3169_v46  ;;  %3327 = vmatprep.subr.bf16.mxu0 %v3171_v17 }
 0x988   :  { %3255 = vmatpush1.bf16.msra.mxu1 %v3168_v14  ;;  %3328 = vmatpush1.bf16.msra.mxu0 %v3170_v6  ;;  %v8131_v14 = vld [vmem:[#allocation88_spill] sm:$0xff] }
 0x989   :  { %3256 = vmatprep.subr.bf16.mxu1 %v3177_v57  ;;  %3329 = vmatprep.subr.bf16.mxu0 %v3179_v54  ;;  %v8133_v57 = vld [vmem:[#allocation90_spill] sm:$0xff] }
 0x98c   :  { %3257 = vmatpush1.bf16.msra.mxu1 %v3176_v61  ;;  %3330 = vmatpush1.bf16.msra.mxu0 %v3178_v50 }
 0x98d   :  { %3372 = vmatprep.subr.bf16.mxu1 %v3061_v60  ;;  %3431 = vmatprep.subr.bf16.mxu0 %v3063_v45 }
 0xa02   :  { %v2425_v58 = vpop.f32.mrb[88].mxu1  ;;  %v2466_v59 = vpop.f32.mrb[96].mxu0 }
 0xa03   :  { %v2473_v63 = vadd.f32 %v2425_v58, %v8126_v62  ;;  %v2475_v7 = vadd.f32 %v2466_v59, %v8127_v34  ;;  %v2427_v8 = vpop.f32.mrb[89].mxu1  ;;  %v2468_v11 = vpop.f32.mrb[97].mxu0 }
 0xa04   :  { %v2474_v4 = vadd.f32 %v2427_v8, %v8128_v12  ;;  %v2476_v48 = vadd.f32 %v2468_v11, %v8129_v3  ;;  %v2429_v51 = vpop.f32.mrb[90].mxu1  ;;  %v2470_v55 = vpop.f32.mrb[98].mxu0  ;;  %v2804_v12 = vld [vmem:[#allocation8 + $0x20] sm:$0xff] }
 0xa05   :  { %v2564_v22 = vmul.f32 0.5, %v2473_v63  ;;  %v2430_v10 = vpop.f32.mrb[91].mxu1  ;;  %v2471_v1 = vpop.f32.mrb[99].mxu0  ;;  %v2812_v3 = vld [vmem:[#allocation8 + $0x60] sm:$0xff]  ;;  %v2814_v51 = vld [vmem:[#allocation8 + $0x70] sm:$0xff] }
 0xa06   :  { %v2568_v9 = vmul.f32 0.5, %v2474_v4  ;;  %v2573_v2 = vmul.f32 0.5, %v2476_v48  ;;  %v2806_v48 = vld [vmem:[#allocation8 + $0x30] sm:$0xff]  ;;  %v2829_v10 = vld [vmem:[#allocation8 + $0xe8] sm:$0xff]  ;;  %v2823_v1 = vld [vmem:[#allocation8 + $0xb8] sm:$0xff] }
 0xa07   :  { %5167 = vtanh.f32 %v2564_v22  ;;  %v2821_v22 = vld [vmem:[#allocation8 + $0xa8] sm:$0xff] }
 0xa08   :  { %5169 = vtanh.f32 %v2568_v9  ;;  %v2831_v9 = vld [vmem:[#allocation8 + $0xf8] sm:$0xff] }
 0xa09   :  { %5171 = vtanh.f32 %v2475_v7 }
 0xa0a   :  { %5173 = vtanh.f32 %v2573_v2 }
 0xa11   :  { %v5168_v26 = vpop.eup %5167 }
 0xa12   :  { %v5170_v13 = vpop.eup %5169  ;;  %v2566_v49 = vmul.f32 0.5, %v5168_v26  ;;  %v3060_v26 = vpack.c.bf16 %v2812_v3, %v2804_v12  ;;  %v2868_v12 = vld [vmem:[#allocation8 + $0x220] sm:$0xff] }
 0xa13   :  { %v2570_v29 = vmul.f32 0.5, %v5170_v13  ;;  %v5172_v37 = vpop.eup %5171  ;;  %v2820_v13 = vld [vmem:[#allocation8 + $0xa0] sm:$0xff] }
 0xa14   :  { %v2567_v32 = vadd.f32 0.5, %v2566_v49  ;;  %v5174_v44 = vpop.eup %5173  ;;  %v2828_v49 = vld [vmem:[#allocation8 + $0xe0] sm:$0xff] }
 0xa15   :  { %v2571_v40 = vadd.f32 0.5, %v2570_v29  ;;  %v2575_v46 = vmul.f32 0.5, %v5174_v44  ;;  %v8134_v29 = vld [vmem:[#allocation115_spill] sm:$0xff]  ;;  %v3071_v44 = vpack.c.bf16 %v2831_v9, %v2823_v1  ;;  %v2887_v1 = vld [vmem:[#allocation8 + $0x2b8] sm:$0xff] }
 0xa16   :  { %v2578_v24 = vmul.f32 %v5172_v37, %v2567_v32  ;;  %v8135_v32 = vld [vmem:[#allocation50_spill] sm:$0xff]  ;;  %v2895_v9 = vld [vmem:[#allocation8 + $0x2f8] sm:$0xff] }
 0xa17   :  { %v2577_v39 = vmul.f32 %v2571_v40, %v6898_v20  ;;  %v2576_v36 = vadd.f32 0.5, %v2575_v46  ;;  %v6966_v37 = vpack.c.bf16 %v8135_v32, %v8134_v29  ;;  %v2822_v40 = vld [vmem:[#allocation8 + $0xb0] sm:$0xff]  ;;  %v2845_v46 = vld [vmem:[#allocation8 + $0x168] sm:$0xff] }
 0xa18   :  { %v8141_v29 = vld [vmem:[#allocation60_spill] sm:$0xff] }
 0xa19   :  { %v2579_v30 = vadd.f32 %v2578_v24, %v2577_v39  ;;  %v2830_v24 = vld [vmem:[#allocation8 + $0xf0] sm:$0xff]  ;;  %v2837_v39 = vld [vmem:[#allocation8 + $0x128] sm:$0xff]  ;;  %v6992_v32 = vpack.c.bf16 %v6813_v5, %v8141_v29 }
 0xa1a   :  { %v2973_v29 = vld [vmem:[#allocation8 + $0x568] sm:$0xff] }
 0xa1b   :  { %5175 = vtanh.f32 %v2579_v30  ;;  %v3069_v30 = vpack.c.bf16 %v2829_v10, %v2821_v22  ;;  %v2885_v22 = vld [vmem:[#allocation8 + $0x2a8] sm:$0xff] }
 0xa1c   :  { %v2893_v10 = vld [vmem:[#allocation8 + $0x2e8] sm:$0xff] }
 0xa22   :  { %v2512_v0 = vpop.f32.mrb[92].mxu1  ;;  %v2553_v31 = vpop.f32.mrb[100].mxu0 }
 0xa23   :  { %v2560_v17 = vadd.f32 %v2512_v0, %v8130_v16  ;;  %v2562_v35 = vadd.f32 %v2553_v31, %v8131_v14  ;;  %v2514_v15 = vpop.f32.mrb[93].mxu1  ;;  %v2555_v6 = vpop.f32.mrb[101].mxu0  ;;  %v2847_v0 = vld [vmem:[#allocation8 + $0x178] sm:$0xff]  ;;  %v3070_v14 = vpack.c.bf16 %v2830_v24, %v2822_v40  ;;  %v2886_v40 = vld [vmem:[#allocation8 + $0x2b0] sm:$0xff] }
 0xa24   :  { %v2561_v56 = vadd.f32 %v2514_v15, %v8132_v47  ;;  %v2563_v52 = vadd.f32 %v2555_v6, %v8133_v57  ;;  %v2516_v33 = vpop.f32.mrb[94].mxu1  ;;  %v2557_v28 = vpop.f32.mrb[102].mxu0  ;;  %v8136_v31 = vld [vmem:[#allocation61_spill] sm:$0xff]  ;;  %v3077_v15 = vpack.c.bf16 %v2845_v46, %v2837_v39  ;;  %v2838_v47 = vld [vmem:[#allocation8 + $0x130] sm:$0xff]  ;;  %v2853_v57 = vld [vmem:[#allocation8 + $0x1a8] sm:$0xff] }
 0xa25   :  { %v5176_v20 = vpop.eup %5175  ;;  %v2582_v54 = vmul.f32 0.5, %v2560_v17  ;;  %v2517_v61 = vpop.f32.mrb[95].mxu1  ;;  %v6974_v16 = vpack.c.bf16 %v8136_v31, %v6851_v21  ;;  %v3068_v17 = vpack.c.bf16 %v2828_v49, %v2820_v13  ;;  %v2855_v21 = vld [vmem:[#allocation8 + $0x1b8] sm:$0xff]  ;;  %v2884_v13 = vld [vmem:[#allocation8 + $0x2a0] sm:$0xff]  ;;  %v2894_v24 = vld [vmem:[#allocation8 + $0x2f0] sm:$0xff] }
 0xa26   :  { %v2558_v27 = vpop.f32.mrb[103].mxu0  ;;  %v6958_v42 = vmul.f32 %v5176_v20, %v2576_v36  ;;  %v2586_v50 = vmul.f32 0.5, %v2561_v56  ;;  %v2591_v25 = vmul.f32 0.5, %v2563_v52  ;;  %v2844_v36 = vld [vmem:[#allocation8 + $0x160] sm:$0xff]  ;;  %v2846_v56 = vld [vmem:[#allocation8 + $0x170] sm:$0xff]  ;;  %v2861_v52 = vld [vmem:[#allocation8 + $0x1e8] sm:$0xff] }
 0xa27   :  { %5177 = vtanh.f32 %v2582_v54  ;;  %v2863_v33 = vld [vmem:[#allocation8 + $0x1f8] sm:$0xff]  ;;  %v3078_v20 = vpack.c.bf16 %v2846_v56, %v2838_v47  ;;  %v2852_v54 = vld [vmem:[#allocation8 + $0x1a0] sm:$0xff]  ;;  %v2901_v39 = vld [vmem:[#allocation8 + $0x328] sm:$0xff] }
 0xa28   :  { %5179 = vtanh.f32 %v2586_v50  ;;  %v2860_v61 = vld [vmem:[#allocation8 + $0x1e0] sm:$0xff]  ;;  %v8137_v27 = vld [vmem:[#allocation53_spill] sm:$0xff]  ;;  %v8138_v50 = vld [vmem:[#allocation56_spill] sm:$0xff] }
 0xa29   :  { %5181 = vtanh.f32 %v2562_v35  ;;  %v2836_v35 = vld [vmem:[#allocation8 + $0x120] sm:$0xff]  ;;  %v2909_v46 = vld [vmem:[#allocation8 + $0x368] sm:$0xff]  ;;  %v2902_v56 = vld [vmem:[#allocation8 + $0x330] sm:$0xff] }
 0xa2a   :  { %5183 = vtanh.f32 %v2591_v25  ;;  %v3076_v28 = vpack.c.bf16 %v2844_v36, %v2836_v35  ;;  %v6980_v25 = vpack.c.bf16 %v8138_v50, %v8137_v27  ;;  %v2892_v49 = vld [vmem:[#allocation8 + $0x2e0] sm:$0xff]  ;;  %v8142_v31 = vld [vmem:[#allocation51_spill] sm:$0xff]  ;;  %v3102_v35 = vpack.c.bf16 %v2894_v24, %v2886_v40  ;;  %v2967_v40 = vld [vmem:[#allocation8 + $0x538] sm:$0xff] }
 0xa2b   :  { %v3100_v5 = vpack.c.bf16 %v2892_v49, %v2884_v13  ;;  %v2908_v47 = vld [vmem:[#allocation8 + $0x360] sm:$0xff]  ;;  %v7004_v50 = vpack.c.bf16 %v6958_v42, %v6905_v23  ;;  %v2958_v13 = vld [vmem:[#allocation8 + $0x4f0] sm:$0xff]  ;;  %v2965_v49 = vld [vmem:[#allocation8 + $0x528] sm:$0xff] }
 0xa2c   :  { %v2924_v27 = vld [vmem:[#allocation8 + $0x3e0] sm:$0xff]  ;;  %v2975_v24 = vld [vmem:[#allocation8 + $0x578] sm:$0xff] }
 0xa31   :  { %v5178_v18 = vpop.eup %5177 }
 0xa32   :  { %v5180_v19 = vpop.eup %5179  ;;  %v2584_v60 = vmul.f32 0.5, %v5178_v18  ;;  %v2854_v18 = vld [vmem:[#allocation8 + $0x1b0] sm:$0xff] }
 0xa33   :  { %v2588_v43 = vmul.f32 0.5, %v5180_v19  ;;  %v5182_v58 = vpop.eup %5181  ;;  %v2862_v19 = vld [vmem:[#allocation8 + $0x1f0] sm:$0xff] }
 0xa34   :  { %v2585_v45 = vadd.f32 0.5, %v2584_v60  ;;  %v5184_v7 = vpop.eup %5183  ;;  %v2869_v60 = vld [vmem:[#allocation8 + $0x228] sm:$0xff] }
 0xa35   :  { %v2589_v59 = vadd.f32 0.5, %v2588_v43  ;;  %v2593_v8 = vmul.f32 0.5, %v5184_v7  ;;  %v3085_v43 = vpack.c.bf16 %v2861_v52, %v2853_v57  ;;  %v2910_v57 = vld [vmem:[#allocation8 + $0x370] sm:$0xff]  ;;  %v2917_v52 = vld [vmem:[#allocation8 + $0x3a8] sm:$0xff] }
 0xa36   :  { %v2596_v62 = vmul.f32 %v5182_v58, %v2585_v45  ;;  %v3087_v45 = vpack.c.bf16 %v2863_v33, %v2855_v21  ;;  %v2877_v58 = vld [vmem:[#allocation8 + $0x268] sm:$0xff]  ;;  %v2919_v33 = vld [vmem:[#allocation8 + $0x3b8] sm:$0xff] }
 0xa37   :  { %v2595_v63 = vmul.f32 %v2589_v59, %v6928_v41  ;;  %v2594_v11 = vadd.f32 0.5, %v2593_v8  ;;  %v3062_v41 = vpack.c.bf16 %v2814_v51, %v2806_v48  ;;  %v2871_v59 = vld [vmem:[#allocation8 + $0x238] sm:$0xff]  ;;  %v3084_v8 = vpack.c.bf16 %v2860_v61, %v2852_v54  ;;  %v2876_v48 = vld [vmem:[#allocation8 + $0x260] sm:$0xff]  ;;  %v2870_v51 = vld [vmem:[#allocation8 + $0x230] sm:$0xff] }
 0xa38   :  { %v2925_v21 = vld [vmem:[#allocation8 + $0x3e8] sm:$0xff]  ;;  %v3110_v54 = vpack.c.bf16 %v2910_v57, %v2902_v56  ;;  %v2916_v61 = vld [vmem:[#allocation8 + $0x3a0] sm:$0xff] }
 0xa39   :  { %v2597_v34 = vadd.f32 %v2596_v62, %v2595_v63  ;;  %v2879_v62 = vld [vmem:[#allocation8 + $0x278] sm:$0xff]  ;;  %v2980_v56 = vld [vmem:[#allocation8 + $0x5a0] sm:$0xff] }
 0xa3a   :  { %v8139_v63 = vld [vmem:[#allocation57_spill] sm:$0xff]  ;;  %v3095_v3 = vpack.c.bf16 %v2879_v62, %v2871_v59  ;;  %v2988_v57 = vld [vmem:[#allocation8 + $0x5e0] sm:$0xff] }
 0xa3b   :  { %5185 = vtanh.f32 %v2597_v34  ;;  %v8140_v34 = vld [vmem:[#allocation54_spill] sm:$0xff]  ;;  %v2935_v59 = vld [vmem:[#allocation8 + $0x438] sm:$0xff] }
 0xa3c   :  { %v6986_v7 = vpack.c.bf16 %v8140_v34, %v8139_v63  ;;  %v2943_v62 = vld [vmem:[#allocation8 + $0x478] sm:$0xff]  ;;  %v3116_v63 = vpack.c.bf16 %v2924_v27, %v2916_v61 }
 0xa3d   :  { %v3127_v42 = vpack.c.bf16 %v2943_v62, %v2935_v59  ;;  %v2999_v61 = vld [vmem:[#allocation8 + $0x638] sm:$0xff]  ;;  %v2998_v59 = vld [vmem:[#allocation8 + $0x630] sm:$0xff] }
 0xa3e   :  { %v3007_v27 = vld [vmem:[#allocation8 + $0x678] sm:$0xff]  ;;  %v3006_v62 = vld [vmem:[#allocation8 + $0x670] sm:$0xff] }
 0xa45   :  { %v5186_v4 = vpop.eup %5185 }
 0xa46   :  { %v2599_v55 = vmul.f32 %v5186_v4, %v2594_v11  ;;  %v3086_v11 = vpack.c.bf16 %v2862_v19, %v2854_v18  ;;  %v3093_v4 = vpack.c.bf16 %v2877_v58, %v2869_v60  ;;  %v2918_v18 = vld [vmem:[#allocation8 + $0x3b0] sm:$0xff]  ;;  %v2933_v60 = vld [vmem:[#allocation8 + $0x428] sm:$0xff] }
 0xa47   :  { %v2926_v19 = vld [vmem:[#allocation8 + $0x3f0] sm:$0xff]  ;;  %v2941_v58 = vld [vmem:[#allocation8 + $0x468] sm:$0xff] }
 0xa48   :  { %v6962_v2 = vpack.c.bf16 %v6943_v38, %v2599_v55  ;;  %v2839_v38 = vld [vmem:[#allocation8 + $0x138] sm:$0xff]  ;;  %v2878_v55 = vld [vmem:[#allocation8 + $0x270] sm:$0xff]  ;;  %v3118_v34 = vpack.c.bf16 %v2926_v19, %v2918_v18  ;;  %v3125_v23 = vpack.c.bf16 %v2941_v58, %v2933_v60  ;;  %v3148_v18 = vpack.c.bf16 %v2988_v57, %v2980_v56  ;;  %v2996_v60 = vld [vmem:[#allocation8 + $0x620] sm:$0xff] }
 0xa49   :  { %v3079_v6 = vpack.c.bf16 %v2847_v0, %v2839_v38  ;;  %v2903_v38 = vld [vmem:[#allocation8 + $0x338] sm:$0xff]  ;;  %v3159_v58 = vpack.c.bf16 %v3007_v27, %v2999_v61  ;;  %v2602_v61 = vld [vmem:[#allocation10 + $0x10] sm:$0xff] }
 0xa4a   :  { %3258 = vmatprep.mubr.bf16.mxu1 %v6962_v2  ;;  %3331 = vmatprep.mubr.bf16.mxu0 %v6962_v2  ;;  %v2911_v0 = vld [vmem:[#allocation8 + $0x378] sm:$0xff]  ;;  %v2606_v27 = vld [vmem:[#allocation10 + $0x30] sm:$0xff] }
 0xa4b   :  { %3259 = vmatmul.mubr.bf16.vlgmr.msra.gmra.mrb[96].mxu1 %v6966_v37  ;;  %3332 = vmatmul.mubr.bf16.vlgmr.msra.gmra.mrb[104].mxu0 %v6966_v37  ;;  %v3111_v36 = vpack.c.bf16 %v2911_v0, %v2903_v38  ;;  %v3141_v38 = vpack.c.bf16 %v2973_v29, %v2965_v49  ;;  %v3143_v0 = vpack.c.bf16 %v2975_v24, %v2967_v40  ;;  %v3030_v40 = vld [vmem:[#allocation8 + $0x730] sm:$0xff]  ;;  %v2603_v56 = vld [vmem:[#allocation10 + $0x18] sm:$0xff] }
 0xa4c   :  { %3373 = vmatpush1.bf16.msra.mxu1 %v3060_v26  ;;  %3432 = vmatpush1.bf16.msra.mxu0 %v3062_v41  ;;  %v3092_v26 = vpack.c.bf16 %v2876_v48, %v2868_v12  ;;  %v3094_v41 = vpack.c.bf16 %v2878_v55, %v2870_v51  ;;  %v2934_v12 = vld [vmem:[#allocation8 + $0x430] sm:$0xff]  ;;  %v2957_v48 = vld [vmem:[#allocation8 + $0x4e8] sm:$0xff]  ;;  %v2951_v51 = vld [vmem:[#allocation8 + $0x4b8] sm:$0xff] }
 0xa4d   :  { %3268 = vmatprep.mubr.bf16.mxu1 %v6974_v16  ;;  %3341 = vmatprep.mubr.bf16.mxu0 %v6974_v16  ;;  %v2959_v55 = vld [vmem:[#allocation8 + $0x4f8] sm:$0xff]  ;;  %v3038_v24 = vld [vmem:[#allocation8 + $0x770] sm:$0xff] }
 0xa4e   :  { %3374 = vmatprep.subr.bf16.mxu1 %v3069_v30  ;;  %3433 = vmatprep.subr.bf16.mxu0 %v3071_v44  ;;  %v3101_v30 = vpack.c.bf16 %v2893_v10, %v2885_v22  ;;  %v3103_v44 = vpack.c.bf16 %v2895_v9, %v2887_v1  ;;  %v2948_v1 = vld [vmem:[#allocation8 + $0x4a0] sm:$0xff]  ;;  %v2607_v57 = vld [vmem:[#allocation10 + $0x38] sm:$0xff] }
 0xa4f   :  { %v2956_v9 = vld [vmem:[#allocation8 + $0x4e0] sm:$0xff] }
 0xa50   :  { %3375 = vmatpush1.bf16.msra.mxu1 %v3068_v17  ;;  %3434 = vmatpush1.bf16.msra.mxu0 %v3070_v14  ;;  %v8143_v17 = vld [vmem:[#allocation48_spill] sm:$0xff] }
 0xa51   :  { %3376 = vmatprep.subr.bf16.mxu1 %v3077_v15  ;;  %3435 = vmatprep.subr.bf16.mxu0 %v3079_v6  ;;  %v6998_v14 = vpack.c.bf16 %v8143_v17, %v8142_v31  ;;  %v2900_v15 = vld [vmem:[#allocation8 + $0x320] sm:$0xff]  ;;  %v3109_v6 = vpack.c.bf16 %v2909_v46, %v2901_v39  ;;  %v3132_v39 = vpack.c.bf16 %v2956_v9, %v2948_v1  ;;  %v2966_v31 = vld [vmem:[#allocation8 + $0x530] sm:$0xff]  ;;  %v3031_v1 = vld [vmem:[#allocation8 + $0x738] sm:$0xff] }
 0xa52   :  { %v2972_v46 = vld [vmem:[#allocation8 + $0x560] sm:$0xff]  ;;  %v2974_v17 = vld [vmem:[#allocation8 + $0x570] sm:$0xff]  ;;  %v3039_v9 = vld [vmem:[#allocation8 + $0x778] sm:$0xff] }
 0xa53   :  { %3269 = vmatmul.mubr.bf16.gmra.mrb[100].mxu1 %v6980_v25  ;;  %3342 = vmatmul.mubr.bf16.gmra.mrb[108].mxu0 %v6980_v25  ;;  %v3175_v29 = vpack.c.bf16 %v3039_v9, %v3031_v1  ;;  %v2625_v1 = vld [vmem:[#allocation10 + $0xc8] sm:$0xff] }
 0xa54   :  { %3377 = vmatpush1.bf16.msra.mxu1 %v3076_v28  ;;  %3436 = vmatpush1.bf16.msra.mxu0 %v3078_v20  ;;  %v2927_v28 = vld [vmem:[#allocation8 + $0x3f8] sm:$0xff]  ;;  %v3108_v20 = vpack.c.bf16 %v2908_v47, %v2900_v15  ;;  %v3142_v47 = vpack.c.bf16 %v2974_v17, %v2966_v31  ;;  %v3044_v31 = vld [vmem:[#allocation8 + $0x7a0] sm:$0xff]  ;;  %v2629_v9 = vld [vmem:[#allocation10 + $0xe8] sm:$0xff] }
 0xa55   :  { %3278 = vmatprep.mubr.bf16.mxu1 %v6986_v7  ;;  %3351 = vmatprep.mubr.bf16.mxu0 %v6986_v7  ;;  %v2983_v15 = vld [vmem:[#allocation8 + $0x5b8] sm:$0xff]  ;;  %v3052_v17 = vld [vmem:[#allocation8 + $0x7e0] sm:$0xff] }
 0xa56   :  { %3378 = vmatprep.subr.bf16.mxu1 %v3085_v43  ;;  %3437 = vmatprep.subr.bf16.mxu0 %v3087_v45  ;;  %v3117_v43 = vpack.c.bf16 %v2925_v21, %v2917_v52  ;;  %v3119_v45 = vpack.c.bf16 %v2927_v28, %v2919_v33  ;;  %v2982_v33 = vld [vmem:[#allocation8 + $0x5b0] sm:$0xff] }
 0xa57   :  { %v2990_v28 = vld [vmem:[#allocation8 + $0x5f0] sm:$0xff] }
 0xa58   :  { %3379 = vmatpush1.bf16.msra.mxu1 %v3084_v8  ;;  %3438 = vmatpush1.bf16.msra.mxu0 %v3086_v11  ;;  %v2932_v8 = vld [vmem:[#allocation8 + $0x420] sm:$0xff]  ;;  %v3150_v19 = vpack.c.bf16 %v2990_v28, %v2982_v33  ;;  %v7012_v28 = vpack.c.bf16 %v2607_v57, %v2603_v56  ;;  %v2643_v56 = vld [vmem:[#allocation10 + $0x158] sm:$0xff] }
 0xa59   :  { %3380 = vmatprep.subr.bf16.mxu1 %v3093_v4  ;;  %3439 = vmatprep.subr.bf16.mxu0 %v3095_v3  ;;  %v2940_v11 = vld [vmem:[#allocation8 + $0x460] sm:$0xff]  ;;  %v2942_v4 = vld [vmem:[#allocation8 + $0x470] sm:$0xff]  ;;  %v2949_v3 = vld [vmem:[#allocation8 + $0x4a8] sm:$0xff] }
 0xa5a   :  { %v3124_v22 = vpack.c.bf16 %v2940_v11, %v2932_v8  ;;  %v3126_v10 = vpack.c.bf16 %v2942_v4, %v2934_v12  ;;  %v3015_v8 = vld [vmem:[#allocation8 + $0x6b8] sm:$0xff]  ;;  %v3012_v12 = vld [vmem:[#allocation8 + $0x6a0] sm:$0xff] }
 0xa5b   :  { %3279 = vmatmul.mubr.bf16.gmra.mrb[104].mxu1 %v6992_v32  ;;  %3352 = vmatmul.mubr.bf16.gmra.mrb[112].mxu0 %v6992_v32  ;;  %v3023_v11 = vld [vmem:[#allocation8 + $0x6f8] sm:$0xff]  ;;  %v3020_v4 = vld [vmem:[#allocation8 + $0x6e0] sm:$0xff] }
 0xa5c   :  { %3381 = vmatpush1.bf16.msra.mxu1 %v3092_v26  ;;  %3440 = vmatpush1.bf16.msra.mxu0 %v3094_v41  ;;  %v3133_v26 = vpack.c.bf16 %v2957_v48, %v2949_v3  ;;  %v2950_v41 = vld [vmem:[#allocation8 + $0x4b0] sm:$0xff]  ;;  %v3167_v48 = vpack.c.bf16 %v3023_v11, %v3015_v8  ;;  %v2647_v57 = vld [vmem:[#allocation10 + $0x178] sm:$0xff] }
 0xa5d   :  { %3288 = vmatprep.mubr.bf16.mxu1 %v6998_v14  ;;  %3361 = vmatprep.mubr.bf16.mxu0 %v6998_v14  ;;  %v2610_v8 = vld [vmem:[#allocation10 + $0x50] sm:$0xff] }
 0xa5e   :  { %3382 = vmatprep.subr.bf16.mxu1 %v3101_v30  ;;  %3441 = vmatprep.subr.bf16.mxu0 %v3103_v44  ;;  %v3134_v30 = vpack.c.bf16 %v2958_v13, %v2950_v41  ;;  %v2964_v44 = vld [vmem:[#allocation8 + $0x520] sm:$0xff]  ;;  %v2614_v11 = vld [vmem:[#allocation10 + $0x70] sm:$0xff] }
 0xa5f   :  { %v3028_v41 = vld [vmem:[#allocation8 + $0x720] sm:$0xff] }
 0xa60   :  { %3383 = vmatpush1.bf16.msra.mxu1 %v3100_v5  ;;  %3442 = vmatpush1.bf16.msra.mxu0 %v3102_v35  ;;  %v2981_v5 = vld [vmem:[#allocation8 + $0x5a8] sm:$0xff]  ;;  %v3036_v13 = vld [vmem:[#allocation8 + $0x760] sm:$0xff] }
 0xa61   :  { %3384 = vmatprep.subr.bf16.mxu1 %v3109_v6  ;;  %3443 = vmatprep.subr.bf16.mxu0 %v3111_v36  ;;  %v2989_v35 = vld [vmem:[#allocation8 + $0x5e8] sm:$0xff]  ;;  %v2991_v6 = vld [vmem:[#allocation8 + $0x5f8] sm:$0xff]  ;;  %v3140_v36 = vpack.c.bf16 %v2972_v46, %v2964_v44 }
 0xa62   :  { %v3149_v52 = vpack.c.bf16 %v2989_v35, %v2981_v5  ;;  %v3151_v21 = vpack.c.bf16 %v2991_v6, %v2983_v15  ;;  %v3047_v44 = vld [vmem:[#allocation8 + $0x7b8] sm:$0xff]  ;;  %v3046_v15 = vld [vmem:[#allocation8 + $0x7b0] sm:$0xff] }
 0xa63   :  { %3289 = vmatmul.mubr.bf16.gmra.mrb[108].mxu1 %v7004_v50  ;;  %3362 = vmatmul.mubr.bf16.gmra.mrb[116].mxu0 %v7004_v50  ;;  %v3055_v46 = vld [vmem:[#allocation8 + $0x7f8] sm:$0xff]  ;;  %v3054_v6 = vld [vmem:[#allocation8 + $0x7f0] sm:$0xff] }
 0xa64   :  { %3385 = vmatpush1.bf16.msra.mxu1 %v3108_v20  ;;  %3444 = vmatpush1.bf16.msra.mxu0 %v3110_v54  ;;  %v2997_v20 = vld [vmem:[#allocation8 + $0x628] sm:$0xff]  ;;  %v3183_v35 = vpack.c.bf16 %v3055_v46, %v3047_v44 }
 0xa65   :  { %3404 = vmatprep.mubr.bf16.mxu1 %v6962_v2  ;;  %3463 = vmatprep.mubr.bf16.mxu0 %v6962_v2  ;;  %v3135_v2 = vpack.c.bf16 %v2959_v55, %v2951_v51  ;;  %v3005_v54 = vld [vmem:[#allocation8 + $0x668] sm:$0xff]  ;;  %v3014_v51 = vld [vmem:[#allocation8 + $0x6b0] sm:$0xff] }
 0xa66   :  { %3386 = vmatprep.subr.bf16.mxu1 %v3117_v43  ;;  %3445 = vmatprep.subr.bf16.mxu0 %v3119_v45  ;;  %v3004_v43 = vld [vmem:[#allocation8 + $0x660] sm:$0xff]  ;;  %v3157_v45 = vpack.c.bf16 %v3005_v54, %v2997_v20  ;;  %v3022_v55 = vld [vmem:[#allocation8 + $0x6f0] sm:$0xff]  ;;  %v2633_v44 = vld [vmem:[#allocation10 + $0x108] sm:$0xff] }
 0xa67   :  { %v2600_v20 = vld [vmem:[#allocation10] sm:$0xff]  ;;  %v2637_v46 = vld [vmem:[#allocation10 + $0x128] sm:$0xff] }
 0xa68   :  { %3387 = vmatpush1.bf16.msra.mxu1 %v3116_v63  ;;  %3446 = vmatpush1.bf16.msra.mxu0 %v3118_v34  ;;  %v3013_v63 = vld [vmem:[#allocation8 + $0x6a8] sm:$0xff]  ;;  %v2604_v54 = vld [vmem:[#allocation10 + $0x20] sm:$0xff] }
 0xa69   :  { %3388 = vmatprep.subr.bf16.mxu1 %v3125_v23  ;;  %3447 = vmatprep.subr.bf16.mxu0 %v3127_v42  ;;  %v3021_v34 = vld [vmem:[#allocation8 + $0x6e8] sm:$0xff]  ;;  %v3156_v23 = vpack.c.bf16 %v3004_v43, %v2996_v60  ;;  %v3158_v42 = vpack.c.bf16 %v3006_v62, %v2998_v59  ;;  %v2611_v60 = vld [vmem:[#allocation10 + $0x58] sm:$0xff]  ;;  %v2608_v59 = vld [vmem:[#allocation10 + $0x40] sm:$0xff] }
 0xa6a   :  { %v3165_v3 = vpack.c.bf16 %v3021_v34, %v3013_v63  ;;  %v2615_v43 = vld [vmem:[#allocation10 + $0x78] sm:$0xff]  ;;  %v2612_v62 = vld [vmem:[#allocation10 + $0x60] sm:$0xff] }
 0xa6b   :  { %v7022_v34 = vpack.c.bf16 %v2615_v43, %v2611_v60  ;;  %v2649_v60 = vld [vmem:[#allocation10 + $0x188] sm:$0xff] }
 0xa6c   :  { %3389 = vmatpush1.bf16.msra.mxu1 %v3124_v22  ;;  %3448 = vmatpush1.bf16.msra.mxu0 %v3126_v10  ;;  %v3029_v22 = vld [vmem:[#allocation8 + $0x728] sm:$0xff] }
 0xa6d   :  { %3390 = vmatprep.subr.bf16.mxu1 %v3133_v26  ;;  %3449 = vmatprep.subr.bf16.mxu0 %v3135_v2  ;;  %v3037_v10 = vld [vmem:[#allocation8 + $0x768] sm:$0xff]  ;;  %v3164_v26 = vpack.c.bf16 %v3020_v4, %v3012_v12  ;;  %v3166_v2 = vpack.c.bf16 %v3022_v55, %v3014_v51  ;;  %v2619_v12 = vld [vmem:[#allocation10 + $0x98] sm:$0xff]  ;;  %v2616_v51 = vld [vmem:[#allocation10 + $0x80] sm:$0xff] }
 0xa6e   :  { %v3173_v49 = vpack.c.bf16 %v3037_v10, %v3029_v22  ;;  %v2623_v4 = vld [vmem:[#allocation10 + $0xb8] sm:$0xff]  ;;  %v2620_v55 = vld [vmem:[#allocation10 + $0xa0] sm:$0xff]  ;;  %v2618_v10 = vld [vmem:[#allocation10 + $0x90] sm:$0xff] }
 0xa6f   :  { %v7038_v22 = vpack.c.bf16 %v2623_v4, %v2619_v12  ;;  %v2653_v43 = vld [vmem:[#allocation10 + $0x1a8] sm:$0xff]  ;;  %v2650_v4 = vld [vmem:[#allocation10 + $0x190] sm:$0xff] }
 0xa70   :  { %3391 = vmatpush1.bf16.msra.mxu1 %v3132_v39  ;;  %3450 = vmatpush1.bf16.msra.mxu0 %v3134_v30  ;;  %v3045_v39 = vld [vmem:[#allocation8 + $0x7a8] sm:$0xff] }
 0xa71   :  { %3392 = vmatprep.subr.bf16.mxu1 %v3141_v38  ;;  %3451 = vmatprep.subr.bf16.mxu0 %v3143_v0  ;;  %v3053_v30 = vld [vmem:[#allocation8 + $0x7e8] sm:$0xff]  ;;  %v3172_v38 = vpack.c.bf16 %v3036_v13, %v3028_v41  ;;  %v3174_v0 = vpack.c.bf16 %v3038_v24, %v3030_v40  ;;  %v7042_v41 = vpack.c.bf16 %v2620_v55, %v2616_v51 }
 0xa72   :  { %v3181_v5 = vpack.c.bf16 %v3053_v30, %v3045_v39  ;;  %v7048_v40 = vpack.c.bf16 %v2629_v9, %v2625_v1  ;;  %v2626_v39 = vld [vmem:[#allocation10 + $0xd0] sm:$0xff]  ;;  %v2657_v51 = vld [vmem:[#allocation10 + $0x1c8] sm:$0xff] }
 0xa73   :  { %v2630_v30 = vld [vmem:[#allocation10 + $0xf0] sm:$0xff]  ;;  %v2661_v55 = vld [vmem:[#allocation10 + $0x1e8] sm:$0xff] }
 0xa74   :  { %3393 = vmatpush1.bf16.msra.mxu1 %v3140_v36  ;;  %3452 = vmatpush1.bf16.msra.mxu0 %v3142_v47  ;;  %v2601_v36 = vld [vmem:[#allocation10 + $0x8] sm:$0xff] }
 0xa75   :  { %3394 = vmatprep.subr.bf16.mxu1 %v3149_v52  ;;  %3453 = vmatprep.subr.bf16.mxu0 %v3151_v21  ;;  %v2605_v47 = vld [vmem:[#allocation10 + $0x28] sm:$0xff]  ;;  %v3180_v52 = vpack.c.bf16 %v3052_v17, %v3044_v31  ;;  %v3182_v21 = vpack.c.bf16 %v3054_v6, %v3046_v15  ;;  %v7060_v17 = vpack.c.bf16 %v2630_v30, %v2626_v39  ;;  %v2634_v6 = vld [vmem:[#allocation10 + $0x110] sm:$0xff] }
 0xa76   :  { %v7010_v33 = vpack.c.bf16 %v2605_v47, %v2601_v36  ;;  %v2641_v36 = vld [vmem:[#allocation10 + $0x148] sm:$0xff]  ;;  %v2658_v39 = vld [vmem:[#allocation10 + $0x1d0] sm:$0xff] }
 0xa77   :  { %v2645_v47 = vld [vmem:[#allocation10 + $0x168] sm:$0xff]  ;;  %v2662_v30 = vld [vmem:[#allocation10 + $0x1f0] sm:$0xff] }
 0xa78   :  { %3395 = vmatpush1.bf16.msra.mxu1 %v3148_v18  ;;  %3454 = vmatpush1.bf16.msra.mxu0 %v3150_v19  ;;  %v2609_v18 = vld [vmem:[#allocation10 + $0x48] sm:$0xff] }
 0xa79   :  { %3396 = vmatprep.subr.bf16.mxu1 %v3157_v45  ;;  %3455 = vmatprep.subr.bf16.mxu0 %v3159_v58  ;;  %v2613_v19 = vld [vmem:[#allocation10 + $0x68] sm:$0xff]  ;;  %v7016_v45 = vpack.c.bf16 %v2604_v54, %v2600_v20  ;;  %v7018_v58 = vpack.c.bf16 %v2606_v27, %v2602_v61  ;;  %v2640_v20 = vld [vmem:[#allocation10 + $0x140] sm:$0xff]  ;;  %v7076_v61 = vpack.c.bf16 %v2645_v47, %v2641_v36  ;;  %v2698_v47 = vld [vmem:[#allocation11 + $0x10] sm:$0xff] }
 0xa7a   :  { %v7020_v63 = vpack.c.bf16 %v2613_v19, %v2609_v18  ;;  %v2644_v54 = vld [vmem:[#allocation10 + $0x160] sm:$0xff]  ;;  %v7078_v27 = vpack.c.bf16 %v2647_v57, %v2643_v56  ;;  %v2642_v18 = vld [vmem:[#allocation10 + $0x150] sm:$0xff]  ;;  %v2705_v57 = vld [vmem:[#allocation11 + $0x48] sm:$0xff] }
 0xa7b   :  { %v2646_v19 = vld [vmem:[#allocation10 + $0x170] sm:$0xff] }
 0xa7c   :  { %3397 = vmatpush1.bf16.msra.mxu1 %v3156_v23  ;;  %3456 = vmatpush1.bf16.msra.mxu0 %v3158_v42  ;;  %v2617_v23 = vld [vmem:[#allocation10 + $0x88] sm:$0xff]  ;;  %v2702_v56 = vld [vmem:[#allocation11 + $0x30] sm:$0xff] }
 0xa7d   :  { %3398 = vmatprep.subr.bf16.mxu1 %v3165_v3  ;;  %3457 = vmatprep.subr.bf16.mxu0 %v3167_v48  ;;  %v2621_v42 = vld [vmem:[#allocation10 + $0xa8] sm:$0xff]  ;;  %v7030_v3 = vpack.c.bf16 %v2612_v62, %v2608_v59  ;;  %v7032_v48 = vpack.c.bf16 %v2614_v11, %v2610_v8  ;;  %v2651_v59 = vld [vmem:[#allocation10 + $0x198] sm:$0xff]  ;;  %v7086_v8 = vpack.c.bf16 %v2644_v54, %v2640_v20 }
 0xa7e   :  { %v2655_v62 = vld [vmem:[#allocation10 + $0x1b8] sm:$0xff]  ;;  %v7088_v11 = vpack.c.bf16 %v2646_v19, %v2642_v18  ;;  %v2709_v20 = vld [vmem:[#allocation11 + $0x68] sm:$0xff] }
 0xa7f   :  { %v7094_v12 = vpack.c.bf16 %v2655_v62, %v2651_v59  ;;  %v2707_v54 = vld [vmem:[#allocation11 + $0x58] sm:$0xff]  ;;  %v2708_v59 = vld [vmem:[#allocation11 + $0x60] sm:$0xff]  ;;  %v2765_v62 = vpack.c.bf16 %v2709_v20, %v2705_v57 }
 0xa80   :  { %3399 = vmatpush1.bf16.msra.mxu1 %v3164_v26  ;;  %3458 = vmatpush1.bf16.msra.mxu0 %v3166_v2  ;;  %v2627_v26 = vld [vmem:[#allocation10 + $0xd8] sm:$0xff]  ;;  %v2724_v57 = vld [vmem:[#allocation11 + $0xe0] sm:$0xff] }
 0xa81   :  { %3400 = vmatprep.subr.bf16.mxu1 %v3173_v49  ;;  %3459 = vmatprep.subr.bf16.mxu0 %v3175_v29  ;;  %v2631_v2 = vld [vmem:[#allocation10 + $0xf8] sm:$0xff]  ;;  %v2624_v49 = vld [vmem:[#allocation10 + $0xc0] sm:$0xff] }
 0xa82   :  { %v2628_v29 = vld [vmem:[#allocation10 + $0xe0] sm:$0xff]  ;;  %v7050_v24 = vpack.c.bf16 %v2631_v2, %v2627_v26  ;;  %v2711_v18 = vld [vmem:[#allocation11 + $0x78] sm:$0xff] }
 0xa83   :  { %v7058_v31 = vpack.c.bf16 %v2628_v29, %v2624_v49  ;;  %v2656_v26 = vld [vmem:[#allocation10 + $0x1c0] sm:$0xff]  ;;  %v7104_v49 = vpack.c.bf16 %v2661_v55, %v2657_v51  ;;  %v2717_v51 = vld [vmem:[#allocation11 + $0xa8] sm:$0xff]  ;;  %v2715_v55 = vld [vmem:[#allocation11 + $0x98] sm:$0xff] }
 0xa84   :  { %3401 = vmatpush1.bf16.msra.mxu1 %v3172_v38  ;;  %3460 = vmatpush1.bf16.msra.mxu0 %v3174_v0  ;;  %v2635_v38 = vld [vmem:[#allocation10 + $0x118] sm:$0xff]  ;;  %v2660_v2 = vld [vmem:[#allocation10 + $0x1e0] sm:$0xff] }
 0xa85   :  { %3402 = vmatprep.subr.bf16.mxu1 %v3181_v5  ;;  %3461 = vmatprep.subr.bf16.mxu0 %v3183_v35  ;;  %v2639_v0 = vld [vmem:[#allocation10 + $0x138] sm:$0xff]  ;;  %v2632_v5 = vld [vmem:[#allocation10 + $0x100] sm:$0xff] }
 0xa86   :  { %v2636_v35 = vld [vmem:[#allocation10 + $0x120] sm:$0xff]  ;;  %v7066_v15 = vpack.c.bf16 %v2639_v0, %v2635_v38  ;;  %v2699_v38 = vld [vmem:[#allocation11 + $0x18] sm:$0xff] }
 0xa87   :  { %v2703_v0 = vld [vmem:[#allocation11 + $0x38] sm:$0xff] }
 0xa88   :  { %3403 = vmatpush1.bf16.msra.mxu1 %v3180_v52  ;;  %3462 = vmatpush1.bf16.msra.mxu0 %v3182_v21  ;;  %v7070_v52 = vpack.c.bf16 %v2636_v35, %v2632_v5  ;;  %v7114_v5 = vpack.c.bf16 %v2660_v2, %v2656_v26  ;;  %v7116_v35 = vpack.c.bf16 %v2662_v30, %v2658_v39  ;;  %v2712_v2 = vld [vmem:[#allocation11 + $0x80] sm:$0xff] }
 0xa89   :  { %3490 = vmatprep.subr.bf16.mxu1 %v7010_v33  ;;  %3531 = vmatprep.subr.bf16.mxu0 %v7012_v28  ;;  %v2763_v36 = vpack.c.bf16 %v2703_v0, %v2699_v38  ;;  %v2716_v39 = vld [vmem:[#allocation11 + $0xa0] sm:$0xff]  ;;  %v2718_v38 = vld [vmem:[#allocation11 + $0xb0] sm:$0xff]  ;;  %v2721_v0 = vld [vmem:[#allocation11 + $0xc8] sm:$0xff] }
 0xa8b   :  { %3405 = vmatmul.mubr.bf16.vlgmr.msra.gmra.mrb[112].mxu1 %v6966_v37  ;;  %3464 = vmatmul.mubr.bf16.vlgmr.msra.gmra.mrb[120].mxu0 %v6966_v37  ;;  %v7036_v37 = vpack.c.bf16 %v2621_v42, %v2617_v23  ;;  %v2648_v23 = vld [vmem:[#allocation10 + $0x180] sm:$0xff] }
 0xa8c   :  { %3410 = vmatprep.mubr.bf16.mxu1 %v6974_v16  ;;  %3469 = vmatprep.mubr.bf16.mxu0 %v6974_v16  ;;  %v2622_v16 = vld [vmem:[#allocation10 + $0xb0] sm:$0xff]  ;;  %v2652_v42 = vld [vmem:[#allocation10 + $0x1a0] sm:$0xff] }
 0xa8d   :  { %3491 = vmatpush1.bf16.msra.mxu1 %v7016_v45  ;;  %3532 = vmatpush1.bf16.msra.mxu0 %v7018_v58  ;;  %v7044_v13 = vpack.c.bf16 %v2622_v16, %v2618_v10  ;;  %v2659_v10 = vld [vmem:[#allocation10 + $0x1d8] sm:$0xff]  ;;  %v7098_v1 = vpack.c.bf16 %v2652_v42, %v2648_v23  ;;  %v2767_v23 = vpack.c.bf16 %v2711_v18, %v2707_v54  ;;  %v2706_v42 = vld [vmem:[#allocation11 + $0x50] sm:$0xff] }
 0xa8e   :  { %3492 = vmatprep.subr.bf16.mxu1 %v7020_v63  ;;  %3533 = vmatprep.subr.bf16.mxu0 %v7022_v34  ;;  %v2663_v16 = vld [vmem:[#allocation10 + $0x1f8] sm:$0xff]  ;;  %v2722_v18 = vld [vmem:[#allocation11 + $0xd0] sm:$0xff] }
 0xa8f   :  { %v7106_v29 = vpack.c.bf16 %v2663_v16, %v2659_v10  ;;  %v2719_v10 = vld [vmem:[#allocation11 + $0xb8] sm:$0xff] }
 0xa91   :  { %3493 = vmatpush1.bf16.msra.mxu1 %v7030_v3  ;;  %3534 = vmatpush1.bf16.msra.mxu0 %v7032_v48 }
 0xa92   :  { %3494 = vmatprep.subr.bf16.mxu1 %v7036_v37  ;;  %3535 = vmatprep.subr.bf16.mxu0 %v7038_v22 }
 0xa93   :  { %3411 = vmatmul.mubr.bf16.gmra.mrb[116].mxu1 %v6980_v25  ;;  %3470 = vmatmul.mubr.bf16.gmra.mrb[124].mxu0 %v6980_v25  ;;  %v7064_v25 = vpack.c.bf16 %v2637_v46, %v2633_v44  ;;  %v2697_v44 = vld [vmem:[#allocation11 + $0x8] sm:$0xff] }
 0xa94   :  { %3416 = vmatprep.mubr.bf16.mxu1 %v6986_v7  ;;  %3475 = vmatprep.mubr.bf16.mxu0 %v6986_v7  ;;  %v2638_v7 = vld [vmem:[#allocation10 + $0x130] sm:$0xff]  ;;  %v2701_v46 = vld [vmem:[#allocation11 + $0x28] sm:$0xff] }
 0xa95   :  { %3495 = vmatpush1.bf16.msra.mxu1 %v7042_v41  ;;  %3536 = vmatpush1.bf16.msra.mxu0 %v7044_v13  ;;  %v7072_v21 = vpack.c.bf16 %v2638_v7, %v2634_v6  ;;  %v2696_v6 = vld [vmem:[#allocation11] sm:$0xff] }
 0xa96   :  { %3496 = vmatprep.subr.bf16.mxu1 %v7048_v40  ;;  %3537 = vmatprep.subr.bf16.mxu0 %v7050_v24  ;;  %v2700_v7 = vld [vmem:[#allocation11 + $0x20] sm:$0xff] }
 0xa97   :  { %v2760_v19 = vpack.c.bf16 %v2700_v7, %v2696_v6  ;;  %v2725_v6 = vld [vmem:[#allocation11 + $0xe8] sm:$0xff]  ;;  %v2723_v7 = vld [vmem:[#allocation11 + $0xd8] sm:$0xff] }
 0xa98   :  { %v2773_v20 = vpack.c.bf16 %v2725_v6, %v2721_v0  ;;  %v2740_v0 = vld [vmem:[#allocation11 + $0x160] sm:$0xff] }
 0xa99   :  { %3497 = vmatpush1.bf16.msra.mxu1 %v7058_v31  ;;  %3538 = vmatpush1.bf16.msra.mxu0 %v7060_v17 }
 0xa9a   :  { %3498 = vmatprep.subr.bf16.mxu1 %v7064_v25  ;;  %3539 = vmatprep.subr.bf16.mxu0 %v7066_v15 }
 0xa9b   :  { %3417 = vmatmul.mubr.bf16.gmra.mrb[120].mxu1 %v6992_v32  ;;  %3476 = vmatmul.mubr.bf16.gmra.mrb[128].mxu0 %v6992_v32  ;;  %v7092_v32 = vpack.c.bf16 %v2653_v43, %v2649_v60  ;;  %v2762_v60 = vpack.c.bf16 %v2702_v56, %v2698_v47  ;;  %v2704_v43 = vld [vmem:[#allocation11 + $0x40] sm:$0xff] }
 0xa9c   :  { %3422 = vmatprep.mubr.bf16.mxu1 %v6998_v14  ;;  %3481 = vmatprep.mubr.bf16.mxu0 %v6998_v14  ;;  %v2654_v14 = vld [vmem:[#allocation10 + $0x1b0] sm:$0xff]  ;;  %v2764_v16 = vpack.c.bf16 %v2708_v59, %v2704_v43  ;;  %v2720_v56 = vld [vmem:[#allocation11 + $0xc0] sm:$0xff]  ;;  %v2733_v43 = vld [vmem:[#allocation11 + $0x128] sm:$0xff] }
 0xa9d   :  { %3499 = vmatpush1.bf16.msra.mxu1 %v7070_v52  ;;  %3540 = vmatpush1.bf16.msra.mxu0 %v7072_v21  ;;  %v7100_v9 = vpack.c.bf16 %v2654_v14, %v2650_v4  ;;  %v2710_v4 = vld [vmem:[#allocation11 + $0x70] sm:$0xff]  ;;  %v2713_v14 = vld [vmem:[#allocation11 + $0x88] sm:$0xff]  ;;  %v2731_v59 = vld [vmem:[#allocation11 + $0x118] sm:$0xff] }
 0xa9e   :  { %3500 = vmatprep.subr.bf16.mxu1 %v7076_v61  ;;  %3541 = vmatprep.subr.bf16.mxu0 %v7078_v27  ;;  %v2766_v26 = vpack.c.bf16 %v2710_v4, %v2706_v42  ;;  %v2769_v30 = vpack.c.bf16 %v2717_v51, %v2713_v14  ;;  %v2728_v4 = vld [vmem:[#allocation11 + $0x100] sm:$0xff] }
 0xa9f   :  { %v2732_v14 = vld [vmem:[#allocation11 + $0x120] sm:$0xff] }
 0xaa1   :  { %3501 = vmatpush1.bf16.msra.mxu1 %v7086_v8  ;;  %3542 = vmatpush1.bf16.msra.mxu0 %v7088_v11 }
 0xaa2   :  { %3502 = vmatprep.subr.bf16.mxu1 %v7092_v32  ;;  %3543 = vmatprep.subr.bf16.mxu0 %v7094_v12 }
 0xaa3   :  { %3423 = vmatmul.mubr.bf16.gmra.mrb[124].mxu1 %v7004_v50  ;;  %3482 = vmatmul.mubr.bf16.gmra.mrb[132].mxu0 %v7004_v50  ;;  %v2761_v50 = vpack.c.bf16 %v2701_v46, %v2697_v44  ;;  %v2771_v44 = vpack.c.bf16 %v2719_v10, %v2715_v55  ;;  %v2714_v46 = vld [vmem:[#allocation11 + $0x90] sm:$0xff] }
 0xaa4   :  { %3522 = vmatprep.mubr.bf16.mxu1 %v7842_v53  ;;  %3563 = vmatprep.mubr.bf16.mxu0 %v7842_v53  ;;  %v2770_v47 = vpack.c.bf16 %v2718_v38, %v2714_v46  ;;  %v2730_v10 = vld [vmem:[#allocation11 + $0x110] sm:$0xff]  ;;  %v2736_v38 = vld [vmem:[#allocation11 + $0x140] sm:$0xff] }
 0xaa5   :  { %3503 = vmatpush1.bf16.msra.mxu1 %v7098_v1  ;;  %3544 = vmatpush1.bf16.msra.mxu0 %v7100_v9 }
 0xaa6   :  { %3504 = vmatprep.subr.bf16.mxu1 %v7104_v49  ;;  %3545 = vmatprep.subr.bf16.mxu0 %v7106_v29 }
 0xaa9   :  { %3505 = vmatpush1.bf16.msra.mxu1 %v7114_v5  ;;  %3546 = vmatpush1.bf16.msra.mxu0 %v7116_v35 }
 0xaaa   :  { %3576 = vmatprep.subr.bf16.mxu1 %v2761_v50  ;;  %3617 = vmatprep.subr.bf16.mxu0 %v2763_v36  ;;  %v2727_v50 = vld [vmem:[#allocation11 + $0xf8] sm:$0xff]  ;;  %v2768_v36 = vpack.c.bf16 %v2716_v39, %v2712_v2  ;;  %v2741_v2 = vld [vmem:[#allocation11 + $0x168] sm:$0xff] }
 0xaab   :  { %v2775_v54 = vpack.c.bf16 %v2727_v50, %v2723_v7  ;;  %v2739_v39 = vld [vmem:[#allocation11 + $0x158] sm:$0xff]  ;;  %v2738_v50 = vld [vmem:[#allocation11 + $0x150] sm:$0xff] }
 0xaac   :  { %3523 = vmatmul.mubr.bf16.vlgmr.msra.gmra.mrb[128].mxu1 %v7842_v53  ;;  %3564 = vmatmul.mubr.bf16.vlgmr.msra.gmra.mrb[136].mxu0 %v7842_v53 }
 0xaad   :  { %3577 = vmatpush1.bf16.msra.mxu1 %v2760_v19  ;;  %3618 = vmatpush1.bf16.msra.mxu0 %v2762_v60  ;;  %v2726_v19 = vld [vmem:[#allocation11 + $0xf0] sm:$0xff]  ;;  %v2729_v60 = vld [vmem:[#allocation11 + $0x108] sm:$0xff] }
 0xaae   :  { %3578 = vmatprep.subr.bf16.mxu1 %v2765_v62  ;;  %3619 = vmatprep.subr.bf16.mxu0 %v2767_v23  ;;  %v2735_v62 = vld [vmem:[#allocation11 + $0x138] sm:$0xff]  ;;  %v2772_v23 = vpack.c.bf16 %v2724_v57, %v2720_v56  ;;  %v2774_v42 = vpack.c.bf16 %v2726_v19, %v2722_v18  ;;  %v2777_v51 = vpack.c.bf16 %v2733_v43, %v2729_v60  ;;  %v2749_v56 = vld [vmem:[#allocation11 + $0x1a8] sm:$0xff]  ;;  %v2744_v19 = vld [vmem:[#allocation11 + $0x180] sm:$0xff] }
 0xaaf   :  { %3608 = vmatprep.mubr.bf16.mxu1 %v7842_v53  ;;  %3649 = vmatprep.mubr.bf16.mxu0 %v7842_v53  ;;  %v2779_v55 = vpack.c.bf16 %v2735_v62, %v2731_v59  ;;  %v2747_v57 = vld [vmem:[#allocation11 + $0x198] sm:$0xff]  ;;  %v2748_v60 = vld [vmem:[#allocation11 + $0x1a0] sm:$0xff]  ;;  %v2746_v62 = vld [vmem:[#allocation11 + $0x190] sm:$0xff] }
 0xab1   :  { %3579 = vmatpush1.bf16.msra.mxu1 %v2764_v16  ;;  %3620 = vmatpush1.bf16.msra.mxu0 %v2766_v26  ;;  %v2734_v16 = vld [vmem:[#allocation11 + $0x130] sm:$0xff]  ;;  %v2737_v26 = vld [vmem:[#allocation11 + $0x148] sm:$0xff] }
 0xab2   :  { %3580 = vmatprep.subr.bf16.mxu1 %v2769_v30  ;;  %3621 = vmatprep.subr.bf16.mxu0 %v2771_v44  ;;  %v2743_v30 = vld [vmem:[#allocation11 + $0x178] sm:$0xff]  ;;  %v2776_v44 = vpack.c.bf16 %v2732_v14, %v2728_v4  ;;  %v2778_v46 = vpack.c.bf16 %v2734_v16, %v2730_v10  ;;  %v2781_v6 = vpack.c.bf16 %v2741_v2, %v2737_v26  ;;  %v2757_v4 = vld [vmem:[#allocation11 + $0x1e8] sm:$0xff]  ;;  %v2752_v16 = vld [vmem:[#allocation11 + $0x1c0] sm:$0xff] }
 0xab3   :  { %v2783_v7 = vpack.c.bf16 %v2743_v30, %v2739_v39  ;;  %v2755_v14 = vld [vmem:[#allocation11 + $0x1d8] sm:$0xff]  ;;  %v2756_v39 = vld [vmem:[#allocation11 + $0x1e0] sm:$0xff]  ;;  %v2754_v30 = vld [vmem:[#allocation11 + $0x1d0] sm:$0xff] }
 0xab5   :  { %3581 = vmatpush1.bf16.msra.mxu1 %v2768_v36  ;;  %3622 = vmatpush1.bf16.msra.mxu0 %v2770_v47  ;;  %v2742_v36 = vld [vmem:[#allocation11 + $0x170] sm:$0xff]  ;;  %v2745_v47 = vld [vmem:[#allocation11 + $0x188] sm:$0xff] }
 0xab6   :  { %3582 = vmatprep.subr.bf16.mxu1 %v2773_v20  ;;  %3623 = vmatprep.subr.bf16.mxu0 %v2775_v54  ;;  %v2751_v20 = vld [vmem:[#allocation11 + $0x1b8] sm:$0xff]  ;;  %v2780_v54 = vpack.c.bf16 %v2740_v0, %v2736_v38  ;;  %v2782_v18 = vpack.c.bf16 %v2742_v36, %v2738_v50  ;;  %v2785_v43 = vpack.c.bf16 %v2749_v56, %v2745_v47  ;;  %v7167_v0 = vld [vmem:[%s7679_s9] sm:$0xff] }
 0xab7   :  { %v2787_v59 = vpack.c.bf16 %v2751_v20, %v2747_v57  ;;  %v8144_v50 = vld [vmem:[#allocation58_spill] sm:$0xff] }
 0xab8   :  { %v8145_v36 = vsub.s32 0, %v8144_v50  ;;  %v8146_v56 = vsub.s32 2, %v8144_v50 }
 0xab9   :  { %3583 = vmatpush1.bf16.msra.mxu1 %v2772_v23  ;;  %3624 = vmatpush1.bf16.msra.mxu0 %v2774_v42  ;;  %v2750_v23 = vld [vmem:[#allocation11 + $0x1b0] sm:$0xff]  ;;  %v2753_v42 = vld [vmem:[#allocation11 + $0x1c8] sm:$0xff] }
 0xaba   :  { %3584 = vmatprep.subr.bf16.mxu1 %v2777_v51  ;;  %3625 = vmatprep.subr.bf16.mxu0 %v2779_v55  ;;  %v2759_v51 = vld [vmem:[#allocation11 + $0x1f8] sm:$0xff]  ;;  %v2784_v55 = vpack.c.bf16 %v2748_v60, %v2744_v19  ;;  %v2786_v10 = vpack.c.bf16 %v2750_v23, %v2746_v62  ;;  %v2789_v26 = vpack.c.bf16 %v2757_v4, %v2753_v42  ;;  %v8148_v60 = vsub.s32 3, %v8144_v50 }
 0xabb   :  { %v2791_v2 = vpack.c.bf16 %v2759_v51, %v2755_v14  ;;  %v7176_v47 = vrot.slane %v7167_v0, %v8145_v36  ;;  %v7181_v57 = vrot.slane %v7167_v0, %v8146_v56 }
 0xabd   :  { %3585 = vmatpush1.bf16.msra.mxu1 %v2776_v44  ;;  %3626 = vmatpush1.bf16.msra.mxu0 %v2778_v46  ;;  %v2758_v44 = vld [vmem:[#allocation11 + $0x1f0] sm:$0xff]  ;;  %v2788_v46 = vpack.c.bf16 %v2756_v39, %v2752_v16 }
 0xabe   :  { %3586 = vmatprep.subr.bf16.mxu1 %v2781_v6  ;;  %3627 = vmatprep.subr.bf16.mxu0 %v2783_v7  ;;  %v2790_v38 = vpack.c.bf16 %v2758_v44, %v2754_v30 }
 0xac1   :  { %3587 = vmatpush1.bf16.msra.mxu1 %v2780_v54  ;;  %3628 = vmatpush1.bf16.msra.mxu0 %v2782_v18  ;;  %v8147_v18 = vsub.s32 1, %v8144_v50 }
 0xac2   :  { %3588 = vmatprep.subr.bf16.mxu1 %v2785_v43  ;;  %3629 = vmatprep.subr.bf16.mxu0 %v2787_v59  ;;  %v7195_v43 = vrot.slane %v7167_v0, %v8148_v60 }
 0xac3   :  { %v7190_v19 = vrot.slane %v7167_v0, %v8147_v18 }
 0xac5   :  { %3589 = vmatpush1.bf16.msra.mxu1 %v2784_v55  ;;  %3630 = vmatpush1.bf16.msra.mxu0 %v2786_v10 }
 0xac6   :  { %3590 = vmatprep.subr.bf16.mxu1 %v2789_v26  ;;  %3631 = vmatprep.subr.bf16.mxu0 %v2791_v2 }
 0xac9   :  { %3591 = vmatpush1.bf16.msra.mxu1 %v2788_v46  ;;  %3632 = vmatpush1.bf16.msra.mxu0 %v2790_v38 }
 0xaca   :  { %3699 = vmatprep.subr.bf16.mxu1 %v7010_v33  ;;  %3740 = vmatprep.subr.bf16.mxu0 %v7012_v28 }
 0xacc   :  { %3609 = vmatmul.mubr.bf16.vlgmr.msra.gmra.mrb[132].mxu1 %v7842_v53  ;;  %3650 = vmatmul.mubr.bf16.vlgmr.msra.gmra.mrb[140].mxu0 %v7842_v53 }
 0xacd   :  { %3700 = vmatpush1.bf16.msra.mxu1 %v7016_v45  ;;  %3741 = vmatpush1.bf16.msra.mxu0 %v7018_v58 }
 0xace   :  { %3701 = vmatprep.subr.bf16.mxu1 %v7020_v63  ;;  %3742 = vmatprep.subr.bf16.mxu0 %v7022_v34 }
 0xacf   :  { %3731 = vmatprep.mubr.bf16.mxu1 %v7842_v53  ;;  %3772 = vmatprep.mubr.bf16.mxu0 %v7842_v53 }
 0xad1   :  { %3702 = vmatpush1.bf16.msra.mxu1 %v7030_v3  ;;  %3743 = vmatpush1.bf16.msra.mxu0 %v7032_v48 }
 0xad2   :  { %3703 = vmatprep.subr.bf16.mxu1 %v7036_v37  ;;  %3744 = vmatprep.subr.bf16.mxu0 %v7038_v22 }
 0xad5   :  { %3704 = vmatpush1.bf16.msra.mxu1 %v7042_v41  ;;  %3745 = vmatpush1.bf16.msra.mxu0 %v7044_v13 }
 0xad6   :  { %3705 = vmatprep.subr.bf16.mxu1 %v7048_v40  ;;  %3746 = vmatprep.subr.bf16.mxu0 %v7050_v24 }
 0xad9   :  { %3706 = vmatpush1.bf16.msra.mxu1 %v7058_v31  ;;  %3747 = vmatpush1.bf16.msra.mxu0 %v7060_v17 }
 0xada   :  { %3707 = vmatprep.subr.bf16.mxu1 %v7064_v25  ;;  %3748 = vmatprep.subr.bf16.mxu0 %v7066_v15 }
 0xadd   :  { %3708 = vmatpush1.bf16.msra.mxu1 %v7070_v52  ;;  %3749 = vmatpush1.bf16.msra.mxu0 %v7072_v21 }
 0xade   :  { %3709 = vmatprep.subr.bf16.mxu1 %v7076_v61  ;;  %3750 = vmatprep.subr.bf16.mxu0 %v7078_v27 }
 0xae1   :  { %3710 = vmatpush1.bf16.msra.mxu1 %v7086_v8  ;;  %3751 = vmatpush1.bf16.msra.mxu0 %v7088_v11 }
 0xae2   :  { %3711 = vmatprep.subr.bf16.mxu1 %v7092_v32  ;;  %3752 = vmatprep.subr.bf16.mxu0 %v7094_v12 }
 0xae5   :  { %3712 = vmatpush1.bf16.msra.mxu1 %v7098_v1  ;;  %3753 = vmatpush1.bf16.msra.mxu0 %v7100_v9 }
 0xae6   :  { %3713 = vmatprep.subr.bf16.mxu1 %v7104_v49  ;;  %3754 = vmatprep.subr.bf16.mxu0 %v7106_v29 }
 0xae9   :  { %3714 = vmatpush1.bf16.msra.mxu1 %v7114_v5  ;;  %3755 = vmatpush1.bf16.msra.mxu0 %v7116_v35 }
 0xaea   :  { %3804 = vmatprep.subr.bf16.mxu1 %v7010_v33  ;;  %3845 = vmatprep.subr.bf16.mxu0 %v7012_v28 }
 0xb1e   :  { %v7169_v6 = vpop.f32.mrb[96].mxu1  ;;  %v7171_v7 = vpop.f32.mrb[104].mxu0 }
 0xb1f   :  { %v7183_v20 = vpop.f32.mrb[97].mxu1  ;;  %v7185_v54 = vpop.f32.mrb[105].mxu0 }
 0xb20   :  { %v3264_v59 = vpop.f32.mrb[98].mxu1  ;;  %v3337_v62 = vpop.f32.mrb[106].mxu0 }
 0xb21   :  { %v7198_v23 = vadd.f32 %v3264_v59, %v7176_v47  ;;  %v7201_v42 = vadd.f32 %v3337_v62, %v7181_v57  ;;  %v3266_v4 = vpop.f32.mrb[99].mxu1  ;;  %v3339_v14 = vpop.f32.mrb[107].mxu0 }
 0xb22   :  { %v7204_v51 = vadd.f32 %v3266_v4, %v7190_v19  ;;  %v7207_v55 = vadd.f32 %v3339_v14, %v7195_v43 }
 0xb23   :  { %8149 = vst [vmem:[#allocation111_spill] sm:$0xff] %v7201_v42 }
 0xb24   :  { %8150 = vst [vmem:[#allocation112_spill] sm:$0xff] %v7204_v51  ;;  %8151 = vst [vmem:[#allocation113_spill] sm:$0xff] %v7207_v55 }
 0xb26   :  { %v3270_v10 = vpop.f32.mrb[100].mxu1  ;;  %v3343_v16 = vpop.f32.mrb[108].mxu0 }
 0xb27   :  { %v7210_v26 = vadd.f32 %v3270_v10, %v7176_v47  ;;  %v7213_v2 = vadd.f32 %v3343_v16, %v7181_v57  ;;  %v3272_v39 = vpop.f32.mrb[101].mxu1  ;;  %v3345_v30 = vpop.f32.mrb[109].mxu0 }
 0xb28   :  { %v7216_v44 = vadd.f32 %v3272_v39, %v7190_v19  ;;  %v7219_v46 = vadd.f32 %v3345_v30, %v7195_v43  ;;  %v3274_v38 = vpop.f32.mrb[102].mxu1  ;;  %v3347_v36 = vpop.f32.mrb[110].mxu0 }
 0xb29   :  { %8152 = vst [vmem:[#allocation114_spill] sm:$0xff] %v7210_v26  ;;  %8153 = vst [vmem:[#allocation63_spill] sm:$0xff] %v7213_v2  ;;  %v7222_v56 = vadd.f32 %v3274_v38, %v7176_v47  ;;  %v7225_v18 = vadd.f32 %v3347_v36, %v7181_v57  ;;  %v3276_v60 = vpop.f32.mrb[103].mxu1  ;;  %v3349_v59 = vpop.f32.mrb[111].mxu0 }
 0xb2a   :  { %8154 = vst [vmem:[#allocation64_spill] sm:$0xff] %v7216_v44  ;;  %8155 = vst [vmem:[#allocation65_spill] sm:$0xff] %v7219_v46  ;;  %v7228_v62 = vadd.f32 %v3276_v60, %v7190_v19  ;;  %v7231_v4 = vadd.f32 %v3349_v59, %v7195_v43 }
 0xb2b   :  { %8156 = vst [vmem:[#allocation66_spill] sm:$0xff] %v7222_v56  ;;  %8157 = vst [vmem:[#allocation49_spill] sm:$0xff] %v7225_v18 }
 0xb2c   :  { %8158 = vst [vmem:[#allocation107_spill] sm:$0xff] %v7228_v62  ;;  %8159 = vst [vmem:[#allocation108_spill] sm:$0xff] %v7231_v4 }
 0xb2e   :  { %v3280_v14 = vpop.f32.mrb[104].mxu1  ;;  %v3353_v10 = vpop.f32.mrb[112].mxu0 }
 0xb2f   :  { %v7234_v16 = vadd.f32 %v3280_v14, %v7176_v47  ;;  %v7237_v39 = vadd.f32 %v3353_v10, %v7181_v57  ;;  %v3282_v30 = vpop.f32.mrb[105].mxu1  ;;  %v3355_v38 = vpop.f32.mrb[113].mxu0 }
 0xb30   :  { %v7240_v36 = vadd.f32 %v3282_v30, %v7190_v19  ;;  %v7243_v18 = vadd.f32 %v3355_v38, %v7195_v43  ;;  %v3284_v60 = vpop.f32.mrb[106].mxu1  ;;  %v3357_v62 = vpop.f32.mrb[114].mxu0 }
 0xb31   :  { %8160 = vst [vmem:[#allocation109_spill] sm:$0xff] %v7234_v16  ;;  %8161 = vst [vmem:[#allocation110_spill] sm:$0xff] %v7237_v39  ;;  %v7246_v59 = vadd.f32 %v3284_v60, %v7176_v47  ;;  %v7249_v4 = vadd.f32 %v3357_v62, %v7181_v57  ;;  %v3286_v14 = vpop.f32.mrb[107].mxu1  ;;  %v3359_v16 = vpop.f32.mrb[115].mxu0 }
 0xb32   :  { %8162 = vst [vmem:[#allocation67_spill] sm:$0xff] %v7240_v36  ;;  %8163 = vst [vmem:[#allocation68_spill] sm:$0xff] %v7243_v18  ;;  %v7252_v10 = vadd.f32 %v3286_v14, %v7190_v19  ;;  %v7255_v39 = vadd.f32 %v3359_v16, %v7195_v43 }
 0xb33   :  { %8164 = vst [vmem:[#allocation69_spill] sm:$0xff] %v7246_v59  ;;  %8165 = vst [vmem:[#allocation70_spill] sm:$0xff] %v7249_v4 }
 0xb34   :  { %8166 = vst [vmem:[#allocation52_spill] sm:$0xff] %v7252_v10  ;;  %8167 = vst [vmem:[#allocation103_spill] sm:$0xff] %v7255_v39 }
 0xb36   :  { %v3290_v30 = vpop.f32.mrb[108].mxu1  ;;  %v3363_v36 = vpop.f32.mrb[116].mxu0 }
 0xb37   :  { %v7258_v38 = vadd.f32 %v3290_v30, %v7176_v47  ;;  %v7261_v18 = vadd.f32 %v3363_v36, %v7181_v57  ;;  %v3292_v60 = vpop.f32.mrb[109].mxu1  ;;  %v3365_v59 = vpop.f32.mrb[117].mxu0 }
 0xb38   :  { %v7264_v62 = vadd.f32 %v3292_v60, %v7190_v19  ;;  %v7267_v4 = vadd.f32 %v3365_v59, %v7195_v43  ;;  %v3294_v14 = vpop.f32.mrb[110].mxu1  ;;  %v3367_v10 = vpop.f32.mrb[118].mxu0 }
 0xb39   :  { %8168 = vst [vmem:[#allocation104_spill] sm:$0xff] %v7258_v38  ;;  %8169 = vst [vmem:[#allocation105_spill] sm:$0xff] %v7261_v18  ;;  %v7270_v16 = vadd.f32 %v3294_v14, %v7176_v47  ;;  %v7273_v39 = vadd.f32 %v3367_v10, %v7181_v57  ;;  %v3296_v30 = vpop.f32.mrb[111].mxu1  ;;  %v3369_v38 = vpop.f32.mrb[119].mxu0 }
 0xb3a   :  { %8170 = vst [vmem:[#allocation106_spill] sm:$0xff] %v7264_v62  ;;  %8171 = vst [vmem:[#allocation71_spill] sm:$0xff] %v7267_v4  ;;  %v7276_v36 = vadd.f32 %v3296_v30, %v7190_v19  ;;  %v7279_v18 = vadd.f32 %v3369_v38, %v7195_v43 }
 0xb3b   :  { %8172 = vst [vmem:[#allocation72_spill] sm:$0xff] %v7270_v16  ;;  %8173 = vst [vmem:[#allocation73_spill] sm:$0xff] %v7273_v39 }
 0xb3c   :  { %8174 = vst [vmem:[#allocation74_spill] sm:$0xff] %v7276_v36  ;;  %8175 = vst [vmem:[#allocation55_spill] sm:$0xff] %v7279_v18 }
 0xb5e   :  { %v3406_v60 = vpop.f32.mrb[112].mxu1  ;;  %v3465_v62 = vpop.f32.mrb[120].mxu0 }
 0xb5f   :  { %v3407_v59 = vpop.f32.mrb[113].mxu1  ;;  %v3466_v4 = vpop.f32.mrb[121].mxu0 }
 0xb60   :  { %v3408_v56 = vpop.f32.mrb[114].mxu1  ;;  %v3467_v46 = vpop.f32.mrb[122].mxu0 }
 0xb61   :  { %v3409_v44 = vpop.f32.mrb[115].mxu1  ;;  %v3468_v14 = vpop.f32.mrb[123].mxu0 }
 0xb66   :  { %v3412_v16 = vpop.f32.mrb[116].mxu1  ;;  %v3471_v2 = vpop.f32.mrb[124].mxu0 }
 0xb67   :  { %v3413_v10 = vpop.f32.mrb[117].mxu1  ;;  %v3472_v39 = vpop.f32.mrb[125].mxu0 }
 0xb68   :  { %v3414_v26 = vpop.f32.mrb[118].mxu1  ;;  %v3473_v55 = vpop.f32.mrb[126].mxu0 }
 0xb69   :  { %v3415_v51 = vpop.f32.mrb[119].mxu1  ;;  %v3474_v30 = vpop.f32.mrb[127].mxu0  ;;  %v3263_v55 = vadd.f32 %v7183_v20, %v7190_v19  ;;  %v3336_v26 = vadd.f32 %v7185_v54, %v7195_v43 }
 0xb6a   :  { %v3261_v51 = vadd.f32 %v7169_v6, %v7176_v47 }
 0xb6e   :  { %v3418_v36 = vpop.f32.mrb[120].mxu1  ;;  %v3477_v42 = vpop.f32.mrb[128].mxu0 }
 0xb6f   :  { %v3419_v38 = vpop.f32.mrb[121].mxu1  ;;  %v3478_v18 = vpop.f32.mrb[129].mxu0  ;;  %v3334_v42 = vadd.f32 %v7171_v7, %v7181_v57 }
 0xb70   :  { %v3420_v60 = vpop.f32.mrb[122].mxu1  ;;  %v3479_v62 = vpop.f32.mrb[130].mxu0 }
 0xb71   :  { %v3421_v59 = vpop.f32.mrb[123].mxu1  ;;  %v3480_v4 = vpop.f32.mrb[131].mxu0 }
 0xb76   :  { %v3424_v56 = vpop.f32.mrb[124].mxu1  ;;  %v3483_v46 = vpop.f32.mrb[132].mxu0 }
 0xb77   :  { %v3425_v44 = vpop.f32.mrb[125].mxu1  ;;  %v3484_v14 = vpop.f32.mrb[133].mxu0 }
 0xb78   :  { %v3426_v16 = vpop.f32.mrb[126].mxu1  ;;  %v3485_v2 = vpop.f32.mrb[134].mxu0 }
 0xb79   :  { %v3428_v10 = vpop.f32.mrb[127].mxu1  ;;  %v3487_v39 = vpop.f32.mrb[135].mxu0 }
 0xb7f   :  { %v3524_v18 = vpop.f32.mrb[128].mxu1  ;;  %v3565_v36 = vpop.f32.mrb[136].mxu0 }
 0xb80   :  { %v3572_v30 = vadd.f32 %v3524_v18, %v3261_v51  ;;  %v3574_v38 = vadd.f32 %v3565_v36, %v3334_v42  ;;  %v3526_v60 = vpop.f32.mrb[129].mxu1  ;;  %v3567_v62 = vpop.f32.mrb[137].mxu0 }
 0xb81   :  { %v3573_v59 = vadd.f32 %v3526_v60, %v3263_v55  ;;  %v3575_v4 = vadd.f32 %v3567_v62, %v3336_v26  ;;  %v3528_v56 = vpop.f32.mrb[130].mxu1  ;;  %v3569_v46 = vpop.f32.mrb[138].mxu0  ;;  %v8178_v60 = vsub.s32 6, %v8144_v50 }
 0xb82   :  { %v3662_v6 = vmul.f32 0.5, %v3572_v30  ;;  %v3529_v47 = vpop.f32.mrb[131].mxu1  ;;  %v3570_v44 = vpop.f32.mrb[139].mxu0  ;;  %v8177_v30 = vsub.s32 4, %v8144_v50  ;;  %v8180_v56 = vsub.s32 7, %v8144_v50 }
 0xb83   :  { %v3666_v7 = vmul.f32 0.5, %v3573_v59  ;;  %v3671_v57 = vmul.f32 0.5, %v3575_v4  ;;  %v3213_v62 = vrot.slane %v7167_v0, %v8178_v60  ;;  %v8179_v59 = vsub.s32 5, %v8144_v50 }
 0xb84   :  { %5187 = vtanh.f32 %v3662_v6  ;;  %v3217_v46 = vrot.slane %v7167_v0, %v8180_v56 }
 0xb85   :  { %5189 = vtanh.f32 %v3666_v7  ;;  %v3209_v4 = vrot.slane %v7167_v0, %v8179_v59  ;;  %v3486_v44 = vadd.f32 %v3485_v2, %v3213_v62 }
 0xb86   :  { %5191 = vtanh.f32 %v3574_v38  ;;  %v3205_v38 = vrot.slane %v7167_v0, %v8177_v30 }
 0xb87   :  { %5193 = vtanh.f32 %v3671_v57  ;;  %v3429_v7 = vadd.f32 %v3428_v10, %v3209_v4  ;;  %v3488_v57 = vadd.f32 %v3487_v39, %v3217_v46 }
 0xb88   :  { %v3427_v47 = vadd.f32 %v3426_v16, %v3205_v38 }
 0xb8e   :  { %v5188_v20 = vpop.eup %5187 }
 0xb8f   :  { %v5190_v54 = vpop.eup %5189  ;;  %v3664_v19 = vmul.f32 0.5, %v5188_v20 }
 0xb90   :  { %v3668_v43 = vmul.f32 0.5, %v5190_v54  ;;  %v5192_v51 = vpop.eup %5191 }
 0xb91   :  { %v3665_v14 = vadd.f32 0.5, %v3664_v19  ;;  %v5194_v36 = vpop.eup %5193 }
 0xb92   :  { %v3669_v42 = vadd.f32 0.5, %v3668_v43  ;;  %v3673_v6 = vmul.f32 0.5, %v5194_v36 }
 0xb93   :  { %v3676_v55 = vmul.f32 %v5192_v51, %v3665_v14 }
 0xb94   :  { %v3675_v26 = vmul.f32 0.0, %v3669_v42  ;;  %v3674_v42 = vadd.f32 0.5, %v3673_v6 }
 0xb96   :  { %v7289_v18 = vadd.f32 %v3676_v55, %v3675_v26 }
 0xb98   :  { %8176 = vst [vmem:[#allocation99_spill] sm:$0xff] %v7289_v18  ;;  %5195 = vtanh.f32 %v7289_v18 }
 0xb9f   :  { %v3610_v20 = vpop.f32.mrb[132].mxu1  ;;  %v3651_v54 = vpop.f32.mrb[140].mxu0 }
 0xba0   :  { %v3658_v19 = vadd.f32 %v3610_v20, %v3427_v47  ;;  %v3660_v43 = vadd.f32 %v3651_v54, %v3486_v44  ;;  %v3612_v14 = vpop.f32.mrb[133].mxu1  ;;  %v3653_v51 = vpop.f32.mrb[141].mxu0 }
 0xba1   :  { %v3659_v55 = vadd.f32 %v3612_v14, %v3429_v7  ;;  %v3661_v26 = vadd.f32 %v3653_v51, %v3488_v57  ;;  %v3614_v30 = vpop.f32.mrb[134].mxu1  ;;  %v3655_v60 = vpop.f32.mrb[142].mxu0 }
 0xba2   :  { %v5196_v59 = vpop.eup %5195  ;;  %v3680_v50 = vmul.f32 0.5, %v3658_v19  ;;  %v3615_v18 = vpop.f32.mrb[135].mxu1  ;;  %v8182_v60 = vld [vmem:[#allocation112_spill] sm:$0xff] }
 0xba3   :  { %v3656_v0 = vpop.f32.mrb[143].mxu0  ;;  %v3679_v36 = vmul.f32 %v5196_v59, %v3674_v42  ;;  %v3684_v16 = vmul.f32 0.5, %v3659_v55  ;;  %v3689_v10 = vmul.f32 0.5, %v3661_v26  ;;  %v8181_v42 = vld [vmem:[#allocation111_spill] sm:$0xff] }
 0xba4   :  { %5197 = vtanh.f32 %v3680_v50  ;;  %v8183_v50 = vld [vmem:[#allocation113_spill] sm:$0xff] }
 0xba5   :  { %v3698_v2 = vpack.c.bf16 %v3679_v36, %v3679_v36  ;;  %5199 = vtanh.f32 %v3684_v16 }
 0xba6   :  { %5201 = vtanh.f32 %v3660_v43 }
 0xba7   :  { %3732 = vmatmul.mubr.bf16.vlgmr.msra.gmra.mrb[136].mxu1 %v3698_v2  ;;  %3773 = vmatmul.mubr.bf16.vlgmr.msra.gmra.mrb[144].mxu0 %v3698_v2  ;;  %5203 = vtanh.f32 %v3689_v10 }
 0xba8   :  { %3805 = vmatpush1.bf16.msra.mxu1 %v7016_v45  ;;  %3846 = vmatpush1.bf16.msra.mxu0 %v7018_v58 }
 0xba9   :  { %3806 = vmatprep.subr.bf16.mxu1 %v7020_v63  ;;  %3847 = vmatprep.subr.bf16.mxu0 %v7022_v34 }
 0xbaa   :  { %3836 = vmatprep.mubr.bf16.mxu1 %v7842_v53  ;;  %3877 = vmatprep.mubr.bf16.mxu0 %v7842_v53 }
 0xbac   :  { %3807 = vmatpush1.bf16.msra.mxu1 %v7030_v3  ;;  %3848 = vmatpush1.bf16.msra.mxu0 %v7032_v48 }
 0xbad   :  { %3808 = vmatprep.subr.bf16.mxu1 %v7036_v37  ;;  %3849 = vmatprep.subr.bf16.mxu0 %v7038_v22 }
 0xbae   :  { %v5198_v39 = vpop.eup %5197 }
 0xbaf   :  { %v5200_v18 = vpop.eup %5199  ;;  %v3682_v38 = vmul.f32 0.5, %v5198_v39 }
 0xbb0   :  { %v3686_v62 = vmul.f32 0.5, %v5200_v18  ;;  %3809 = vmatpush1.bf16.msra.mxu1 %v7042_v41  ;;  %3850 = vmatpush1.bf16.msra.mxu0 %v7044_v13  ;;  %v5202_v56 = vpop.eup %5201 }
 0xbb1   :  { %v3683_v4 = vadd.f32 0.5, %v3682_v38  ;;  %3810 = vmatprep.subr.bf16.mxu1 %v7048_v40  ;;  %3851 = vmatprep.subr.bf16.mxu0 %v7050_v24  ;;  %v5204_v7 = vpop.eup %5203 }
 0xbb2   :  { %v3687_v46 = vadd.f32 0.5, %v3686_v62  ;;  %v3691_v57 = vmul.f32 0.5, %v5204_v7  ;;  %v8184_v7 = vld [vmem:[#allocation99_spill] sm:$0xff] }
 0xbb3   :  { %v3694_v6 = vmul.f32 %v5202_v56, %v3683_v4 }
 0xbb4   :  { %v3693_v47 = vmul.f32 0.0, %v3687_v46  ;;  %3811 = vmatpush1.bf16.msra.mxu1 %v7058_v31  ;;  %3852 = vmatpush1.bf16.msra.mxu0 %v7060_v17  ;;  %v3692_v20 = vadd.f32 0.5, %v3691_v57 }
 0xbb5   :  { %3812 = vmatprep.subr.bf16.mxu1 %v7064_v25  ;;  %3853 = vmatprep.subr.bf16.mxu0 %v7066_v15 }
 0xbb6   :  { %v3695_v44 = vadd.f32 %v3694_v6, %v3693_v47 }
 0xbb8   :  { %5205 = vtanh.f32 %v3695_v44  ;;  %3813 = vmatpush1.bf16.msra.mxu1 %v7070_v52  ;;  %3854 = vmatpush1.bf16.msra.mxu0 %v7072_v21 }
 0xbb9   :  { %3814 = vmatprep.subr.bf16.mxu1 %v7076_v61  ;;  %3855 = vmatprep.subr.bf16.mxu0 %v7078_v27 }
 0xbbc   :  { %3815 = vmatpush1.bf16.msra.mxu1 %v7086_v8  ;;  %3856 = vmatpush1.bf16.msra.mxu0 %v7088_v11 }
 0xbbd   :  { %3816 = vmatprep.subr.bf16.mxu1 %v7092_v32  ;;  %3857 = vmatprep.subr.bf16.mxu0 %v7094_v12 }
 0xbc0   :  { %3817 = vmatpush1.bf16.msra.mxu1 %v7098_v1  ;;  %3858 = vmatpush1.bf16.msra.mxu0 %v7100_v9 }
 0xbc1   :  { %3818 = vmatprep.subr.bf16.mxu1 %v7104_v49  ;;  %3859 = vmatprep.subr.bf16.mxu0 %v7106_v29 }
 0xbc2   :  { %v5206_v54 = vpop.eup %5205 }
 0xbc3   :  { %v7334_v19 = vmul.f32 %v5206_v54, %v3692_v20 }
 0xbc4   :  { %3819 = vmatpush1.bf16.msra.mxu1 %v7114_v5  ;;  %3860 = vmatpush1.bf16.msra.mxu0 %v7116_v35 }
 0xbc5   :  { %3909 = vmatprep.subr.bf16.mxu1 %v7010_v33  ;;  %3950 = vmatprep.subr.bf16.mxu0 %v7012_v28 }
 0xc7a   :  { %v3733_v43 = vpop.f32.mrb[136].mxu1  ;;  %v3774_v14 = vpop.f32.mrb[144].mxu0 }
 0xc7b   :  { %v3781_v51 = vadd.f32 %v3733_v43, %v7198_v23  ;;  %v3783_v55 = vadd.f32 %v3774_v14, %v8181_v42  ;;  %v3735_v26 = vpop.f32.mrb[137].mxu1  ;;  %v3776_v30 = vpop.f32.mrb[145].mxu0 }
 0xc7c   :  { %v3782_v59 = vadd.f32 %v3735_v26, %v8182_v60  ;;  %v3784_v0 = vadd.f32 %v3776_v30, %v8183_v50  ;;  %v3737_v36 = vpop.f32.mrb[138].mxu1  ;;  %v3778_v16 = vpop.f32.mrb[146].mxu0  ;;  %v8185_v60 = vld [vmem:[#allocation114_spill] sm:$0xff]  ;;  %v8186_v50 = vld [vmem:[#allocation63_spill] sm:$0xff] }
 0xc7d   :  { %v3785_v2 = vmul.f32 0.5, %v3781_v51  ;;  %v3738_v10 = vpop.f32.mrb[139].mxu1  ;;  %v3779_v39 = vpop.f32.mrb[147].mxu0 }
 0xc7e   :  { %v3789_v18 = vmul.f32 0.5, %v3782_v59  ;;  %v3794_v38 = vmul.f32 0.5, %v3784_v0  ;;  %v8188_v39 = vld [vmem:[#allocation65_spill] sm:$0xff] }
 0xc7f   :  { %5207 = vtanh.f32 %v3785_v2  ;;  %v8187_v2 = vld [vmem:[#allocation64_spill] sm:$0xff] }
 0xc80   :  { %5209 = vtanh.f32 %v3789_v18 }
 0xc81   :  { %5211 = vtanh.f32 %v3783_v55 }
 0xc82   :  { %5213 = vtanh.f32 %v3794_v38 }
 0xc89   :  { %v5208_v62 = vpop.eup %5207 }
 0xc8a   :  { %v5210_v23 = vpop.eup %5209  ;;  %v3787_v4 = vmul.f32 0.5, %v5208_v62 }
 0xc8b   :  { %v3791_v56 = vmul.f32 0.5, %v5210_v23  ;;  %v5212_v6 = vpop.eup %5211 }
 0xc8c   :  { %v3788_v46 = vadd.f32 0.5, %v3787_v4  ;;  %v5214_v54 = vpop.eup %5213 }
 0xc8d   :  { %v3792_v47 = vadd.f32 0.5, %v3791_v56  ;;  %v3796_v43 = vmul.f32 0.5, %v5214_v54 }
 0xc8e   :  { %v3799_v44 = vmul.f32 %v5212_v6, %v3788_v46 }
 0xc8f   :  { %v3798_v57 = vmul.f32 %v3792_v47, %v8184_v7  ;;  %v3797_v14 = vadd.f32 0.5, %v3796_v43 }
 0xc91   :  { %v7345_v20 = vadd.f32 %v3799_v44, %v3798_v57 }
 0xc93   :  { %5215 = vtanh.f32 %v7345_v20 }
 0xc9d   :  { %v5216_v51 = vpop.eup %5215 }
 0xc9e   :  { %v3802_v42 = vmul.f32 %v5216_v51, %v3797_v14 }
 0xca0   :  { %v3803_v55 = vpack.c.bf16 %v3802_v42, %v3802_v42 }
 0xca2   :  { %3837 = vmatmul.mubr.bf16.vlgmr.msra.gmra.mrb[140].mxu1 %v3803_v55  ;;  %3878 = vmatmul.mubr.bf16.vlgmr.msra.gmra.mrb[148].mxu0 %v3803_v55 }
 0xca3   :  { %3910 = vmatpush1.bf16.msra.mxu1 %v7016_v45  ;;  %3951 = vmatpush1.bf16.msra.mxu0 %v7018_v58 }
 0xca4   :  { %3911 = vmatprep.subr.bf16.mxu1 %v7020_v63  ;;  %3952 = vmatprep.subr.bf16.mxu0 %v7022_v34 }
 0xca5   :  { %3941 = vmatprep.mubr.bf16.mxu1 %v7842_v53  ;;  %3982 = vmatprep.mubr.bf16.mxu0 %v7842_v53 }
 0xca7   :  { %3912 = vmatpush1.bf16.msra.mxu1 %v7030_v3  ;;  %3953 = vmatpush1.bf16.msra.mxu0 %v7032_v48 }
 0xca8   :  { %3913 = vmatprep.subr.bf16.mxu1 %v7036_v37  ;;  %3954 = vmatprep.subr.bf16.mxu0 %v7038_v22 }
 0xcab   :  { %3914 = vmatpush1.bf16.msra.mxu1 %v7042_v41  ;;  %3955 = vmatpush1.bf16.msra.mxu0 %v7044_v13 }
 0xcac   :  { %3915 = vmatprep.subr.bf16.mxu1 %v7048_v40  ;;  %3956 = vmatprep.subr.bf16.mxu0 %v7050_v24 }
 0xcaf   :  { %3916 = vmatpush1.bf16.msra.mxu1 %v7058_v31  ;;  %3957 = vmatpush1.bf16.msra.mxu0 %v7060_v17 }
 0xcb0   :  { %3917 = vmatprep.subr.bf16.mxu1 %v7064_v25  ;;  %3958 = vmatprep.subr.bf16.mxu0 %v7066_v15 }
 0xcb3   :  { %3918 = vmatpush1.bf16.msra.mxu1 %v7070_v52  ;;  %3959 = vmatpush1.bf16.msra.mxu0 %v7072_v21 }
 0xcb4   :  { %3919 = vmatprep.subr.bf16.mxu1 %v7076_v61  ;;  %3960 = vmatprep.subr.bf16.mxu0 %v7078_v27 }
 0xcb7   :  { %3920 = vmatpush1.bf16.msra.mxu1 %v7086_v8  ;;  %3961 = vmatpush1.bf16.msra.mxu0 %v7088_v11 }
 0xcb8   :  { %3921 = vmatprep.subr.bf16.mxu1 %v7092_v32  ;;  %3962 = vmatprep.subr.bf16.mxu0 %v7094_v12 }
 0xcbb   :  { %3922 = vmatpush1.bf16.msra.mxu1 %v7098_v1  ;;  %3963 = vmatpush1.bf16.msra.mxu0 %v7100_v9 }
 0xcbc   :  { %3923 = vmatprep.subr.bf16.mxu1 %v7104_v49  ;;  %3964 = vmatprep.subr.bf16.mxu0 %v7106_v29 }
 0xcbf   :  { %3924 = vmatpush1.bf16.msra.mxu1 %v7114_v5  ;;  %3965 = vmatpush1.bf16.msra.mxu0 %v7116_v35 }
 0xcc0   :  { %4014 = vmatprep.subr.bf16.mxu1 %v7010_v33  ;;  %4055 = vmatprep.subr.bf16.mxu0 %v7012_v28 }
 0xd75   :  { %v3838_v26 = vpop.f32.mrb[140].mxu1  ;;  %v3879_v30 = vpop.f32.mrb[148].mxu0 }
 0xd76   :  { %v3886_v59 = vadd.f32 %v3838_v26, %v8185_v60  ;;  %v3888_v0 = vadd.f32 %v3879_v30, %v8186_v50  ;;  %v3840_v36 = vpop.f32.mrb[141].mxu1  ;;  %v3881_v16 = vpop.f32.mrb[149].mxu0 }
 0xd77   :  { %v3887_v10 = vadd.f32 %v3840_v36, %v8187_v2  ;;  %v3889_v18 = vadd.f32 %v3881_v16, %v8188_v39  ;;  %v3842_v38 = vpop.f32.mrb[142].mxu1  ;;  %v3883_v62 = vpop.f32.mrb[150].mxu0  ;;  %v8189_v16 = vld [vmem:[#allocation66_spill] sm:$0xff] }
 0xd78   :  { %v3890_v23 = vmul.f32 0.5, %v3886_v59  ;;  %v3843_v4 = vpop.f32.mrb[143].mxu1  ;;  %v3884_v56 = vpop.f32.mrb[151].mxu0  ;;  %v8191_v62 = vld [vmem:[#allocation107_spill] sm:$0xff] }
 0xd79   :  { %v3894_v46 = vmul.f32 0.5, %v3887_v10  ;;  %v3899_v6 = vmul.f32 0.5, %v3889_v18  ;;  %v8190_v10 = vld [vmem:[#allocation49_spill] sm:$0xff]  ;;  %v8192_v4 = vld [vmem:[#allocation108_spill] sm:$0xff] }
 0xd7a   :  { %5217 = vtanh.f32 %v3890_v23 }
 0xd7b   :  { %5219 = vtanh.f32 %v3894_v46 }
 0xd7c   :  { %5221 = vtanh.f32 %v3888_v0 }
 0xd7d   :  { %5223 = vtanh.f32 %v3899_v6 }
 0xd84   :  { %v5218_v47 = vpop.eup %5217 }
 0xd85   :  { %v5220_v44 = vpop.eup %5219  ;;  %v3892_v7 = vmul.f32 0.5, %v5218_v47 }
 0xd86   :  { %v3896_v57 = vmul.f32 0.5, %v5220_v44  ;;  %v5222_v43 = vpop.eup %5221 }
 0xd87   :  { %v3893_v54 = vadd.f32 0.5, %v3892_v7  ;;  %v5224_v26 = vpop.eup %5223 }
 0xd88   :  { %v3897_v14 = vadd.f32 0.5, %v3896_v57  ;;  %v3901_v30 = vmul.f32 0.5, %v5224_v26 }
 0xd89   :  { %v3904_v51 = vmul.f32 %v5222_v43, %v3893_v54 }
 0xd8a   :  { %v3903_v42 = vmul.f32 %v3897_v14, %v7345_v20  ;;  %v3902_v60 = vadd.f32 0.5, %v3901_v30 }
 0xd8c   :  { %v7387_v55 = vadd.f32 %v3904_v51, %v3903_v42 }
 0xd8e   :  { %5225 = vtanh.f32 %v7387_v55 }
 0xd98   :  { %v5226_v59 = vpop.eup %5225 }
 0xd99   :  { %v3907_v50 = vmul.f32 %v5226_v59, %v3902_v60 }
 0xd9b   :  { %v3908_v0 = vpack.c.bf16 %v3907_v50, %v3907_v50 }
 0xd9d   :  { %3942 = vmatmul.mubr.bf16.vlgmr.msra.gmra.mrb[144].mxu1 %v3908_v0  ;;  %3983 = vmatmul.mubr.bf16.vlgmr.msra.gmra.mrb[152].mxu0 %v3908_v0 }
 0xd9e   :  { %4015 = vmatpush1.bf16.msra.mxu1 %v7016_v45  ;;  %4056 = vmatpush1.bf16.msra.mxu0 %v7018_v58 }
 0xd9f   :  { %4016 = vmatprep.subr.bf16.mxu1 %v7020_v63  ;;  %4057 = vmatprep.subr.bf16.mxu0 %v7022_v34 }
 0xda0   :  { %4046 = vmatprep.mubr.bf16.mxu1 %v7842_v53  ;;  %4087 = vmatprep.mubr.bf16.mxu0 %v7842_v53 }
 0xda2   :  { %4017 = vmatpush1.bf16.msra.mxu1 %v7030_v3  ;;  %4058 = vmatpush1.bf16.msra.mxu0 %v7032_v48 }
 0xda3   :  { %4018 = vmatprep.subr.bf16.mxu1 %v7036_v37  ;;  %4059 = vmatprep.subr.bf16.mxu0 %v7038_v22 }
 0xda6   :  { %4019 = vmatpush1.bf16.msra.mxu1 %v7042_v41  ;;  %4060 = vmatpush1.bf16.msra.mxu0 %v7044_v13 }
 0xda7   :  { %4020 = vmatprep.subr.bf16.mxu1 %v7048_v40  ;;  %4061 = vmatprep.subr.bf16.mxu0 %v7050_v24 }
 0xdaa   :  { %4021 = vmatpush1.bf16.msra.mxu1 %v7058_v31  ;;  %4062 = vmatpush1.bf16.msra.mxu0 %v7060_v17 }
 0xdab   :  { %4022 = vmatprep.subr.bf16.mxu1 %v7064_v25  ;;  %4063 = vmatprep.subr.bf16.mxu0 %v7066_v15 }
 0xdae   :  { %4023 = vmatpush1.bf16.msra.mxu1 %v7070_v52  ;;  %4064 = vmatpush1.bf16.msra.mxu0 %v7072_v21 }
 0xdaf   :  { %4024 = vmatprep.subr.bf16.mxu1 %v7076_v61  ;;  %4065 = vmatprep.subr.bf16.mxu0 %v7078_v27 }
 0xdb2   :  { %4025 = vmatpush1.bf16.msra.mxu1 %v7086_v8  ;;  %4066 = vmatpush1.bf16.msra.mxu0 %v7088_v11 }
 0xdb3   :  { %4026 = vmatprep.subr.bf16.mxu1 %v7092_v32  ;;  %4067 = vmatprep.subr.bf16.mxu0 %v7094_v12 }
 0xdb6   :  { %4027 = vmatpush1.bf16.msra.mxu1 %v7098_v1  ;;  %4068 = vmatpush1.bf16.msra.mxu0 %v7100_v9 }
 0xdb7   :  { %4028 = vmatprep.subr.bf16.mxu1 %v7104_v49  ;;  %4069 = vmatprep.subr.bf16.mxu0 %v7106_v29 }
 0xdba   :  { %4029 = vmatpush1.bf16.msra.mxu1 %v7114_v5  ;;  %4070 = vmatpush1.bf16.msra.mxu0 %v7116_v35 }
 0xdbb   :  { %4119 = vmatprep.subr.bf16.mxu1 %v7010_v33  ;;  %4160 = vmatprep.subr.bf16.mxu0 %v7012_v28 }
 0xe70   :  { %v3943_v20 = vpop.f32.mrb[144].mxu1  ;;  %v3984_v36 = vpop.f32.mrb[152].mxu0 }
 0xe71   :  { %v3991_v2 = vadd.f32 %v3943_v20, %v8189_v16  ;;  %v3993_v39 = vadd.f32 %v3984_v36, %v8190_v10  ;;  %v3945_v18 = vpop.f32.mrb[145].mxu1  ;;  %v3986_v38 = vpop.f32.mrb[153].mxu0 }
 0xe72   :  { %v3992_v23 = vadd.f32 %v3945_v18, %v8191_v62  ;;  %v3994_v56 = vadd.f32 %v3986_v38, %v8192_v4  ;;  %v3947_v46 = vpop.f32.mrb[146].mxu1  ;;  %v3988_v6 = vpop.f32.mrb[154].mxu0  ;;  %v8193_v38 = vld [vmem:[#allocation109_spill] sm:$0xff] }
 0xe73   :  { %v3995_v47 = vmul.f32 0.5, %v3991_v2  ;;  %v3948_v44 = vpop.f32.mrb[147].mxu1  ;;  %v3989_v7 = vpop.f32.mrb[155].mxu0  ;;  %v8195_v6 = vld [vmem:[#allocation67_spill] sm:$0xff] }
 0xe74   :  { %v3999_v57 = vmul.f32 0.5, %v3992_v23  ;;  %v4004_v54 = vmul.f32 0.5, %v3994_v56  ;;  %v8194_v23 = vld [vmem:[#allocation110_spill] sm:$0xff]  ;;  %v8196_v44 = vld [vmem:[#allocation68_spill] sm:$0xff] }
 0xe75   :  { %5227 = vtanh.f32 %v3995_v47 }
 0xe76   :  { %5229 = vtanh.f32 %v3999_v57 }
 0xe77   :  { %5231 = vtanh.f32 %v3993_v39 }
 0xe78   :  { %5233 = vtanh.f32 %v4004_v54 }
 0xe7f   :  { %v5228_v43 = vpop.eup %5227 }
 0xe80   :  { %v5230_v14 = vpop.eup %5229  ;;  %v3997_v51 = vmul.f32 0.5, %v5228_v43 }
 0xe81   :  { %v4001_v42 = vmul.f32 0.5, %v5230_v14  ;;  %v5232_v30 = vpop.eup %5231 }
 0xe82   :  { %v3998_v26 = vadd.f32 0.5, %v3997_v51  ;;  %v5234_v20 = vpop.eup %5233 }
 0xe83   :  { %v4002_v60 = vadd.f32 0.5, %v4001_v42  ;;  %v4006_v36 = vmul.f32 0.5, %v5234_v20 }
 0xe84   :  { %v4009_v59 = vmul.f32 %v5232_v30, %v3998_v26 }
 0xe85   :  { %v4008_v50 = vmul.f32 %v4002_v60, %v7387_v55  ;;  %v4007_v16 = vadd.f32 0.5, %v4006_v36 }
 0xe87   :  { %v7429_v0 = vadd.f32 %v4009_v59, %v4008_v50 }
 0xe89   :  { %5235 = vtanh.f32 %v7429_v0 }
 0xe93   :  { %v5236_v2 = vpop.eup %5235 }
 0xe94   :  { %v4012_v10 = vmul.f32 %v5236_v2, %v4007_v16 }
 0xe96   :  { %v4013_v39 = vpack.c.bf16 %v4012_v10, %v4012_v10 }
 0xe98   :  { %4047 = vmatmul.mubr.bf16.vlgmr.msra.gmra.mrb[148].mxu1 %v4013_v39  ;;  %4088 = vmatmul.mubr.bf16.vlgmr.msra.gmra.mrb[156].mxu0 %v4013_v39 }
 0xe99   :  { %4120 = vmatpush1.bf16.msra.mxu1 %v7016_v45  ;;  %4161 = vmatpush1.bf16.msra.mxu0 %v7018_v58 }
 0xe9a   :  { %4121 = vmatprep.subr.bf16.mxu1 %v7020_v63  ;;  %4162 = vmatprep.subr.bf16.mxu0 %v7022_v34 }
 0xe9b   :  { %4151 = vmatprep.mubr.bf16.mxu1 %v7842_v53  ;;  %4192 = vmatprep.mubr.bf16.mxu0 %v7842_v53 }
 0xe9d   :  { %4122 = vmatpush1.bf16.msra.mxu1 %v7030_v3  ;;  %4163 = vmatpush1.bf16.msra.mxu0 %v7032_v48 }
 0xe9e   :  { %4123 = vmatprep.subr.bf16.mxu1 %v7036_v37  ;;  %4164 = vmatprep.subr.bf16.mxu0 %v7038_v22 }
 0xea1   :  { %4124 = vmatpush1.bf16.msra.mxu1 %v7042_v41  ;;  %4165 = vmatpush1.bf16.msra.mxu0 %v7044_v13 }
 0xea2   :  { %4125 = vmatprep.subr.bf16.mxu1 %v7048_v40  ;;  %4166 = vmatprep.subr.bf16.mxu0 %v7050_v24 }
 0xea5   :  { %4126 = vmatpush1.bf16.msra.mxu1 %v7058_v31  ;;  %4167 = vmatpush1.bf16.msra.mxu0 %v7060_v17 }
 0xea6   :  { %4127 = vmatprep.subr.bf16.mxu1 %v7064_v25  ;;  %4168 = vmatprep.subr.bf16.mxu0 %v7066_v15 }
 0xea9   :  { %4128 = vmatpush1.bf16.msra.mxu1 %v7070_v52  ;;  %4169 = vmatpush1.bf16.msra.mxu0 %v7072_v21 }
 0xeaa   :  { %4129 = vmatprep.subr.bf16.mxu1 %v7076_v61  ;;  %4170 = vmatprep.subr.bf16.mxu0 %v7078_v27 }
 0xead   :  { %4130 = vmatpush1.bf16.msra.mxu1 %v7086_v8  ;;  %4171 = vmatpush1.bf16.msra.mxu0 %v7088_v11 }
 0xeae   :  { %4131 = vmatprep.subr.bf16.mxu1 %v7092_v32  ;;  %4172 = vmatprep.subr.bf16.mxu0 %v7094_v12 }
 0xeb1   :  { %4132 = vmatpush1.bf16.msra.mxu1 %v7098_v1  ;;  %4173 = vmatpush1.bf16.msra.mxu0 %v7100_v9 }
 0xeb2   :  { %4133 = vmatprep.subr.bf16.mxu1 %v7104_v49  ;;  %4174 = vmatprep.subr.bf16.mxu0 %v7106_v29 }
 0xeb5   :  { %4134 = vmatpush1.bf16.msra.mxu1 %v7114_v5  ;;  %4175 = vmatpush1.bf16.msra.mxu0 %v7116_v35 }
 0xeb6   :  { %4224 = vmatprep.subr.bf16.mxu1 %v7010_v33  ;;  %4265 = vmatprep.subr.bf16.mxu0 %v7012_v28 }
 0xf6b   :  { %v4048_v55 = vpop.f32.mrb[148].mxu1  ;;  %v4089_v18 = vpop.f32.mrb[156].mxu0 }
 0xf6c   :  { %v4096_v62 = vadd.f32 %v4048_v55, %v8193_v38  ;;  %v4098_v4 = vadd.f32 %v4089_v18, %v8194_v23  ;;  %v4050_v56 = vpop.f32.mrb[149].mxu1  ;;  %v4091_v46 = vpop.f32.mrb[157].mxu0 }
 0xf6d   :  { %v4097_v47 = vadd.f32 %v4050_v56, %v8195_v6  ;;  %v4099_v7 = vadd.f32 %v4091_v46, %v8196_v44  ;;  %v4052_v57 = vpop.f32.mrb[150].mxu1  ;;  %v4093_v54 = vpop.f32.mrb[158].mxu0  ;;  %v8197_v46 = vld [vmem:[#allocation69_spill] sm:$0xff] }
 0xf6e   :  { %v4100_v43 = vmul.f32 0.5, %v4096_v62  ;;  %v4053_v14 = vpop.f32.mrb[151].mxu1  ;;  %v4094_v51 = vpop.f32.mrb[159].mxu0  ;;  %v8199_v54 = vld [vmem:[#allocation52_spill] sm:$0xff] }
 0xf6f   :  { %v4104_v42 = vmul.f32 0.5, %v4097_v47  ;;  %v4109_v26 = vmul.f32 0.5, %v4099_v7  ;;  %v8198_v47 = vld [vmem:[#allocation70_spill] sm:$0xff]  ;;  %v8200_v14 = vld [vmem:[#allocation103_spill] sm:$0xff] }
 0xf70   :  { %5237 = vtanh.f32 %v4100_v43 }
 0xf71   :  { %5239 = vtanh.f32 %v4104_v42 }
 0xf72   :  { %5241 = vtanh.f32 %v4098_v4 }
 0xf73   :  { %5243 = vtanh.f32 %v4109_v26 }
 0xf7a   :  { %v5238_v30 = vpop.eup %5237 }
 0xf7b   :  { %v5240_v60 = vpop.eup %5239  ;;  %v4102_v59 = vmul.f32 0.5, %v5238_v30 }
 0xf7c   :  { %v4106_v50 = vmul.f32 0.5, %v5240_v60  ;;  %v5242_v36 = vpop.eup %5241 }
 0xf7d   :  { %v4103_v20 = vadd.f32 0.5, %v4102_v59  ;;  %v5244_v55 = vpop.eup %5243 }
 0xf7e   :  { %v4107_v16 = vadd.f32 0.5, %v4106_v50  ;;  %v4111_v18 = vmul.f32 0.5, %v5244_v55 }
 0xf7f   :  { %v4114_v2 = vmul.f32 %v5242_v36, %v4103_v20 }
 0xf80   :  { %v4113_v10 = vmul.f32 %v4107_v16, %v7429_v0  ;;  %v4112_v38 = vadd.f32 0.5, %v4111_v18 }
 0xf82   :  { %v7471_v39 = vadd.f32 %v4114_v2, %v4113_v10 }
 0xf84   :  { %5245 = vtanh.f32 %v7471_v39 }
 0xf8e   :  { %v5246_v62 = vpop.eup %5245 }
 0xf8f   :  { %v4117_v23 = vmul.f32 %v5246_v62, %v4112_v38 }
 0xf91   :  { %v4118_v4 = vpack.c.bf16 %v4117_v23, %v4117_v23 }
 0xf93   :  { %4152 = vmatmul.mubr.bf16.vlgmr.msra.gmra.mrb[152].mxu1 %v4118_v4  ;;  %4193 = vmatmul.mubr.bf16.vlgmr.msra.gmra.mrb[160].mxu0 %v4118_v4 }
 0xf94   :  { %4225 = vmatpush1.bf16.msra.mxu1 %v7016_v45  ;;  %4266 = vmatpush1.bf16.msra.mxu0 %v7018_v58 }
 0xf95   :  { %4226 = vmatprep.subr.bf16.mxu1 %v7020_v63  ;;  %4267 = vmatprep.subr.bf16.mxu0 %v7022_v34 }
 0xf96   :  { %4256 = vmatprep.mubr.bf16.mxu1 %v7842_v53  ;;  %4297 = vmatprep.mubr.bf16.mxu0 %v7842_v53 }
 0xf98   :  { %4227 = vmatpush1.bf16.msra.mxu1 %v7030_v3  ;;  %4268 = vmatpush1.bf16.msra.mxu0 %v7032_v48 }
 0xf99   :  { %4228 = vmatprep.subr.bf16.mxu1 %v7036_v37  ;;  %4269 = vmatprep.subr.bf16.mxu0 %v7038_v22 }
 0xf9c   :  { %4229 = vmatpush1.bf16.msra.mxu1 %v7042_v41  ;;  %4270 = vmatpush1.bf16.msra.mxu0 %v7044_v13 }
 0xf9d   :  { %4230 = vmatprep.subr.bf16.mxu1 %v7048_v40  ;;  %4271 = vmatprep.subr.bf16.mxu0 %v7050_v24 }
 0xfa0   :  { %4231 = vmatpush1.bf16.msra.mxu1 %v7058_v31  ;;  %4272 = vmatpush1.bf16.msra.mxu0 %v7060_v17 }
 0xfa1   :  { %4232 = vmatprep.subr.bf16.mxu1 %v7064_v25  ;;  %4273 = vmatprep.subr.bf16.mxu0 %v7066_v15 }
 0xfa4   :  { %4233 = vmatpush1.bf16.msra.mxu1 %v7070_v52  ;;  %4274 = vmatpush1.bf16.msra.mxu0 %v7072_v21 }
 0xfa5   :  { %4234 = vmatprep.subr.bf16.mxu1 %v7076_v61  ;;  %4275 = vmatprep.subr.bf16.mxu0 %v7078_v27 }
 0xfa8   :  { %4235 = vmatpush1.bf16.msra.mxu1 %v7086_v8  ;;  %4276 = vmatpush1.bf16.msra.mxu0 %v7088_v11 }
 0xfa9   :  { %4236 = vmatprep.subr.bf16.mxu1 %v7092_v32  ;;  %4277 = vmatprep.subr.bf16.mxu0 %v7094_v12 }
 0xfac   :  { %4237 = vmatpush1.bf16.msra.mxu1 %v7098_v1  ;;  %4278 = vmatpush1.bf16.msra.mxu0 %v7100_v9 }
 0xfad   :  { %4238 = vmatprep.subr.bf16.mxu1 %v7104_v49  ;;  %4279 = vmatprep.subr.bf16.mxu0 %v7106_v29 }
 0xfb0   :  { %4239 = vmatpush1.bf16.msra.mxu1 %v7114_v5  ;;  %4280 = vmatpush1.bf16.msra.mxu0 %v7116_v35 }
 0xfb1   :  { %4329 = vmatprep.subr.bf16.mxu1 %v7010_v33  ;;  %4370 = vmatprep.subr.bf16.mxu0 %v7012_v28 }
0x1066   :  { %v4153_v0 = vpop.f32.mrb[152].mxu1  ;;  %v4194_v56 = vpop.f32.mrb[160].mxu0 }
0x1067   :  { %v4201_v6 = vadd.f32 %v4153_v0, %v8197_v46  ;;  %v4203_v44 = vadd.f32 %v4194_v56, %v8198_v47  ;;  %v4155_v7 = vpop.f32.mrb[153].mxu1  ;;  %v4196_v57 = vpop.f32.mrb[161].mxu0 }
0x1068   :  { %v4202_v43 = vadd.f32 %v4155_v7, %v8199_v54  ;;  %v4204_v51 = vadd.f32 %v4196_v57, %v8200_v14  ;;  %v4157_v42 = vpop.f32.mrb[154].mxu1  ;;  %v4198_v26 = vpop.f32.mrb[162].mxu0 }
0x1069   :  { %v4205_v30 = vmul.f32 0.5, %v4201_v6  ;;  %v4158_v60 = vpop.f32.mrb[155].mxu1  ;;  %v4199_v59 = vpop.f32.mrb[163].mxu0 }
0x106a   :  { %v4209_v33 = vmul.f32 0.5, %v4202_v43  ;;  %v4214_v28 = vmul.f32 0.5, %v4204_v51 }
0x106b   :  { %5247 = vtanh.f32 %v4205_v30 }
0x106c   :  { %5249 = vtanh.f32 %v4209_v33 }
0x106d   :  { %5251 = vtanh.f32 %v4203_v44 }
0x106e   :  { %5253 = vtanh.f32 %v4214_v28 }
0x1075   :  { %v5248_v50 = vpop.eup %5247 }
0x1076   :  { %v5250_v20 = vpop.eup %5249  ;;  %v4207_v36 = vmul.f32 0.5, %v5248_v50 }
0x1077   :  { %v4211_v16 = vmul.f32 0.5, %v5250_v20  ;;  %v5252_v10 = vpop.eup %5251 }
0x1078   :  { %v4208_v2 = vadd.f32 0.5, %v4207_v36  ;;  %v5254_v23 = vpop.eup %5253 }
0x1079   :  { %v4212_v55 = vadd.f32 0.5, %v4211_v16  ;;  %v4216_v4 = vmul.f32 0.5, %v5254_v23  ;;  %v5523_v16 = vmov -1.0   ;;  %v4434_v23 = vmul.f32 0.5, %v7334_v19 }
0x107a   :  { %v4219_v18 = vmul.f32 %v5252_v10, %v4208_v2 }
0x107b   :  { %v4218_v38 = vmul.f32 %v4212_v55, %v7471_v39  ;;  %v4217_v0 = vadd.f32 0.5, %v4216_v4 }
0x107d   :  { %v7513_v62 = vadd.f32 %v4219_v18, %v4218_v38 }
0x107f   :  { %5255 = vtanh.f32 %v7513_v62 }
0x1089   :  { %v5256_v56 = vpop.eup %5255 }
0x108a   :  { %v4222_v46 = vmul.f32 %v5256_v56, %v4217_v0 }
0x108c   :  { %v4223_v6 = vpack.c.bf16 %v4222_v46, %v4222_v46 }
0x108e   :  { %4257 = vmatmul.mubr.bf16.vlgmr.msra.gmra.mrb[156].mxu1 %v4223_v6  ;;  %4298 = vmatmul.mubr.bf16.vlgmr.msra.gmra.mrb[164].mxu0 %v4223_v6 }
0x108f   :  { %4330 = vmatpush1.bf16.msra.mxu1 %v7016_v45  ;;  %4371 = vmatpush1.bf16.msra.mxu0 %v7018_v58  ;;  %v4436_v45 = vmul.f32 0.70710677, %v7334_v19  ;;  %v4490_v19 = vld [vmem:[#allocation13 + $0x18] sm:$0xff] }
0x1090   :  { %4331 = vmatprep.subr.bf16.mxu1 %v7020_v63  ;;  %4372 = vmatprep.subr.bf16.mxu0 %v7022_v34 }
0x1091   :  { %4361 = vmatprep.mubr.bf16.mxu1 %v7842_v53  ;;  %4402 = vmatprep.mubr.bf16.mxu0 %v7842_v53  ;;  %v8201_v53 = vmov 0.0   ;;  %v4442_v58 = vand.u32 2147483647, %v4436_v45  ;;  %vm4438_vm11 = vcmp.ge.f32.partialorder %v4436_v45, 0.0  ;;  %v4503_v45 = vld [vmem:[#allocation13 + $0x80] sm:$0xff] }
0x1092   :  { %v4440_v2 = vsel %vm4438_vm11, 1.0, %v5523_v16 }
0x1093   :  { %4332 = vmatpush1.bf16.msra.mxu1 %v7030_v3  ;;  %4373 = vmatpush1.bf16.msra.mxu0 %v7032_v48  ;;  %v4444_v63 = vmul.f32 0.3275911, %v4442_v58 }
0x1094   :  { %4333 = vmatprep.subr.bf16.mxu1 %v7036_v37  ;;  %4374 = vmatprep.subr.bf16.mxu0 %v7038_v22 }
0x1095   :  { %v4446_v34 = vadd.f32 1.0, %v4444_v63  ;;  %v4487_v63 = vld [vmem:[#allocation13] sm:$0xff] }
0x1097   :  { %4334 = vmatpush1.bf16.msra.mxu1 %v7042_v41  ;;  %4375 = vmatpush1.bf16.msra.mxu0 %v7044_v13  ;;  %5257 = vrcp.f32 %v4446_v34  ;;  %v4470_v13 = vsub.f32 0.0, %v4442_v58 }
0x1098   :  { %4335 = vmatprep.subr.bf16.mxu1 %v7048_v40  ;;  %4376 = vmatprep.subr.bf16.mxu0 %v7050_v24 }
0x1099   :  { %v4472_v24 = vmul.f32 %v4470_v13, %v4442_v58  ;;  %v4504_v58 = vld [vmem:[#allocation13 + $0x88] sm:$0xff]  ;;  %v4489_v13 = vld [vmem:[#allocation13 + $0x10] sm:$0xff] }
0x109a   :  { %v4529_v34 = vpack.c.bf16 %v4504_v58, %v4503_v45 }
0x109b   :  { %4336 = vmatpush1.bf16.msra.mxu1 %v7058_v31  ;;  %4377 = vmatpush1.bf16.msra.mxu0 %v7060_v17  ;;  %v4475_v39 = vmul.f32 1.442695, %v4472_v24  ;;  %v4508_v24 = vld [vmem:[#allocation13 + $0xa8] sm:$0xff] }
0x109c   :  { %4337 = vmatprep.subr.bf16.mxu1 %v7064_v25  ;;  %4378 = vmatprep.subr.bf16.mxu0 %v7066_v15  ;;  %v8202_v25 = vld [vmem:[#allocation104_spill] sm:$0xff] }
0x109f   :  { %4338 = vmatpush1.bf16.msra.mxu1 %v7070_v52  ;;  %4379 = vmatpush1.bf16.msra.mxu0 %v7072_v21  ;;  %v8203_v52 = vld [vmem:[#allocation105_spill] sm:$0xff] }
0x10a0   :  { %4339 = vmatprep.subr.bf16.mxu1 %v7076_v61  ;;  %4380 = vmatprep.subr.bf16.mxu0 %v7078_v27 }
0x10a1   :  { %v5258_v3 = vpop.eup %5257 }
0x10a2   :  { %v4452_v48 = vmul.f32 1.0614054, %v5258_v3 }
0x10a3   :  { %4340 = vmatpush1.bf16.msra.mxu1 %v7086_v8  ;;  %4381 = vmatpush1.bf16.msra.mxu0 %v7088_v11  ;;  %v8204_v8 = vld [vmem:[#allocation106_spill] sm:$0xff] }
0x10a4   :  { %4341 = vmatprep.subr.bf16.mxu1 %v7092_v32  ;;  %4382 = vmatprep.subr.bf16.mxu0 %v7094_v12  ;;  %v4454_v37 = vadd.f32 -1.4531521, %v4452_v48  ;;  %v8205_v32 = vld [vmem:[#allocation71_spill] sm:$0xff]  ;;  %v4505_v48 = vld [vmem:[#allocation13 + $0x90] sm:$0xff] }
0x10a6   :  { %v4456_v22 = vmul.f32 %v5258_v3, %v4454_v37  ;;  %v4506_v37 = vld [vmem:[#allocation13 + $0x98] sm:$0xff] }
0x10a7   :  { %4342 = vmatpush1.bf16.msra.mxu1 %v7098_v1  ;;  %4383 = vmatpush1.bf16.msra.mxu0 %v7100_v9 }
0x10a8   :  { %4343 = vmatprep.subr.bf16.mxu1 %v7104_v49  ;;  %4384 = vmatprep.subr.bf16.mxu0 %v7106_v29  ;;  %v4458_v41 = vadd.f32 1.4214138, %v4456_v22 }
0x10aa   :  { %v4460_v40 = vmul.f32 %v5258_v3, %v4458_v41  ;;  %v4530_v41 = vpack.c.bf16 %v4506_v37, %v4505_v48 }
0x10ab   :  { %4344 = vmatpush1.bf16.msra.mxu1 %v7114_v5  ;;  %4385 = vmatpush1.bf16.msra.mxu0 %v7116_v35 }
0x10ac   :  { %4965 = vmatprep.subr.bf16.mxu0 %v8201_v53  ;;  %v4462_v35 = vadd.f32 -0.28449672, %v4460_v40  ;;  %v4507_v40 = vld [vmem:[#allocation13 + $0xa0] sm:$0xff]  ;;  %4909 = vmatprep.subr.bf16.mxu1 %v4529_v34 }
0x10ae   :  { %v4464_v44 = vmul.f32 %v5258_v3, %v4462_v35  ;;  %v4514_v35 = vld [vmem:[#allocation13 + $0xd8] sm:$0xff] }
0x10b0   :  { %v4466_v7 = vadd.f32 0.2548296, %v4464_v44  ;;  %v4497_v44 = vld [vmem:[#allocation13 + $0x50] sm:$0xff] }
0x10b2   :  { %v4468_v43 = vmul.f32 %v5258_v3, %v4466_v7  ;;  %v4488_v3 = vld [vmem:[#allocation13 + $0x8] sm:$0xff]  ;;  %v4498_v7 = vld [vmem:[#allocation13 + $0x58] sm:$0xff] }
0x10b3   :  { %v4521_v22 = vpack.c.bf16 %v4488_v3, %v4487_v63 }
0x1161   :  { %v4258_v31 = vpop.f32.mrb[156].mxu1  ;;  %v4299_v17 = vpop.f32.mrb[164].mxu0 }
0x1162   :  { %v4306_v15 = vadd.f32 %v4258_v31, %v8202_v25  ;;  %v4308_v21 = vadd.f32 %v4299_v17, %v8203_v52  ;;  %v4260_v61 = vpop.f32.mrb[157].mxu1  ;;  %v4301_v27 = vpop.f32.mrb[165].mxu0  ;;  %v4522_v31 = vpack.c.bf16 %v4490_v19, %v4489_v13  ;;  %v4531_v17 = vpack.c.bf16 %v4508_v24, %v4507_v40  ;;  %v4491_v25 = vld [vmem:[#allocation13 + $0x20] sm:$0xff]  ;;  %v4509_v52 = vld [vmem:[#allocation13 + $0xb0] sm:$0xff] }
0x1163   :  { %v4307_v11 = vadd.f32 %v4260_v61, %v8204_v8  ;;  %v4309_v12 = vadd.f32 %v4301_v27, %v8205_v32  ;;  %v4262_v1 = vpop.f32.mrb[158].mxu1  ;;  %v4303_v9 = vpop.f32.mrb[166].mxu0  ;;  %v4493_v8 = vld [vmem:[#allocation13 + $0x30] sm:$0xff]  ;;  %v4511_v32 = vld [vmem:[#allocation13 + $0xc0] sm:$0xff] }
0x1164   :  { %v4310_v49 = vmul.f32 0.5, %v4306_v15  ;;  %v4263_v29 = vpop.f32.mrb[159].mxu1  ;;  %v4304_v5 = vpop.f32.mrb[167].mxu0  ;;  %v4492_v15 = vld [vmem:[#allocation13 + $0x28] sm:$0xff] }
0x1165   :  { %v4314_v47 = vmul.f32 0.5, %v4307_v11  ;;  %v4319_v57 = vmul.f32 0.5, %v4309_v12  ;;  %v4523_v61 = vpack.c.bf16 %v4492_v15, %v4491_v25  ;;  %v4494_v11 = vld [vmem:[#allocation13 + $0x38] sm:$0xff]  ;;  %v4512_v12 = vld [vmem:[#allocation13 + $0xc8] sm:$0xff]  ;;  %v4513_v5 = vld [vmem:[#allocation13 + $0xd0] sm:$0xff] }
0x1166   :  { %5259 = vtanh.f32 %v4310_v49  ;;  %v4524_v1 = vpack.c.bf16 %v4494_v11, %v4493_v8  ;;  %v4533_v9 = vpack.c.bf16 %v4512_v12, %v4511_v32  ;;  %v4495_v49 = vld [vmem:[#allocation13 + $0x40] sm:$0xff]  ;;  %v4496_v29 = vld [vmem:[#allocation13 + $0x48] sm:$0xff] }
0x1167   :  { %5261 = vtanh.f32 %v4314_v47  ;;  %v4534_v47 = vpack.c.bf16 %v4514_v35, %v4513_v5 }
0x1168   :  { %5263 = vpow2.f32 %v4475_v39  ;;  %v4525_v39 = vpack.c.bf16 %v4496_v29, %v4495_v49 }
0x1169   :  { %5265 = vtanh.f32 %v4308_v21  ;;  %v4510_v21 = vld [vmem:[#allocation13 + $0xb8] sm:$0xff] }
0x116a   :  { %5267 = vtanh.f32 %v4319_v57  ;;  %v4532_v27 = vpack.c.bf16 %v4510_v21, %v4509_v52  ;;  %v4515_v57 = vld [vmem:[#allocation13 + $0xe0] sm:$0xff] }
0x1170   :  { %v5260_v54 = vpop.eup %5259 }
0x1171   :  { %v5262_v14 = vpop.eup %5261  ;;  %v4312_v51 = vmul.f32 0.5, %v5260_v54  ;;  %v4516_v54 = vld [vmem:[#allocation13 + $0xe8] sm:$0xff] }
0x1172   :  { %v4316_v42 = vmul.f32 0.5, %v5262_v14  ;;  %v5264_v26 = vpop.eup %5263  ;;  %v4535_v14 = vpack.c.bf16 %v4516_v54, %v4515_v57 }
0x1173   :  { %v4313_v30 = vadd.f32 0.5, %v4312_v51  ;;  %v5266_v60 = vpop.eup %5265  ;;  %v4478_v33 = vmul.f32 %v5264_v26, %v4468_v43  ;;  %v4526_v43 = vpack.c.bf16 %v4498_v7, %v4497_v44  ;;  %v4499_v51 = vld [vmem:[#allocation13 + $0x60] sm:$0xff]  ;;  %v4517_v26 = vld [vmem:[#allocation13 + $0xf0] sm:$0xff] }
0x1174   :  { %v4317_v59 = vadd.f32 0.5, %v4316_v42  ;;  %v5268_v10 = vpop.eup %5267  ;;  %v4500_v42 = vld [vmem:[#allocation13 + $0x68] sm:$0xff] }
0x1175   :  { %v4324_v28 = vmul.f32 %v5266_v60, %v4313_v30  ;;  %v4480_v36 = vsub.f32 1.0, %v4478_v33  ;;  %v4321_v18 = vmul.f32 0.5, %v5268_v10  ;;  %v4518_v30 = vld [vmem:[#allocation13 + $0xf8] sm:$0xff]  ;;  %v4527_v60 = vpack.c.bf16 %v4500_v42, %v4499_v51  ;;  %v4501_v33 = vld [vmem:[#allocation13 + $0x70] sm:$0xff] }
0x1176   :  { %v4323_v50 = vmul.f32 %v4317_v59, %v7513_v62  ;;  %v4536_v59 = vpack.c.bf16 %v4518_v30, %v4517_v26  ;;  %v8206_v10 = vld [vmem:[#allocation72_spill] sm:$0xff] }
0x1177   :  { %v4482_v55 = vmul.f32 %v4480_v36, %v4440_v2  ;;  %v4322_v4 = vadd.f32 0.5, %v4321_v18  ;;  %v8207_v18 = vld [vmem:[#allocation73_spill] sm:$0xff] }
0x1178   :  { %v7555_v20 = vadd.f32 %v4324_v28, %v4323_v50  ;;  %v4502_v28 = vld [vmem:[#allocation13 + $0x78] sm:$0xff] }
0x1179   :  { %v4484_v38 = vadd.f32 1.0, %v4482_v55  ;;  %v4528_v50 = vpack.c.bf16 %v4502_v28, %v4501_v33 }
0x117a   :  { %5269 = vtanh.f32 %v7555_v20 }
0x117b   :  { %v4486_v56 = vmul.f32 %v4484_v38, %v4434_v23 }
0x117d   :  { %v4520_v6 = vpack.c.bf16 %v4486_v56, %v4486_v56 }
0x1184   :  { %v5270_v0 = vpop.eup %5269 }
0x1185   :  { %v4327_v46 = vmul.f32 %v5270_v0, %v4322_v4  ;;  %v8208_v0 = vld [vmem:[#allocation74_spill] sm:$0xff] }
0x1187   :  { %v4328_v62 = vpack.c.bf16 %v4327_v46, %v4327_v46  ;;  %v8209_v46 = vld [vmem:[#allocation55_spill] sm:$0xff] }
0x1189   :  { %4362 = vmatmul.mubr.bf16.vlgmr.msra.gmra.mrb[160].mxu1 %v4328_v62  ;;  %4403 = vmatmul.mubr.bf16.vlgmr.msra.gmra.mrb[168].mxu0 %v4328_v62 }
0x118a   :  { %4576 = vmatprep.mubr.bf16.mxu1 %v4520_v6  ;;  %4910 = vmatpush3.bf16.msra.mxu1 %v4521_v22 }
0x118b   :  { %4911 = vmatprep.subr.bf16.mxu1 %v4530_v41  ;;  %4981 = vmatprep.mubr.msk.bf16.mxu0 %vm5524_vm14, %v8201_v53 }
0x118e   :  { %4912 = vmatpush3.bf16.msra.mxu1 %v4522_v31 }
0x118f   :  { %4913 = vmatprep.subr.bf16.mxu1 %v4531_v17 }
0x1192   :  { %4914 = vmatpush3.bf16.msra.mxu1 %v4523_v61 }
0x1193   :  { %4915 = vmatprep.subr.bf16.mxu1 %v4532_v27 }
0x1196   :  { %4916 = vmatpush3.bf16.msra.mxu1 %v4524_v1 }
0x1197   :  { %4917 = vmatprep.subr.bf16.mxu1 %v4533_v9 }
0x119a   :  { %4918 = vmatpush3.bf16.msra.mxu1 %v4525_v39 }
0x119b   :  { %4919 = vmatprep.subr.bf16.mxu1 %v4534_v47 }
0x119e   :  { %4920 = vmatpush3.bf16.msra.mxu1 %v4526_v43 }
0x119f   :  { %4921 = vmatprep.subr.bf16.mxu1 %v4535_v14 }
0x11a2   :  { %4922 = vmatpush3.bf16.msra.mxu1 %v4527_v60 }
0x11a3   :  { %4923 = vmatprep.subr.bf16.mxu1 %v4536_v59 }
0x11a6   :  { %4924 = vmatpush3.bf16.msra.mxu1 %v4528_v50 }
0x11a7   :  { %4985 = vmatprep.subr.bf16.mxu1 %v8201_v53 }
0x125c   :  { %v4363_v36 = vpop.f32.mrb[160].mxu1  ;;  %v4404_v2 = vpop.f32.mrb[168].mxu0 }
0x125d   :  { %v4411_v55 = vadd.f32 %v4363_v36, %v8206_v10  ;;  %v4413_v38 = vadd.f32 %v4404_v2, %v8207_v18  ;;  %v4365_v23 = vpop.f32.mrb[161].mxu1  ;;  %v4406_v4 = vpop.f32.mrb[169].mxu0  ;;  %v4892_v36 = vld [vmem:[%s7681_s11] ss:$0 sm:$0xff] }
0x125e   :  { %v4412_v56 = vadd.f32 %v4365_v23, %v8208_v0  ;;  %v4414_v62 = vadd.f32 %v4406_v4, %v8209_v46  ;;  %v4367_v6 = vpop.f32.mrb[162].mxu1  ;;  %v4408_v45 = vpop.f32.mrb[170].mxu0 }
0x125f   :  { %v4415_v58 = vmul.f32 0.5, %v4411_v55  ;;  %v4368_v63 = vpop.f32.mrb[163].mxu1  ;;  %v4409_v34 = vpop.f32.mrb[171].mxu0  ;;  %v4642_v6 = vld [vmem:[%s7684_s14] sm:$0xff]  ;;  %v4643_v45 = vld [vmem:[%s7684_s14 + $0x8] sm:$0xff] }
0x1260   :  { %v4419_v3 = vmul.f32 0.5, %v4412_v56  ;;  %v4424_v48 = vmul.f32 0.5, %v4414_v62  ;;  %v4659_v63 = vpack.c.bf16 %v4643_v45, %v4642_v6  ;;  %v4645_v34 = vld [vmem:[%s7684_s14 + $0x18] sm:$0xff] }
0x1261   :  { %5271 = vtanh.f32 %v4415_v58  ;;  %v4644_v58 = vld [vmem:[%s7684_s14 + $0x10] sm:$0xff] }
0x1262   :  { %5273 = vtanh.f32 %v4419_v3  ;;  %4966 = vmatpush3.bf16.msra.mxu0 %v4659_v63  ;;  %v4660_v3 = vpack.c.bf16 %v4645_v34, %v4644_v58 }
0x1263   :  { %5275 = vtanh.f32 %v4413_v38  ;;  %v8210_v38 = vld [vmem:[#allocation23_spill] sm:$0xff]  ;;  %4967 = vmatprep.subr.bf16.mxu0 %v8201_v53 }
0x1264   :  { %5277 = vtanh.f32 %v4424_v48  ;;  %vm4586_vm13 = vcmp.lt.s32.totalorder %v8210_v38, 28  ;;  %v4646_v48 = vld [vmem:[%s7684_s14 + $0x20] sm:$0xff]  ;;  %vm4716_vm0 = vcmp.lt.s32.totalorder %v8210_v38, 64 }
0x1265   :  { %v4893_v0 = vsel %vm4586_vm13, 1.0, %v8201_v53 }
0x1266   :  { %4968 = vmatpush3.bf16.msra.mxu0 %v4660_v3 }
0x1267   :  { %4969 = vmatprep.subr.bf16.mxu0 %v8201_v53 }
0x126b   :  { %v5272_v37 = vpop.eup %5271 }
0x126c   :  { %v5274_v22 = vpop.eup %5273  ;;  %v4417_v41 = vmul.f32 0.5, %v5272_v37  ;;  %v4647_v37 = vld [vmem:[%s7684_s14 + $0x28] sm:$0xff] }
0x126d   :  { %v4421_v13 = vmul.f32 0.5, %v5274_v22  ;;  %v5276_v40 = vpop.eup %5275  ;;  %v4661_v22 = vpack.c.bf16 %v4647_v37, %v4646_v48  ;;  %v4897_v48 = vsel %vm4716_vm0, 1.0, %v8201_v53 }
0x126e   :  { %v4418_v19 = vadd.f32 0.5, %v4417_v41  ;;  %v5278_v15 = vpop.eup %5277  ;;  %v4648_v41 = vld [vmem:[%s7684_s14 + $0x30] sm:$0xff] }
0x126f   :  { %v4422_v24 = vadd.f32 0.5, %v4421_v13  ;;  %v4426_v52 = vmul.f32 0.5, %v5278_v15  ;;  %v4649_v13 = vld [vmem:[%s7684_s14 + $0x38] sm:$0xff]  ;;  %4970 = vmatpush3.bf16.msra.mxu0 %v4661_v22 }
0x1270   :  { %v4429_v31 = vmul.f32 %v5276_v40, %v4418_v19  ;;  %v4662_v19 = vpack.c.bf16 %v4649_v13, %v4648_v41  ;;  %4971 = vmatprep.subr.bf16.mxu0 %v8201_v53  ;;  %v4650_v40 = vld [vmem:[%s7684_s14 + $0x40] sm:$0xff] }
0x1271   :  { %v4428_v17 = vmul.f32 %v4422_v24, %v7555_v20  ;;  %v4427_v21 = vadd.f32 0.5, %v4426_v52  ;;  %v4651_v24 = vld [vmem:[%s7684_s14 + $0x48] sm:$0xff]  ;;  %v4654_v52 = vld [vmem:[%s7684_s14 + $0x60] sm:$0xff] }
0x1272   :  { %v4772_v13 = vld [vmem:[#allocation14] sm:$0xff] }
0x1273   :  { %v4430_v25 = vadd.f32 %v4429_v31, %v4428_v17  ;;  %4972 = vmatpush3.bf16.msra.mxu0 %v4662_v19  ;;  %v4663_v31 = vpack.c.bf16 %v4651_v24, %v4650_v40  ;;  %v4652_v17 = vld [vmem:[%s7684_s14 + $0x50] sm:$0xff]  ;;  %v4773_v19 = vld [vmem:[#allocation14 + $0x8] sm:$0xff] }
0x1274   :  { %4973 = vmatprep.subr.bf16.mxu0 %v8201_v53  ;;  %v4774_v40 = vld [vmem:[#allocation14 + $0x10] sm:$0xff]  ;;  %v4789_v24 = vpack.c.bf16 %v4773_v19, %v4772_v13 }
0x1275   :  { %5279 = vtanh.f32 %v4430_v25  ;;  %v4653_v25 = vld [vmem:[%s7684_s14 + $0x58] sm:$0xff] }
0x1276   :  { %v4664_v15 = vpack.c.bf16 %v4653_v25, %v4652_v17  ;;  %v4776_v25 = vld [vmem:[#allocation14 + $0x20] sm:$0xff] }
0x1277   :  { %4974 = vmatpush3.bf16.msra.mxu0 %v4663_v31  ;;  %v4775_v31 = vld [vmem:[#allocation14 + $0x18] sm:$0xff] }
0x1278   :  { %4975 = vmatprep.subr.bf16.mxu0 %v8201_v53  ;;  %v4790_v17 = vpack.c.bf16 %v4775_v31, %v4774_v40 }
0x127b   :  { %4976 = vmatpush3.bf16.msra.mxu0 %v4664_v15  ;;  %v4777_v15 = vld [vmem:[#allocation14 + $0x28] sm:$0xff] }
0x127c   :  { %4977 = vmatprep.subr.bf16.mxu0 %v8201_v53  ;;  %v4791_v38 = vpack.c.bf16 %v4777_v15, %v4776_v25 }
0x127f   :  { %v5280_v61 = vpop.eup %5279 }
0x1280   :  { %v4432_v27 = vmul.f32 %v5280_v61, %v4427_v21  ;;  %v4655_v21 = vld [vmem:[%s7684_s14 + $0x68] sm:$0xff] }
0x1281   :  { %v4665_v61 = vpack.c.bf16 %v4655_v21, %v4654_v52  ;;  %v4778_v52 = vld [vmem:[#allocation14 + $0x30] sm:$0xff]  ;;  %v4779_v21 = vld [vmem:[#allocation14 + $0x38] sm:$0xff] }
0x1282   :  { %v4435_v8 = vmul.f32 0.70710677, %v4432_v27  ;;  %v4433_v30 = vmul.f32 0.5, %v4432_v27  ;;  %v4656_v27 = vld [vmem:[%s7684_s14 + $0x70] sm:$0xff] }
0x1283   :  { %4978 = vmatpush3.bf16.msra.mxu0 %v4665_v61  ;;  %v4792_v61 = vpack.c.bf16 %v4779_v21, %v4778_v52 }
0x1284   :  { %v4441_v11 = vand.u32 2147483647, %v4435_v8  ;;  %vm4437_vm12 = vcmp.ge.f32.partialorder %v4435_v8, 0.0  ;;  %v4657_v8 = vld [vmem:[%s7684_s14 + $0x78] sm:$0xff]  ;;  %4979 = vmatprep.subr.bf16.mxu0 %v8201_v53 }
0x1285   :  { %v4439_v42 = vsel %vm4437_vm12, 1.0, %v5523_v16 }
0x1286   :  { %v4443_v32 = vmul.f32 0.3275911, %v4441_v11  ;;  %v4469_v1 = vsub.f32 0.0, %v4441_v11 }
0x1288   :  { %v4445_v12 = vadd.f32 1.0, %v4443_v32  ;;  %v4471_v49 = vmul.f32 %v4469_v1, %v4441_v11  ;;  %v4666_v11 = vpack.c.bf16 %v4657_v8, %v4656_v27  ;;  %v4780_v27 = vld [vmem:[#allocation14 + $0x40] sm:$0xff]  ;;  %v4781_v8 = vld [vmem:[#allocation14 + $0x48] sm:$0xff] }
0x128a   :  { %5281 = vrcp.f32 %v4445_v12  ;;  %v4473_v35 = vmul.f32 1.442695, %v4471_v49  ;;  %4980 = vmatpush3.bf16.msra.mxu0 %v4666_v11  ;;  %v4894_v49 = vld [vmem:[%s7682_s12] ss:$0 sm:$0xff]  ;;  %v4793_v11 = vpack.c.bf16 %v4781_v8, %v4780_v27 }
0x128c   :  { %5283 = vpow2.f32 %v4473_v35 }
0x1294   :  { %v5282_v9 = vpop.eup %5281 }
0x1295   :  { %v4451_v29 = vmul.f32 1.0614054, %v5282_v9 }
0x1296   :  { %v5284_v43 = vpop.eup %5283 }
0x1297   :  { %v4453_v5 = vadd.f32 -1.4531521, %v4451_v29 }
0x1299   :  { %v4455_v39 = vmul.f32 %v5282_v9, %v4453_v5  ;;  %v4895_v5 = vld [vmem:[%s7683_s13] ss:$0 sm:$0xff] }
0x129b   :  { %v4457_v20 = vadd.f32 1.4214138, %v4455_v39 }
0x129d   :  { %v4459_v47 = vmul.f32 %v5282_v9, %v4457_v20 }
0x129f   :  { %v4461_v44 = vadd.f32 -0.28449672, %v4459_v47 }
0x12a1   :  { %v4463_v7 = vmul.f32 %v5282_v9, %v4461_v44 }
0x12a3   :  { %v4465_v57 = vadd.f32 0.2548296, %v4463_v7 }
0x12a5   :  { %v4467_v54 = vmul.f32 %v5282_v9, %v4465_v57 }
0x12a7   :  { %v4477_v14 = vmul.f32 %v5284_v43, %v4467_v54 }
0x12a9   :  { %v4479_v51 = vsub.f32 1.0, %v4477_v14 }
0x12ab   :  { %v4481_v26 = vmul.f32 %v4479_v51, %v4439_v42 }
0x12ad   :  { %v4483_v60 = vadd.f32 1.0, %v4481_v26 }
0x12af   :  { %v4485_v59 = vmul.f32 %v4483_v60, %v4433_v30 }
0x12b1   :  { %v4519_v33 = vpack.c.bf16 %v4485_v59, %v4485_v59 }
0x12b3   :  { %4577 = vmatmul.mubr.bf16.vlgmr.msra.gmra.mrb[164].mxu1 %v4519_v33 }
0x12b4   :  { %5001 = vmatprep.mubr.msk.bf16.mxu1 %vm5524_vm14, %v8201_v53  ;;  %4986 = vmatpush3.bf16.msra.mxu1 %v4789_v24 }
0x12b5   :  { %4987 = vmatprep.subr.bf16.mxu1 %v8201_v53 }
0x12b8   :  { %4988 = vmatpush3.bf16.msra.mxu1 %v4790_v17 }
0x12b9   :  { %4989 = vmatprep.subr.bf16.mxu1 %v8201_v53 }
0x12bc   :  { %4990 = vmatpush3.bf16.msra.mxu1 %v4791_v38 }
0x12bd   :  { %4991 = vmatprep.subr.bf16.mxu1 %v8201_v53 }
0x12c0   :  { %4992 = vmatpush3.bf16.msra.mxu1 %v4792_v61 }
0x12c1   :  { %4993 = vmatprep.subr.bf16.mxu1 %v8201_v53 }
0x12c4   :  { %4994 = vmatpush3.bf16.msra.mxu1 %v4793_v11 }
0x12c5   :  { %4995 = vmatprep.subr.bf16.mxu1 %v8201_v53 }
0x1386   :  { %v4925_v28 = vpop.f32.mrb[164].mxu1 }
0x1387   :  { %v4926_v50 = vpop.f32.mrb[165].mxu1 }
0x1388   :  { %v4927_v2 = vadd.f32 %v4926_v50, %v4925_v28  ;;  %v4928_v10 = vpop.f32.mrb[166].mxu1 }
0x1389   :  { %v4929_v55 = vpop.f32.mrb[167].mxu1 }
0x138a   :  { %v4579_v18 = vadd.f32 %v4927_v2, %v4892_v36 }
0x138c   :  { %4589 = vadd.xlane.f32.xlu0 %v4579_v18 }
0x1419   :  { %v4590_v23 = vpop.xlane.xlu0 %4589 }
0x141a   :  { %v4591_v4 = vmul.f32 0.035714287, %v4590_v23 }
0x141c   :  { %v4592_v56 = vsub.f32 %v4579_v18, %v4591_v4 }
0x141e   :  { %v4593_v46 = vmul.f32 %v4893_v0, %v4592_v56 }
0x1420   :  { %v4594_v62 = vmul.f32 %v4593_v46, %v4593_v46 }
0x1422   :  { %4595 = vadd.xlane.f32.xlu1 %v4594_v62 }
0x14af   :  { %v4596_v32 = vpop.xlane.xlu1 %4595 }
0x14b0   :  { %v4597_v12 = vmul.f32 0.035714287, %v4596_v32  ;;  %v4782_v32 = vld [vmem:[#allocation14 + $0x50] sm:$0xff] }
0x14b2   :  { %v4598_v1 = vadd.f32 1e-05, %v4597_v12  ;;  %v4783_v12 = vld [vmem:[#allocation14 + $0x58] sm:$0xff] }
0x14b4   :  { %5285 = vrsqrt.f32 %v4598_v1  ;;  %v4794_v1 = vpack.c.bf16 %v4783_v12, %v4782_v32 }
0x14b6   :  { %4996 = vmatpush3.bf16.msra.mxu1 %v4794_v1 }
0x14b7   :  { %4997 = vmatprep.subr.bf16.mxu1 %v8201_v53 }
0x14be   :  { %v5286_v9 = vpop.eup %5285 }
0x14bf   :  { %v4600_v29 = vmul.f32 %v5286_v9, %v4593_v46  ;;  %v4896_v46 = vld [vmem:[%s7685_s15] ss:$0 sm:$0xff] }
0x14c0   :  { %v4784_v9 = vld [vmem:[#allocation14 + $0x60] sm:$0xff] }
0x14c1   :  { %v4607_v35 = vmul.f32 %v4894_v49, %v4600_v29  ;;  %v4785_v49 = vld [vmem:[#allocation14 + $0x68] sm:$0xff] }
0x14c2   :  { %v4795_v29 = vpack.c.bf16 %v4785_v49, %v4784_v9 }
0x14c3   :  { %v4614_v39 = vadd.f32 %v4895_v5, %v4607_v35  ;;  %v4786_v5 = vld [vmem:[#allocation14 + $0x70] sm:$0xff]  ;;  %v4787_v35 = vld [vmem:[#allocation14 + $0x78] sm:$0xff] }
0x14c4   :  { %4998 = vmatpush3.bf16.msra.mxu1 %v4795_v29 }
0x14c5   :  { %v4616_v20 = vmul.f32 0.70710677, %v4614_v39  ;;  %v4615_v23 = vmul.f32 0.5, %v4614_v39  ;;  %v4796_v39 = vpack.c.bf16 %v4787_v35, %v4786_v5  ;;  %4999 = vmatprep.subr.bf16.mxu1 %v8201_v53 }
0x14c7   :  { %v4619_v47 = vand.u32 2147483647, %v4616_v20  ;;  %vm4617_vm15 = vcmp.ge.f32.partialorder %v4616_v20, 0.0 }
0x14c8   :  { %v4618_v55 = vsel %vm4617_vm15, 1.0, %v5523_v16  ;;  %5000 = vmatpush3.bf16.msra.mxu1 %v4796_v39 }
0x14c9   :  { %v4620_v44 = vmul.f32 0.3275911, %v4619_v47  ;;  %v4633_v57 = vsub.f32 0.0, %v4619_v47 }
0x14cb   :  { %v4621_v7 = vadd.f32 1.0, %v4620_v44  ;;  %v4634_v43 = vmul.f32 %v4633_v57, %v4619_v47  ;;  %v4898_v57 = vld [vmem:[%s7686_s16] ss:$0 sm:$0xff] }
0x14cd   :  { %5287 = vrcp.f32 %v4621_v7  ;;  %v4635_v42 = vmul.f32 1.442695, %v4634_v43  ;;  %v4899_v43 = vld [vmem:[%s7687_s17] ss:$0 sm:$0xff] }
0x14cf   :  { %5289 = vpow2.f32 %v4635_v42 }
0x14d7   :  { %v5288_v54 = vpop.eup %5287 }
0x14d8   :  { %v4624_v14 = vmul.f32 1.0614054, %v5288_v54 }
0x14d9   :  { %v5290_v36 = vpop.eup %5289 }
0x14da   :  { %v4625_v51 = vadd.f32 -1.4531521, %v4624_v14 }
0x14dc   :  { %v4626_v26 = vmul.f32 %v5288_v54, %v4625_v51 }
0x14de   :  { %v4627_v30 = vadd.f32 1.4214138, %v4626_v26 }
0x14e0   :  { %v4628_v60 = vmul.f32 %v5288_v54, %v4627_v30 }
0x14e2   :  { %v4629_v59 = vadd.f32 -0.28449672, %v4628_v60 }
0x14e4   :  { %v4630_v33 = vmul.f32 %v5288_v54, %v4629_v59 }
0x14e6   :  { %v4631_v28 = vadd.f32 0.2548296, %v4630_v33 }
0x14e8   :  { %v4632_v50 = vmul.f32 %v5288_v54, %v4631_v28 }
0x14ea   :  { %v4637_v2 = vmul.f32 %v5290_v36, %v4632_v50 }
0x14ec   :  { %v4638_v10 = vsub.f32 1.0, %v4637_v2 }
0x14ee   :  { %v4639_v18 = vmul.f32 %v4638_v10, %v4618_v55 }
0x14f0   :  { %v4640_v4 = vadd.f32 1.0, %v4639_v18 }
0x14f2   :  { %v4641_v0 = vmul.f32 %v4640_v4, %v4615_v23 }
0x14f4   :  { %v4658_v56 = vpack.c.bf16 %v4641_v0, %v4641_v0 }
0x14f6   :  { %4982 = vmatmul.mubr.bf16.vlgmr.msra.gmra.mrb[172].mxu0 %v4658_v56 }
0x15c9   :  { %v4708_v62 = vpop.f32.mrb[172].mxu0 }
0x15ca   :  { %v4709_v6 = vadd.f32 %v4896_v46, %v4708_v62  ;;  %v4983_v45 = vpop.f32.mrb[173].mxu0 }
0x15cb   :  { %v4711_v58 = vpop.f32.mrb[174].mxu0 }
0x15cc   :  { %4719 = vadd.xlane.f32.xlu0 %v4709_v6  ;;  %v4984_v63 = vpop.f32.mrb[175].mxu0 }
0x1659   :  { %v4720_v34 = vpop.xlane.xlu0 %4719 }
0x165a   :  { %v4721_v3 = vmul.f32 0.015625, %v4720_v34 }
0x165c   :  { %v4722_v37 = vsub.f32 %v4709_v6, %v4721_v3 }
0x165e   :  { %v4723_v22 = vmul.f32 %v4897_v48, %v4722_v37  ;;  %v4900_v48 = vld [vmem:[%s8211_s2] ss:$0 sm:$0xff] }
0x1660   :  { %v4724_v41 = vmul.f32 %v4723_v22, %v4723_v22 }
0x1662   :  { %4725 = vadd.xlane.f32.xlu0 %v4724_v41 }
0x16ef   :  { %v4726_v20 = vpop.xlane.xlu0 %4725 }
0x16f0   :  { %v4727_v47 = vmul.f32 0.015625, %v4726_v20 }
0x16f2   :  { %v4728_v44 = vadd.f32 1e-05, %v4727_v47 }
0x16f4   :  { %5291 = vrsqrt.f32 %v4728_v44 }
0x16fe   :  { %v5292_v7 = vpop.eup %5291 }
0x16ff   :  { %v4730_v54 = vmul.f32 %v5292_v7, %v4723_v22 }
0x1701   :  { %v4737_v14 = vmul.f32 %v4898_v57, %v4730_v54 }
0x1703   :  { %v4744_v51 = vadd.f32 %v4899_v43, %v4737_v14 }
0x1705   :  { %v4746_v42 = vmul.f32 0.70710677, %v4744_v51  ;;  %v4745_v58 = vmul.f32 0.5, %v4744_v51 }
0x1707   :  { %v4749_v26 = vand.u32 2147483647, %v4746_v42  ;;  %vm4747_vm1 = vcmp.ge.f32.partialorder %v4746_v42, 0.0 }
0x1708   :  { %v4748_v6 = vsel %vm4747_vm1, 1.0, %v5523_v16 }
0x1709   :  { %v4750_v53 = vmul.f32 0.3275911, %v4749_v26  ;;  %v4763_v60 = vsub.f32 0.0, %v4749_v26 }
0x170b   :  { %v4751_v30 = vadd.f32 1.0, %v4750_v53  ;;  %v4764_v33 = vmul.f32 %v4763_v60, %v4749_v26 }
0x170d   :  { %5293 = vrcp.f32 %v4751_v30  ;;  %v4765_v36 = vmul.f32 1.442695, %v4764_v33 }
0x170f   :  { %5295 = vpow2.f32 %v4765_v36 }
0x1717   :  { %v5294_v59 = vpop.eup %5293 }
0x1718   :  { %v4754_v28 = vmul.f32 1.0614054, %v5294_v59 }
0x1719   :  { %v5296_v56 = vpop.eup %5295 }
0x171a   :  { %v4755_v50 = vadd.f32 -1.4531521, %v4754_v28 }
0x171c   :  { %v4756_v2 = vmul.f32 %v5294_v59, %v4755_v50 }
0x171e   :  { %v4757_v10 = vadd.f32 1.4214138, %v4756_v2 }
0x1720   :  { %v4758_v55 = vmul.f32 %v5294_v59, %v4757_v10 }
0x1722   :  { %v4759_v18 = vadd.f32 -0.28449672, %v4758_v55 }
0x1724   :  { %v4760_v23 = vmul.f32 %v5294_v59, %v4759_v18 }
0x1726   :  { %v4761_v4 = vadd.f32 0.2548296, %v4760_v23 }
0x1728   :  { %v4762_v0 = vmul.f32 %v5294_v59, %v4761_v4 }
0x172a   :  { %v4767_v46 = vmul.f32 %v5296_v56, %v4762_v0 }
0x172c   :  { %v4768_v62 = vsub.f32 1.0, %v4767_v46 }
0x172e   :  { %v4769_v45 = vmul.f32 %v4768_v62, %v4748_v6 }
0x1730   :  { %v4770_v63 = vadd.f32 1.0, %v4769_v45 }
0x1732   :  { %v4771_v34 = vmul.f32 %v4770_v63, %v4745_v58 }
0x1734   :  { %v4788_v3 = vpack.c.bf16 %v4771_v34, %v4771_v34 }
0x1736   :  { %5002 = vmatmul.mubr.bf16.vlgmr.msra.gmra.mrb[168].mxu1 %v4788_v3 }
0x1809   :  { %v4838_v37 = vpop.f32.mrb[168].mxu1 }
0x180a   :  { %v4839_v22 = vadd.f32 %v4900_v48, %v4838_v37  ;;  %v5003_v41 = vpop.f32.mrb[169].mxu1 }
0x180b   :  { %v4841_v13 = vpop.f32.mrb[170].mxu1 }
0x180c   :  { %4844 = vst [vmem:[#allocation16] sm:$0xff] %v4839_v22  ;;  %v5004_v19 = vpop.f32.mrb[171].mxu1 }
0x180d   :  { %5484 = shalt.err (!%p5481_p12)
}
0x180e   :  { %s8212_s18 = sld [smem:[#allocation122_spill]] }
0x1814   :  { %s5485_s24 = scalar_lea.hbm %s8212_s18, 128 }
0x1815   :  { %p5486_p13 = scmp.ne.s32.totalorder %s8212_s18, %s5485_s24  ;;  %p5489_p0 = scmp.lt.u32.totalorder %s5485_s24, %s8212_s18 }
0x1817   :  { %p5491_p1 = pnand %p5489_p0, %p5486_p13 }
0x1819   :  { %5494 = shalt.err (!%p5491_p1)
}
0x181a   :  { %4854 = dma.vmem_to_hbm [thread:$0]  %s4852_s29, 128, %s8212_s18, [#allocation4]  }
0x181b   :  { %5505 = dma.done.wait [#allocation4], 128  }
0x181c   :  { %5506 = vsyncadd [#allocation4], 4294967168 }
0x181d   :  { %4858 = vsyncpa [#allocation3], 1 }
0x181e   :  { %4859 = vsyncpa [#allocation6], 1 }
0x181f   :  { %4860 = vsyncpa [#allocation9], 1 }
0x1820   :  { %4861 = vsyncpa [#allocation12], 1 }
0x1821   :  { %4862 = vsyncpa [#allocation15], 1 }
0x1822   :  { %4863 = vsyncpa [#allocation4], 1 }

</bundles_post_ra>
